<compile_context>
chip_gen: v5e
topology: v5e:2x2
jax: 0.10.0
libtpu: 0.0.40
codegen_flags: <defaults>
</compile_context>

<pallas_src>
import functools

import jax
import jax.numpy as jnp
from jax.experimental import pallas as pl
from jax.experimental.pallas import tpu as pltpu


def lstm_fc_kernel(x_ref,                 # (B, T, D_in)  batch-first, as in PyTorch
                   wih0_ref,              # (D_in, 4H)    = W_ih(l0)^T
                   whh0_ref,              # (H,   4H)     = W_hh(l0)^T
                   b0_ref,                # (1,   4H)     = b_ih(l0) + b_hh(l0)
                   w1_ref,                # (2H,  4H)     = [W_ih(l1)^T ; W_hh(l1)^T]
                   b1_ref,                # (1,   4H)     = b_ih(l1) + b_hh(l1)
                   wfc_ref,               # (H, O)        = W_fc^T
                   bfc_ref,               # (1, O)
                   out_ref):              # (B, O)
    B, T, D_in = x_ref.shape
    H = whh0_ref.shape[0]
    G = 4 * H

    # Hoist weights / biases out of the recurrence (loaded once).
    whh0 = whh0_ref[...]
    w1 = w1_ref[...]
    b1b = jnp.broadcast_to(b1_ref[...], (B, G))     # hoisted broadcast (JAX won't CSE it)

    # ---- Hoisted layer-0 input projection: one matmul for all timesteps ----
    # (B, T, D_in) -> (B*T, D_in) is a layout-trivial leading-dim merge (T == 8 sublanes).
    x2d = x_ref[...].reshape(B * T, D_in)
    xw0 = (jnp.dot(x2d, wih0_ref[...], preferred_element_type=jnp.float32)
           + b0_ref[...])                           # layer-0 bias folded in, once
    xw0 = xw0.reshape(B, T, G)                      # row b*T+t -> (b, t, :)

    def gates_to_hc(gates, c_prev):
        # PyTorch gate order i, f, g, o; H=128 -> slices are whole 128-lane blocks.
        i_g = jax.nn.sigmoid(gates[:, 0 * H:1 * H])
        f_g = jax.nn.sigmoid(gates[:, 1 * H:2 * H])
        g_g = jnp.tanh(gates[:, 2 * H:3 * H])
        o_g = jax.nn.sigmoid(gates[:, 3 * H:4 * H])
        c_new = f_g * c_prev + i_g * g_g
        h_new = o_g * jnp.tanh(c_new)
        return h_new, c_new

    h0 = jnp.zeros((B, H), jnp.float32)
    c0 = jnp.zeros((B, H), jnp.float32)
    h1 = jnp.zeros((B, H), jnp.float32)
    c1 = jnp.zeros((B, H), jnp.float32)

    # T is small & static -> fully unrolled recurrence (static slices, one dot per
    # layer per step on the serial dependency chain).
    for t in range(T):
        # Layer 0: input contribution precomputed; only the recurrent dot remains.
        gates0 = xw0[:, t, :] + jnp.dot(h0, whh0, preferred_element_type=jnp.float32)
        h0, c0 = gates_to_hc(gates0, c0)

        # Layer 1: fused input+recurrent dot against the pre-stacked weight.
        inp1 = jnp.concatenate([h0, h1], axis=1)            # (B, 2H) lane-concat
        gates1 = jnp.dot(inp1, w1, preferred_element_type=jnp.float32) + b1b
        h1, c1 = gates_to_hc(gates1, c1)

    # FC on the last timestep's top-layer hidden state.
    out_ref[...] = (jnp.dot(h1, wfc_ref[...], preferred_element_type=jnp.float32)
                    + bfc_ref[...]).astype(out_ref.dtype)


def neural_network_forward(x, params):
    """x: (B, T, D_in) float32, batch_first — same convention as the PyTorch module."""
    wih0, whh0, b0, w1, b1, wfc, bfc = params
    B, T, D_in = x.shape
    O = wfc.shape[1]

    vmem = functools.partial(pl.BlockSpec, memory_space=pltpu.MemorySpace.VMEM)
    n_inputs = 8
    return pl.pallas_call(
        lstm_fc_kernel,
        out_shape=jax.ShapeDtypeStruct((B, O), jnp.float32),
        in_specs=[vmem() for _ in range(n_inputs)],
        out_specs=vmem(),
        # No grid / pipelining: total footprint is a few hundred KiB, kernel is
        # latency-bound; grids would only add per-step overhead.
    )(x, wih0, whh0, b0, w1, b1, wfc, bfc)


def init_params(key, input_size, hidden_size, output_size):
    """Deterministic init mimicking PyTorch's U(-1/sqrt(H), 1/sqrt(H)).

    Weights are stored pre-transposed for (B,K)@(K,N) matmuls; the two LSTM bias
    vectors (b_ih + b_hh) are pre-summed; layer-1 input/recurrent weights are
    pre-stacked into one (2H, 4H) matrix so the kernel does one dot per step.
    """
    H = hidden_size
    bound = 1.0 / jnp.sqrt(jnp.float32(H))
    ks = jax.random.split(key, 8)
    u = lambda k, shape: jax.random.uniform(k, shape, jnp.float32, -bound, bound)

    wih0 = u(ks[0], (input_size, 4 * H))                     # W_ih(l0)^T
    whh0 = u(ks[1], (H, 4 * H))                              # W_hh(l0)^T
    b0 = u(ks[2], (1, 4 * H)) + u(ks[3], (1, 4 * H))         # b_ih + b_hh, layer 0
    wih1 = u(ks[4], (H, 4 * H))                              # W_ih(l1)^T
    whh1 = u(ks[5], (H, 4 * H))                              # W_hh(l1)^T
    w1 = jnp.concatenate([wih1, whh1], axis=0)               # (2H, 4H) stacked
    b1 = u(ks[6], (1, 4 * H)) + u(ks[7], (1, 4 * H))         # b_ih + b_hh, layer 1

    kfc_w, kfc_b = jax.random.split(jax.random.fold_in(key, 123))
    bound_fc = 1.0 / jnp.sqrt(jnp.float32(H))
    wfc = jax.random.uniform(kfc_w, (H, output_size), jnp.float32, -bound_fc, bound_fc)
    bfc = jax.random.uniform(kfc_b, (1, output_size), jnp.float32, -bound_fc, bound_fc)
    return (wih0, whh0, b0, w1, b1, wfc, bfc)


if __name__ == "__main__":
    # Shapes consistent with the module's globals:
    # input_size=29, hidden_size=128, nb_layers=2, output_size=29; batch=2, seq=8.
    input_size = 29
    hidden_size = 128
    output_size = 29
    batch, seq = 2, 8

    key = jax.random.PRNGKey(0)
    k_x, k_p = jax.random.split(key)
    x = jax.random.normal(k_x, (batch, seq, input_size), jnp.float32)
    params = init_params(k_p, input_size, hidden_size, output_size)

    out = neural_network_forward(x, params)
    jax.block_until_ready(out)
    assert out.shape == (batch, output_size) and out.dtype == jnp.float32
    print("KERNEL_OK")
</pallas_src>

<mosaic_0001>
module attributes {stable_mosaic.version = 11 : i64} {
  func.func @lstm_fc_kernel(%arg0: memref<2x8x29xf32, #tpu.memory_space<vmem>>, %arg1: memref<29x512xf32, #tpu.memory_space<vmem>>, %arg2: memref<128x512xf32, #tpu.memory_space<vmem>>, %arg3: memref<1x512xf32, #tpu.memory_space<vmem>>, %arg4: memref<256x512xf32, #tpu.memory_space<vmem>>, %arg5: memref<1x512xf32, #tpu.memory_space<vmem>>, %arg6: memref<128x29xf32, #tpu.memory_space<vmem>>, %arg7: memref<1x29xf32, #tpu.memory_space<vmem>>, %arg8: memref<2x29xf32, #tpu.memory_space<vmem>>) attributes {dimension_semantics = [], scalar_prefetch = 0 : i64, scratch_operands = 0 : i64, tpu.core_type = #tpu.core_type<tc>} {
    %c0 = arith.constant 0 : index
    %c0_0 = arith.constant 0 : index
    %0 = vector.load %arg2[%c0, %c0_0] : memref<128x512xf32, #tpu.memory_space<vmem>>, vector<128x512xf32>
    %c0_1 = arith.constant 0 : index
    %c0_2 = arith.constant 0 : index
    %1 = vector.load %arg4[%c0_1, %c0_2] : memref<256x512xf32, #tpu.memory_space<vmem>>, vector<256x512xf32>
    %c0_3 = arith.constant 0 : index
    %c0_4 = arith.constant 0 : index
    %2 = vector.load %arg5[%c0_3, %c0_4] : memref<1x512xf32, #tpu.memory_space<vmem>>, vector<1x512xf32>
    %3 = vector.shape_cast %2 : vector<1x512xf32> to vector<1x512xf32>
    %4 = vector.broadcast %3 : vector<1x512xf32> to vector<2x512xf32>
    %c0_5 = arith.constant 0 : index
    %c0_6 = arith.constant 0 : index
    %c0_7 = arith.constant 0 : index
    %5 = vector.load %arg0[%c0_5, %c0_6, %c0_7] : memref<2x8x29xf32, #tpu.memory_space<vmem>>, vector<2x8x29xf32>
    %6 = vector.shape_cast %5 : vector<2x8x29xf32> to vector<16x29xf32>
    %c0_8 = arith.constant 0 : index
    %c0_9 = arith.constant 0 : index
    %7 = vector.load %arg1[%c0_8, %c0_9] : memref<29x512xf32, #tpu.memory_space<vmem>>, vector<29x512xf32>
    %cst = arith.constant dense<0.000000e+00> : vector<16x512xf32>
    %8 = tpu.matmul %6, %7, %cst {dimension_numbers = #tpu.dot_dimension_numbers<[1], [0], [0], [1], [0, 0, 1, 1], [], []>} : vector<16x29xf32>, vector<29x512xf32>, vector<16x512xf32> -> vector<16x512xf32>
    %c0_10 = arith.constant 0 : index
    %c0_11 = arith.constant 0 : index
    %9 = vector.load %arg3[%c0_10, %c0_11] : memref<1x512xf32, #tpu.memory_space<vmem>>, vector<1x512xf32>
    %10 = vector.broadcast %9 : vector<1x512xf32> to vector<16x512xf32>
    %11 = arith.addf %8, %10 : vector<16x512xf32>
    %12 = vector.shape_cast %11 : vector<16x512xf32> to vector<2x8x512xf32>
    %cst_12 = arith.constant 0.000000e+00 : f32
    %13 = vector.broadcast %cst_12 : f32 to vector<2x128xf32>
    %cst_13 = arith.constant 0.000000e+00 : f32
    %14 = vector.broadcast %cst_13 : f32 to vector<2x128xf32>
    %cst_14 = arith.constant 0.000000e+00 : f32
    %15 = vector.broadcast %cst_14 : f32 to vector<2x128xf32>
    %cst_15 = arith.constant 0.000000e+00 : f32
    %16 = vector.broadcast %cst_15 : f32 to vector<2x128xf32>
    %17 = vector.extract_strided_slice %12 {offsets = [0, 0, 0], sizes = [2, 1, 512], strides = [1, 1, 1]} : vector<2x8x512xf32> to vector<2x1x512xf32>
    %18 = vector.shape_cast %17 : vector<2x1x512xf32> to vector<2x512xf32>
    %cst_16 = arith.constant dense<0.000000e+00> : vector<2x512xf32>
    %19 = tpu.matmul %13, %0, %cst_16 {dimension_numbers = #tpu.dot_dimension_numbers<[1], [0], [0], [1], [0, 0, 1, 1], [], []>} : vector<2x128xf32>, vector<128x512xf32>, vector<2x512xf32> -> vector<2x512xf32>
    %20 = arith.addf %18, %19 : vector<2x512xf32>
    %21 = vector.extract_strided_slice %20 {offsets = [0, 0], sizes = [2, 128], strides = [1, 1]} : vector<2x512xf32> to vector<2x128xf32>
    %22 = arith.negf %21 : vector<2x128xf32>
    %23 = math.exp %22 : vector<2x128xf32>
    %cst_17 = arith.constant 1.000000e+00 : f32
    %24 = vector.broadcast %cst_17 : f32 to vector<2x128xf32>
    %25 = arith.addf %24, %23 : vector<2x128xf32>
    %26 = arith.divf %24, %25 : vector<2x128xf32>
    %27 = vector.extract_strided_slice %20 {offsets = [0, 128], sizes = [2, 128], strides = [1, 1]} : vector<2x512xf32> to vector<2x128xf32>
    %28 = arith.negf %27 : vector<2x128xf32>
    %29 = math.exp %28 : vector<2x128xf32>
    %cst_18 = arith.constant 1.000000e+00 : f32
    %30 = vector.broadcast %cst_18 : f32 to vector<2x128xf32>
    %31 = arith.addf %30, %29 : vector<2x128xf32>
    %32 = arith.divf %30, %31 : vector<2x128xf32>
    %33 = vector.extract_strided_slice %20 {offsets = [0, 256], sizes = [2, 128], strides = [1, 1]} : vector<2x512xf32> to vector<2x128xf32>
    %34 = math.tanh %33 : vector<2x128xf32>
    %35 = vector.extract_strided_slice %20 {offsets = [0, 384], sizes = [2, 128], strides = [1, 1]} : vector<2x512xf32> to vector<2x128xf32>
    %36 = arith.negf %35 : vector<2x128xf32>
    %37 = math.exp %36 : vector<2x128xf32>
    %cst_19 = arith.constant 1.000000e+00 : f32
    %38 = vector.broadcast %cst_19 : f32 to vector<2x128xf32>
    %39 = arith.addf %38, %37 : vector<2x128xf32>
    %40 = arith.divf %38, %39 : vector<2x128xf32>
    %41 = arith.mulf %32, %14 : vector<2x128xf32>
    %42 = arith.mulf %26, %34 : vector<2x128xf32>
    %43 = arith.addf %41, %42 : vector<2x128xf32>
    %44 = math.tanh %43 : vector<2x128xf32>
    %45 = arith.mulf %40, %44 : vector<2x128xf32>
    %46 = tpu.concatenate %45, %15 in 1 : vector<2x128xf32>, vector<2x128xf32> -> vector<2x256xf32>
    %cst_20 = arith.constant dense<0.000000e+00> : vector<2x512xf32>
    %47 = tpu.matmul %46, %1, %cst_20 {dimension_numbers = #tpu.dot_dimension_numbers<[1], [0], [0], [1], [0, 0, 1, 1], [], []>} : vector<2x256xf32>, vector<256x512xf32>, vector<2x512xf32> -> vector<2x512xf32>
    %48 = arith.addf %47, %4 : vector<2x512xf32>
    %49 = vector.extract_strided_slice %48 {offsets = [0, 0], sizes = [2, 128], strides = [1, 1]} : vector<2x512xf32> to vector<2x128xf32>
    %50 = arith.negf %49 : vector<2x128xf32>
    %51 = math.exp %50 : vector<2x128xf32>
    %cst_21 = arith.constant 1.000000e+00 : f32
    %52 = vector.broadcast %cst_21 : f32 to vector<2x128xf32>
    %53 = arith.addf %52, %51 : vector<2x128xf32>
    %54 = arith.divf %52, %53 : vector<2x128xf32>
    %55 = vector.extract_strided_slice %48 {offsets = [0, 128], sizes = [2, 128], strides = [1, 1]} : vector<2x512xf32> to vector<2x128xf32>
    %56 = arith.negf %55 : vector<2x128xf32>
    %57 = math.exp %56 : vector<2x128xf32>
    %cst_22 = arith.constant 1.000000e+00 : f32
    %58 = vector.broadcast %cst_22 : f32 to vector<2x128xf32>
    %59 = arith.addf %58, %57 : vector<2x128xf32>
    %60 = arith.divf %58, %59 : vector<2x128xf32>
    %61 = vector.extract_strided_slice %48 {offsets = [0, 256], sizes = [2, 128], strides = [1, 1]} : vector<2x512xf32> to vector<2x128xf32>
    %62 = math.tanh %61 : vector<2x128xf32>
    %63 = vector.extract_strided_slice %48 {offsets = [0, 384], sizes = [2, 128], strides = [1, 1]} : vector<2x512xf32> to vector<2x128xf32>
    %64 = arith.negf %63 : vector<2x128xf32>
    %65 = math.exp %64 : vector<2x128xf32>
    %cst_23 = arith.constant 1.000000e+00 : f32
    %66 = vector.broadcast %cst_23 : f32 to vector<2x128xf32>
    %67 = arith.addf %66, %65 : vector<2x128xf32>
    %68 = arith.divf %66, %67 : vector<2x128xf32>
    %69 = arith.mulf %60, %16 : vector<2x128xf32>
    %70 = arith.mulf %54, %62 : vector<2x128xf32>
    %71 = arith.addf %69, %70 : vector<2x128xf32>
    %72 = math.tanh %71 : vector<2x128xf32>
    %73 = arith.mulf %68, %72 : vector<2x128xf32>
    %74 = vector.extract_strided_slice %12 {offsets = [0, 1, 0], sizes = [2, 1, 512], strides = [1, 1, 1]} : vector<2x8x512xf32> to vector<2x1x512xf32>
    %75 = vector.shape_cast %74 : vector<2x1x512xf32> to vector<2x512xf32>
    %cst_24 = arith.constant dense<0.000000e+00> : vector<2x512xf32>
    %76 = tpu.matmul %45, %0, %cst_24 {dimension_numbers = #tpu.dot_dimension_numbers<[1], [0], [0], [1], [0, 0, 1, 1], [], []>} : vector<2x128xf32>, vector<128x512xf32>, vector<2x512xf32> -> vector<2x512xf32>
    %77 = arith.addf %75, %76 : vector<2x512xf32>
    %78 = vector.extract_strided_slice %77 {offsets = [0, 0], sizes = [2, 128], strides = [1, 1]} : vector<2x512xf32> to vector<2x128xf32>
    %79 = arith.negf %78 : vector<2x128xf32>
    %80 = math.exp %79 : vector<2x128xf32>
    %cst_25 = arith.constant 1.000000e+00 : f32
    %81 = vector.broadcast %cst_25 : f32 to vector<2x128xf32>
    %82 = arith.addf %81, %80 : vector<2x128xf32>
    %83 = arith.divf %81, %82 : vector<2x128xf32>
    %84 = vector.extract_strided_slice %77 {offsets = [0, 128], sizes = [2, 128], strides = [1, 1]} : vector<2x512xf32> to vector<2x128xf32>
    %85 = arith.negf %84 : vector<2x128xf32>
    %86 = math.exp %85 : vector<2x128xf32>
    %cst_26 = arith.constant 1.000000e+00 : f32
    %87 = vector.broadcast %cst_26 : f32 to vector<2x128xf32>
    %88 = arith.addf %87, %86 : vector<2x128xf32>
    %89 = arith.divf %87, %88 : vector<2x128xf32>
    %90 = vector.extract_strided_slice %77 {offsets = [0, 256], sizes = [2, 128], strides = [1, 1]} : vector<2x512xf32> to vector<2x128xf32>
    %91 = math.tanh %90 : vector<2x128xf32>
    %92 = vector.extract_strided_slice %77 {offsets = [0, 384], sizes = [2, 128], strides = [1, 1]} : vector<2x512xf32> to vector<2x128xf32>
    %93 = arith.negf %92 : vector<2x128xf32>
    %94 = math.exp %93 : vector<2x128xf32>
    %cst_27 = arith.constant 1.000000e+00 : f32
    %95 = vector.broadcast %cst_27 : f32 to vector<2x128xf32>
    %96 = arith.addf %95, %94 : vector<2x128xf32>
    %97 = arith.divf %95, %96 : vector<2x128xf32>
    %98 = arith.mulf %89, %43 : vector<2x128xf32>
    %99 = arith.mulf %83, %91 : vector<2x128xf32>
    %100 = arith.addf %98, %99 : vector<2x128xf32>
    %101 = math.tanh %100 : vector<2x128xf32>
    %102 = arith.mulf %97, %101 : vector<2x128xf32>
    %103 = tpu.concatenate %102, %73 in 1 : vector<2x128xf32>, vector<2x128xf32> -> vector<2x256xf32>
    %cst_28 = arith.constant dense<0.000000e+00> : vector<2x512xf32>
    %104 = tpu.matmul %103, %1, %cst_28 {dimension_numbers = #tpu.dot_dimension_numbers<[1], [0], [0], [1], [0, 0, 1, 1], [], []>} : vector<2x256xf32>, vector<256x512xf32>, vector<2x512xf32> -> vector<2x512xf32>
    %105 = arith.addf %104, %4 : vector<2x512xf32>
    %106 = vector.extract_strided_slice %105 {offsets = [0, 0], sizes = [2, 128], strides = [1, 1]} : vector<2x512xf32> to vector<2x128xf32>
    %107 = arith.negf %106 : vector<2x128xf32>
    %108 = math.exp %107 : vector<2x128xf32>
    %cst_29 = arith.constant 1.000000e+00 : f32
    %109 = vector.broadcast %cst_29 : f32 to vector<2x128xf32>
    %110 = arith.addf %109, %108 : vector<2x128xf32>
    %111 = arith.divf %109, %110 : vector<2x128xf32>
    %112 = vector.extract_strided_slice %105 {offsets = [0, 128], sizes = [2, 128], strides = [1, 1]} : vector<2x512xf32> to vector<2x128xf32>
    %113 = arith.negf %112 : vector<2x128xf32>
    %114 = math.exp %113 : vector<2x128xf32>
    %cst_30 = arith.constant 1.000000e+00 : f32
    %115 = vector.broadcast %cst_30 : f32 to vector<2x128xf32>
    %116 = arith.addf %115, %114 : vector<2x128xf32>
    %117 = arith.divf %115, %116 : vector<2x128xf32>
    %118 = vector.extract_strided_slice %105 {offsets = [0, 256], sizes = [2, 128], strides = [1, 1]} : vector<2x512xf32> to vector<2x128xf32>
    %119 = math.tanh %118 : vector<2x128xf32>
    %120 = vector.extract_strided_slice %105 {offsets = [0, 384], sizes = [2, 128], strides = [1, 1]} : vector<2x512xf32> to vector<2x128xf32>
    %121 = arith.negf %120 : vector<2x128xf32>
    %122 = math.exp %121 : vector<2x128xf32>
    %cst_31 = arith.constant 1.000000e+00 : f32
    %123 = vector.broadcast %cst_31 : f32 to vector<2x128xf32>
    %124 = arith.addf %123, %122 : vector<2x128xf32>
    %125 = arith.divf %123, %124 : vector<2x128xf32>
    %126 = arith.mulf %117, %71 : vector<2x128xf32>
    %127 = arith.mulf %111, %119 : vector<2x128xf32>
    %128 = arith.addf %126, %127 : vector<2x128xf32>
    %129 = math.tanh %128 : vector<2x128xf32>
    %130 = arith.mulf %125, %129 : vector<2x128xf32>
    %131 = vector.extract_strided_slice %12 {offsets = [0, 2, 0], sizes = [2, 1, 512], strides = [1, 1, 1]} : vector<2x8x512xf32> to vector<2x1x512xf32>
    %132 = vector.shape_cast %131 : vector<2x1x512xf32> to vector<2x512xf32>
    %cst_32 = arith.constant dense<0.000000e+00> : vector<2x512xf32>
    %133 = tpu.matmul %102, %0, %cst_32 {dimension_numbers = #tpu.dot_dimension_numbers<[1], [0], [0], [1], [0, 0, 1, 1], [], []>} : vector<2x128xf32>, vector<128x512xf32>, vector<2x512xf32> -> vector<2x512xf32>
    %134 = arith.addf %132, %133 : vector<2x512xf32>
    %135 = vector.extract_strided_slice %134 {offsets = [0, 0], sizes = [2, 128], strides = [1, 1]} : vector<2x512xf32> to vector<2x128xf32>
    %136 = arith.negf %135 : vector<2x128xf32>
    %137 = math.exp %136 : vector<2x128xf32>
    %cst_33 = arith.constant 1.000000e+00 : f32
    %138 = vector.broadcast %cst_33 : f32 to vector<2x128xf32>
    %139 = arith.addf %138, %137 : vector<2x128xf32>
    %140 = arith.divf %138, %139 : vector<2x128xf32>
    %141 = vector.extract_strided_slice %134 {offsets = [0, 128], sizes = [2, 128], strides = [1, 1]} : vector<2x512xf32> to vector<2x128xf32>
    %142 = arith.negf %141 : vector<2x128xf32>
    %143 = math.exp %142 : vector<2x128xf32>
    %cst_34 = arith.constant 1.000000e+00 : f32
    %144 = vector.broadcast %cst_34 : f32 to vector<2x128xf32>
    %145 = arith.addf %144, %143 : vector<2x128xf32>
    %146 = arith.divf %144, %145 : vector<2x128xf32>
    %147 = vector.extract_strided_slice %134 {offsets = [0, 256], sizes = [2, 128], strides = [1, 1]} : vector<2x512xf32> to vector<2x128xf32>
    %148 = math.tanh %147 : vector<2x128xf32>
    %149 = vector.extract_strided_slice %134 {offsets = [0, 384], sizes = [2, 128], strides = [1, 1]} : vector<2x512xf32> to vector<2x128xf32>
    %150 = arith.negf %149 : vector<2x128xf32>
    %151 = math.exp %150 : vector<2x128xf32>
    %cst_35 = arith.constant 1.000000e+00 : f32
    %152 = vector.broadcast %cst_35 : f32 to vector<2x128xf32>
    %153 = arith.addf %152, %151 : vector<2x128xf32>
    %154 = arith.divf %152, %153 : vector<2x128xf32>
    %155 = arith.mulf %146, %100 : vector<2x128xf32>
    %156 = arith.mulf %140, %148 : vector<2x128xf32>
    %157 = arith.addf %155, %156 : vector<2x128xf32>
    %158 = math.tanh %157 : vector<2x128xf32>
    %159 = arith.mulf %154, %158 : vector<2x128xf32>
    %160 = tpu.concatenate %159, %130 in 1 : vector<2x128xf32>, vector<2x128xf32> -> vector<2x256xf32>
    %cst_36 = arith.constant dense<0.000000e+00> : vector<2x512xf32>
    %161 = tpu.matmul %160, %1, %cst_36 {dimension_numbers = #tpu.dot_dimension_numbers<[1], [0], [0], [1], [0, 0, 1, 1], [], []>} : vector<2x256xf32>, vector<256x512xf32>, vector<2x512xf32> -> vector<2x512xf32>
    %162 = arith.addf %161, %4 : vector<2x512xf32>
    %163 = vector.extract_strided_slice %162 {offsets = [0, 0], sizes = [2, 128], strides = [1, 1]} : vector<2x512xf32> to vector<2x128xf32>
    %164 = arith.negf %163 : vector<2x128xf32>
    %165 = math.exp %164 : vector<2x128xf32>
    %cst_37 = arith.constant 1.000000e+00 : f32
    %166 = vector.broadcast %cst_37 : f32 to vector<2x128xf32>
    %167 = arith.addf %166, %165 : vector<2x128xf32>
    %168 = arith.divf %166, %167 : vector<2x128xf32>
    %169 = vector.extract_strided_slice %162 {offsets = [0, 128], sizes = [2, 128], strides = [1, 1]} : vector<2x512xf32> to vector<2x128xf32>
    %170 = arith.negf %169 : vector<2x128xf32>
    %171 = math.exp %170 : vector<2x128xf32>
    %cst_38 = arith.constant 1.000000e+00 : f32
    %172 = vector.broadcast %cst_38 : f32 to vector<2x128xf32>
    %173 = arith.addf %172, %171 : vector<2x128xf32>
    %174 = arith.divf %172, %173 : vector<2x128xf32>
    %175 = vector.extract_strided_slice %162 {offsets = [0, 256], sizes = [2, 128], strides = [1, 1]} : vector<2x512xf32> to vector<2x128xf32>
    %176 = math.tanh %175 : vector<2x128xf32>
    %177 = vector.extract_strided_slice %162 {offsets = [0, 384], sizes = [2, 128], strides = [1, 1]} : vector<2x512xf32> to vector<2x128xf32>
    %178 = arith.negf %177 : vector<2x128xf32>
    %179 = math.exp %178 : vector<2x128xf32>
    %cst_39 = arith.constant 1.000000e+00 : f32
    %180 = vector.broadcast %cst_39 : f32 to vector<2x128xf32>
    %181 = arith.addf %180, %179 : vector<2x128xf32>
    %182 = arith.divf %180, %181 : vector<2x128xf32>
    %183 = arith.mulf %174, %128 : vector<2x128xf32>
    %184 = arith.mulf %168, %176 : vector<2x128xf32>
    %185 = arith.addf %183, %184 : vector<2x128xf32>
    %186 = math.tanh %185 : vector<2x128xf32>
    %187 = arith.mulf %182, %186 : vector<2x128xf32>
    %188 = vector.extract_strided_slice %12 {offsets = [0, 3, 0], sizes = [2, 1, 512], strides = [1, 1, 1]} : vector<2x8x512xf32> to vector<2x1x512xf32>
    %189 = vector.shape_cast %188 : vector<2x1x512xf32> to vector<2x512xf32>
    %cst_40 = arith.constant dense<0.000000e+00> : vector<2x512xf32>
    %190 = tpu.matmul %159, %0, %cst_40 {dimension_numbers = #tpu.dot_dimension_numbers<[1], [0], [0], [1], [0, 0, 1, 1], [], []>} : vector<2x128xf32>, vector<128x512xf32>, vector<2x512xf32> -> vector<2x512xf32>
    %191 = arith.addf %189, %190 : vector<2x512xf32>
    %192 = vector.extract_strided_slice %191 {offsets = [0, 0], sizes = [2, 128], strides = [1, 1]} : vector<2x512xf32> to vector<2x128xf32>
    %193 = arith.negf %192 : vector<2x128xf32>
    %194 = math.exp %193 : vector<2x128xf32>
    %cst_41 = arith.constant 1.000000e+00 : f32
    %195 = vector.broadcast %cst_41 : f32 to vector<2x128xf32>
    %196 = arith.addf %195, %194 : vector<2x128xf32>
    %197 = arith.divf %195, %196 : vector<2x128xf32>
    %198 = vector.extract_strided_slice %191 {offsets = [0, 128], sizes = [2, 128], strides = [1, 1]} : vector<2x512xf32> to vector<2x128xf32>
    %199 = arith.negf %198 : vector<2x128xf32>
    %200 = math.exp %199 : vector<2x128xf32>
    %cst_42 = arith.constant 1.000000e+00 : f32
    %201 = vector.broadcast %cst_42 : f32 to vector<2x128xf32>
    %202 = arith.addf %201, %200 : vector<2x128xf32>
    %203 = arith.divf %201, %202 : vector<2x128xf32>
    %204 = vector.extract_strided_slice %191 {offsets = [0, 256], sizes = [2, 128], strides = [1, 1]} : vector<2x512xf32> to vector<2x128xf32>
    %205 = math.tanh %204 : vector<2x128xf32>
    %206 = vector.extract_strided_slice %191 {offsets = [0, 384], sizes = [2, 128], strides = [1, 1]} : vector<2x512xf32> to vector<2x128xf32>
    %207 = arith.negf %206 : vector<2x128xf32>
    %208 = math.exp %207 : vector<2x128xf32>
    %cst_43 = arith.constant 1.000000e+00 : f32
    %209 = vector.broadcast %cst_43 : f32 to vector<2x128xf32>
    %210 = arith.addf %209, %208 : vector<2x128xf32>
    %211 = arith.divf %209, %210 : vector<2x128xf32>
    %212 = arith.mulf %203, %157 : vector<2x128xf32>
    %213 = arith.mulf %197, %205 : vector<2x128xf32>
    %214 = arith.addf %212, %213 : vector<2x128xf32>
    %215 = math.tanh %214 : vector<2x128xf32>
    %216 = arith.mulf %211, %215 : vector<2x128xf32>
    %217 = tpu.concatenate %216, %187 in 1 : vector<2x128xf32>, vector<2x128xf32> -> vector<2x256xf32>
    %cst_44 = arith.constant dense<0.000000e+00> : vector<2x512xf32>
    %218 = tpu.matmul %217, %1, %cst_44 {dimension_numbers = #tpu.dot_dimension_numbers<[1], [0], [0], [1], [0, 0, 1, 1], [], []>} : vector<2x256xf32>, vector<256x512xf32>, vector<2x512xf32> -> vector<2x512xf32>
    %219 = arith.addf %218, %4 : vector<2x512xf32>
    %220 = vector.extract_strided_slice %219 {offsets = [0, 0], sizes = [2, 128], strides = [1, 1]} : vector<2x512xf32> to vector<2x128xf32>
    %221 = arith.negf %220 : vector<2x128xf32>
    %222 = math.exp %221 : vector<2x128xf32>
    %cst_45 = arith.constant 1.000000e+00 : f32
    %223 = vector.broadcast %cst_45 : f32 to vector<2x128xf32>
    %224 = arith.addf %223, %222 : vector<2x128xf32>
    %225 = arith.divf %223, %224 : vector<2x128xf32>
    %226 = vector.extract_strided_slice %219 {offsets = [0, 128], sizes = [2, 128], strides = [1, 1]} : vector<2x512xf32> to vector<2x128xf32>
    %227 = arith.negf %226 : vector<2x128xf32>
    %228 = math.exp %227 : vector<2x128xf32>
    %cst_46 = arith.constant 1.000000e+00 : f32
    %229 = vector.broadcast %cst_46 : f32 to vector<2x128xf32>
    %230 = arith.addf %229, %228 : vector<2x128xf32>
    %231 = arith.divf %229, %230 : vector<2x128xf32>
    %232 = vector.extract_strided_slice %219 {offsets = [0, 256], sizes = [2, 128], strides = [1, 1]} : vector<2x512xf32> to vector<2x128xf32>
    %233 = math.tanh %232 : vector<2x128xf32>
    %234 = vector.extract_strided_slice %219 {offsets = [0, 384], sizes = [2, 128], strides = [1, 1]} : vector<2x512xf32> to vector<2x128xf32>
    %235 = arith.negf %234 : vector<2x128xf32>
    %236 = math.exp %235 : vector<2x128xf32>
    %cst_47 = arith.constant 1.000000e+00 : f32
    %237 = vector.broadcast %cst_47 : f32 to vector<2x128xf32>
    %238 = arith.addf %237, %236 : vector<2x128xf32>
    %239 = arith.divf %237, %238 : vector<2x128xf32>
    %240 = arith.mulf %231, %185 : vector<2x128xf32>
    %241 = arith.mulf %225, %233 : vector<2x128xf32>
    %242 = arith.addf %240, %241 : vector<2x128xf32>
    %243 = math.tanh %242 : vector<2x128xf32>
    %244 = arith.mulf %239, %243 : vector<2x128xf32>
    %245 = vector.extract_strided_slice %12 {offsets = [0, 4, 0], sizes = [2, 1, 512], strides = [1, 1, 1]} : vector<2x8x512xf32> to vector<2x1x512xf32>
    %246 = vector.shape_cast %245 : vector<2x1x512xf32> to vector<2x512xf32>
    %cst_48 = arith.constant dense<0.000000e+00> : vector<2x512xf32>
    %247 = tpu.matmul %216, %0, %cst_48 {dimension_numbers = #tpu.dot_dimension_numbers<[1], [0], [0], [1], [0, 0, 1, 1], [], []>} : vector<2x128xf32>, vector<128x512xf32>, vector<2x512xf32> -> vector<2x512xf32>
    %248 = arith.addf %246, %247 : vector<2x512xf32>
    %249 = vector.extract_strided_slice %248 {offsets = [0, 0], sizes = [2, 128], strides = [1, 1]} : vector<2x512xf32> to vector<2x128xf32>
    %250 = arith.negf %249 : vector<2x128xf32>
    %251 = math.exp %250 : vector<2x128xf32>
    %cst_49 = arith.constant 1.000000e+00 : f32
    %252 = vector.broadcast %cst_49 : f32 to vector<2x128xf32>
    %253 = arith.addf %252, %251 : vector<2x128xf32>
    %254 = arith.divf %252, %253 : vector<2x128xf32>
    %255 = vector.extract_strided_slice %248 {offsets = [0, 128], sizes = [2, 128], strides = [1, 1]} : vector<2x512xf32> to vector<2x128xf32>
    %256 = arith.negf %255 : vector<2x128xf32>
    %257 = math.exp %256 : vector<2x128xf32>
    %cst_50 = arith.constant 1.000000e+00 : f32
    %258 = vector.broadcast %cst_50 : f32 to vector<2x128xf32>
    %259 = arith.addf %258, %257 : vector<2x128xf32>
    %260 = arith.divf %258, %259 : vector<2x128xf32>
    %261 = vector.extract_strided_slice %248 {offsets = [0, 256], sizes = [2, 128], strides = [1, 1]} : vector<2x512xf32> to vector<2x128xf32>
    %262 = math.tanh %261 : vector<2x128xf32>
    %263 = vector.extract_strided_slice %248 {offsets = [0, 384], sizes = [2, 128], strides = [1, 1]} : vector<2x512xf32> to vector<2x128xf32>
    %264 = arith.negf %263 : vector<2x128xf32>
    %265 = math.exp %264 : vector<2x128xf32>
    %cst_51 = arith.constant 1.000000e+00 : f32
    %266 = vector.broadcast %cst_51 : f32 to vector<2x128xf32>
    %267 = arith.addf %266, %265 : vector<2x128xf32>
    %268 = arith.divf %266, %267 : vector<2x128xf32>
    %269 = arith.mulf %260, %214 : vector<2x128xf32>
    %270 = arith.mulf %254, %262 : vector<2x128xf32>
    %271 = arith.addf %269, %270 : vector<2x128xf32>
    %272 = math.tanh %271 : vector<2x128xf32>
    %273 = arith.mulf %268, %272 : vector<2x128xf32>
    %274 = tpu.concatenate %273, %244 in 1 : vector<2x128xf32>, vector<2x128xf32> -> vector<2x256xf32>
    %cst_52 = arith.constant dense<0.000000e+00> : vector<2x512xf32>
    %275 = tpu.matmul %274, %1, %cst_52 {dimension_numbers = #tpu.dot_dimension_numbers<[1], [0], [0], [1], [0, 0, 1, 1], [], []>} : vector<2x256xf32>, vector<256x512xf32>, vector<2x512xf32> -> vector<2x512xf32>
    %276 = arith.addf %275, %4 : vector<2x512xf32>
    %277 = vector.extract_strided_slice %276 {offsets = [0, 0], sizes = [2, 128], strides = [1, 1]} : vector<2x512xf32> to vector<2x128xf32>
    %278 = arith.negf %277 : vector<2x128xf32>
    %279 = math.exp %278 : vector<2x128xf32>
    %cst_53 = arith.constant 1.000000e+00 : f32
    %280 = vector.broadcast %cst_53 : f32 to vector<2x128xf32>
    %281 = arith.addf %280, %279 : vector<2x128xf32>
    %282 = arith.divf %280, %281 : vector<2x128xf32>
    %283 = vector.extract_strided_slice %276 {offsets = [0, 128], sizes = [2, 128], strides = [1, 1]} : vector<2x512xf32> to vector<2x128xf32>
    %284 = arith.negf %283 : vector<2x128xf32>
    %285 = math.exp %284 : vector<2x128xf32>
    %cst_54 = arith.constant 1.000000e+00 : f32
    %286 = vector.broadcast %cst_54 : f32 to vector<2x128xf32>
    %287 = arith.addf %286, %285 : vector<2x128xf32>
    %288 = arith.divf %286, %287 : vector<2x128xf32>
    %289 = vector.extract_strided_slice %276 {offsets = [0, 256], sizes = [2, 128], strides = [1, 1]} : vector<2x512xf32> to vector<2x128xf32>
    %290 = math.tanh %289 : vector<2x128xf32>
    %291 = vector.extract_strided_slice %276 {offsets = [0, 384], sizes = [2, 128], strides = [1, 1]} : vector<2x512xf32> to vector<2x128xf32>
    %292 = arith.negf %291 : vector<2x128xf32>
    %293 = math.exp %292 : vector<2x128xf32>
    %cst_55 = arith.constant 1.000000e+00 : f32
    %294 = vector.broadcast %cst_55 : f32 to vector<2x128xf32>
    %295 = arith.addf %294, %293 : vector<2x128xf32>
    %296 = arith.divf %294, %295 : vector<2x128xf32>
    %297 = arith.mulf %288, %242 : vector<2x128xf32>
    %298 = arith.mulf %282, %290 : vector<2x128xf32>
    %299 = arith.addf %297, %298 : vector<2x128xf32>
    %300 = math.tanh %299 : vector<2x128xf32>
    %301 = arith.mulf %296, %300 : vector<2x128xf32>
    %302 = vector.extract_strided_slice %12 {offsets = [0, 5, 0], sizes = [2, 1, 512], strides = [1, 1, 1]} : vector<2x8x512xf32> to vector<2x1x512xf32>
    %303 = vector.shape_cast %302 : vector<2x1x512xf32> to vector<2x512xf32>
    %cst_56 = arith.constant dense<0.000000e+00> : vector<2x512xf32>
    %304 = tpu.matmul %273, %0, %cst_56 {dimension_numbers = #tpu.dot_dimension_numbers<[1], [0], [0], [1], [0, 0, 1, 1], [], []>} : vector<2x128xf32>, vector<128x512xf32>, vector<2x512xf32> -> vector<2x512xf32>
    %305 = arith.addf %303, %304 : vector<2x512xf32>
    %306 = vector.extract_strided_slice %305 {offsets = [0, 0], sizes = [2, 128], strides = [1, 1]} : vector<2x512xf32> to vector<2x128xf32>
    %307 = arith.negf %306 : vector<2x128xf32>
    %308 = math.exp %307 : vector<2x128xf32>
    %cst_57 = arith.constant 1.000000e+00 : f32
    %309 = vector.broadcast %cst_57 : f32 to vector<2x128xf32>
    %310 = arith.addf %309, %308 : vector<2x128xf32>
    %311 = arith.divf %309, %310 : vector<2x128xf32>
    %312 = vector.extract_strided_slice %305 {offsets = [0, 128], sizes = [2, 128], strides = [1, 1]} : vector<2x512xf32> to vector<2x128xf32>
    %313 = arith.negf %312 : vector<2x128xf32>
    %314 = math.exp %313 : vector<2x128xf32>
    %cst_58 = arith.constant 1.000000e+00 : f32
    %315 = vector.broadcast %cst_58 : f32 to vector<2x128xf32>
    %316 = arith.addf %315, %314 : vector<2x128xf32>
    %317 = arith.divf %315, %316 : vector<2x128xf32>
    %318 = vector.extract_strided_slice %305 {offsets = [0, 256], sizes = [2, 128], strides = [1, 1]} : vector<2x512xf32> to vector<2x128xf32>
    %319 = math.tanh %318 : vector<2x128xf32>
    %320 = vector.extract_strided_slice %305 {offsets = [0, 384], sizes = [2, 128], strides = [1, 1]} : vector<2x512xf32> to vector<2x128xf32>
    %321 = arith.negf %320 : vector<2x128xf32>
    %322 = math.exp %321 : vector<2x128xf32>
    %cst_59 = arith.constant 1.000000e+00 : f32
    %323 = vector.broadcast %cst_59 : f32 to vector<2x128xf32>
    %324 = arith.addf %323, %322 : vector<2x128xf32>
    %325 = arith.divf %323, %324 : vector<2x128xf32>
    %326 = arith.mulf %317, %271 : vector<2x128xf32>
    %327 = arith.mulf %311, %319 : vector<2x128xf32>
    %328 = arith.addf %326, %327 : vector<2x128xf32>
    %329 = math.tanh %328 : vector<2x128xf32>
    %330 = arith.mulf %325, %329 : vector<2x128xf32>
    %331 = tpu.concatenate %330, %301 in 1 : vector<2x128xf32>, vector<2x128xf32> -> vector<2x256xf32>
    %cst_60 = arith.constant dense<0.000000e+00> : vector<2x512xf32>
    %332 = tpu.matmul %331, %1, %cst_60 {dimension_numbers = #tpu.dot_dimension_numbers<[1], [0], [0], [1], [0, 0, 1, 1], [], []>} : vector<2x256xf32>, vector<256x512xf32>, vector<2x512xf32> -> vector<2x512xf32>
    %333 = arith.addf %332, %4 : vector<2x512xf32>
    %334 = vector.extract_strided_slice %333 {offsets = [0, 0], sizes = [2, 128], strides = [1, 1]} : vector<2x512xf32> to vector<2x128xf32>
    %335 = arith.negf %334 : vector<2x128xf32>
    %336 = math.exp %335 : vector<2x128xf32>
    %cst_61 = arith.constant 1.000000e+00 : f32
    %337 = vector.broadcast %cst_61 : f32 to vector<2x128xf32>
    %338 = arith.addf %337, %336 : vector<2x128xf32>
    %339 = arith.divf %337, %338 : vector<2x128xf32>
    %340 = vector.extract_strided_slice %333 {offsets = [0, 128], sizes = [2, 128], strides = [1, 1]} : vector<2x512xf32> to vector<2x128xf32>
    %341 = arith.negf %340 : vector<2x128xf32>
    %342 = math.exp %341 : vector<2x128xf32>
    %cst_62 = arith.constant 1.000000e+00 : f32
    %343 = vector.broadcast %cst_62 : f32 to vector<2x128xf32>
    %344 = arith.addf %343, %342 : vector<2x128xf32>
    %345 = arith.divf %343, %344 : vector<2x128xf32>
    %346 = vector.extract_strided_slice %333 {offsets = [0, 256], sizes = [2, 128], strides = [1, 1]} : vector<2x512xf32> to vector<2x128xf32>
    %347 = math.tanh %346 : vector<2x128xf32>
    %348 = vector.extract_strided_slice %333 {offsets = [0, 384], sizes = [2, 128], strides = [1, 1]} : vector<2x512xf32> to vector<2x128xf32>
    %349 = arith.negf %348 : vector<2x128xf32>
    %350 = math.exp %349 : vector<2x128xf32>
    %cst_63 = arith.constant 1.000000e+00 : f32
    %351 = vector.broadcast %cst_63 : f32 to vector<2x128xf32>
    %352 = arith.addf %351, %350 : vector<2x128xf32>
    %353 = arith.divf %351, %352 : vector<2x128xf32>
    %354 = arith.mulf %345, %299 : vector<2x128xf32>
    %355 = arith.mulf %339, %347 : vector<2x128xf32>
    %356 = arith.addf %354, %355 : vector<2x128xf32>
    %357 = math.tanh %356 : vector<2x128xf32>
    %358 = arith.mulf %353, %357 : vector<2x128xf32>
    %359 = vector.extract_strided_slice %12 {offsets = [0, 6, 0], sizes = [2, 1, 512], strides = [1, 1, 1]} : vector<2x8x512xf32> to vector<2x1x512xf32>
    %360 = vector.shape_cast %359 : vector<2x1x512xf32> to vector<2x512xf32>
    %cst_64 = arith.constant dense<0.000000e+00> : vector<2x512xf32>
    %361 = tpu.matmul %330, %0, %cst_64 {dimension_numbers = #tpu.dot_dimension_numbers<[1], [0], [0], [1], [0, 0, 1, 1], [], []>} : vector<2x128xf32>, vector<128x512xf32>, vector<2x512xf32> -> vector<2x512xf32>
    %362 = arith.addf %360, %361 : vector<2x512xf32>
    %363 = vector.extract_strided_slice %362 {offsets = [0, 0], sizes = [2, 128], strides = [1, 1]} : vector<2x512xf32> to vector<2x128xf32>
    %364 = arith.negf %363 : vector<2x128xf32>
    %365 = math.exp %364 : vector<2x128xf32>
    %cst_65 = arith.constant 1.000000e+00 : f32
    %366 = vector.broadcast %cst_65 : f32 to vector<2x128xf32>
    %367 = arith.addf %366, %365 : vector<2x128xf32>
    %368 = arith.divf %366, %367 : vector<2x128xf32>
    %369 = vector.extract_strided_slice %362 {offsets = [0, 128], sizes = [2, 128], strides = [1, 1]} : vector<2x512xf32> to vector<2x128xf32>
    %370 = arith.negf %369 : vector<2x128xf32>
    %371 = math.exp %370 : vector<2x128xf32>
    %cst_66 = arith.constant 1.000000e+00 : f32
    %372 = vector.broadcast %cst_66 : f32 to vector<2x128xf32>
    %373 = arith.addf %372, %371 : vector<2x128xf32>
    %374 = arith.divf %372, %373 : vector<2x128xf32>
    %375 = vector.extract_strided_slice %362 {offsets = [0, 256], sizes = [2, 128], strides = [1, 1]} : vector<2x512xf32> to vector<2x128xf32>
    %376 = math.tanh %375 : vector<2x128xf32>
    %377 = vector.extract_strided_slice %362 {offsets = [0, 384], sizes = [2, 128], strides = [1, 1]} : vector<2x512xf32> to vector<2x128xf32>
    %378 = arith.negf %377 : vector<2x128xf32>
    %379 = math.exp %378 : vector<2x128xf32>
    %cst_67 = arith.constant 1.000000e+00 : f32
    %380 = vector.broadcast %cst_67 : f32 to vector<2x128xf32>
    %381 = arith.addf %380, %379 : vector<2x128xf32>
    %382 = arith.divf %380, %381 : vector<2x128xf32>
    %383 = arith.mulf %374, %328 : vector<2x128xf32>
    %384 = arith.mulf %368, %376 : vector<2x128xf32>
    %385 = arith.addf %383, %384 : vector<2x128xf32>
    %386 = math.tanh %385 : vector<2x128xf32>
    %387 = arith.mulf %382, %386 : vector<2x128xf32>
    %388 = tpu.concatenate %387, %358 in 1 : vector<2x128xf32>, vector<2x128xf32> -> vector<2x256xf32>
    %cst_68 = arith.constant dense<0.000000e+00> : vector<2x512xf32>
    %389 = tpu.matmul %388, %1, %cst_68 {dimension_numbers = #tpu.dot_dimension_numbers<[1], [0], [0], [1], [0, 0, 1, 1], [], []>} : vector<2x256xf32>, vector<256x512xf32>, vector<2x512xf32> -> vector<2x512xf32>
    %390 = arith.addf %389, %4 : vector<2x512xf32>
    %391 = vector.extract_strided_slice %390 {offsets = [0, 0], sizes = [2, 128], strides = [1, 1]} : vector<2x512xf32> to vector<2x128xf32>
    %392 = arith.negf %391 : vector<2x128xf32>
    %393 = math.exp %392 : vector<2x128xf32>
    %cst_69 = arith.constant 1.000000e+00 : f32
    %394 = vector.broadcast %cst_69 : f32 to vector<2x128xf32>
    %395 = arith.addf %394, %393 : vector<2x128xf32>
    %396 = arith.divf %394, %395 : vector<2x128xf32>
    %397 = vector.extract_strided_slice %390 {offsets = [0, 128], sizes = [2, 128], strides = [1, 1]} : vector<2x512xf32> to vector<2x128xf32>
    %398 = arith.negf %397 : vector<2x128xf32>
    %399 = math.exp %398 : vector<2x128xf32>
    %cst_70 = arith.constant 1.000000e+00 : f32
    %400 = vector.broadcast %cst_70 : f32 to vector<2x128xf32>
    %401 = arith.addf %400, %399 : vector<2x128xf32>
    %402 = arith.divf %400, %401 : vector<2x128xf32>
    %403 = vector.extract_strided_slice %390 {offsets = [0, 256], sizes = [2, 128], strides = [1, 1]} : vector<2x512xf32> to vector<2x128xf32>
    %404 = math.tanh %403 : vector<2x128xf32>
    %405 = vector.extract_strided_slice %390 {offsets = [0, 384], sizes = [2, 128], strides = [1, 1]} : vector<2x512xf32> to vector<2x128xf32>
    %406 = arith.negf %405 : vector<2x128xf32>
    %407 = math.exp %406 : vector<2x128xf32>
    %cst_71 = arith.constant 1.000000e+00 : f32
    %408 = vector.broadcast %cst_71 : f32 to vector<2x128xf32>
    %409 = arith.addf %408, %407 : vector<2x128xf32>
    %410 = arith.divf %408, %409 : vector<2x128xf32>
    %411 = arith.mulf %402, %356 : vector<2x128xf32>
    %412 = arith.mulf %396, %404 : vector<2x128xf32>
    %413 = arith.addf %411, %412 : vector<2x128xf32>
    %414 = math.tanh %413 : vector<2x128xf32>
    %415 = arith.mulf %410, %414 : vector<2x128xf32>
    %416 = vector.extract_strided_slice %12 {offsets = [0, 7, 0], sizes = [2, 1, 512], strides = [1, 1, 1]} : vector<2x8x512xf32> to vector<2x1x512xf32>
    %417 = vector.shape_cast %416 : vector<2x1x512xf32> to vector<2x512xf32>
    %cst_72 = arith.constant dense<0.000000e+00> : vector<2x512xf32>
    %418 = tpu.matmul %387, %0, %cst_72 {dimension_numbers = #tpu.dot_dimension_numbers<[1], [0], [0], [1], [0, 0, 1, 1], [], []>} : vector<2x128xf32>, vector<128x512xf32>, vector<2x512xf32> -> vector<2x512xf32>
    %419 = arith.addf %417, %418 : vector<2x512xf32>
    %420 = vector.extract_strided_slice %419 {offsets = [0, 0], sizes = [2, 128], strides = [1, 1]} : vector<2x512xf32> to vector<2x128xf32>
    %421 = arith.negf %420 : vector<2x128xf32>
    %422 = math.exp %421 : vector<2x128xf32>
    %cst_73 = arith.constant 1.000000e+00 : f32
    %423 = vector.broadcast %cst_73 : f32 to vector<2x128xf32>
    %424 = arith.addf %423, %422 : vector<2x128xf32>
    %425 = arith.divf %423, %424 : vector<2x128xf32>
    %426 = vector.extract_strided_slice %419 {offsets = [0, 128], sizes = [2, 128], strides = [1, 1]} : vector<2x512xf32> to vector<2x128xf32>
    %427 = arith.negf %426 : vector<2x128xf32>
    %428 = math.exp %427 : vector<2x128xf32>
    %cst_74 = arith.constant 1.000000e+00 : f32
    %429 = vector.broadcast %cst_74 : f32 to vector<2x128xf32>
    %430 = arith.addf %429, %428 : vector<2x128xf32>
    %431 = arith.divf %429, %430 : vector<2x128xf32>
    %432 = vector.extract_strided_slice %419 {offsets = [0, 256], sizes = [2, 128], strides = [1, 1]} : vector<2x512xf32> to vector<2x128xf32>
    %433 = math.tanh %432 : vector<2x128xf32>
    %434 = vector.extract_strided_slice %419 {offsets = [0, 384], sizes = [2, 128], strides = [1, 1]} : vector<2x512xf32> to vector<2x128xf32>
    %435 = arith.negf %434 : vector<2x128xf32>
    %436 = math.exp %435 : vector<2x128xf32>
    %cst_75 = arith.constant 1.000000e+00 : f32
    %437 = vector.broadcast %cst_75 : f32 to vector<2x128xf32>
    %438 = arith.addf %437, %436 : vector<2x128xf32>
    %439 = arith.divf %437, %438 : vector<2x128xf32>
    %440 = arith.mulf %431, %385 : vector<2x128xf32>
    %441 = arith.mulf %425, %433 : vector<2x128xf32>
    %442 = arith.addf %440, %441 : vector<2x128xf32>
    %443 = math.tanh %442 : vector<2x128xf32>
    %444 = arith.mulf %439, %443 : vector<2x128xf32>
    %445 = tpu.concatenate %444, %415 in 1 : vector<2x128xf32>, vector<2x128xf32> -> vector<2x256xf32>
    %cst_76 = arith.constant dense<0.000000e+00> : vector<2x512xf32>
    %446 = tpu.matmul %445, %1, %cst_76 {dimension_numbers = #tpu.dot_dimension_numbers<[1], [0], [0], [1], [0, 0, 1, 1], [], []>} : vector<2x256xf32>, vector<256x512xf32>, vector<2x512xf32> -> vector<2x512xf32>
    %447 = arith.addf %446, %4 : vector<2x512xf32>
    %448 = vector.extract_strided_slice %447 {offsets = [0, 0], sizes = [2, 128], strides = [1, 1]} : vector<2x512xf32> to vector<2x128xf32>
    %449 = arith.negf %448 : vector<2x128xf32>
    %450 = math.exp %449 : vector<2x128xf32>
    %cst_77 = arith.constant 1.000000e+00 : f32
    %451 = vector.broadcast %cst_77 : f32 to vector<2x128xf32>
    %452 = arith.addf %451, %450 : vector<2x128xf32>
    %453 = arith.divf %451, %452 : vector<2x128xf32>
    %454 = vector.extract_strided_slice %447 {offsets = [0, 128], sizes = [2, 128], strides = [1, 1]} : vector<2x512xf32> to vector<2x128xf32>
    %455 = arith.negf %454 : vector<2x128xf32>
    %456 = math.exp %455 : vector<2x128xf32>
    %cst_78 = arith.constant 1.000000e+00 : f32
    %457 = vector.broadcast %cst_78 : f32 to vector<2x128xf32>
    %458 = arith.addf %457, %456 : vector<2x128xf32>
    %459 = arith.divf %457, %458 : vector<2x128xf32>
    %460 = vector.extract_strided_slice %447 {offsets = [0, 256], sizes = [2, 128], strides = [1, 1]} : vector<2x512xf32> to vector<2x128xf32>
    %461 = math.tanh %460 : vector<2x128xf32>
    %462 = vector.extract_strided_slice %447 {offsets = [0, 384], sizes = [2, 128], strides = [1, 1]} : vector<2x512xf32> to vector<2x128xf32>
    %463 = arith.negf %462 : vector<2x128xf32>
    %464 = math.exp %463 : vector<2x128xf32>
    %cst_79 = arith.constant 1.000000e+00 : f32
    %465 = vector.broadcast %cst_79 : f32 to vector<2x128xf32>
    %466 = arith.addf %465, %464 : vector<2x128xf32>
    %467 = arith.divf %465, %466 : vector<2x128xf32>
    %468 = arith.mulf %459, %413 : vector<2x128xf32>
    %469 = arith.mulf %453, %461 : vector<2x128xf32>
    %470 = arith.addf %468, %469 : vector<2x128xf32>
    %471 = math.tanh %470 : vector<2x128xf32>
    %472 = arith.mulf %467, %471 : vector<2x128xf32>
    %c0_80 = arith.constant 0 : index
    %c0_81 = arith.constant 0 : index
    %473 = vector.load %arg6[%c0_80, %c0_81] : memref<128x29xf32, #tpu.memory_space<vmem>>, vector<128x29xf32>
    %cst_82 = arith.constant dense<0.000000e+00> : vector<2x29xf32>
    %474 = tpu.matmul %472, %473, %cst_82 {dimension_numbers = #tpu.dot_dimension_numbers<[1], [0], [0], [1], [0, 0, 1, 1], [], []>} : vector<2x128xf32>, vector<128x29xf32>, vector<2x29xf32> -> vector<2x29xf32>
    %c0_83 = arith.constant 0 : index
    %c0_84 = arith.constant 0 : index
    %475 = vector.load %arg7[%c0_83, %c0_84] : memref<1x29xf32, #tpu.memory_space<vmem>>, vector<1x29xf32>
    %476 = vector.broadcast %475 : vector<1x29xf32> to vector<2x29xf32>
    %477 = arith.addf %474, %476 : vector<2x29xf32>
    %c0_85 = arith.constant 0 : index
    %c0_86 = arith.constant 0 : index
    %478 = vector.load %arg8[%c0_85, %c0_86] : memref<2x29xf32, #tpu.memory_space<vmem>>, vector<2x29xf32>
    tpu.vector_store %arg8[%c0_85, %c0_86], %477 {strides = array<i32>} : memref<2x29xf32, #tpu.memory_space<vmem>>, vector<2x29xf32>,
    return
  }
}

</mosaic_0001>

<bundles_post_ra>
// kernel: tpu_custom_call.1
= control target key start
LH: loop header
LB: loop body
LE: loop exit
PB: predicated region body
PF: predicated region fallthrough
CT: control target
= control target key end

     0   :  { %13 = vsyncpa [#allocation3], 0  ;;  %s9903_s0 = inlined_call_operand.vmem [shape: f32[2,8,29], index: 0, kind: input, shape index: {}]   ;;  %s9904_s1 = inlined_call_operand.vmem [shape: f32[29,512], index: 1, kind: input, shape index: {}]   ;;  %s9905_s2 = inlined_call_operand.hbm [shape: f32[128,512], index: 2, kind: input, shape index: {}]   ;;  %s9906_s3 = inlined_call_operand.vmem [shape: f32[1,512], index: 3, kind: input, shape index: {}]   ;;  %s9907_s4 = inlined_call_operand.hbm [shape: f32[256,512], index: 4, kind: input, shape index: {}]   ;;  %s9908_s5 = inlined_call_operand.vmem [shape: f32[1,512], index: 5, kind: input, shape index: {}]   ;;  %s9909_s6 = inlined_call_operand.vmem [shape: f32[128,29], index: 6, kind: input, shape index: {}]   ;;  %s9910_s7 = inlined_call_operand.vmem [shape: f32[1,29], index: 7, kind: input, shape index: {}]   ;;  %s9911_s8 = inlined_call_operand.hbm [shape: f32[2,29], index: 8, kind: output, shape index: {}]  }
   0x1   :  { %14 = vsyncpa [#allocation6], 0 }
   0x2   :  { %15 = vsyncpa [#allocation4], 0  ;;  %s24_s29 = sshll.u32 %s9905_s2, 4  ;;  %s5424_s30 = smov [#allocation2]   ;;  %s25_s29 = int_to_ptr.hbm [resolvable:$true] %s24_s29 }
   0x3   :  { %s26_s9 = sshll.u32 %s5424_s30, 4  ;;  %s39_s12 = sshll.u32 %s9907_s4, 4  ;;  %s27_s9 = int_to_ptr.vmem [resolvable:$true] %s26_s9  ;;  %s40_s12 = int_to_ptr.hbm [resolvable:$true] %s39_s12 }
   0x4   :  { %s5425_s13 = smov 512   ;;  %s5426_s14 = smov 32  }
   0x5   :  { %32 = dma.hbm_to_vmem [thread:$0]  %s25_s29, 8192, %s27_s9, [#allocation3], %s5425_s13, %s5425_s13, %s5426_s14  }
   0x6   :  { %s5427_s15 = smov [#allocation5]  }
   0x7   :  { %s41_s16 = sshll.u32 %s5427_s15, 4  ;;  %s42_s16 = int_to_ptr.vmem [resolvable:$true] %s41_s16 }
   0x8   :  { %47 = dma.hbm_to_vmem [thread:$0]  %s40_s12, 16384, %s42_s16, [#allocation6], %s5425_s13, %s5425_s13, %s5426_s14  }
   0x9   :  { %5418 = dma.done.wait [#allocation3], 8192  }
   0xa   :  { %5419 = vsyncadd [#allocation3], 4294959104 }
   0xb   :  { %5420 = dma.done.wait [#allocation6], 16384  }
   0xc   :  { %5421 = vsyncadd [#allocation6], 4294950912  ;;  %vm299_vm0 = vcmask 1044480   ;;  %v278_v0 = vld [vmem:[%s9904_s1 + $0x60] sm:$0x1f]  ;;  %v277_v4 = vld [vmem:[%s9904_s1 + $0x58] sm:$0xff] }
   0xd   :  { %v281_v1 = vld [vmem:[%s9904_s1 + $0x78] sm:$0x1f]  ;;  %v122_v2 = vld [vmem:[#allocation2 + $0x1e0] sm:$0xff]  ;;  %4262 = vmatpush.msk.msra.mxu1 %vm299_vm0, %v278_v0  ;;  %v280_v11 = vld [vmem:[%s9904_s1 + $0x70] sm:$0x1f]  ;;  %vm292_vm1 = vcmask 236544  }
   0xe   :  { %4271 = vmatpush.msk.msra.mxu3 %vm299_vm0, %v281_v1  ;;  %v274_v3 = vld [vmem:[%s9904_s1 + $0x40] sm:$0xff]  ;;  %404 = vmatpush.msra.mxu0 %v122_v2  ;;  %v273_v7 = vld [vmem:[%s9904_s1 + $0x38] sm:$0xff]  ;;  %v279_v13 = vld [vmem:[%s9904_s1 + $0x68] sm:$0x1f]  ;;  %v9912_v2 = vmov 0.0   ;;  %s5429_s10 = smov [#allocation7]  }
   0xf   :  { %v118_v5 = vld [vmem:[#allocation2 + $0x1c0] sm:$0xff]  ;;  %325 = vmatpush.msra.mxu1 %v274_v3  ;;  %v269_v10 = vld [vmem:[%s9904_s1 + $0x18] sm:$0xff]  ;;  %4268 = vmatpush.msk.msra.mxu2 %vm299_vm0, %v280_v11  ;;  %v276_v15 = vld [vmem:[%s9904_s1 + $0x50] sm:$0xff]  ;;  %s4249_s11 = sshll.u32 %s5429_s10, 4  ;;  %s4251_s14 = sshll.u32 %s9911_s8, 4  ;;  %s4250_s11 = int_to_ptr.vmem [resolvable:$true] %s4249_s11  ;;  %s4252_s14 = int_to_ptr.hbm [resolvable:$true] %s4251_s14 }
  0x10   :  { %v270_v6 = vld [vmem:[%s9904_s1 + $0x20] sm:$0xff]  ;;  %394 = vmatpush.msra.mxu3 %v277_v4  ;;  %405 = vmatpush.msra.mxu0 %v118_v5  ;;  %v5513_v14 = vld [vmem:[#allocation2 + $0x1f8] sm:$0xff]  ;;  %v275_v17 = vld [vmem:[%s9904_s1 + $0x48] sm:$0xff] }
  0x11   :  { %v114_v8 = vld [vmem:[#allocation2 + $0x1a0] sm:$0xff]  ;;  %326 = vmatpush.msra.mxu1 %v270_v6  ;;  %v5523_v18 = vld [vmem:[#allocation2 + $0x1d8] sm:$0xff]  ;;  %v272_v19 = vld [vmem:[%s9904_s1 + $0x30] sm:$0xff]  ;;  %371 = vmatpush.msra.mxu2 %v276_v15 }
  0x12   :  { %v266_v9 = vld [vmem:[%s9904_s1] sm:$0xff]  ;;  %395 = vmatpush.msra.mxu3 %v273_v7  ;;  %406 = vmatpush.msra.mxu0 %v114_v8  ;;  %v271_v21 = vld [vmem:[%s9904_s1 + $0x28] sm:$0xff]  ;;  %v5532_v22 = vld [vmem:[#allocation2 + $0x1b8] sm:$0xff] }
  0x13   :  { %v110_v12 = vld [vmem:[#allocation2 + $0x180] sm:$0xff]  ;;  %327 = vmatpush.msra.mxu1 %v266_v9  ;;  %372 = vmatpush.msra.mxu2 %v272_v19  ;;  %v267_v25 = vld [vmem:[%s9904_s1 + $0x8] sm:$0xff]  ;;  %v5543_v26 = vld [vmem:[#allocation2 + $0x198] sm:$0xff] }
  0x14   :  { %396 = vmatpush.msra.mxu3 %v269_v10  ;;  %v106_v16 = vld [vmem:[#allocation2 + $0x160] sm:$0xff]  ;;  %407 = vmatpush.msra.mxu0 %v110_v12  ;;  %v268_v27 = vld [vmem:[%s9904_s1 + $0x10] sm:$0xff]  ;;  %v5551_v29 = vld [vmem:[#allocation2 + $0x1e8] sm:$0xff] }
  0x15   :  { %4265 = vmatpush.msk.msrb.mxu1 %vm299_vm0, %v279_v13  ;;  %v102_v20 = vld [vmem:[#allocation2 + $0x140] sm:$0xff]  ;;  %v124_v30 = vld [vmem:[#allocation2 + $0x1f0] sm:$0xff]  ;;  %v5553_v31 = vld [vmem:[#allocation2 + $0x178] sm:$0xff]  ;;  %373 = vmatpush.msra.mxu2 %v268_v27 }
  0x16   :  { %464 = vmatpush.msrb.mxu3 %v5513_v14  ;;  %408 = vmatpush.msra.mxu0 %v106_v16  ;;  %v5537_v23 = vld [vmem:[%s9903_s0] sm:$0xff]  ;;  %v5556_v33 = vld [vmem:[#allocation2 + $0x1c8] sm:$0xff]  ;;  %v120_v34 = vld [vmem:[#allocation2 + $0x1d0] sm:$0xff] }
  0x17   :  { %348 = vmatpush.msrb.mxu1 %v275_v17  ;;  %v98_v24 = vld [vmem:[#allocation2 + $0x120] sm:$0xff]  ;;  %v5559_v35 = vld [vmem:[#allocation2 + $0x158] sm:$0xff]  ;;  %444 = vmatpush.msrb.mxu2 %v124_v30  ;;  %v5562_v37 = vld [vmem:[#allocation2 + $0x1a8] sm:$0xff] }
  0x18   :  { %465 = vmatpush.msrb.mxu3 %v5523_v18  ;;  %409 = vmatpush.msra.mxu0 %v102_v20  ;;  %v94_v28 = vld [vmem:[#allocation2 + $0x100] sm:$0xff]  ;;  %v116_v38 = vld [vmem:[#allocation2 + $0x1b0] sm:$0xff]  ;;  %v5565_v39 = vld [vmem:[#allocation2 + $0x138] sm:$0xff] }
  0x19   :  { %349 = vmatpush.msrb.mxu1 %v271_v21  ;;  %v90_v32 = vld [vmem:[#allocation2 + $0xe0] sm:$0xff]  ;;  %445 = vmatpush.msrb.mxu2 %v120_v34  ;;  %v5568_v41 = vld [vmem:[#allocation2 + $0x188] sm:$0xff]  ;;  %v112_v43 = vld [vmem:[#allocation2 + $0x190] sm:$0xff] }
  0x1a   :  { %466 = vmatpush.msrb.mxu3 %v5532_v22  ;;  %4263 = vmatmul.msk.f32.vlgmr.msra.gmra.mxu1 %vm292_vm1, %v5537_v23  ;;  %v86_v36 = vld [vmem:[#allocation2 + $0xc0] sm:$0xff]  ;;  %v5574_v42 = vld [vmem:[%s9903_s0 + $0x8] sm:$0xff]  ;;  %v5577_v44 = vld [vmem:[#allocation2 + $0x118] sm:$0xff] }
  0x1b   :  { %410 = vmatpush.msra.mxu0 %v98_v24  ;;  %350 = vmatpush.msrb.mxu1 %v267_v25  ;;  %v82_v40 = vld [vmem:[#allocation2 + $0xa0] sm:$0xff]  ;;  %v5580_v46 = vld [vmem:[#allocation2 + $0x168] sm:$0xff]  ;;  %v108_v47 = vld [vmem:[#allocation2 + $0x170] sm:$0xff] }
  0x1c   :  { %467 = vmatpush.msrb.mxu3 %v5543_v26  ;;  %446 = vmatpush.msrb.mxu2 %v116_v38  ;;  %v78_v45 = vld [vmem:[#allocation2 + $0x80] sm:$0xff]  ;;  %v5584_v48 = vld [vmem:[#allocation2 + $0xf8] sm:$0xff]  ;;  %v5587_v50 = vld [vmem:[#allocation2 + $0x148] sm:$0xff] }
  0x1d   :  { %411 = vmatpush.msra.mxu0 %v94_v28  ;;  %424 = vmatpush.msra.mxu1 %v5551_v29  ;;  %v74_v49 = vld [vmem:[#allocation2 + $0x60] sm:$0xff]  ;;  %v104_v51 = vld [vmem:[#allocation2 + $0x150] sm:$0xff]  ;;  %v5592_v52 = vld [vmem:[#allocation2 + $0xd8] sm:$0xff] }
  0x1e   :  { %468 = vmatpush.msrb.mxu3 %v5553_v31  ;;  %447 = vmatpush.msrb.mxu2 %v112_v43  ;;  %v70_v53 = vld [vmem:[#allocation2 + $0x40] sm:$0xff]  ;;  %v5595_v54 = vld [vmem:[#allocation2 + $0x128] sm:$0xff]  ;;  %v100_v55 = vld [vmem:[#allocation2 + $0x130] sm:$0xff] }
  0x1f   :  { %412 = vmatpush.msra.mxu0 %v90_v32  ;;  %425 = vmatpush.msra.mxu1 %v5556_v33  ;;  %v5598_v56 = vld [vmem:[#allocation2 + $0xb8] sm:$0xff]  ;;  %v66_v57 = vld [vmem:[#allocation2 + $0x20] sm:$0xff]  ;;  %v5601_v58 = vld [vmem:[#allocation2 + $0x108] sm:$0xff] }
  0x20   :  { %469 = vmatpush.msrb.mxu3 %v5559_v35  ;;  %448 = vmatpush.msrb.mxu2 %v108_v47  ;;  %v96_v59 = vld [vmem:[#allocation2 + $0x110] sm:$0xff]  ;;  %v5605_v60 = vld [vmem:[#allocation2 + $0x98] sm:$0xff]  ;;  %v62_v61 = vld [vmem:[#allocation2] sm:$0xff] }
  0x21   :  { %413 = vmatpush.msra.mxu0 %v86_v36  ;;  %426 = vmatpush.msra.mxu1 %v5562_v37  ;;  %v5610_v62 = vld [vmem:[#allocation2 + $0xe8] sm:$0xff]  ;;  %v92_v63 = vld [vmem:[#allocation2 + $0xf0] sm:$0xff]  ;;  %v5615_v0 = vld [vmem:[#allocation2 + $0x78] sm:$0xff] }
  0x22   :  { %470 = vmatpush.msrb.mxu3 %v5565_v39  ;;  %4264 = vmatmul.msk.f32.gmra.mxu1 %vm292_vm1, %v5574_v42  ;;  %v5619_v1 = vld [vmem:[#allocation2 + $0xc8] sm:$0xff]  ;;  %v88_v3 = vld [vmem:[#allocation2 + $0xd0] sm:$0xff]  ;;  %v5623_v4 = vld [vmem:[#allocation2 + $0x58] sm:$0xff] }
  0x23   :  { %414 = vmatpush.msra.mxu0 %v82_v40  ;;  %427 = vmatpush.msra.mxu1 %v5568_v41  ;;  %v5626_v5 = vld [vmem:[#allocation2 + $0xa8] sm:$0xff]  ;;  %v84_v6 = vld [vmem:[#allocation2 + $0xb0] sm:$0xff]  ;;  %v5629_v7 = vld [vmem:[#allocation2 + $0x38] sm:$0xff] }
  0x24   :  { %471 = vmatpush.msrb.mxu3 %v5577_v44  ;;  %449 = vmatpush.msrb.mxu2 %v104_v51  ;;  %v5632_v8 = vld [vmem:[#allocation2 + $0x88] sm:$0xff]  ;;  %v80_v9 = vld [vmem:[#allocation2 + $0x90] sm:$0xff]  ;;  %v5636_v10 = vld [vmem:[#allocation2 + $0x18] sm:$0xff] }
  0x25   :  { %415 = vmatpush.msra.mxu0 %v78_v45  ;;  %4272 = vmatmul.msk.f32.vlgmr.msra.gmra.mxu3 %vm292_vm1, %v5537_v23  ;;  %v5638_v11 = vld [vmem:[#allocation2 + $0x68] sm:$0xff]  ;;  %v76_v12 = vld [vmem:[#allocation2 + $0x70] sm:$0xff]  ;;  %v5664_v25 = vld [vmem:[#allocation5 + $0x3e0] sm:$0xff] }
  0x26   :  { %428 = vmatpush.msra.mxu1 %v5580_v46  ;;  %472 = vmatpush.msrb.mxu3 %v5584_v48  ;;  %v5645_v13 = vld [vmem:[#allocation2 + $0x48] sm:$0xff]  ;;  %v72_v16 = vld [vmem:[#allocation2 + $0x50] sm:$0xff]  ;;  %v5671_v28 = vld [vmem:[#allocation5 + $0x3c0] sm:$0xff] }
  0x27   :  { %416 = vmatpush.msra.mxu0 %v74_v49  ;;  %450 = vmatpush.msrb.mxu2 %v100_v55  ;;  %v5647_v15 = vld [vmem:[#allocation5 + $0x3e8] sm:$0xff]  ;;  %v68_v20 = vld [vmem:[#allocation2 + $0x30] sm:$0xff]  ;;  %v5677_v32 = vld [vmem:[#allocation5 + $0x3a0] sm:$0xff] }
  0x28   :  { %429 = vmatpush.msra.mxu1 %v5587_v50  ;;  %473 = vmatpush.msrb.mxu3 %v5592_v52  ;;  %v5652_v17 = vld [vmem:[#allocation2 + $0x28] sm:$0xff]  ;;  %v64_v24 = vld [vmem:[#allocation2 + $0x10] sm:$0xff]  ;;  %v5683_v36 = vld [vmem:[#allocation5 + $0x380] sm:$0xff] }
  0x29   :  { %417 = vmatpush.msra.mxu0 %v70_v53  ;;  %451 = vmatpush.msrb.mxu2 %v96_v59  ;;  %v5654_v19 = vld [vmem:[#allocation5 + $0x3c8] sm:$0xff]  ;;  %v5687_v38 = vld [vmem:[#allocation5 + $0x360] sm:$0xff] }
  0x2a   :  { %430 = vmatpush.msra.mxu1 %v5595_v54  ;;  %474 = vmatpush.msrb.mxu3 %v5598_v56  ;;  %v5658_v21 = vld [vmem:[#allocation2 + $0x8] sm:$0xff]  ;;  %v5691_v40 = vld [vmem:[#allocation5 + $0x340] sm:$0xff] }
  0x2b   :  { %418 = vmatpush.msra.mxu0 %v66_v57  ;;  %4266 = vmatmul.msk.f32.vlgmr.msrb.gmra.mxu1 %vm292_vm1, %v5537_v23  ;;  %v5668_v27 = vld [vmem:[#allocation5 + $0x388] sm:$0xff]  ;;  %v5699_v45 = vld [vmem:[#allocation5 + $0x300] sm:$0xff] }
  0x2c   :  { %431 = vmatpush.msra.mxu1 %v5601_v58  ;;  %475 = vmatpush.msrb.mxu3 %v5605_v60  ;;  %v5675_v30 = vld [vmem:[#allocation5 + $0x368] sm:$0xff]  ;;  %10447 = vst [vmem:[#allocation11_spill] sm:$0xff] %v5699_v45  ;;  %v5705_v49 = vld [vmem:[#allocation5 + $0x2e0] sm:$0xff] }
  0x2d   :  { %4269 = vmatmul.msk.f32.vlgmr.msra.gmra.mxu2 %vm292_vm1, %v5537_v23  ;;  %4273 = vmatmul.msk.f32.gmra.mxu3 %vm292_vm1, %v5574_v42  ;;  %v5660_v23 = vld [vmem:[#allocation5 + $0x3a8] sm:$0xff]  ;;  %10449 = vst [vmem:[#allocation13_spill] sm:$0xff] %v5705_v49  ;;  %v5711_v53 = vld [vmem:[#allocation5 + $0x2c0] sm:$0xff] }
  0x2e   :  { %419 = vmatpush.msra.mxu0 %v62_v61  ;;  %432 = vmatpush.msra.mxu1 %v5610_v62  ;;  %v5681_v34 = vld [vmem:[#allocation5 + $0x348] sm:$0xff]  ;;  %10451 = vst [vmem:[#allocation15_spill] sm:$0xff] %v5711_v53  ;;  %v5719_v57 = vld [vmem:[#allocation5 + $0x2a0] sm:$0xff] }
  0x2f   :  { %420 = vmatmul.f32.vlgmr.msra.gmra.mxu0 %v9912_v2  ;;  %452 = vmatpush.msrb.mxu2 %v92_v63  ;;  %v5697_v43 = vld [vmem:[#allocation5 + $0x328] sm:$0xff]  ;;  %10453 = vst [vmem:[#allocation17_spill] sm:$0xff] %v5719_v57  ;;  %v5723_v61 = vld [vmem:[#allocation5 + $0x280] sm:$0xff] }
  0x30   :  { %476 = vmatpush.msrb.mxu3 %v5615_v0  ;;  %433 = vmatpush.msra.mxu1 %v5619_v1  ;;  %v5703_v47 = vld [vmem:[#allocation5 + $0x308] sm:$0xff]  ;;  %10455 = vst [vmem:[#allocation19_spill] sm:$0xff] %v5723_v61 }
  0x31   :  { %453 = vmatpush.msrb.mxu2 %v88_v3  ;;  %10448 = vst [vmem:[#allocation12_spill] sm:$0xff] %v5703_v47  ;;  %v5707_v51 = vld [vmem:[#allocation5 + $0x2e8] sm:$0xff]  ;;  %v5729_v3 = vld [vmem:[#allocation5 + $0x260] sm:$0xff] }
  0x32   :  { %477 = vmatpush.msrb.mxu3 %v5623_v4  ;;  %434 = vmatpush.msra.mxu1 %v5626_v5  ;;  %10450 = vst [vmem:[#allocation14_spill] sm:$0xff] %v5707_v51  ;;  %v5713_v55 = vld [vmem:[#allocation5 + $0x2c8] sm:$0xff] }
  0x33   :  { %454 = vmatpush.msrb.mxu2 %v84_v6  ;;  %4267 = vmatmul.msk.f32.gmra.mxu1 %vm292_vm1, %v5574_v42  ;;  %10452 = vst [vmem:[#allocation16_spill] sm:$0xff] %v5713_v55  ;;  %v5721_v59 = vld [vmem:[#allocation5 + $0x2a8] sm:$0xff] }
  0x34   :  { %478 = vmatpush.msrb.mxu3 %v5629_v7  ;;  %435 = vmatpush.msra.mxu1 %v5632_v8  ;;  %10454 = vst [vmem:[#allocation18_spill] sm:$0xff] %v5721_v59  ;;  %v5727_v63 = vld [vmem:[#allocation5 + $0x288] sm:$0xff] }
  0x35   :  { %4270 = vmatmul.msk.f32.gmra.mxu2 %vm292_vm1, %v5574_v42  ;;  %v5695_v42 = vld [vmem:[#allocation5 + $0x320] sm:$0xff]  ;;  %10456 = vst [vmem:[#allocation20_spill] sm:$0xff] %v5727_v63  ;;  %v5731_v6 = vld [vmem:[#allocation5 + $0x268] sm:$0xff] }
  0x36   :  { %455 = vmatpush.msrb.mxu2 %v80_v9  ;;  %479 = vmatpush.msrb.mxu3 %v5636_v10  ;;  %10457 = vst [vmem:[#allocation21_spill] sm:$0xff] %v5729_v3  ;;  %v5735_v9 = vld [vmem:[#allocation5 + $0x240] sm:$0xff] }
  0x37   :  { %436 = vmatpush.msra.mxu1 %v5638_v11  ;;  %480 = vmatmul.f32.vlgmr.msrb.gmra.mxu3 %v9912_v2  ;;  %10458 = vst [vmem:[#allocation22_spill] sm:$0xff] %v5731_v6 }
  0x38   :  { %456 = vmatpush.msrb.mxu2 %v76_v12  ;;  %700 = vmatpush.msra.mxu3 %v5647_v15  ;;  %10459 = vst [vmem:[#allocation23_spill] sm:$0xff] %v5735_v9  ;;  %v5737_v12 = vld [vmem:[#allocation5 + $0x248] sm:$0xff] }
  0x39   :  { %437 = vmatpush.msra.mxu1 %v5645_v13  ;;  %10460 = vst [vmem:[#allocation24_spill] sm:$0xff] %v5737_v12 }
  0x3a   :  { %457 = vmatpush.msrb.mxu2 %v72_v16  ;;  %701 = vmatpush.msra.mxu3 %v5654_v19  ;;  %v5743_v16 = vld [vmem:[#allocation5 + $0x220] sm:$0xff] }
  0x3b   :  { %438 = vmatpush.msra.mxu1 %v5652_v17  ;;  %10461 = vst [vmem:[#allocation25_spill] sm:$0xff] %v5743_v16 }
  0x3c   :  { %458 = vmatpush.msrb.mxu2 %v68_v20  ;;  %702 = vmatpush.msra.mxu3 %v5660_v23  ;;  %v5745_v20 = vld [vmem:[#allocation5 + $0x228] sm:$0xff] }
  0x3d   :  { %439 = vmatpush.msra.mxu1 %v5658_v21  ;;  %10462 = vst [vmem:[#allocation26_spill] sm:$0xff] %v5745_v20 }
  0x3e   :  { %440 = vmatmul.f32.vlgmr.msra.gmra.mxu1 %v9912_v2  ;;  %459 = vmatpush.msrb.mxu2 %v64_v24  ;;  %v5749_v24 = vld [vmem:[#allocation5 + $0x200] sm:$0xff] }
  0x3f   :  { %460 = vmatmul.f32.vlgmr.msrb.gmra.mxu2 %v9912_v2  ;;  %660 = vmatpush.msrb.mxu1 %v5664_v25  ;;  %10463 = vst [vmem:[#allocation27_spill] sm:$0xff] %v5749_v24  ;;  %v5751_v2 = vld [vmem:[#allocation5 + $0x208] sm:$0xff] }
  0x40   :  { %703 = vmatpush.msra.mxu3 %v5668_v27  ;;  %10464 = vst [vmem:[#allocation28_spill] sm:$0xff] %v5751_v2 }
  0x41   :  { %661 = vmatpush.msrb.mxu1 %v5671_v28 }
  0x42   :  { %704 = vmatpush.msra.mxu3 %v5675_v30 }
  0x43   :  { %662 = vmatpush.msrb.mxu1 %v5677_v32 }
  0x44   :  { %705 = vmatpush.msra.mxu3 %v5681_v34 }
  0x45   :  { %663 = vmatpush.msrb.mxu1 %v5683_v36 }
  0x46   :  { %706 = vmatpush.msra.mxu3 %v5697_v43 }
  0x47   :  { %664 = vmatpush.msrb.mxu1 %v5687_v38 }
  0x48   :  { %707 = vmatpush.msra.mxu3 %v5703_v47  ;;  %v5933_v47 = vld [vmem:[#allocation5 + $0x48] sm:$0xff] }
  0x49   :  { %665 = vmatpush.msrb.mxu1 %v5691_v40  ;;  %10519 = vst [vmem:[#allocation82_spill] sm:$0xff] %v5933_v47 }
  0x4a   :  { %708 = vmatpush.msra.mxu3 %v5707_v51  ;;  %v5920_v51 = vld [vmem:[#allocation5 + $0x270] sm:$0xff] }
  0x4b   :  { %666 = vmatpush.msrb.mxu1 %v5695_v42 }
  0x4c   :  { %709 = vmatpush.msra.mxu3 %v5713_v55 }
  0x4d   :  { %667 = vmatpush.msrb.mxu1 %v5699_v45  ;;  %v5935_v45 = vld [vmem:[#allocation5 + $0x250] sm:$0xff] }
  0x4e   :  { %710 = vmatpush.msra.mxu3 %v5721_v59  ;;  %v5875_v59 = vld [vmem:[#allocation5 + $0x2d8] sm:$0xff] }
  0x4f   :  { %668 = vmatpush.msrb.mxu1 %v5705_v49  ;;  %10505 = vst [vmem:[#allocation68_spill] sm:$0xff] %v5875_v59 }
  0x50   :  { %711 = vmatpush.msra.mxu3 %v5727_v63  ;;  %v5825_v63 = vld [vmem:[#allocation5 + $0x358] sm:$0xff] }
  0x51   :  { %669 = vmatpush.msrb.mxu1 %v5711_v53  ;;  %10488 = vst [vmem:[#allocation52_spill] sm:$0xff] %v5825_v63  ;;  %v5905_v53 = vld [vmem:[#allocation5 + $0x290] sm:$0xff] }
  0x52   :  { %712 = vmatpush.msra.mxu3 %v5731_v6  ;;  %v5755_v6 = vld [vmem:[#allocation5 + $0x1e0] sm:$0xff]  ;;  %10512 = vst [vmem:[#allocation75_spill] sm:$0xff] %v5905_v53 }
  0x53   :  { %670 = vmatpush.msrb.mxu1 %v5719_v57  ;;  %10465 = vst [vmem:[#allocation29_spill] sm:$0xff] %v5755_v6  ;;  %640 = vmatpush.msrb.mxu0 %v5755_v6  ;;  %v5781_v6 = vld [vmem:[#allocation5 + $0x1a8] sm:$0xff]  ;;  %v5895_v57 = vld [vmem:[#allocation5 + $0x2b8] sm:$0xff] }
  0x54   :  { %713 = vmatpush.msra.mxu3 %v5737_v12  ;;  %v5759_v12 = vld [vmem:[#allocation5 + $0x3f0] sm:$0xff]  ;;  %10474 = vst [vmem:[#allocation38_spill] sm:$0xff] %v5781_v6 }
  0x55   :  { %671 = vmatpush.msrb.mxu1 %v5723_v61  ;;  %10467 = vst [vmem:[#allocation31_spill] sm:$0xff] %v5759_v12  ;;  %v5851_v61 = vld [vmem:[#allocation5 + $0x318] sm:$0xff] }
  0x56   :  { %714 = vmatpush.msra.mxu3 %v5745_v20  ;;  %v5767_v20 = vld [vmem:[#allocation5 + $0x1c0] sm:$0xff]  ;;  %10497 = vst [vmem:[#allocation60_spill] sm:$0xff] %v5851_v61 }
  0x57   :  { %672 = vmatpush.msrb.mxu1 %v5729_v3  ;;  %10469 = vst [vmem:[#allocation33_spill] sm:$0xff] %v5767_v20  ;;  %641 = vmatpush.msrb.mxu0 %v5767_v20  ;;  %v5775_v3 = vld [vmem:[#allocation5 + $0x3d8] sm:$0xff]  ;;  %v5793_v20 = vld [vmem:[#allocation5 + $0x188] sm:$0xff] }
  0x58   :  { %715 = vmatpush.msra.mxu3 %v5751_v2  ;;  %v5771_v2 = vld [vmem:[#allocation5 + $0x3d0] sm:$0xff]  ;;  %10472 = vst [vmem:[#allocation36_spill] sm:$0xff] %v5775_v3 }
  0x59   :  { %673 = vmatpush.msrb.mxu1 %v5735_v9  ;;  %v5757_v9 = vld [vmem:[#allocation5 + $0x1e8] sm:$0xff]  ;;  %10471 = vst [vmem:[#allocation35_spill] sm:$0xff] %v5771_v2 }
  0x5a   :  { %10466 = vst [vmem:[#allocation30_spill] sm:$0xff] %v5757_v9  ;;  %680 = vmatpush.msra.mxu2 %v5757_v9  ;;  %v5779_v9 = vld [vmem:[#allocation5 + $0x1a0] sm:$0xff] }
  0x5b   :  { %674 = vmatpush.msrb.mxu1 %v5743_v16  ;;  %v5763_v16 = vld [vmem:[#allocation5 + $0x3f8] sm:$0xff]  ;;  %10473 = vst [vmem:[#allocation37_spill] sm:$0xff] %v5779_v9  ;;  %642 = vmatpush.msrb.mxu0 %v5779_v9 }
  0x5c   :  { %10468 = vst [vmem:[#allocation32_spill] sm:$0xff] %v5763_v16  ;;  %780 = vmatpush.msrb.mxu3 %v5763_v16  ;;  %v5783_v16 = vld [vmem:[#allocation5 + $0x3b0] sm:$0xff] }
  0x5d   :  { %675 = vmatpush.msrb.mxu1 %v5749_v24  ;;  %v5769_v24 = vld [vmem:[#allocation5 + $0x1c8] sm:$0xff]  ;;  %10475 = vst [vmem:[#allocation39_spill] sm:$0xff] %v5783_v16 }
  0x5e   :  { %10470 = vst [vmem:[#allocation34_spill] sm:$0xff] %v5769_v24  ;;  %681 = vmatpush.msra.mxu2 %v5769_v24  ;;  %781 = vmatpush.msrb.mxu3 %v5775_v3  ;;  %v5791_v24 = vld [vmem:[#allocation5 + $0x180] sm:$0xff]  ;;  %v5795_v3 = vld [vmem:[#allocation5 + $0x390] sm:$0xff] }
  0x5f   :  { %740 = vmatpush.msra.mxu1 %v5759_v12  ;;  %v5787_v12 = vld [vmem:[#allocation5 + $0x3b8] sm:$0xff]  ;;  %10477 = vst [vmem:[#allocation41_spill] sm:$0xff] %v5791_v24  ;;  %643 = vmatpush.msrb.mxu0 %v5791_v24 }
  0x60   :  { %682 = vmatpush.msra.mxu2 %v5781_v6  ;;  %10476 = vst [vmem:[#allocation40_spill] sm:$0xff] %v5787_v12  ;;  %782 = vmatpush.msrb.mxu3 %v5787_v12  ;;  %v5805_v6 = vld [vmem:[#allocation5 + $0x160] sm:$0xff]  ;;  %v5807_v12 = vld [vmem:[#allocation5 + $0x168] sm:$0xff]  ;;  %v5813_v24 = vld [vmem:[#allocation5 + $0x378] sm:$0xff] }
  0x61   :  { %741 = vmatpush.msra.mxu1 %v5771_v2  ;;  %10478 = vst [vmem:[#allocation42_spill] sm:$0xff] %v5793_v20  ;;  %v5799_v2 = vld [vmem:[#allocation5 + $0x398] sm:$0xff]  ;;  %644 = vmatpush.msrb.mxu0 %v5805_v6 }
  0x62   :  { %10479 = vst [vmem:[#allocation43_spill] sm:$0xff] %v5795_v3  ;;  %683 = vmatpush.msra.mxu2 %v5793_v20  ;;  %783 = vmatpush.msrb.mxu3 %v5799_v2  ;;  %v5817_v20 = vld [vmem:[#allocation5 + $0x140] sm:$0xff] }
  0x63   :  { %742 = vmatpush.msra.mxu1 %v5783_v16  ;;  %10480 = vst [vmem:[#allocation44_spill] sm:$0xff] %v5799_v2  ;;  %v5809_v16 = vld [vmem:[#allocation5 + $0x370] sm:$0xff]  ;;  %645 = vmatpush.msrb.mxu0 %v5817_v20 }
  0x64   :  { %10481 = vst [vmem:[#allocation45_spill] sm:$0xff] %v5805_v6  ;;  %684 = vmatpush.msra.mxu2 %v5807_v12  ;;  %784 = vmatpush.msrb.mxu3 %v5813_v24  ;;  %v5821_v2 = vld [vmem:[#allocation5 + $0x350] sm:$0xff]  ;;  %v5831_v6 = vld [vmem:[#allocation5 + $0x128] sm:$0xff] }
  0x65   :  { %743 = vmatpush.msra.mxu1 %v5795_v3  ;;  %10482 = vst [vmem:[#allocation46_spill] sm:$0xff] %v5807_v12  ;;  %v5819_v3 = vld [vmem:[#allocation5 + $0x148] sm:$0xff]  ;;  %v5829_v12 = vld [vmem:[#allocation5 + $0x120] sm:$0xff] }
  0x66   :  { %10483 = vst [vmem:[#allocation47_spill] sm:$0xff] %v5809_v16  ;;  %685 = vmatpush.msra.mxu2 %v5819_v3  ;;  %785 = vmatpush.msrb.mxu3 %v5825_v63  ;;  %v5845_v63 = vld [vmem:[#allocation5 + $0x108] sm:$0xff] }
  0x67   :  { %10484 = vst [vmem:[#allocation48_spill] sm:$0xff] %v5813_v24  ;;  %744 = vmatpush.msra.mxu1 %v5809_v16  ;;  %v5833_v24 = vld [vmem:[#allocation5 + $0x330] sm:$0xff]  ;;  %v10492_v16 = vmov 0.0   ;;  %646 = vmatpush.msrb.mxu0 %v5829_v12 }
  0x68   :  { %10485 = vst [vmem:[#allocation49_spill] sm:$0xff] %v5817_v20  ;;  %676 = vmatmul.f32.vlgmr.msrb.gmra.mxu1 %v10492_v16  ;;  %716 = vmatmul.f32.vlgmr.msra.gmra.mxu3 %v10492_v16  ;;  %v5843_v20 = vld [vmem:[#allocation5 + $0x100] sm:$0xff] }
  0x69   :  { %10486 = vst [vmem:[#allocation50_spill] sm:$0xff] %v5819_v3  ;;  %745 = vmatpush.msra.mxu1 %v5821_v2  ;;  %686 = vmatpush.msra.mxu2 %v5831_v6  ;;  %v5839_v3 = vld [vmem:[#allocation5 + $0x338] sm:$0xff] }
  0x6a   :  { %10487 = vst [vmem:[#allocation51_spill] sm:$0xff] %v5821_v2  ;;  %786 = vmatpush.msrb.mxu3 %v5839_v3  ;;  %v5847_v2 = vld [vmem:[#allocation5 + $0x310] sm:$0xff]  ;;  %647 = vmatpush.msrb.mxu0 %v5843_v20 }
  0x6b   :  { %10489 = vst [vmem:[#allocation53_spill] sm:$0xff] %v5829_v12  ;;  %746 = vmatpush.msra.mxu1 %v5833_v24  ;;  %687 = vmatpush.msra.mxu2 %v5845_v63 }
  0x6c   :  { %10490 = vst [vmem:[#allocation54_spill] sm:$0xff] %v5831_v6  ;;  %787 = vmatpush.msrb.mxu3 %v5851_v61  ;;  %v5855_v6 = vld [vmem:[#allocation5 + $0xe0] sm:$0xff]  ;;  %v5871_v61 = vld [vmem:[#allocation5 + $0x2d0] sm:$0xff] }
  0x6d   :  { %10491 = vst [vmem:[#allocation55_spill] sm:$0xff] %v5833_v24  ;;  %747 = vmatpush.msra.mxu1 %v5847_v2  ;;  %v5859_v24 = vld [vmem:[#allocation5 + $0x2f0] sm:$0xff]  ;;  %648 = vmatpush.msrb.mxu0 %v5855_v6 }
  0x6e   :  { %10493 = vst [vmem:[#allocation56_spill] sm:$0xff] %v5839_v3  ;;  %v5857_v3 = vld [vmem:[#allocation5 + $0xe8] sm:$0xff] }
  0x6f   :  { %10494 = vst [vmem:[#allocation57_spill] sm:$0xff] %v5843_v20  ;;  %688 = vmatpush.msra.mxu2 %v5857_v3  ;;  %v5863_v20 = vld [vmem:[#allocation5 + $0x2f8] sm:$0xff]  ;;  %748 = vmatpush.msra.mxu1 %v5859_v24 }
  0x70   :  { %10495 = vst [vmem:[#allocation58_spill] sm:$0xff] %v5845_v63  ;;  %788 = vmatpush.msrb.mxu3 %v5863_v20  ;;  %v5867_v63 = vld [vmem:[#allocation5 + $0xc0] sm:$0xff] }
  0x71   :  { %10496 = vst [vmem:[#allocation59_spill] sm:$0xff] %v5847_v2  ;;  %v5869_v2 = vld [vmem:[#allocation5 + $0xc8] sm:$0xff]  ;;  %649 = vmatpush.msrb.mxu0 %v5867_v63  ;;  %749 = vmatpush.msra.mxu1 %v5871_v61 }
  0x72   :  { %10498 = vst [vmem:[#allocation61_spill] sm:$0xff] %v5855_v6  ;;  %689 = vmatpush.msra.mxu2 %v5869_v2  ;;  %789 = vmatpush.msrb.mxu3 %v5875_v59  ;;  %v5901_v59 = vld [vmem:[#allocation5 + $0x80] sm:$0xff] }
  0x73   :  { %10499 = vst [vmem:[#allocation62_spill] sm:$0xff] %v5857_v3  ;;  %v5880_v3 = vld [vmem:[%s9906_s3] sm:$0xf] }
  0x74   :  { %10500 = vst [vmem:[#allocation63_spill] sm:$0xff] %v5859_v24  ;;  %v284_v6 = vperm.slane %v5880_v3, 0  ;;  %v5887_v24 = vld [vmem:[#allocation5 + $0xa8] sm:$0xff]  ;;  %790 = vmatpush.msrb.mxu3 %v5895_v57 }
  0x75   :  { %10501 = vst [vmem:[#allocation64_spill] sm:$0xff] %v5863_v20  ;;  %v5885_v20 = vld [vmem:[#allocation5 + $0xa0] sm:$0xff]  ;;  %690 = vmatpush.msra.mxu2 %v5887_v24 }
  0x76   :  { %10502 = vst [vmem:[#allocation65_spill] sm:$0xff] %v5867_v63  ;;  %v5889_v63 = vld [vmem:[#allocation5 + $0x2b0] sm:$0xff]  ;;  %650 = vmatpush.msrb.mxu0 %v5885_v20 }
  0x77   :  { %10503 = vst [vmem:[#allocation66_spill] sm:$0xff] %v5869_v2  ;;  %750 = vmatpush.msra.mxu1 %v5889_v63 }
  0x78   :  { %10504 = vst [vmem:[#allocation67_spill] sm:$0xff] %v5871_v61  ;;  %v5903_v61 = vld [vmem:[#allocation5 + $0x88] sm:$0xff]  ;;  %651 = vmatpush.msrb.mxu0 %v5901_v59 }
  0x79   :  { %10506 = vst [vmem:[#allocation69_spill] sm:$0xff] %v5885_v20  ;;  %691 = vmatpush.msra.mxu2 %v5903_v61  ;;  %v5909_v20 = vld [vmem:[#allocation5 + $0x298] sm:$0xff]  ;;  %751 = vmatpush.msra.mxu1 %v5905_v53 }
  0x7a   :  { %10507 = vst [vmem:[#allocation70_spill] sm:$0xff] %v5887_v24  ;;  %791 = vmatpush.msrb.mxu3 %v5909_v20 }
  0x7b   :  { %10508 = vst [vmem:[#allocation71_spill] sm:$0xff] %v5889_v63  ;;  %v5918_v63 = vld [vmem:[#allocation5 + $0x68] sm:$0xff]  ;;  %752 = vmatpush.msra.mxu1 %v5920_v51 }
  0x7c   :  { %10509 = vst [vmem:[#allocation72_spill] sm:$0xff] %v5895_v57  ;;  %v5916_v57 = vld [vmem:[#allocation5 + $0x60] sm:$0xff]  ;;  %692 = vmatpush.msra.mxu2 %v5918_v63 }
  0x7d   :  { %10510 = vst [vmem:[#allocation73_spill] sm:$0xff] %v5901_v59  ;;  %652 = vmatpush.msrb.mxu0 %v5916_v57  ;;  %753 = vmatpush.msra.mxu1 %v5935_v45 }
  0x7e   :  { %10511 = vst [vmem:[#allocation74_spill] sm:$0xff] %v5903_v61  ;;  %v5924_v61 = vld [vmem:[#allocation5 + $0x278] sm:$0xff]  ;;  %693 = vmatpush.msra.mxu2 %v5933_v47 }
  0x7f   :  { %10513 = vst [vmem:[#allocation76_spill] sm:$0xff] %v5909_v20  ;;  %792 = vmatpush.msrb.mxu3 %v5924_v61  ;;  %v5931_v20 = vld [vmem:[#allocation5 + $0x40] sm:$0xff]  ;;  %v5952_v47 = vld [vmem:[#allocation5 + $0x238] sm:$0xff] }
  0x80   :  { %10515 = vst [vmem:[#allocation78_spill] sm:$0xff] %v5916_v57  ;;  %653 = vmatpush.msrb.mxu0 %v5931_v20  ;;  %v5948_v57 = vld [vmem:[#allocation5 + $0x230] sm:$0xff] }
  0x81   :  { %10516 = vst [vmem:[#allocation79_spill] sm:$0xff] %v5918_v63  ;;  %v5939_v63 = vld [vmem:[#allocation5 + $0x258] sm:$0xff]  ;;  %754 = vmatpush.msra.mxu1 %v5948_v57 }
  0x82   :  { %10518 = vst [vmem:[#allocation81_spill] sm:$0xff] %v5931_v20  ;;  %793 = vmatpush.msrb.mxu3 %v5939_v63 }
  0x83   :  { %10520 = vst [vmem:[#allocation83_spill] sm:$0xff] %v5939_v63  ;;  %v5960_v63 = vld [vmem:[#allocation5 + $0x210] sm:$0xff] }
  0x84   :  { %10523 = vst [vmem:[#allocation86_spill] sm:$0xff] %v5948_v57  ;;  %794 = vmatpush.msrb.mxu3 %v5952_v47  ;;  %755 = vmatpush.msra.mxu1 %v5960_v63 }
  0x85   :  { %10524 = vst [vmem:[#allocation87_spill] sm:$0xff] %v5952_v47  ;;  %v5974_v47 = vld [vmem:[#allocation5 + $0x1d0] sm:$0xff]  ;;  %756 = vmatmul.f32.vlgmr.msra.gmra.mxu1 %v10492_v16 }
  0x86   :  { %10527 = vst [vmem:[#allocation90_spill] sm:$0xff] %v5960_v63  ;;  %883 = vmatpush.msrb.mxu1 %v5551_v29  ;;  %v285_v63 = vperm.slane %v5880_v3, 1 }
  0x87   :  { %10531 = vst [vmem:[#allocation94_spill] sm:$0xff] %v5974_v47 }
  0x88   :  { %884 = vmatpush.msrb.mxu1 %v5556_v33 }
  0x8a   :  { %885 = vmatpush.msrb.mxu1 %v5562_v37 }
  0x8c   :  { %886 = vmatpush.msrb.mxu1 %v5568_v41 }
  0x8e   :  { %887 = vmatpush.msrb.mxu1 %v5580_v46 }
  0x90   :  { %888 = vmatpush.msrb.mxu1 %v5587_v50  ;;  %v6056_v50 = vld [vmem:[#allocation5 + $0xf0] sm:$0xff] }
  0x92   :  { %889 = vmatpush.msrb.mxu1 %v5595_v54  ;;  %v6066_v54 = vld [vmem:[#allocation5 + $0xd8] sm:$0xff] }
  0x93   :  { %10541 = vst [vmem:[#allocation104_spill] sm:$0xff] %v6066_v54 }
  0x94   :  { %890 = vmatpush.msrb.mxu1 %v5601_v58  ;;  %v6076_v58 = vld [vmem:[#allocation5 + $0xb0] sm:$0xff] }
  0x96   :  { %891 = vmatpush.msrb.mxu1 %v5610_v62  ;;  %v6089_v62 = vld [vmem:[#allocation5 + $0x98] sm:$0xff] }
  0x97   :  { %v5801_v9 = vpop.f32.mrf.mxu1  ;;  %10542 = vst [vmem:[#allocation105_spill] sm:$0xff] %v6089_v62 }
  0x98   :  { %v5912_v24 = vadd.f32 %v5801_v9, %v284_v6  ;;  %892 = vmatpush.msrb.mxu1 %v5619_v1 }
  0x9a   :  { %10514 = vst [vmem:[#allocation77_spill] sm:$0xff] %v5912_v24  ;;  %893 = vmatpush.msrb.mxu1 %v5626_v5 }
  0x9c   :  { %894 = vmatpush.msrb.mxu1 %v5632_v8 }
  0x9e   :  { %895 = vmatpush.msrb.mxu1 %v5638_v11  ;;  %v6152_v11 = vld [vmem:[#allocation5 + $0x18] sm:$0xff] }
  0x9f   :  { %v332_v12 = vpop.f32.mrf.mxu1  ;;  %10549 = vst [vmem:[#allocation112_spill] sm:$0xff] %v6152_v11 }
  0xa0   :  { %v5926_v59 = vadd.f32 %v332_v12, %v284_v6  ;;  %896 = vmatpush.msrb.mxu1 %v5645_v13 }
  0xa2   :  { %10517 = vst [vmem:[#allocation80_spill] sm:$0xff] %v5926_v59  ;;  %897 = vmatpush.msrb.mxu1 %v5652_v17 }
  0xa4   :  { %898 = vmatpush.msrb.mxu1 %v5658_v21 }
  0xa6   :  { %1130 = vmatpush.msra.mxu1 %v5664_v25 }
  0xa8   :  { %v5891_v2 = vpop.f32.mrf.mxu3  ;;  %v5897_v55 = vpop.f32.mrf.mxu1  ;;  %1131 = vmatpush.msra.mxu1 %v5671_v28 }
  0xaa   :  { %1132 = vmatpush.msra.mxu1 %v5677_v32 }
  0xac   :  { %v421_v49 = vpop.f32.mrf.mxu0  ;;  %1133 = vmatpush.msra.mxu1 %v5683_v36 }
  0xad   :  { %v488_v9 = vrot.slane %v421_v49, 1  ;;  %v500_v53 = vadd.f32 %v421_v49, %v5912_v24  ;;  %v5944_v49 = vld [vmem:[#allocation5 + $0x20] sm:$0xff]  ;;  %v5946_v24 = vld [vmem:[#allocation5 + $0x28] sm:$0xff] }
  0xae   :  { %10521 = vst [vmem:[#allocation84_spill] sm:$0xff] %v5944_v49  ;;  %654 = vmatpush.msrb.mxu0 %v5944_v49  ;;  %694 = vmatpush.msra.mxu2 %v5946_v24  ;;  %v5966_v49 = vld [vmem:[#allocation5 + $0x1f0] sm:$0xff] }
  0xaf   :  { %v504_v6 = vadd.f32 %v488_v9, %v5926_v59  ;;  %v4274_v12 = vmul.f32 -1.442695, %v500_v53  ;;  %10522 = vst [vmem:[#allocation85_spill] sm:$0xff] %v5946_v24  ;;  %v5956_v53 = vld [vmem:[#allocation5] sm:$0xff]  ;;  %v5958_v59 = vld [vmem:[#allocation5 + $0x8] sm:$0xff]  ;;  %v5964_v24 = vld [vmem:[#allocation5 + $0x218] sm:$0xff]  ;;  %1134 = vmatpush.msra.mxu1 %v5687_v38 }
  0xb0   :  { %v401_v9 = vpop.f32.mrf.mxu3  ;;  %10525 = vst [vmem:[#allocation88_spill] sm:$0xff] %v5956_v53  ;;  %655 = vmatpush.msrb.mxu0 %v5956_v53  ;;  %695 = vmatpush.msra.mxu2 %v5958_v59  ;;  %v5976_v53 = vld [vmem:[#allocation5 + $0x1d8] sm:$0xff] }
  0xb1   :  { %4354 = vpow2.f32 %v4274_v12  ;;  %v4275_v20 = vmul.f32 -1.442695, %v504_v6  ;;  %10526 = vst [vmem:[#allocation89_spill] sm:$0xff] %v5958_v59  ;;  %v5968_v6 = vld [vmem:[#allocation5 + $0x1f8] sm:$0xff]  ;;  %v355_v12 = vpop.f32.mrf.mxu1  ;;  %795 = vmatpush.msrb.mxu3 %v5964_v24  ;;  %v5978_v59 = vpop.f32.mrf.mxu2  ;;  %1135 = vmatpush.msra.mxu1 %v5691_v40  ;;  %v6334_v40 = vld [vmem:[#allocation2 + $0x150] sm:$0xff] }
  0xb2   :  { %10528 = vst [vmem:[#allocation91_spill] sm:$0xff] %v5964_v24  ;;  %720 = vmatpush.msra.mxu0 %v5966_v49  ;;  %760 = vmatpush.msrb.mxu2 %v5968_v6  ;;  %v5985_v24 = vld [vmem:[#allocation5 + $0x1b0] sm:$0xff] }
  0xb3   :  { %10529 = vst [vmem:[#allocation92_spill] sm:$0xff] %v5966_v49  ;;  %4356 = vpow2.f32 %v4275_v20  ;;  %923 = vmatpush.msra.mxu3 %v5513_v14  ;;  %v287_v20 = vperm.slane %v5880_v3, 3  ;;  %v5987_v49 = vld [vmem:[#allocation5 + $0x1b8] sm:$0xff]  ;;  %v5996_v14 = vld [vmem:[#allocation5 + $0x190] sm:$0xff]  ;;  %1136 = vmatpush.msra.mxu1 %v5695_v42 }
  0xb4   :  { %10530 = vst [vmem:[#allocation93_spill] sm:$0xff] %v5968_v6  ;;  %721 = vmatpush.msra.mxu0 %v5974_v47  ;;  %761 = vmatpush.msrb.mxu2 %v5976_v53 }
  0xb5   :  { %10532 = vst [vmem:[#allocation95_spill] sm:$0xff] %v5976_v53  ;;  %924 = vmatpush.msra.mxu3 %v5523_v18  ;;  %v5998_v53 = vld [vmem:[#allocation5 + $0x198] sm:$0xff]  ;;  %v6003_v57 = vadd.f32 %v5891_v2, %v287_v20  ;;  %v6007_v18 = vadd.f32 %v401_v9, %v287_v20  ;;  %v6021_v2 = vadd.f32 %v355_v12, %v285_v63  ;;  %v6038_v12 = vld [vmem:[#allocation5 + $0x130] sm:$0xff] }
  0xb6   :  { %10533 = vst [vmem:[#allocation96_spill] sm:$0xff] %v5985_v24  ;;  %722 = vmatpush.msra.mxu0 %v5985_v24  ;;  %762 = vmatpush.msrb.mxu2 %v5987_v49  ;;  %v6016_v24 = vadd.f32 %v5897_v55, %v285_v63  ;;  %v6026_v55 = vld [vmem:[#allocation5 + $0x150] sm:$0xff] }
  0xb7   :  { %10534 = vst [vmem:[#allocation97_spill] sm:$0xff] %v5987_v49  ;;  %v4355_v6 = vpop.eup %4354  ;;  %925 = vmatpush.msra.mxu3 %v5532_v22  ;;  %v6013_v49 = vld [vmem:[#allocation5 + $0x178] sm:$0xff] }
  0xb8   :  { %v5992_v29 = vadd.f32 1.0, %v4355_v6  ;;  %10535 = vst [vmem:[#allocation98_spill] sm:$0xff] %v5996_v14  ;;  %723 = vmatpush.msra.mxu0 %v5996_v14  ;;  %763 = vmatpush.msrb.mxu2 %v5998_v53  ;;  %v6011_v6 = vld [vmem:[#allocation5 + $0x170] sm:$0xff] }
  0xb9   :  { %10536 = vst [vmem:[#allocation99_spill] sm:$0xff] %v5998_v53  ;;  %v4357_v47 = vpop.eup %4356  ;;  %926 = vmatpush.msra.mxu3 %v5543_v26  ;;  %v6028_v53 = vld [vmem:[#allocation5 + $0x158] sm:$0xff] }
  0xba   :  { %10537 = vst [vmem:[#allocation100_spill] sm:$0xff] %v6003_v57  ;;  %v6005_v33 = vadd.f32 1.0, %v4357_v47  ;;  %4358 = vrcp.f32 %v5992_v29  ;;  %v481_v22 = vpop.f32.mrf.mxu3  ;;  %724 = vmatpush.msra.mxu0 %v6011_v6  ;;  %764 = vmatpush.msrb.mxu2 %v6013_v49  ;;  %v527_v8 = vand.u32 2147483648, %v5992_v29  ;;  %vm521_vm3 = vweird.f32 %v5992_v29 }
  0xbb   :  { %10538 = vst [vmem:[#allocation101_spill] sm:$0xff] %v6007_v18  ;;  %v441_v37 = vpop.f32.mrf.mxu1  ;;  %v491_v47 = vrot.slane %v481_v22, 1  ;;  %v503_v9 = vadd.f32 %v481_v22, %v6003_v57  ;;  %927 = vmatpush.msra.mxu3 %v5553_v31  ;;  %v6040_v22 = vld [vmem:[#allocation5 + $0x138] sm:$0xff] }
  0xbc   :  { %10539 = vst [vmem:[#allocation102_spill] sm:$0xff] %v6016_v24  ;;  %v489_v20 = vrot.slane %v441_v37, 1  ;;  %v501_v14 = vadd.f32 %v441_v37, %v6016_v24  ;;  %4360 = vrcp.f32 %v6005_v33  ;;  %725 = vmatpush.msra.mxu0 %v6026_v55  ;;  %765 = vmatpush.msrb.mxu2 %v6028_v53  ;;  %v6042_v37 = vpop.f32.mrf.mxu2  ;;  %vm536_vm5 = vweird.f32 %v6005_v33 }
  0xbd   :  { %10540 = vst [vmem:[#allocation103_spill] sm:$0xff] %v6021_v2  ;;  %v507_v26 = vadd.f32 %v491_v47, %v6007_v18  ;;  %v4278_v41 = vmul.f32 -1.442695, %v503_v9  ;;  %928 = vmatpush.msra.mxu3 %v5559_v35  ;;  %v6048_v9 = vld [vmem:[#allocation5 + $0x110] sm:$0xff]  ;;  %v6058_v35 = vld [vmem:[#allocation5 + $0xf8] sm:$0xff] }
  0xbe   :  { %v505_v63 = vadd.f32 %v489_v20, %v6021_v2  ;;  %v4276_v46 = vmul.f32 -1.442695, %v501_v14  ;;  %726 = vmatpush.msra.mxu0 %v6038_v12  ;;  %766 = vmatpush.msrb.mxu2 %v6040_v22  ;;  %v6054_v14 = vld [vmem:[#allocation5 + $0x118] sm:$0xff] }
  0xbf   :  { %4362 = vpow2.f32 %v4278_v41  ;;  %v4279_v31 = vmul.f32 -1.442695, %v507_v26  ;;  %929 = vmatpush.msra.mxu3 %v5565_v39  ;;  %v6064_v26 = vld [vmem:[#allocation5 + $0xd0] sm:$0xff] }
  0xc0   :  { %v4277_v47 = vmul.f32 -1.442695, %v505_v63  ;;  %v6050_v20 = vpop.eup %4358  ;;  %4364 = vpow2.f32 %v4276_v46  ;;  %727 = vmatpush.msra.mxu0 %v6048_v9  ;;  %767 = vmatpush.msrb.mxu2 %v6054_v14  ;;  %v286_v46 = vperm.slane %v5880_v3, 2 }
  0xc1   :  { %4366 = vpow2.f32 %v4279_v31  ;;  %930 = vmatpush.msra.mxu3 %v5577_v44  ;;  %v517_v41 = vmul.f32 %v6050_v20, %v5992_v29  ;;  %v6078_v44 = vld [vmem:[#allocation5 + $0xb8] sm:$0xff]  ;;  %vm522_vm2 = vweird.f32 %v6050_v20 }
  0xc2   :  { %4368 = vpow2.f32 %v4277_v47  ;;  %v6068_v39 = vpop.eup %4360  ;;  %728 = vmatpush.msra.mxu0 %v6056_v50  ;;  %768 = vmatpush.msrb.mxu2 %v6058_v35  ;;  %vm6183_vm7 = vmor %vm521_vm3, %vm522_vm2 }
  0xc3   :  { %931 = vmatpush.msra.mxu3 %v5584_v48  ;;  %v532_v47 = vmul.f32 %v6068_v39, %v6005_v33  ;;  %v6087_v48 = vld [vmem:[#allocation5 + $0x90] sm:$0xff]  ;;  %v518_v18 = vsub.f32 1.0, %v517_v41  ;;  %vm537_vm8 = vweird.f32 %v6068_v39 }
  0xc4   :  { %729 = vmatpush.msra.mxu0 %v6064_v26  ;;  %769 = vmatpush.msrb.mxu2 %v6066_v54  ;;  %v461_v1 = vpop.f32.mrf.mxu2  ;;  %vm6212_vm11 = vmor %vm536_vm5, %vm537_vm8 }
  0xc5   :  { %v4363_v63 = vpop.eup %4362  ;;  %932 = vmatpush.msra.mxu3 %v5592_v52  ;;  %v6102_v52 = vadd.f32 %v5978_v59, %v286_v46  ;;  %v490_v5 = vrot.slane %v461_v1, 1  ;;  %v519_v59 = vmul.f32 %v6050_v20, %v518_v18 }
  0xc6   :  { %v4365_v31 = vpop.eup %4364  ;;  %730 = vmatpush.msra.mxu0 %v6076_v58  ;;  %770 = vmatpush.msrb.mxu2 %v6078_v44  ;;  %v6095_v2 = vadd.f32 1.0, %v4363_v63  ;;  %v6109_v63 = vld [vmem:[#allocation5 + $0x70] sm:$0xff] }
  0xc7   :  { %v4367_v57 = vpop.eup %4366  ;;  %v6091_v24 = vadd.f32 1.0, %v4365_v31  ;;  %933 = vmatpush.msra.mxu3 %v5598_v56  ;;  %10543 = vst [vmem:[#allocation106_spill] sm:$0xff] %v6102_v52  ;;  %v533_v31 = vsub.f32 1.0, %v532_v47  ;;  %v6117_v56 = vadd.f32 %v6042_v37, %v286_v46  ;;  %v6125_v47 = vld [vmem:[#allocation5 + $0x58] sm:$0xff]  ;;  %v502_v18 = vadd.f32 %v461_v1, %v6102_v52 }
  0xc8   :  { %v4369_v3 = vpop.eup %4368  ;;  %v6097_v54 = vadd.f32 1.0, %v4367_v57  ;;  %731 = vmatpush.msra.mxu0 %v6087_v48  ;;  %771 = vmatpush.msrb.mxu2 %v6089_v62  ;;  %10544 = vst [vmem:[#allocation107_spill] sm:$0xff] %v6109_v63  ;;  %v6111_v57 = vld [vmem:[#allocation5 + $0x78] sm:$0xff]  ;;  %v540_v37 = vand.u32 2147483647, %v6005_v33  ;;  %v520_v52 = vadd.f32 %v6050_v20, %v519_v59  ;;  %v528_v59 = vor.u32 1.1754944e-38, %v527_v8 }
  0xc9   :  { %v6104_v41 = vadd.f32 1.0, %v4369_v3  ;;  %4370 = vrcp.f32 %v6091_v24  ;;  %934 = vmatpush.msra.mxu3 %v5605_v60  ;;  %10545 = vst [vmem:[#allocation108_spill] sm:$0xff] %v6117_v56  ;;  %v6123_v3 = vld [vmem:[#allocation5 + $0x50] sm:$0xff]  ;;  %v525_v60 = vand.u32 2147483647, %v5992_v29  ;;  %v6138_v46 = vld [vmem:[#allocation5 + $0x38] sm:$0xff]  ;;  %v534_v62 = vmul.f32 %v6068_v39, %v533_v31 }
  0xca   :  { %4372 = vrcp.f32 %v6097_v54  ;;  %796 = vmatmul.f32.vlgmr.msrb.gmra.mxu3 %v10492_v16  ;;  %10546 = vst [vmem:[#allocation109_spill] sm:$0xff] %v6125_v47  ;;  %732 = vmatpush.msra.mxu0 %v6109_v63  ;;  %v6136_v16 = vld [vmem:[#allocation5 + $0x30] sm:$0xff]  ;;  %v506_v1 = vadd.f32 %v490_v5, %v6117_v56  ;;  %vm6168_vm6 = vcmp.eq.f32.partialorder %v540_v37, 8.507059e+37  ;;  %v542_v56 = vand.u32 2147483648, %v6005_v33 }
  0xcb   :  { %4374 = vrcp.f32 %v6104_v41  ;;  %772 = vmatpush.msrb.mxu2 %v6111_v57  ;;  %935 = vmatpush.msra.mxu3 %v5615_v0  ;;  %10547 = vst [vmem:[#allocation110_spill] sm:$0xff] %v6138_v46  ;;  %v6150_v0 = vld [vmem:[#allocation5 + $0x10] sm:$0xff]  ;;  %vm6159_vm4 = vcmp.eq.f32.partialorder %v525_v60, 8.507059e+37  ;;  %v565_v17 = vand.u32 2147483648, %v6091_v24  ;;  %v524_v29 = vsel %vm6183_vm7, %v6050_v20, %v520_v52 }
  0xcc   :  { %4376 = vrcp.f32 %v6095_v2  ;;  %733 = vmatpush.msra.mxu0 %v6123_v3  ;;  %10548 = vst [vmem:[#allocation111_spill] sm:$0xff] %v6150_v0  ;;  %vm559_vm10 = vweird.f32 %v6091_v24  ;;  %v580_v21 = vand.u32 2147483648, %v6104_v41  ;;  %v578_v20 = vand.u32 2147483647, %v6104_v41 }
  0xcd   :  { %773 = vmatpush.msrb.mxu2 %v6125_v47  ;;  %936 = vmatpush.msra.mxu3 %v5623_v4  ;;  %4378 = vtanh.f32 %v502_v18  ;;  %v535_v18 = vadd.f32 %v6068_v39, %v534_v62  ;;  %vm574_vm14 = vweird.f32 %v6104_v41  ;;  %v620_v36 = vand.u32 2147483648, %v6097_v54 }
  0xce   :  { %734 = vmatpush.msra.mxu0 %v6136_v16  ;;  %4380 = vtanh.f32 %v506_v1  ;;  %v566_v1 = vor.u32 1.1754944e-38, %v565_v17  ;;  %vm579_vm1 = vcmp.eq.f32.partialorder %v578_v20, 8.507059e+37  ;;  %v605_v38 = vand.u32 2147483648, %v6095_v2  ;;  %v10560_v17 = vld [vmem:[#allocation11_spill] sm:$0xff] }
  0xcf   :  { %v6143_v63 = vpop.eup %4370  ;;  %774 = vmatpush.msrb.mxu2 %v6138_v46  ;;  %937 = vmatpush.msra.mxu3 %v5629_v7  ;;  %v603_v42 = vand.u32 2147483647, %v6095_v2 }
  0xd0   :  { %v6154_v31 = vpop.eup %4372  ;;  %v555_v47 = vmul.f32 %v6143_v63, %v6091_v24  ;;  %735 = vmatpush.msra.mxu0 %v6150_v0  ;;  %vm560_vm9 = vweird.f32 %v6143_v63  ;;  %v543_v0 = vor.u32 1.1754944e-38, %v542_v56  ;;  %1137 = vmatpush.msra.mxu1 %v10560_v17  ;;  %v606_v20 = vor.u32 1.1754944e-38, %v605_v38  ;;  %v10576_v38 = vld [vmem:[#allocation27_spill] sm:$0xff]  ;;  %v10577_v17 = vld [vmem:[#allocation28_spill] sm:$0xff] }
  0xd1   :  { %v6165_v4 = vpop.eup %4374  ;;  %775 = vmatpush.msrb.mxu2 %v6152_v11  ;;  %v610_v7 = vmul.f32 %v6154_v31, %v6097_v54  ;;  %938 = vmatpush.msra.mxu3 %v5636_v10  ;;  %v563_v11 = vand.u32 2147483647, %v6091_v24  ;;  %vm561_vm13 = vmor %vm559_vm10, %vm560_vm9  ;;  %vm615_vm2 = vweird.f32 %v6154_v31  ;;  %vm604_vm9 = vcmp.eq.f32.partialorder %v603_v42, 8.507059e+37  ;;  %v10578_v42 = vld [vmem:[#allocation31_spill] sm:$0xff] }
  0xd2   :  { %v6175_v60 = vpop.eup %4376  ;;  %v556_v8 = vsub.f32 1.0, %v555_v47  ;;  %v570_v46 = vmul.f32 %v6165_v4, %v6104_v41  ;;  %vm575_vm12 = vweird.f32 %v6165_v4  ;;  %vm637_vm10 = vcmask 1041409  }
  0xd3   :  { %1170 = vmatpush.msrb.mxu3 %v5647_v15  ;;  %v595_v37 = vmul.f32 %v6175_v60, %v6095_v2  ;;  %v539_v15 = vsel %vm6212_vm11, %v6068_v39, %v535_v18  ;;  %v4379_v33 = vpop.eup %4378  ;;  %vm564_vm15 = vcmp.eq.f32.partialorder %v563_v11, 8.507059e+37  ;;  %vm576_vm0 = vmor %vm574_vm14, %vm575_vm12  ;;  %vm600_vm3 = vweird.f32 %v6175_v60 }
  0xd4   :  { %v557_v62 = vmul.f32 %v6143_v63, %v556_v8  ;;  %v571_v47 = vsub.f32 1.0, %v570_v46  ;;  %v611_v46 = vsub.f32 1.0, %v610_v7  ;;  %v529_v8 = vsel %vm6159_vm4, %v528_v59, %v524_v29  ;;  %v10561_v29 = vld [vmem:[#allocation12_spill] sm:$0xff] }
  0xd5   :  { %1171 = vmatpush.msrb.mxu3 %v5654_v19  ;;  %v4381_v19 = vpop.eup %4380  ;;  %v596_v5 = vsub.f32 1.0, %v595_v37  ;;  %v581_v59 = vor.u32 1.1754944e-38, %v580_v21  ;;  %v544_v56 = vsel %vm6168_vm6, %v543_v0, %v539_v15  ;;  %vm614_vm4 = vweird.f32 %v6097_v54  ;;  %v10564_v15 = vld [vmem:[#allocation15_spill] sm:$0xff] }
  0xd6   :  { %v572_v25 = vmul.f32 %v6165_v4, %v571_v47  ;;  %v558_v52 = vadd.f32 %v6143_v63, %v557_v62  ;;  %v627_v7 = vmul.f32 %v4381_v19, %v544_v56  ;;  %vm6265_vm5 = vmor %vm614_vm4, %vm615_vm2  ;;  %vm599_vm6 = vweird.f32 %v6095_v2  ;;  %v10562_v62 = vld [vmem:[#allocation13_spill] sm:$0xff]  ;;  %v10563_v47 = vld [vmem:[#allocation14_spill] sm:$0xff] }
  0xd7   :  { %1172 = vmatpush.msrb.mxu3 %v5660_v23  ;;  %v612_v23 = vmul.f32 %v6154_v31, %v611_v46  ;;  %v597_v0 = vmul.f32 %v6175_v60, %v596_v5  ;;  %vm601_vm7 = vmor %vm599_vm6, %vm600_vm3  ;;  %1138 = vmatpush.msra.mxu1 %v10562_v62  ;;  %v10565_v2 = vld [vmem:[#allocation16_spill] sm:$0xff]  ;;  %v10567_v46 = vld [vmem:[#allocation18_spill] sm:$0xff] }
  0xd8   :  { %v562_v39 = vsel %vm561_vm13, %v6143_v63, %v558_v52  ;;  %v573_v28 = vadd.f32 %v6165_v4, %v572_v25  ;;  %v626_v63 = vmul.f32 %v4379_v33, %v529_v8  ;;  %v10566_v33 = vld [vmem:[#allocation17_spill] sm:$0xff]  ;;  %v6290_v19 = vld [vmem:[#allocation2 + $0x1e0] sm:$0xff] }
  0xd9   :  { %v567_v18 = vsel %vm564_vm15, %v566_v1, %v562_v39  ;;  %1173 = vmatpush.msrb.mxu3 %v5668_v27  ;;  %v613_v27 = vadd.f32 %v6154_v31, %v612_v23  ;;  %1139 = vmatpush.msra.mxu1 %v10564_v15  ;;  %v10568_v39 = vld [vmem:[#allocation19_spill] sm:$0xff]  ;;  %v6294_v5 = vld [vmem:[#allocation2 + $0x1f0] sm:$0xff] }
  0xda   :  { %v577_v24 = vsel %vm576_vm0, %v6165_v4, %v573_v28  ;;  %v624_v41 = vmul.f32 0.0, %v567_v18  ;;  %v10570_v56 = vld [vmem:[#allocation21_spill] sm:$0xff]  ;;  %v6346_v62 = vld [vmem:[#allocation2 + $0x100] sm:$0xff]  ;;  %v10583_v15 = vld [vmem:[#allocation40_spill] sm:$0xff] }
  0xdb   :  { %v582_v32 = vsel %vm579_vm1, %v581_v59, %v577_v24  ;;  %1174 = vmatpush.msrb.mxu3 %v5675_v30  ;;  %v598_v30 = vadd.f32 %v6175_v60, %v597_v0  ;;  %1140 = vmatpush.msra.mxu1 %v10566_v33  ;;  %v6298_v59 = vld [vmem:[#allocation2 + $0x1c0] sm:$0xff]  ;;  %v6302_v18 = vld [vmem:[#allocation2 + $0x1d0] sm:$0xff] }
  0xdc   :  { %v625_v11 = vmul.f32 0.0, %v582_v32  ;;  %v6244_v13 = vadd.f32 %v626_v63, %v624_v41  ;;  %v10571_v24 = vld [vmem:[#allocation22_spill] sm:$0xff]  ;;  %v10572_v63 = vld [vmem:[#allocation23_spill] sm:$0xff]  ;;  %v6310_v23 = vld [vmem:[#allocation2 + $0x1b0] sm:$0xff] }
  0xdd   :  { %1175 = vmatpush.msrb.mxu3 %v5681_v34  ;;  %v618_v34 = vand.u32 2147483647, %v6097_v54  ;;  %v621_v54 = vor.u32 1.1754944e-38, %v620_v36  ;;  %v602_v21 = vsel %vm601_vm7, %v6175_v60, %v598_v30  ;;  %1141 = vmatpush.msra.mxu1 %v10568_v39  ;;  %v10569_v60 = vld [vmem:[#allocation20_spill] sm:$0xff]  ;;  %v6306_v41 = vld [vmem:[#allocation2 + $0x1a0] sm:$0xff] }
  0xde   :  { %v6249_v4 = vadd.f32 %v627_v7, %v625_v11  ;;  %4382 = vtanh.f32 %v6244_v13  ;;  %v10573_v32 = vld [vmem:[#allocation24_spill] sm:$0xff]  ;;  %v6314_v11 = vld [vmem:[#allocation2 + $0x180] sm:$0xff]  ;;  %v10574_v7 = vld [vmem:[#allocation25_spill] sm:$0xff] }
  0xdf   :  { %1176 = vmatpush.msrb.mxu3 %v5697_v43  ;;  %v617_v43 = vsel %vm6265_vm5, %v6154_v31, %v613_v27  ;;  %vm619_vm8 = vcmp.eq.f32.partialorder %v618_v34, 8.507059e+37  ;;  %v607_v31 = vsel %vm604_vm9, %v606_v20, %v602_v21  ;;  %1142 = vmatpush.msra.mxu1 %v10570_v56  ;;  %v6318_v0 = vld [vmem:[#allocation2 + $0x190] sm:$0xff]  ;;  %v6323_v27 = vld [vmem:[#allocation2 + $0x160] sm:$0xff] }
  0xe0   :  { %4384 = vtanh.f32 %v6249_v4  ;;  %v622_v25 = vsel %vm619_vm8, %v621_v54, %v617_v43  ;;  %v6326_v36 = vld [vmem:[#allocation2 + $0x170] sm:$0xff]  ;;  %v10575_v30 = vld [vmem:[#allocation26_spill] sm:$0xff]  ;;  %v10582_v20 = vld [vmem:[#allocation39_spill] sm:$0xff] }
  0xe1   :  { %1177 = vmatpush.msrb.mxu3 %v10561_v29  ;;  %1143 = vmatpush.msra.mxu1 %v10572_v63  ;;  %v6330_v34 = vld [vmem:[#allocation2 + $0x140] sm:$0xff]  ;;  %v6342_v43 = vld [vmem:[#allocation2 + $0x130] sm:$0xff] }
  0xe2   :  { %v6338_v29 = vld [vmem:[#allocation2 + $0x120] sm:$0xff]  ;;  %v10579_v54 = vld [vmem:[#allocation32_spill] sm:$0xff] }
  0xe3   :  { %1178 = vmatpush.msrb.mxu3 %v10563_v47  ;;  %1144 = vmatpush.msra.mxu1 %v10574_v7  ;;  %v10580_v47 = vld [vmem:[#allocation35_spill] sm:$0xff]  ;;  %v10581_v21 = vld [vmem:[#allocation36_spill] sm:$0xff] }
  0xe4   :  { %v4383_v37 = vpop.eup %4382  ;;  %v10585_v33 = vld [vmem:[#allocation44_spill] sm:$0xff]  ;;  %v10588_v56 = vld [vmem:[#allocation51_spill] sm:$0xff] }
  0xe5   :  { %1179 = vmatpush.msrb.mxu3 %v10565_v2  ;;  %v632_v1 = vmul.f32 %v4383_v37, %v607_v31  ;;  %1145 = vmatpush.msra.mxu1 %v10576_v38  ;;  %v6350_v37 = vld [vmem:[#allocation2 + $0x110] sm:$0xff]  ;;  %v6362_v2 = vld [vmem:[#allocation2 + $0xc0] sm:$0xff] }
  0xe6   :  { %v4385_v10 = vpop.eup %4384  ;;  %v6366_v31 = vld [vmem:[#allocation2 + $0xd0] sm:$0xff]  ;;  %v10590_v7 = vld [vmem:[#allocation55_spill] sm:$0xff] }
  0xe7   :  { %v633_v52 = vmul.f32 %v4385_v10, %v622_v25  ;;  %1180 = vmatpush.msrb.mxu3 %v10567_v46  ;;  %v6354_v10 = vld [vmem:[#allocation2 + $0xe0] sm:$0xff]  ;;  %v6358_v25 = vld [vmem:[#allocation2 + $0xf0] sm:$0xff] }
  0xe8   :  { %v6370_v46 = vld [vmem:[#allocation2 + $0xa0] sm:$0xff]  ;;  %v10587_v39 = vld [vmem:[#allocation48_spill] sm:$0xff] }
  0xe9   :  { %v636_v8 = vrot.slane %v633_v52, 7  ;;  %1181 = vmatpush.msrb.mxu3 %v10569_v60  ;;  %v10584_v52 = vld [vmem:[#allocation43_spill] sm:$0xff]  ;;  %v10589_v63 = vld [vmem:[#allocation52_spill] sm:$0xff] }
  0xea   :  { %v6378_v60 = vld [vmem:[#allocation2 + $0x80] sm:$0xff]  ;;  %v10591_v38 = vld [vmem:[#allocation56_spill] sm:$0xff] }
  0xeb   :  { %v6286_v28 = vsel %vm637_vm10, %v636_v8, %v632_v1  ;;  %1182 = vmatpush.msrb.mxu3 %v10571_v24  ;;  %v10586_v1 = vld [vmem:[#allocation47_spill] sm:$0xff]  ;;  %v6374_v8 = vld [vmem:[#allocation2 + $0xb0] sm:$0xff] }
  0xec   :  { %656 = vmatmul.f32.vlgmr.msrb.gmra.mxu0 %v6286_v28  ;;  %696 = vmatmul.f32.vlgmr.msra.gmra.mxu2 %v6286_v28  ;;  %v6382_v24 = vld [vmem:[#allocation2 + $0x90] sm:$0xff] }
  0xed   :  { %863 = vmatpush.msrb.mxu0 %v6290_v19  ;;  %899 = vmatmul.f32.vlgmr.msrb.gmra.mxu1 %v6286_v28 }
  0xee   :  { %903 = vmatpush.msra.mxu2 %v6294_v5  ;;  %939 = vmatmul.f32.vlgmr.msra.gmra.mxu3 %v6286_v28 }
  0xef   :  { %864 = vmatpush.msrb.mxu0 %v6298_v59  ;;  %1183 = vmatpush.msrb.mxu3 %v10573_v32  ;;  %v6386_v32 = vld [vmem:[#allocation2 + $0x60] sm:$0xff] }
  0xf0   :  { %904 = vmatpush.msra.mxu2 %v6302_v18  ;;  %1210 = vmatpush.msrb.mxu1 %v10578_v42  ;;  %v10592_v42 = vld [vmem:[#allocation59_spill] sm:$0xff] }
  0xf1   :  { %865 = vmatpush.msrb.mxu0 %v6306_v41  ;;  %1184 = vmatpush.msrb.mxu3 %v10575_v30  ;;  %v6390_v30 = vld [vmem:[#allocation2 + $0x70] sm:$0xff] }
  0xf2   :  { %905 = vmatpush.msra.mxu2 %v6310_v23  ;;  %1211 = vmatpush.msrb.mxu1 %v10580_v47  ;;  %v10594_v47 = vld [vmem:[#allocation60_spill] sm:$0xff] }
  0xf3   :  { %866 = vmatpush.msrb.mxu0 %v6314_v11  ;;  %1185 = vmatpush.msrb.mxu3 %v10577_v17  ;;  %v6394_v17 = vld [vmem:[#allocation2 + $0x40] sm:$0xff] }
  0xf4   :  { %906 = vmatpush.msra.mxu2 %v6318_v0  ;;  %736 = vmatmul.f32.vlgmr.msra.gmra.mxu0 %v6286_v28 }
  0xf5   :  { %776 = vmatmul.f32.vlgmr.msrb.gmra.mxu2 %v6286_v28  ;;  %867 = vmatpush.msrb.mxu0 %v6323_v27 }
  0xf6   :  { %907 = vmatpush.msra.mxu2 %v6326_v36  ;;  %1250 = vmatpush.msra.mxu3 %v10579_v54  ;;  %v6398_v54 = vld [vmem:[#allocation2 + $0x50] sm:$0xff] }
  0xf7   :  { %868 = vmatpush.msrb.mxu0 %v6330_v34  ;;  %1212 = vmatpush.msrb.mxu1 %v10582_v20  ;;  %10593 = vst [vmem:[#allocation11_spill] sm:$0xff] %v6398_v54  ;;  %v10596_v20 = vld [vmem:[#allocation63_spill] sm:$0xff] }
  0xf8   :  { %908 = vmatpush.msra.mxu2 %v6334_v40  ;;  %1251 = vmatpush.msra.mxu3 %v10581_v21  ;;  %v6402_v21 = vld [vmem:[#allocation2 + $0x20] sm:$0xff] }
  0xf9   :  { %869 = vmatpush.msrb.mxu0 %v6338_v29  ;;  %1213 = vmatpush.msrb.mxu1 %v10584_v52  ;;  %10595 = vst [vmem:[#allocation12_spill] sm:$0xff] %v6402_v21  ;;  %v10598_v52 = vld [vmem:[#allocation64_spill] sm:$0xff] }
  0xfa   :  { %909 = vmatpush.msra.mxu2 %v6342_v43  ;;  %1252 = vmatpush.msra.mxu3 %v10583_v15  ;;  %v6406_v15 = vld [vmem:[#allocation2 + $0x30] sm:$0xff] }
  0xfb   :  { %870 = vmatpush.msrb.mxu0 %v6346_v62  ;;  %1214 = vmatpush.msrb.mxu1 %v10586_v1  ;;  %10597 = vst [vmem:[#allocation13_spill] sm:$0xff] %v6406_v15  ;;  %v10600_v1 = vld [vmem:[#allocation67_spill] sm:$0xff] }
  0xfc   :  { %910 = vmatpush.msra.mxu2 %v6350_v37  ;;  %1253 = vmatpush.msra.mxu3 %v10585_v33  ;;  %v6410_v33 = vld [vmem:[#allocation2] sm:$0xff] }
  0xfd   :  { %871 = vmatpush.msrb.mxu0 %v6354_v10  ;;  %1215 = vmatpush.msrb.mxu1 %v10588_v56  ;;  %10599 = vst [vmem:[#allocation14_spill] sm:$0xff] %v6410_v33  ;;  %v10602_v56 = vld [vmem:[#allocation29_spill] sm:$0xff] }
  0xfe   :  { %911 = vmatpush.msra.mxu2 %v6358_v25  ;;  %1254 = vmatpush.msra.mxu3 %v10587_v39  ;;  %v6414_v39 = vld [vmem:[#allocation2 + $0x10] sm:$0xff] }
  0xff   :  { %872 = vmatpush.msrb.mxu0 %v6362_v2  ;;  %1216 = vmatpush.msrb.mxu1 %v10590_v7  ;;  %10601 = vst [vmem:[#allocation15_spill] sm:$0xff] %v6414_v39  ;;  %v10604_v7 = vld [vmem:[#allocation68_spill] sm:$0xff] }
 0x100   :  { %912 = vmatpush.msra.mxu2 %v6366_v31  ;;  %1255 = vmatpush.msra.mxu3 %v10589_v63  ;;  %v10603_v63 = vld [vmem:[#allocation30_spill] sm:$0xff] }
 0x101   :  { %873 = vmatpush.msrb.mxu0 %v6370_v46  ;;  %1217 = vmatpush.msrb.mxu1 %v10592_v42  ;;  %v10606_v42 = vld [vmem:[#allocation71_spill] sm:$0xff] }
 0x102   :  { %913 = vmatpush.msra.mxu2 %v6374_v8  ;;  %1256 = vmatpush.msra.mxu3 %v10591_v38  ;;  %v10605_v38 = vld [vmem:[#allocation33_spill] sm:$0xff] }
 0x103   :  { %874 = vmatpush.msrb.mxu0 %v6378_v60  ;;  %1218 = vmatpush.msrb.mxu1 %v10596_v20  ;;  %v10608_v20 = vld [vmem:[#allocation72_spill] sm:$0xff] }
 0x104   :  { %914 = vmatpush.msra.mxu2 %v6382_v24  ;;  %1257 = vmatpush.msra.mxu3 %v10594_v47  ;;  %v10607_v47 = vld [vmem:[#allocation34_spill] sm:$0xff] }
 0x105   :  { %875 = vmatpush.msrb.mxu0 %v6386_v32  ;;  %1219 = vmatpush.msrb.mxu1 %v10600_v1  ;;  %v10610_v1 = vld [vmem:[#allocation75_spill] sm:$0xff] }
 0x106   :  { %915 = vmatpush.msra.mxu2 %v6390_v30  ;;  %1258 = vmatpush.msra.mxu3 %v10598_v52  ;;  %v10609_v52 = vld [vmem:[#allocation37_spill] sm:$0xff] }
 0x107   :  { %876 = vmatpush.msrb.mxu0 %v6394_v17  ;;  %1220 = vmatpush.msrb.mxu1 %v10606_v42  ;;  %v10617_v42 = vld [vmem:[#allocation83_spill] sm:$0xff] }
 0x108   :  { %916 = vmatpush.msra.mxu2 %v6398_v54  ;;  %1259 = vmatpush.msra.mxu3 %v10604_v7  ;;  %v10615_v7 = vld [vmem:[#allocation45_spill] sm:$0xff] }
 0x109   :  { %877 = vmatpush.msrb.mxu0 %v6402_v21  ;;  %1221 = vmatpush.msrb.mxu1 %v10610_v1  ;;  %v10623_v1 = vld [vmem:[#allocation90_spill] sm:$0xff] }
 0x10a   :  { %917 = vmatpush.msra.mxu2 %v6406_v15  ;;  %1260 = vmatpush.msra.mxu3 %v10608_v20  ;;  %v10620_v20 = vld [vmem:[#allocation50_spill] sm:$0xff] }
 0x10b   :  { %878 = vmatpush.msrb.mxu0 %v6410_v33  ;;  %1222 = vmatpush.msrb.mxu1 %v5920_v51  ;;  %v10622_v51 = vld [vmem:[#allocation53_spill] sm:$0xff] }
 0x10c   :  { %918 = vmatpush.msra.mxu2 %v6414_v39  ;;  %879 = vmatmul.f32.vlgmr.msrb.gmra.mxu0 %v6286_v28  ;;  %v10611_v39 = vld [vmem:[#allocation38_spill] sm:$0xff] }
 0x10d   :  { %919 = vmatmul.f32.vlgmr.msra.gmra.mxu2 %v6286_v28  ;;  %1110 = vmatpush.msra.mxu0 %v10602_v56  ;;  %v10612_v28 = vld [vmem:[#allocation76_spill] sm:$0xff]  ;;  %v10613_v56 = vld [vmem:[#allocation41_spill] sm:$0xff] }
 0x10e   :  { %1150 = vmatpush.msrb.mxu2 %v10603_v63  ;;  %1261 = vmatpush.msra.mxu3 %v10612_v28  ;;  %v10614_v63 = vld [vmem:[#allocation42_spill] sm:$0xff]  ;;  %v10625_v28 = vld [vmem:[#allocation91_spill] sm:$0xff] }
 0x10f   :  { %1111 = vmatpush.msra.mxu0 %v10605_v38  ;;  %1223 = vmatpush.msrb.mxu1 %v5935_v45  ;;  %v10616_v38 = vld [vmem:[#allocation46_spill] sm:$0xff]  ;;  %v10626_v45 = vld [vmem:[#allocation57_spill] sm:$0xff] }
 0x110   :  { %1151 = vmatpush.msrb.mxu2 %v10607_v47  ;;  %1262 = vmatpush.msra.mxu3 %v5924_v61  ;;  %v10618_v47 = vld [vmem:[#allocation49_spill] sm:$0xff]  ;;  %v10624_v61 = vld [vmem:[#allocation54_spill] sm:$0xff] }
 0x111   :  { %1112 = vmatpush.msra.mxu0 %v10609_v52  ;;  %v10621_v52 = vld [vmem:[#allocation87_spill] sm:$0xff] }
 0x112   :  { %1152 = vmatpush.msrb.mxu2 %v10611_v39  ;;  %1263 = vmatpush.msra.mxu3 %v10617_v42  ;;  %v10619_v39 = vld [vmem:[#allocation86_spill] sm:$0xff] }
 0x113   :  { %1113 = vmatpush.msra.mxu0 %v10613_v56  ;;  %1224 = vmatpush.msrb.mxu1 %v10619_v39  ;;  %v10627_v56 = vld [vmem:[#allocation58_spill] sm:$0xff] }
 0x114   :  { %1153 = vmatpush.msrb.mxu2 %v10614_v63  ;;  %1264 = vmatpush.msra.mxu3 %v10621_v52  ;;  %v10628_v63 = vld [vmem:[#allocation61_spill] sm:$0xff]  ;;  %v10631_v42 = vld [vmem:[#allocation66_spill] sm:$0xff] }
 0x115   :  { %1114 = vmatpush.msra.mxu0 %v10615_v7  ;;  %1225 = vmatpush.msrb.mxu1 %v10623_v1  ;;  %v10629_v7 = vld [vmem:[#allocation62_spill] sm:$0xff]  ;;  %v10637_v1 = vld [vmem:[#allocation79_spill] sm:$0xff] }
 0x116   :  { %1154 = vmatpush.msrb.mxu2 %v10616_v38  ;;  %1265 = vmatpush.msra.mxu3 %v10625_v28  ;;  %v10630_v38 = vld [vmem:[#allocation65_spill] sm:$0xff]  ;;  %v10633_v39 = vld [vmem:[#allocation70_spill] sm:$0xff] }
 0x117   :  { %1115 = vmatpush.msra.mxu0 %v10618_v47  ;;  %v10632_v47 = vld [vmem:[#allocation69_spill] sm:$0xff]  ;;  %v10635_v52 = vld [vmem:[#allocation74_spill] sm:$0xff] }
 0x118   :  { %1155 = vmatpush.msrb.mxu2 %v10620_v20  ;;  %v10634_v20 = vld [vmem:[#allocation73_spill] sm:$0xff]  ;;  %v10639_v28 = vld [vmem:[#allocation82_spill] sm:$0xff] }
 0x119   :  { %1116 = vmatpush.msra.mxu0 %v10622_v51  ;;  %v10636_v51 = vld [vmem:[#allocation78_spill] sm:$0xff] }
 0x11a   :  { %1156 = vmatpush.msrb.mxu2 %v10624_v61  ;;  %v10638_v61 = vld [vmem:[#allocation81_spill] sm:$0xff] }
 0x11b   :  { %1117 = vmatpush.msra.mxu0 %v10626_v45  ;;  %v10640_v45 = vld [vmem:[#allocation84_spill] sm:$0xff] }
 0x11c   :  { %1157 = vmatpush.msrb.mxu2 %v10627_v56  ;;  %v10641_v56 = vld [vmem:[#allocation85_spill] sm:$0xff] }
 0x11d   :  { %1118 = vmatpush.msra.mxu0 %v10628_v63  ;;  %v10642_v63 = vld [vmem:[#allocation88_spill] sm:$0xff] }
 0x11e   :  { %1158 = vmatpush.msrb.mxu2 %v10629_v7  ;;  %v10643_v7 = vld [vmem:[#allocation89_spill] sm:$0xff] }
 0x11f   :  { %1119 = vmatpush.msra.mxu0 %v10630_v38  ;;  %v10644_v38 = vld [vmem:[#allocation92_spill] sm:$0xff] }
 0x120   :  { %1159 = vmatpush.msrb.mxu2 %v10631_v42  ;;  %v10645_v42 = vld [vmem:[#allocation93_spill] sm:$0xff] }
 0x121   :  { %1120 = vmatpush.msra.mxu0 %v10632_v47  ;;  %v10646_v47 = vld [vmem:[#allocation94_spill] sm:$0xff] }
 0x122   :  { %1160 = vmatpush.msrb.mxu2 %v10633_v39  ;;  %v10647_v39 = vld [vmem:[#allocation95_spill] sm:$0xff] }
 0x123   :  { %1121 = vmatpush.msra.mxu0 %v10634_v20  ;;  %v10648_v20 = vld [vmem:[#allocation96_spill] sm:$0xff] }
 0x124   :  { %1161 = vmatpush.msrb.mxu2 %v10635_v52  ;;  %v10649_v52 = vld [vmem:[#allocation97_spill] sm:$0xff] }
 0x125   :  { %1122 = vmatpush.msra.mxu0 %v10636_v51  ;;  %v10650_v51 = vld [vmem:[#allocation98_spill] sm:$0xff] }
 0x126   :  { %1162 = vmatpush.msrb.mxu2 %v10637_v1  ;;  %v10651_v1 = vld [vmem:[#allocation99_spill] sm:$0xff] }
 0x127   :  { %1123 = vmatpush.msra.mxu0 %v10638_v61 }
 0x128   :  { %1163 = vmatpush.msrb.mxu2 %v10639_v28 }
 0x129   :  { %1124 = vmatpush.msra.mxu0 %v10640_v45 }
 0x12a   :  { %1164 = vmatpush.msrb.mxu2 %v10641_v56 }
 0x12b   :  { %1125 = vmatpush.msra.mxu0 %v10642_v63  ;;  %v10661_v63 = vld [vmem:[#allocation103_spill] sm:$0xff] }
 0x12c   :  { %1165 = vmatpush.msrb.mxu2 %v10643_v7 }
 0x12d   :  { %1190 = vmatpush.msrb.mxu0 %v10644_v38 }
 0x12e   :  { %1230 = vmatpush.msra.mxu2 %v10645_v42  ;;  %v10662_v42 = vld [vmem:[#allocation102_spill] sm:$0xff] }
 0x12f   :  { %1191 = vmatpush.msrb.mxu0 %v10646_v47 }
 0x130   :  { %1231 = vmatpush.msra.mxu2 %v10647_v39 }
 0x131   :  { %1192 = vmatpush.msrb.mxu0 %v10648_v20 }
 0x132   :  { %1232 = vmatpush.msra.mxu2 %v10649_v52 }
 0x133   :  { %1193 = vmatpush.msrb.mxu0 %v10650_v51 }
 0x134   :  { %1233 = vmatpush.msra.mxu2 %v10651_v1 }
 0x135   :  { %1194 = vmatpush.msrb.mxu0 %v6011_v6  ;;  %v10652_v6 = vld [vmem:[#allocation104_spill] sm:$0xff] }
 0x136   :  { %1234 = vmatpush.msra.mxu2 %v6013_v49  ;;  %v10653_v49 = vld [vmem:[#allocation105_spill] sm:$0xff] }
 0x137   :  { %1195 = vmatpush.msrb.mxu0 %v6026_v55  ;;  %v10655_v55 = vld [vmem:[#allocation109_spill] sm:$0xff] }
 0x138   :  { %1235 = vmatpush.msra.mxu2 %v6028_v53  ;;  %v10654_v53 = vld [vmem:[#allocation107_spill] sm:$0xff] }
 0x139   :  { %1196 = vmatpush.msrb.mxu0 %v6038_v12  ;;  %v10656_v12 = vld [vmem:[#allocation110_spill] sm:$0xff] }
 0x13a   :  { %1236 = vmatpush.msra.mxu2 %v6040_v22  ;;  %v10657_v22 = vld [vmem:[#allocation111_spill] sm:$0xff] }
 0x13b   :  { %1197 = vmatpush.msrb.mxu0 %v6048_v9  ;;  %v10658_v9 = vld [vmem:[#allocation112_spill] sm:$0xff] }
 0x13c   :  { %1237 = vmatpush.msra.mxu2 %v6054_v14  ;;  %v677_v14 = vpop.f32.mrf.mxu1 }
 0x13d   :  { %1198 = vmatpush.msrb.mxu0 %v6056_v50 }
 0x13e   :  { %1238 = vmatpush.msra.mxu2 %v6058_v35  ;;  %v254_v35 = vld [vmem:[%s9908_s5] sm:$0xf] }
 0x13f   :  { %1199 = vmatpush.msrb.mxu0 %v6064_v26  ;;  %v717_v26 = vpop.f32.mrf.mxu3 }
 0x140   :  { %1239 = vmatpush.msra.mxu2 %v10652_v6 }
 0x141   :  { %1200 = vmatpush.msrb.mxu0 %v6076_v58  ;;  %v6499_v58 = vperm.slane %v254_v35, 0 }
 0x142   :  { %1240 = vmatpush.msra.mxu2 %v6078_v44 }
 0x143   :  { %1201 = vmatpush.msrb.mxu0 %v6087_v48  ;;  %10659 = vst [vmem:[#allocation16_spill] sm:$0xff] %v6499_v58 }
 0x144   :  { %1241 = vmatpush.msra.mxu2 %v10653_v49  ;;  %v757_v50 = vpop.f32.mrf.mxu1  ;;  %v6507_v49 = vperm.slane %v254_v35, 3 }
 0x145   :  { %1202 = vmatpush.msrb.mxu0 %v10654_v53 }
 0x146   :  { %1242 = vmatpush.msra.mxu2 %v6111_v57  ;;  %10663 = vst [vmem:[#allocation18_spill] sm:$0xff] %v6507_v49 }
 0x147   :  { %1203 = vmatpush.msrb.mxu0 %v6123_v3 }
 0x148   :  { %1243 = vmatpush.msra.mxu2 %v10655_v55 }
 0x149   :  { %1204 = vmatpush.msrb.mxu0 %v6136_v16  ;;  %v6502_v16 = vperm.slane %v254_v35, 1 }
 0x14a   :  { %1244 = vmatpush.msra.mxu2 %v10656_v12 }
 0x14b   :  { %1205 = vmatpush.msrb.mxu0 %v10657_v22  ;;  %10660 = vst [vmem:[#allocation17_spill] sm:$0xff] %v6502_v16  ;;  %v10664_v22 = vld [vmem:[#allocation101_spill] sm:$0xff] }
 0x14c   :  { %1245 = vmatpush.msra.mxu2 %v10658_v9 }
 0x14d   :  { %v797_v45 = vpop.f32.mrf.mxu3 }
 0x169   :  { %v657_v44 = vpop.f32.mrf.mxu0 }
 0x16a   :  { %v658_v48 = vadd.f32 %v657_v44, %v6499_v58  ;;  %v900_v57 = vpop.f32.mrf.mxu1 }
 0x16b   :  { %v948_v28 = vrot.slane %v900_v57, 7  ;;  %v964_v7 = vadd.f32 %v900_v57, %v10661_v63 }
 0x16c   :  { %v678_v3 = vadd.f32 %v677_v14, %v658_v48 }
 0x16d   :  { %v960_v47 = vadd.f32 %v948_v28, %v10662_v42  ;;  %v4286_v20 = vmul.f32 -1.442695, %v964_v7 }
 0x16e   :  { %v4280_v61 = vmul.f32 -1.442695, %v678_v3 }
 0x16f   :  { %v697_v56 = vpop.f32.mrf.mxu2  ;;  %v4285_v1 = vmul.f32 -1.442695, %v960_v47 }
 0x170   :  { %4386 = vpow2.f32 %v4280_v61  ;;  %v698_v38 = vadd.f32 %v697_v56, %v6502_v16 }
 0x171   :  { %v940_v53 = vpop.f32.mrf.mxu3  ;;  %v737_v57 = vpop.f32.mrf.mxu0 }
 0x172   :  { %v718_v39 = vadd.f32 %v717_v26, %v698_v38  ;;  %v966_v9 = vadd.f32 %v940_v53, %v10664_v22  ;;  %v6511_v26 = vperm.slane %v254_v35, 2  ;;  %v950_v61 = vrot.slane %v940_v53, 7 }
 0x174   :  { %v4281_v52 = vmul.f32 -1.442695, %v718_v39  ;;  %10665 = vst [vmem:[#allocation19_spill] sm:$0xff] %v6511_v26  ;;  %v4288_v7 = vmul.f32 -1.442695, %v966_v9  ;;  %v738_v39 = vadd.f32 %v737_v57, %v6511_v26 }
 0x176   :  { %v4387_v51 = vpop.eup %4386  ;;  %4388 = vpow2.f32 %v4281_v52  ;;  %v758_v53 = vadd.f32 %v757_v50, %v738_v39 }
 0x177   :  { %v803_v6 = vadd.f32 1.0, %v4387_v51  ;;  %4390 = vpow2.f32 %v4286_v20  ;;  %v10666_v51 = vld [vmem:[#allocation100_spill] sm:$0xff] }
 0x178   :  { %v777_v55 = vpop.f32.mrf.mxu2 }
 0x179   :  { %4392 = vrcp.f32 %v803_v6  ;;  %v778_v14 = vadd.f32 %v777_v55, %v6507_v49  ;;  %v813_v9 = vand.u32 2147483647, %v803_v6  ;;  %vm809_vm12 = vweird.f32 %v803_v6 }
 0x17a   :  { %4394 = vpow2.f32 %v4285_v1  ;;  %v962_v1 = vadd.f32 %v950_v61, %v10666_v51  ;;  %v10670_v51 = vld [vmem:[#allocation77_spill] sm:$0xff] }
 0x17b   :  { %v798_v38 = vadd.f32 %v797_v45, %v778_v14  ;;  %v815_v14 = vand.u32 2147483648, %v803_v6  ;;  %vm814_vm15 = vcmp.eq.f32.partialorder %v813_v9, 8.507059e+37 }
 0x17c   :  { %v4389_v12 = vpop.eup %4388  ;;  %v4287_v45 = vmul.f32 -1.442695, %v962_v1 }
 0x17d   :  { %v822_v44 = vadd.f32 1.0, %v4389_v12  ;;  %v4391_v48 = vpop.eup %4390  ;;  %v4282_v55 = vmul.f32 -1.442695, %v798_v38 }
 0x17e   :  { %v6513_v47 = vadd.f32 1.0, %v4391_v48 }
 0x17f   :  { %v4393_v3 = vpop.eup %4392  ;;  %4396 = vrcp.f32 %v822_v44  ;;  %v834_v57 = vand.u32 2147483648, %v822_v44  ;;  %vm828_vm0 = vweird.f32 %v822_v44 }
 0x180   :  { %v4395_v28 = vpop.eup %4394  ;;  %v805_v56 = vmul.f32 %v4393_v3, %v803_v6  ;;  %4398 = vpow2.f32 %v4288_v7  ;;  %vm810_vm11 = vweird.f32 %v4393_v3  ;;  %v816_v6 = vor.u32 1.1754944e-38, %v815_v14 }
 0x181   :  { %v6516_v52 = vadd.f32 1.0, %v4395_v28  ;;  %4400 = vrcp.f32 %v6513_v47  ;;  %vm6521_vm13 = vmor %vm809_vm12, %vm810_vm11  ;;  %v832_v28 = vand.u32 2147483647, %v822_v44  ;;  %vm1033_vm3 = vweird.f32 %v6513_v47 }
 0x182   :  { %v806_v20 = vsub.f32 1.0, %v805_v56  ;;  %4402 = vpow2.f32 %v4282_v55 }
 0x183   :  { %4404 = vrcp.f32 %v6516_v52  ;;  %vm833_vm2 = vcmp.eq.f32.partialorder %v832_v28, 8.507059e+37  ;;  %vm1018_vm4 = vweird.f32 %v6516_v52  ;;  %v1022_v58 = vand.u32 2147483647, %v6516_v52 }
 0x184   :  { %v807_v35 = vmul.f32 %v4393_v3, %v806_v20  ;;  %4406 = vtanh.f32 %v758_v53  ;;  %v10669_v20 = vld [vmem:[#allocation80_spill] sm:$0xff] }
 0x185   :  { %v4397_v12 = vpop.eup %4396  ;;  %4408 = vpow2.f32 %v4287_v45 }
 0x186   :  { %v824_v22 = vmul.f32 %v4397_v12, %v822_v44  ;;  %v808_v63 = vadd.f32 %v4393_v3, %v807_v35  ;;  %vm829_vm14 = vweird.f32 %v4397_v12  ;;  %v4399_v56 = vpop.eup %4398 }
 0x187   :  { %v6528_v35 = vpop.eup %4400  ;;  %v6533_v42 = vadd.f32 1.0, %v4399_v56  ;;  %vm830_vm1 = vmor %vm828_vm0, %vm829_vm14 }
 0x188   :  { %v825_v48 = vsub.f32 1.0, %v824_v22  ;;  %v812_v38 = vsel %vm6521_vm13, %v4393_v3, %v808_v63  ;;  %v4403_v22 = vpop.eup %4402  ;;  %v1029_v44 = vmul.f32 %v6528_v35, %v6513_v47  ;;  %vm1034_vm6 = vweird.f32 %v6528_v35 }
 0x189   :  { %v880_v50 = vpop.f32.mrf.mxu0  ;;  %v6531_v49 = vpop.eup %4404  ;;  %v817_v63 = vsel %vm814_vm15, %v816_v6, %v812_v38  ;;  %v6536_v3 = vadd.f32 1.0, %v4403_v22  ;;  %v1039_v6 = vand.u32 2147483648, %v6513_v47  ;;  %vm6586_vm11 = vmor %vm1033_vm3, %vm1034_vm6  ;;  %vm1023_vm3 = vcmp.eq.f32.partialorder %v1022_v58, 8.507059e+37  ;;  %v6626_v58 = vld [vmem:[#allocation2 + $0x1f8] sm:$0xff] }
 0x18a   :  { %v826_v7 = vmul.f32 %v4397_v12, %v825_v48  ;;  %v947_v39 = vrot.slane %v880_v50, 7  ;;  %v963_v1 = vadd.f32 %v880_v50, %v10669_v20  ;;  %v835_v48 = vor.u32 1.1754944e-38, %v834_v57  ;;  %v4407_v9 = vpop.eup %4406 }
 0x18b   :  { %v1014_v57 = vmul.f32 %v6531_v49, %v6516_v52  ;;  %v859_v56 = vmul.f32 %v4407_v9, %v817_v63  ;;  %vm1019_vm7 = vweird.f32 %v6531_v49  ;;  %vm848_vm8 = vweird.f32 %v6536_v3 }
 0x18c   :  { %v827_v55 = vadd.f32 %v4397_v12, %v826_v7  ;;  %v959_v26 = vadd.f32 %v947_v39, %v10670_v51  ;;  %v4284_v53 = vmul.f32 -1.442695, %v963_v1  ;;  %v4409_v7 = vpop.eup %4408  ;;  %vm6599_vm14 = vmor %vm1018_vm4, %vm1019_vm7 }
 0x18d   :  { %v1015_v38 = vsub.f32 1.0, %v1014_v57  ;;  %v6546_v39 = vadd.f32 1.0, %v4409_v7  ;;  %v854_v7 = vand.u32 2147483648, %v6536_v3 }
 0x18e   :  { %v831_v61 = vsel %vm830_vm1, %v4397_v12, %v827_v55  ;;  %v4283_v45 = vmul.f32 -1.442695, %v959_v26  ;;  %4410 = vpow2.f32 %v4284_v53  ;;  %v1030_v26 = vsub.f32 1.0, %v1029_v44 }
 0x18f   :  { %v836_v14 = vsel %vm833_vm2, %v835_v48, %v831_v61  ;;  %4412 = vrcp.f32 %v6536_v3  ;;  %v1016_v44 = vmul.f32 %v6531_v49, %v1015_v38  ;;  %v855_v33 = vor.u32 1.1754944e-38, %v854_v7 }
 0x190   :  { %v858_v50 = vmul.f32 0.0, %v836_v14  ;;  %4414 = vpow2.f32 %v4283_v45  ;;  %v1031_v61 = vmul.f32 %v6528_v35, %v1030_v26  ;;  %v920_v57 = vpop.f32.mrf.mxu2  ;;  %v1037_v26 = vand.u32 2147483647, %v6513_v47 }
 0x191   :  { %4416 = vrcp.f32 %v6533_v42 }
 0x192   :  { %v6544_v12 = vadd.f32 %v859_v56, %v858_v50  ;;  %v1024_v50 = vand.u32 2147483648, %v6516_v52  ;;  %v1040_v56 = vor.u32 1.1754944e-38, %v1039_v6  ;;  %v1032_v53 = vadd.f32 %v6528_v35, %v1031_v61 }
 0x193   :  { %v1017_v6 = vadd.f32 %v6531_v49, %v1016_v44  ;;  %vm6591_vm12 = vcmp.eq.f32.partialorder %v1037_v26, 8.507059e+37 }
 0x194   :  { %10671 = vst [vmem:[#allocation20_spill] sm:$0xff] %v6544_v12  ;;  %v4411_v28 = vpop.eup %4410  ;;  %4418 = vtanh.f32 %v6544_v12  ;;  %v1025_v51 = vor.u32 1.1754944e-38, %v1024_v50  ;;  %v10672_v12 = vld [vmem:[#allocation108_spill] sm:$0xff]  ;;  %v1036_v26 = vsel %vm6586_vm11, %v6528_v35, %v1032_v53 }
 0x195   :  { %v4413_v1 = vpop.eup %4412  ;;  %v6549_v22 = vadd.f32 1.0, %v4411_v28  ;;  %v965_v16 = vadd.f32 %v920_v57, %v10672_v12 }
 0x196   :  { %v4415_v55 = vpop.eup %4414  ;;  %v844_v48 = vmul.f32 %v4413_v1, %v6536_v3  ;;  %vm849_vm5 = vweird.f32 %v4413_v1 }
 0x197   :  { %v6557_v45 = vadd.f32 1.0, %v4415_v55  ;;  %4420 = vrcp.f32 %v6549_v22  ;;  %v6560_v9 = vpop.eup %4416  ;;  %v852_v55 = vand.u32 2147483647, %v6536_v3  ;;  %vm850_vm9 = vmor %vm848_vm8, %vm849_vm5  ;;  %vm995_vm0 = vweird.f32 %v6549_v22 }
 0x198   :  { %4422 = vrcp.f32 %v6546_v39  ;;  %v845_v14 = vsub.f32 1.0, %v844_v48  ;;  %v1069_v38 = vmul.f32 %v6560_v9, %v6533_v42  ;;  %v949_v48 = vrot.slane %v920_v57, 7 }
 0x199   :  { %4424 = vrcp.f32 %v6557_v45  ;;  %vm853_vm13 = vcmp.eq.f32.partialorder %v852_v55, 8.507059e+37  ;;  %v1021_v55 = vsel %vm6599_vm14, %v6531_v49, %v1017_v6  ;;  %v984_v35 = vand.u32 2147483647, %v6557_v45 }
 0x19a   :  { %v846_v28 = vmul.f32 %v4413_v1, %v845_v14  ;;  %v4419_v63 = vpop.eup %4418  ;;  %v1070_v47 = vsub.f32 1.0, %v1069_v38  ;;  %v999_v38 = vand.u32 2147483647, %v6549_v22  ;;  %4426 = vtanh.f32 %v965_v16 }
 0x19b   :  { %v986_v53 = vand.u32 2147483648, %v6557_v45  ;;  %v1041_v16 = vsel %vm6591_vm12, %v1040_v56, %v1036_v26  ;;  %vm980_vm4 = vweird.f32 %v6557_v45  ;;  %vm985_vm7 = vcmp.eq.f32.partialorder %v984_v35, 8.507059e+37  ;;  %v6647_v35 = vld [vmem:[#allocation2 + $0x1b8] sm:$0xff] }
 0x19c   :  { %v847_v20 = vadd.f32 %v4413_v1, %v846_v28  ;;  %v10679_v28 = vld [vmem:[#allocation106_spill] sm:$0xff]  ;;  %vm1000_vm5 = vcmp.eq.f32.partialorder %v999_v38, 8.507059e+37  ;;  %v10680_v56 = vrot.slane %v6249_v4, 7  ;;  %v6632_v38 = vld [vmem:[#allocation2 + $0x1c8] sm:$0xff]  ;;  %vm1074_vm8 = vweird.f32 %v6560_v9 }
 0x19d   :  { %v4421_v14 = vpop.eup %4420  ;;  %v961_v12 = vadd.f32 %v949_v48, %v10679_v28  ;;  %v1001_v48 = vand.u32 2147483648, %v6549_v22 }
 0x19e   :  { %v6580_v15 = vpop.eup %4422  ;;  %v991_v3 = vmul.f32 %v4421_v14, %v6549_v22  ;;  %v851_v57 = vsel %vm850_vm9, %v4413_v1, %v847_v20  ;;  %vm996_vm15 = vweird.f32 %v4421_v14  ;;  %vm1073_vm9 = vweird.f32 %v6533_v42 }
 0x19f   :  { %v4425_v50 = vpop.eup %4424  ;;  %v856_v21 = vsel %vm853_vm13, %v855_v33, %v851_v57  ;;  %v1054_v54 = vmul.f32 %v6580_v15, %v6546_v39  ;;  %4428 = vtanh.f32 %v961_v12  ;;  %vm997_vm2 = vmor %vm995_vm0, %vm996_vm15  ;;  %v1071_v12 = vmul.f32 %v6560_v9, %v1070_v47 }
 0x1a0   :  { %v976_v20 = vmul.f32 %v4425_v50, %v6557_v45  ;;  %v992_v1 = vsub.f32 1.0, %v991_v3  ;;  %v862_v52 = vmul.f32 %v4419_v63, %v856_v21  ;;  %vm981_vm1 = vweird.f32 %v4425_v50  ;;  %v4427_v22 = vpop.eup %4426  ;;  %vm6666_vm12 = vmor %vm1073_vm9, %vm1074_vm8 }
 0x1a1   :  { %v1055_v6 = vsub.f32 1.0, %v1054_v54  ;;  %v1002_v3 = vor.u32 1.1754944e-38, %v1001_v48  ;;  %vm982_vm6 = vmor %vm980_vm4, %vm981_vm1  ;;  %v1072_v4 = vadd.f32 %v6560_v9, %v1071_v12  ;;  %vm1059_vm11 = vweird.f32 %v6580_v15 }
 0x1a2   :  { %v977_v28 = vsub.f32 1.0, %v976_v20  ;;  %v993_v61 = vmul.f32 %v4421_v14, %v992_v1  ;;  %v1105_v33 = vrot.slane %v862_v52, 7  ;;  %v1026_v20 = vsel %vm1023_vm3, %v1025_v51, %v1021_v55  ;;  %v6623_v1 = vld [vmem:[#allocation2 + $0x1e8] sm:$0xff]  ;;  %v6635_v51 = vld [vmem:[#allocation2 + $0x1d8] sm:$0xff] }
 0x1a3   :  { %v1056_v26 = vmul.f32 %v6580_v15, %v1055_v6  ;;  %v10681_v55 = vrot.slane %v6244_v13, 7  ;;  %v1077_v13 = vand.u32 2147483647, %v6533_v42  ;;  %v6659_v6 = vld [vmem:[#allocation2 + $0x198] sm:$0xff]  ;;  %vm1058_vm13 = vweird.f32 %v6546_v39 }
 0x1a4   :  { %v978_v21 = vmul.f32 %v4425_v50, %v977_v28  ;;  %v994_v49 = vadd.f32 %v4421_v14, %v993_v61  ;;  %v1107_v63 = vrot.slane %v1105_v33, 1  ;;  %v987_v28 = vor.u32 1.1754944e-38, %v986_v53  ;;  %v6644_v33 = vld [vmem:[#allocation2 + $0x1a8] sm:$0xff]  ;;  %vm6683_vm14 = vmor %vm1058_vm13, %vm1059_vm11 }
 0x1a5   :  { %v4429_v47 = vpop.eup %4428  ;;  %v1079_v53 = vand.u32 2147483648, %v6533_v42  ;;  %v1064_v42 = vand.u32 2147483648, %v6546_v39  ;;  %v1076_v12 = vsel %vm6666_vm12, %v6560_v9, %v1072_v4  ;;  %vm1078_vm15 = vcmp.eq.f32.partialorder %v1077_v13, 8.507059e+37  ;;  %v6708_v4 = vld [vmem:[#allocation2 + $0xe8] sm:$0xff] }
 0x1a6   :  { %v979_v57 = vadd.f32 %v4425_v50, %v978_v21  ;;  %v998_v7 = vsel %vm997_vm2, %v4421_v14, %v994_v49  ;;  %1146 = vmatmul.f32.vlgmr.msra.gmra.mxu1 %v1107_v63  ;;  %1186 = vmatmul.f32.vlgmr.msrb.gmra.mxu3 %v1107_v63  ;;  %v1090_v14 = vmul.f32 %v10680_v56, %v1041_v16  ;;  %v6656_v49 = vld [vmem:[#allocation2 + $0x188] sm:$0xff]  ;;  %vm1102_vm1 = vcmask 1042434  }
 0x1a7   :  { %v1003_v54 = vsel %vm1000_vm5, %v1002_v3, %v998_v7  ;;  %1356 = vmatpush.msra.mxu1 %v6623_v1  ;;  %1396 = vmatpush.msrb.mxu3 %v6626_v58  ;;  %v1057_v3 = vadd.f32 %v6580_v15, %v1056_v26  ;;  %v6675_v7 = vld [vmem:[#allocation2 + $0x178] sm:$0xff]  ;;  %v1065_v9 = vor.u32 1.1754944e-38, %v1064_v42  ;;  %v6714_v42 = vld [vmem:[#allocation2 + $0xc8] sm:$0xff] }
 0x1a8   :  { %v983_v45 = vsel %vm982_vm6, %v4425_v50, %v979_v57  ;;  %v1092_v44 = vmul.f32 %v4427_v22, %v1003_v54  ;;  %v1089_v50 = vmul.f32 %v10681_v55, %v1026_v20  ;;  %v6672_v57 = vld [vmem:[#allocation2 + $0x168] sm:$0xff]  ;;  %v1062_v22 = vand.u32 2147483647, %v6546_v39  ;;  %v6690_v20 = vld [vmem:[#allocation2 + $0x158] sm:$0xff] }
 0x1a9   :  { %v988_v52 = vsel %vm985_vm7, %v987_v28, %v983_v45  ;;  %1357 = vmatpush.msra.mxu1 %v6632_v38  ;;  %1397 = vmatpush.msrb.mxu3 %v6635_v51  ;;  %v1080_v28 = vor.u32 1.1754944e-38, %v1079_v53  ;;  %v6687_v54 = vld [vmem:[#allocation2 + $0x148] sm:$0xff]  ;;  %v1061_v39 = vsel %vm6683_vm14, %v6580_v15, %v1057_v3  ;;  %v6705_v15 = vld [vmem:[#allocation2 + $0x118] sm:$0xff] }
 0x1aa   :  { %v1091_v48 = vmul.f32 %v4429_v47, %v988_v52  ;;  %v6640_v61 = vadd.f32 %v1092_v44, %v1090_v14  ;;  %v6696_v14 = vld [vmem:[#allocation2 + $0x128] sm:$0xff]  ;;  %v6699_v44 = vld [vmem:[#allocation2 + $0x138] sm:$0xff]  ;;  %vm1063_vm0 = vcmp.eq.f32.partialorder %v1062_v22, 8.507059e+37 }
 0x1ab   :  { %1358 = vmatpush.msra.mxu1 %v6644_v33  ;;  %1398 = vmatpush.msrb.mxu3 %v6647_v35  ;;  %v1081_v56 = vsel %vm1078_vm15, %v1080_v28, %v1076_v12  ;;  %v1066_v52 = vsel %vm1063_vm0, %v1065_v9, %v1061_v39  ;;  %v6702_v55 = vld [vmem:[#allocation2 + $0x108] sm:$0xff]  ;;  %v6711_v53 = vld [vmem:[#allocation2 + $0xf8] sm:$0xff] }
 0x1ac   :  { %v6651_v21 = vadd.f32 %v1091_v48, %v1089_v50  ;;  %4430 = vtanh.f32 %v6640_v61  ;;  %v6717_v22 = vld [vmem:[#allocation2 + $0xd8] sm:$0xff]  ;;  %v6723_v28 = vld [vmem:[#allocation2 + $0xa8] sm:$0xff] }
 0x1ad   :  { %1359 = vmatpush.msra.mxu1 %v6656_v49  ;;  %1399 = vmatpush.msrb.mxu3 %v6659_v6  ;;  %v6731_v39 = vld [vmem:[#allocation2 + $0x88] sm:$0xff] }
 0x1ae   :  { %4432 = vtanh.f32 %v6651_v21  ;;  %1226 = vmatmul.f32.vlgmr.msrb.gmra.mxu1 %v1107_v63  ;;  %1266 = vmatmul.f32.vlgmr.msra.gmra.mxu3 %v1107_v63  ;;  %v6726_v63 = vld [vmem:[#allocation2 + $0xb8] sm:$0xff]  ;;  %v6739_v9 = vld [vmem:[#allocation2 + $0x68] sm:$0xff] }
 0x1af   :  { %1360 = vmatpush.msra.mxu1 %v6672_v57  ;;  %1400 = vmatpush.msrb.mxu3 %v6675_v7 }
 0x1b1   :  { %1361 = vmatpush.msra.mxu1 %v6687_v54  ;;  %1401 = vmatpush.msrb.mxu3 %v6690_v20 }
 0x1b2   :  { %v4431_v45 = vpop.eup %4430 }
 0x1b3   :  { %1362 = vmatpush.msra.mxu1 %v6696_v14  ;;  %1402 = vmatpush.msrb.mxu3 %v6699_v44  ;;  %v1098_v47 = vmul.f32 %v4431_v45, %v1081_v56  ;;  %v6734_v45 = vld [vmem:[#allocation2 + $0x98] sm:$0xff] }
 0x1b4   :  { %v4433_v26 = vpop.eup %4432  ;;  %v6742_v56 = vld [vmem:[#allocation2 + $0x78] sm:$0xff] }
 0x1b5   :  { %1363 = vmatpush.msra.mxu1 %v6702_v55  ;;  %1403 = vmatpush.msrb.mxu3 %v6705_v15  ;;  %v1097_v50 = vmul.f32 %v4433_v26, %v1066_v52  ;;  %v1101_v48 = vrot.slane %v1098_v47, 7  ;;  %v6782_v26 = vld [vmem:[#allocation5 + $0x3c8] sm:$0xff] }
 0x1b6   :  { %10689 = vst [vmem:[#allocation24_spill] sm:$0xff] %v6782_v26  ;;  %v6846_v52 = vld [vmem:[#allocation5 + $0x2c8] sm:$0xff] }
 0x1b7   :  { %1364 = vmatpush.msra.mxu1 %v6708_v4  ;;  %1404 = vmatpush.msrb.mxu3 %v6711_v53  ;;  %v1103_v13 = vsel %vm1102_vm1, %v1101_v48, %v1097_v50  ;;  %v1333_v3 = vrot.slane %v1097_v50, 1  ;;  %10706 = vst [vmem:[#allocation52_spill] sm:$0xff] %v6846_v52  ;;  %v6851_v50 = vld [vmem:[#allocation5 + $0x2a0] sm:$0xff]  ;;  %v6854_v48 = vld [vmem:[#allocation5 + $0x2a8] sm:$0xff] }
 0x1b8   :  { %v1106_v16 = vrot.slane %v1103_v13, 1  ;;  %10709 = vst [vmem:[#allocation55_spill] sm:$0xff] %v6851_v50  ;;  %v10712_v13 = vld [vmem:[#allocation15_spill] sm:$0xff] }
 0x1b9   :  { %1365 = vmatpush.msra.mxu1 %v6714_v42  ;;  %1405 = vmatpush.msrb.mxu3 %v6717_v22  ;;  %v6721_v12 = vsel %vm637_vm10, %v1098_v47, %v1333_v3  ;;  %v6779_v47 = vld [vmem:[#allocation5 + $0x3c0] sm:$0xff]  ;;  %10710 = vst [vmem:[#allocation56_spill] sm:$0xff] %v6854_v48 }
 0x1ba   :  { %1126 = vmatmul.f32.vlgmr.msra.gmra.mxu0 %v1106_v16  ;;  %1166 = vmatmul.f32.vlgmr.msrb.gmra.mxu2 %v1106_v16  ;;  %10688 = vst [vmem:[#allocation23_spill] sm:$0xff] %v6779_v47  ;;  %v6861_v3 = vld [vmem:[#allocation5 + $0x280] sm:$0xff] }
 0x1bb   :  { %1366 = vmatpush.msra.mxu1 %v6723_v28  ;;  %1406 = vmatpush.msrb.mxu3 %v6726_v63  ;;  %10713 = vst [vmem:[#allocation59_spill] sm:$0xff] %v6861_v3 }
 0x1bc   :  { %1336 = vmatpush.msra.mxu0 %v6290_v19  ;;  %1376 = vmatpush.msrb.mxu2 %v6294_v5  ;;  %v6747_v19 = vld [vmem:[#allocation2 + $0x48] sm:$0xff]  ;;  %v6750_v5 = vld [vmem:[#allocation2 + $0x58] sm:$0xff] }
 0x1bd   :  { %1367 = vmatpush.msra.mxu1 %v6731_v39  ;;  %1407 = vmatpush.msrb.mxu3 %v6734_v45 }
 0x1be   :  { %1337 = vmatpush.msra.mxu0 %v6298_v59  ;;  %1377 = vmatpush.msrb.mxu2 %v6302_v18  ;;  %v6755_v59 = vld [vmem:[#allocation2 + $0x28] sm:$0xff]  ;;  %v6758_v18 = vld [vmem:[#allocation2 + $0x38] sm:$0xff] }
 0x1bf   :  { %1368 = vmatpush.msra.mxu1 %v6739_v9  ;;  %1408 = vmatpush.msrb.mxu3 %v6742_v56 }
 0x1c0   :  { %1338 = vmatpush.msra.mxu0 %v6306_v41  ;;  %1378 = vmatpush.msrb.mxu2 %v6310_v23  ;;  %v6761_v41 = vld [vmem:[#allocation2 + $0x8] sm:$0xff]  ;;  %v6764_v23 = vld [vmem:[#allocation2 + $0x18] sm:$0xff] }
 0x1c1   :  { %1369 = vmatpush.msra.mxu1 %v6747_v19  ;;  %1409 = vmatpush.msrb.mxu3 %v6750_v5 }
 0x1c2   :  { %1339 = vmatpush.msra.mxu0 %v6314_v11  ;;  %1379 = vmatpush.msrb.mxu2 %v6318_v0  ;;  %v6771_v11 = vld [vmem:[#allocation5 + $0x3e0] sm:$0xff]  ;;  %v6774_v0 = vld [vmem:[#allocation5 + $0x3e8] sm:$0xff] }
 0x1c3   :  { %1370 = vmatpush.msra.mxu1 %v6755_v59  ;;  %1410 = vmatpush.msrb.mxu3 %v6758_v18  ;;  %10686 = vst [vmem:[#allocation21_spill] sm:$0xff] %v6771_v11 }
 0x1c4   :  { %1206 = vmatmul.f32.vlgmr.msrb.gmra.mxu0 %v1106_v16  ;;  %1246 = vmatmul.f32.vlgmr.msra.gmra.mxu2 %v1106_v16  ;;  %10687 = vst [vmem:[#allocation22_spill] sm:$0xff] %v6774_v0  ;;  %v6864_v16 = vld [vmem:[#allocation5 + $0x288] sm:$0xff] }
 0x1c5   :  { %1371 = vmatpush.msra.mxu1 %v6761_v41  ;;  %1411 = vmatpush.msrb.mxu3 %v6764_v23  ;;  %10714 = vst [vmem:[#allocation60_spill] sm:$0xff] %v6864_v16 }
 0x1c6   :  { %1372 = vmatmul.f32.vlgmr.msra.gmra.mxu1 %v6721_v12  ;;  %1412 = vmatmul.f32.vlgmr.msrb.gmra.mxu3 %v6721_v12 }
 0x1c7   :  { %1340 = vmatpush.msra.mxu0 %v6323_v27  ;;  %1380 = vmatpush.msrb.mxu2 %v6326_v36  ;;  %v6787_v27 = vld [vmem:[#allocation5 + $0x3a0] sm:$0xff]  ;;  %v6790_v36 = vld [vmem:[#allocation5 + $0x3a8] sm:$0xff] }
 0x1c8   :  { %1607 = vmatpush.msrb.mxu1 %v6771_v11  ;;  %1647 = vmatpush.msra.mxu3 %v6774_v0  ;;  %10690 = vst [vmem:[#allocation25_spill] sm:$0xff] %v6787_v27 }
 0x1c9   :  { %1341 = vmatpush.msra.mxu0 %v6330_v34  ;;  %1381 = vmatpush.msrb.mxu2 %v6334_v40  ;;  %10691 = vst [vmem:[#allocation26_spill] sm:$0xff] %v6790_v36  ;;  %v6795_v34 = vld [vmem:[#allocation5 + $0x380] sm:$0xff]  ;;  %v6798_v40 = vld [vmem:[#allocation5 + $0x388] sm:$0xff] }
 0x1ca   :  { %1608 = vmatpush.msrb.mxu1 %v6779_v47  ;;  %1648 = vmatpush.msra.mxu3 %v6782_v26  ;;  %10692 = vst [vmem:[#allocation27_spill] sm:$0xff] %v6795_v34 }
 0x1cb   :  { %1342 = vmatpush.msra.mxu0 %v6338_v29  ;;  %1382 = vmatpush.msrb.mxu2 %v6342_v43  ;;  %10693 = vst [vmem:[#allocation28_spill] sm:$0xff] %v6798_v40  ;;  %v6803_v29 = vld [vmem:[#allocation5 + $0x360] sm:$0xff]  ;;  %v6806_v43 = vld [vmem:[#allocation5 + $0x368] sm:$0xff] }
 0x1cc   :  { %1609 = vmatpush.msrb.mxu1 %v6787_v27  ;;  %1649 = vmatpush.msra.mxu3 %v6790_v36  ;;  %10694 = vst [vmem:[#allocation31_spill] sm:$0xff] %v6803_v29 }
 0x1cd   :  { %1343 = vmatpush.msra.mxu0 %v6346_v62  ;;  %1383 = vmatpush.msrb.mxu2 %v6350_v37  ;;  %10695 = vst [vmem:[#allocation32_spill] sm:$0xff] %v6806_v43  ;;  %v6811_v62 = vld [vmem:[#allocation5 + $0x340] sm:$0xff]  ;;  %v6814_v37 = vld [vmem:[#allocation5 + $0x348] sm:$0xff] }
 0x1ce   :  { %1610 = vmatpush.msrb.mxu1 %v6795_v34  ;;  %1650 = vmatpush.msra.mxu3 %v6798_v40  ;;  %10696 = vst [vmem:[#allocation35_spill] sm:$0xff] %v6811_v62  ;;  %v10824_v34 = vld [vmem:[#allocation19_spill] sm:$0xff] }
 0x1cf   :  { %1344 = vmatpush.msra.mxu0 %v6354_v10  ;;  %1384 = vmatpush.msrb.mxu2 %v6358_v25  ;;  %10697 = vst [vmem:[#allocation36_spill] sm:$0xff] %v6814_v37  ;;  %v6819_v10 = vld [vmem:[#allocation5 + $0x320] sm:$0xff]  ;;  %v6822_v25 = vld [vmem:[#allocation5 + $0x328] sm:$0xff] }
 0x1d0   :  { %1611 = vmatpush.msrb.mxu1 %v6803_v29  ;;  %1651 = vmatpush.msra.mxu3 %v6806_v43  ;;  %10698 = vst [vmem:[#allocation39_spill] sm:$0xff] %v6819_v10  ;;  %v10823_v43 = vld [vmem:[#allocation103_spill] sm:$0xff] }
 0x1d1   :  { %1345 = vmatpush.msra.mxu0 %v6362_v2  ;;  %1385 = vmatpush.msrb.mxu2 %v6366_v31  ;;  %10699 = vst [vmem:[#allocation40_spill] sm:$0xff] %v6822_v25  ;;  %v6827_v2 = vld [vmem:[#allocation5 + $0x300] sm:$0xff]  ;;  %v6830_v31 = vld [vmem:[#allocation5 + $0x308] sm:$0xff] }
 0x1d2   :  { %1612 = vmatpush.msrb.mxu1 %v6811_v62  ;;  %1652 = vmatpush.msra.mxu3 %v6814_v37  ;;  %10700 = vst [vmem:[#allocation43_spill] sm:$0xff] %v6827_v2 }
 0x1d3   :  { %1346 = vmatpush.msra.mxu0 %v6370_v46  ;;  %1386 = vmatpush.msrb.mxu2 %v6374_v8  ;;  %10701 = vst [vmem:[#allocation44_spill] sm:$0xff] %v6830_v31  ;;  %v6835_v46 = vld [vmem:[#allocation5 + $0x2e0] sm:$0xff]  ;;  %v6838_v8 = vld [vmem:[#allocation5 + $0x2e8] sm:$0xff] }
 0x1d4   :  { %1613 = vmatpush.msrb.mxu1 %v6819_v10  ;;  %1653 = vmatpush.msra.mxu3 %v6822_v25  ;;  %10702 = vst [vmem:[#allocation47_spill] sm:$0xff] %v6835_v46 }
 0x1d5   :  { %1347 = vmatpush.msra.mxu0 %v6378_v60  ;;  %1387 = vmatpush.msrb.mxu2 %v6382_v24  ;;  %10703 = vst [vmem:[#allocation48_spill] sm:$0xff] %v6838_v8  ;;  %v10704_v60 = vld [vmem:[#allocation11_spill] sm:$0xff] }
 0x1d6   :  { %1614 = vmatpush.msrb.mxu1 %v6827_v2  ;;  %1654 = vmatpush.msra.mxu3 %v6830_v31  ;;  %v6843_v24 = vld [vmem:[#allocation5 + $0x2c0] sm:$0xff] }
 0x1d7   :  { %1348 = vmatpush.msra.mxu0 %v6386_v32  ;;  %1388 = vmatpush.msrb.mxu2 %v6390_v30  ;;  %10705 = vst [vmem:[#allocation51_spill] sm:$0xff] %v6843_v24  ;;  %v10707_v32 = vld [vmem:[#allocation12_spill] sm:$0xff]  ;;  %v10708_v30 = vld [vmem:[#allocation13_spill] sm:$0xff] }
 0x1d8   :  { %1615 = vmatpush.msrb.mxu1 %v6835_v46  ;;  %1655 = vmatpush.msra.mxu3 %v6838_v8  ;;  %v10820_v8 = vld [vmem:[#allocation17_spill] sm:$0xff] }
 0x1d9   :  { %1349 = vmatpush.msra.mxu0 %v6394_v17  ;;  %1389 = vmatpush.msrb.mxu2 %v10704_v60  ;;  %v10711_v17 = vld [vmem:[#allocation14_spill] sm:$0xff] }
 0x1da   :  { %1616 = vmatpush.msrb.mxu1 %v6843_v24  ;;  %1656 = vmatpush.msra.mxu3 %v6846_v52  ;;  %v6867_v60 = vld [vmem:[#allocation5 + $0x1e0] sm:$0xff] }
 0x1db   :  { %1350 = vmatpush.msra.mxu0 %v10707_v32  ;;  %1390 = vmatpush.msrb.mxu2 %v10708_v30  ;;  %10715 = vst [vmem:[#allocation63_spill] sm:$0xff] %v6867_v60  ;;  %v6870_v32 = vld [vmem:[#allocation5 + $0x1e8] sm:$0xff]  ;;  %v6873_v30 = vld [vmem:[#allocation5 + $0x260] sm:$0xff] }
 0x1dc   :  { %1617 = vmatpush.msrb.mxu1 %v6851_v50  ;;  %1657 = vmatpush.msra.mxu3 %v6854_v48  ;;  %10716 = vst [vmem:[#allocation64_spill] sm:$0xff] %v6870_v32 }
 0x1dd   :  { %1351 = vmatpush.msra.mxu0 %v10711_v17  ;;  %1391 = vmatpush.msrb.mxu2 %v10712_v13  ;;  %10717 = vst [vmem:[#allocation67_spill] sm:$0xff] %v6873_v30  ;;  %v6879_v17 = vld [vmem:[#allocation5 + $0x1c0] sm:$0xff]  ;;  %v6882_v13 = vld [vmem:[#allocation5 + $0x1c8] sm:$0xff] }
 0x1de   :  { %1352 = vmatmul.f32.vlgmr.msra.gmra.mxu0 %v6721_v12  ;;  %1392 = vmatmul.f32.vlgmr.msrb.gmra.mxu2 %v6721_v12  ;;  %v6876_v12 = vld [vmem:[#allocation5 + $0x268] sm:$0xff]  ;;  %10719 = vst [vmem:[#allocation30_spill] sm:$0xff] %v6879_v17 }
 0x1df   :  { %1618 = vmatpush.msrb.mxu1 %v6861_v3  ;;  %1658 = vmatpush.msra.mxu3 %v6864_v16  ;;  %10718 = vst [vmem:[#allocation29_spill] sm:$0xff] %v6876_v12  ;;  %v10819_v3 = vld [vmem:[#allocation16_spill] sm:$0xff] }
 0x1e0   :  { %1587 = vmatpush.msrb.mxu0 %v6867_v60  ;;  %1627 = vmatpush.msra.mxu2 %v6870_v32  ;;  %10720 = vst [vmem:[#allocation68_spill] sm:$0xff] %v6882_v13  ;;  %v6885_v60 = vld [vmem:[#allocation5 + $0x240] sm:$0xff]  ;;  %v6888_v32 = vld [vmem:[#allocation5 + $0x248] sm:$0xff] }
 0x1e1   :  { %1619 = vmatpush.msrb.mxu1 %v6873_v30  ;;  %1659 = vmatpush.msra.mxu3 %v6876_v12  ;;  %10721 = vst [vmem:[#allocation33_spill] sm:$0xff] %v6885_v60  ;;  %v6891_v30 = vld [vmem:[#allocation5 + $0x1a0] sm:$0xff]  ;;  %v6894_v12 = vld [vmem:[#allocation5 + $0x1a8] sm:$0xff] }
 0x1e2   :  { %1588 = vmatpush.msrb.mxu0 %v6879_v17  ;;  %1628 = vmatpush.msra.mxu2 %v6882_v13  ;;  %10722 = vst [vmem:[#allocation71_spill] sm:$0xff] %v6888_v32  ;;  %v6897_v17 = vld [vmem:[#allocation5 + $0x220] sm:$0xff]  ;;  %v6900_v13 = vld [vmem:[#allocation5 + $0x228] sm:$0xff] }
 0x1e3   :  { %1620 = vmatpush.msrb.mxu1 %v6885_v60  ;;  %1660 = vmatpush.msra.mxu3 %v6888_v32  ;;  %10723 = vst [vmem:[#allocation34_spill] sm:$0xff] %v6891_v30  ;;  %v6903_v60 = vld [vmem:[#allocation5 + $0x180] sm:$0xff]  ;;  %v6906_v32 = vld [vmem:[#allocation5 + $0x188] sm:$0xff] }
 0x1e4   :  { %1589 = vmatpush.msrb.mxu0 %v6891_v30  ;;  %10724 = vst [vmem:[#allocation72_spill] sm:$0xff] %v6894_v12  ;;  %1629 = vmatpush.msra.mxu2 %v6894_v12  ;;  %v6909_v30 = vld [vmem:[#allocation5 + $0x200] sm:$0xff]  ;;  %v6912_v12 = vld [vmem:[#allocation5 + $0x208] sm:$0xff] }
 0x1e5   :  { %10725 = vst [vmem:[#allocation37_spill] sm:$0xff] %v6897_v17  ;;  %1621 = vmatpush.msrb.mxu1 %v6897_v17  ;;  %1661 = vmatpush.msra.mxu3 %v6900_v13  ;;  %v6915_v17 = vld [vmem:[#allocation5 + $0x3f0] sm:$0xff] }
 0x1e6   :  { %10726 = vst [vmem:[#allocation75_spill] sm:$0xff] %v6900_v13  ;;  %1590 = vmatpush.msrb.mxu0 %v6903_v60  ;;  %1630 = vmatpush.msra.mxu2 %v6906_v32  ;;  %v6918_v13 = vld [vmem:[#allocation5 + $0x3f8] sm:$0xff] }
 0x1e7   :  { %10727 = vst [vmem:[#allocation38_spill] sm:$0xff] %v6903_v60  ;;  %1622 = vmatpush.msrb.mxu1 %v6909_v30  ;;  %1662 = vmatpush.msra.mxu3 %v6912_v12  ;;  %v6921_v60 = vld [vmem:[#allocation5 + $0x160] sm:$0xff] }
 0x1e8   :  { %10728 = vst [vmem:[#allocation76_spill] sm:$0xff] %v6906_v32  ;;  %1591 = vmatpush.msrb.mxu0 %v6921_v60  ;;  %v6924_v32 = vld [vmem:[#allocation5 + $0x168] sm:$0xff] }
 0x1e9   :  { %10729 = vst [vmem:[#allocation41_spill] sm:$0xff] %v6909_v30  ;;  %1687 = vmatpush.msra.mxu1 %v6915_v17  ;;  %1727 = vmatpush.msrb.mxu3 %v6918_v13  ;;  %v6927_v30 = vld [vmem:[#allocation5 + $0x3d0] sm:$0xff] }
 0x1ea   :  { %10730 = vst [vmem:[#allocation42_spill] sm:$0xff] %v6912_v12  ;;  %1631 = vmatpush.msra.mxu2 %v6924_v32  ;;  %v6930_v12 = vld [vmem:[#allocation5 + $0x3d8] sm:$0xff] }
 0x1eb   :  { %10731 = vst [vmem:[#allocation45_spill] sm:$0xff] %v6915_v17  ;;  %1688 = vmatpush.msra.mxu1 %v6927_v30  ;;  %1728 = vmatpush.msrb.mxu3 %v6930_v12  ;;  %v6933_v17 = vld [vmem:[#allocation5 + $0x140] sm:$0xff] }
 0x1ec   :  { %10732 = vst [vmem:[#allocation46_spill] sm:$0xff] %v6918_v13  ;;  %1592 = vmatpush.msrb.mxu0 %v6933_v17  ;;  %v6936_v13 = vld [vmem:[#allocation5 + $0x148] sm:$0xff] }
 0x1ed   :  { %10733 = vst [vmem:[#allocation83_spill] sm:$0xff] %v6921_v60  ;;  %1632 = vmatpush.msra.mxu2 %v6936_v13  ;;  %v6939_v60 = vld [vmem:[#allocation5 + $0x3b0] sm:$0xff] }
 0x1ee   :  { %10734 = vst [vmem:[#allocation49_spill] sm:$0xff] %v6924_v32  ;;  %1689 = vmatpush.msra.mxu1 %v6939_v60  ;;  %v6942_v32 = vld [vmem:[#allocation5 + $0x3b8] sm:$0xff] }
 0x1ef   :  { %10735 = vst [vmem:[#allocation86_spill] sm:$0xff] %v6927_v30  ;;  %1729 = vmatpush.msrb.mxu3 %v6942_v32  ;;  %v6945_v30 = vld [vmem:[#allocation5 + $0x120] sm:$0xff] }
 0x1f0   :  { %10736 = vst [vmem:[#allocation50_spill] sm:$0xff] %v6930_v12  ;;  %1593 = vmatpush.msrb.mxu0 %v6945_v30  ;;  %v6948_v12 = vld [vmem:[#allocation5 + $0x128] sm:$0xff] }
 0x1f1   :  { %10737 = vst [vmem:[#allocation87_spill] sm:$0xff] %v6933_v17  ;;  %1633 = vmatpush.msra.mxu2 %v6948_v12  ;;  %v6951_v17 = vld [vmem:[#allocation5 + $0x390] sm:$0xff] }
 0x1f2   :  { %10738 = vst [vmem:[#allocation53_spill] sm:$0xff] %v6936_v13  ;;  %1690 = vmatpush.msra.mxu1 %v6951_v17  ;;  %v6954_v13 = vld [vmem:[#allocation5 + $0x398] sm:$0xff] }
 0x1f3   :  { %10739 = vst [vmem:[#allocation90_spill] sm:$0xff] %v6939_v60  ;;  %1730 = vmatpush.msrb.mxu3 %v6954_v13  ;;  %v6957_v60 = vld [vmem:[#allocation5 + $0x100] sm:$0xff] }
 0x1f4   :  { %10740 = vst [vmem:[#allocation54_spill] sm:$0xff] %v6942_v32  ;;  %1594 = vmatpush.msrb.mxu0 %v6957_v60  ;;  %v6960_v32 = vld [vmem:[#allocation5 + $0x108] sm:$0xff] }
 0x1f5   :  { %10741 = vst [vmem:[#allocation91_spill] sm:$0xff] %v6945_v30  ;;  %1634 = vmatpush.msra.mxu2 %v6960_v32  ;;  %v6963_v30 = vld [vmem:[#allocation5 + $0x370] sm:$0xff] }
 0x1f6   :  { %10742 = vst [vmem:[#allocation57_spill] sm:$0xff] %v6948_v12  ;;  %1691 = vmatpush.msra.mxu1 %v6963_v30  ;;  %v6966_v12 = vld [vmem:[#allocation5 + $0x378] sm:$0xff] }
 0x1f7   :  { %10743 = vst [vmem:[#allocation58_spill] sm:$0xff] %v6951_v17  ;;  %1731 = vmatpush.msrb.mxu3 %v6966_v12  ;;  %v6969_v17 = vld [vmem:[#allocation5 + $0xe0] sm:$0xff] }
 0x1f8   :  { %10744 = vst [vmem:[#allocation61_spill] sm:$0xff] %v6954_v13  ;;  %1595 = vmatpush.msrb.mxu0 %v6969_v17  ;;  %v6972_v13 = vld [vmem:[#allocation5 + $0xe8] sm:$0xff] }
 0x1f9   :  { %10745 = vst [vmem:[#allocation62_spill] sm:$0xff] %v6957_v60  ;;  %1635 = vmatpush.msra.mxu2 %v6972_v13  ;;  %v6975_v60 = vld [vmem:[#allocation5 + $0x350] sm:$0xff] }
 0x1fa   :  { %10746 = vst [vmem:[#allocation65_spill] sm:$0xff] %v6960_v32  ;;  %1692 = vmatpush.msra.mxu1 %v6975_v60  ;;  %v6978_v32 = vld [vmem:[#allocation5 + $0x358] sm:$0xff] }
 0x1fb   :  { %10747 = vst [vmem:[#allocation66_spill] sm:$0xff] %v6963_v30  ;;  %1732 = vmatpush.msrb.mxu3 %v6978_v32  ;;  %v6981_v30 = vld [vmem:[#allocation5 + $0xc0] sm:$0xff] }
 0x1fc   :  { %10748 = vst [vmem:[#allocation69_spill] sm:$0xff] %v6966_v12  ;;  %1596 = vmatpush.msrb.mxu0 %v6981_v30  ;;  %v6984_v12 = vld [vmem:[#allocation5 + $0xc8] sm:$0xff] }
 0x1fd   :  { %10749 = vst [vmem:[#allocation70_spill] sm:$0xff] %v6969_v17  ;;  %1636 = vmatpush.msra.mxu2 %v6984_v12  ;;  %v6987_v17 = vld [vmem:[#allocation5 + $0x330] sm:$0xff] }
 0x1fe   :  { %10750 = vst [vmem:[#allocation73_spill] sm:$0xff] %v6972_v13  ;;  %1693 = vmatpush.msra.mxu1 %v6987_v17  ;;  %v6990_v13 = vld [vmem:[#allocation5 + $0x338] sm:$0xff] }
 0x1ff   :  { %10751 = vst [vmem:[#allocation74_spill] sm:$0xff] %v6975_v60  ;;  %1733 = vmatpush.msrb.mxu3 %v6990_v13  ;;  %v6993_v60 = vld [vmem:[#allocation5 + $0xa0] sm:$0xff] }
 0x200   :  { %10752 = vst [vmem:[#allocation78_spill] sm:$0xff] %v6978_v32  ;;  %1597 = vmatpush.msrb.mxu0 %v6993_v60  ;;  %v6996_v32 = vld [vmem:[#allocation5 + $0xa8] sm:$0xff] }
 0x201   :  { %10753 = vst [vmem:[#allocation79_spill] sm:$0xff] %v6981_v30  ;;  %1637 = vmatpush.msra.mxu2 %v6996_v32  ;;  %v6999_v30 = vld [vmem:[#allocation5 + $0x310] sm:$0xff] }
 0x202   :  { %10754 = vst [vmem:[#allocation81_spill] sm:$0xff] %v6984_v12  ;;  %1694 = vmatpush.msra.mxu1 %v6999_v30  ;;  %v7002_v12 = vld [vmem:[#allocation5 + $0x318] sm:$0xff] }
 0x203   :  { %10755 = vst [vmem:[#allocation82_spill] sm:$0xff] %v6987_v17  ;;  %1734 = vmatpush.msrb.mxu3 %v7002_v12  ;;  %v7005_v17 = vld [vmem:[#allocation5 + $0x80] sm:$0xff] }
 0x204   :  { %10756 = vst [vmem:[#allocation84_spill] sm:$0xff] %v6990_v13  ;;  %1598 = vmatpush.msrb.mxu0 %v7005_v17  ;;  %v7008_v13 = vld [vmem:[#allocation5 + $0x88] sm:$0xff] }
 0x205   :  { %10757 = vst [vmem:[#allocation85_spill] sm:$0xff] %v6993_v60  ;;  %1638 = vmatpush.msra.mxu2 %v7008_v13  ;;  %v7011_v60 = vld [vmem:[#allocation5 + $0x2f0] sm:$0xff] }
 0x206   :  { %10758 = vst [vmem:[#allocation88_spill] sm:$0xff] %v6996_v32  ;;  %1695 = vmatpush.msra.mxu1 %v7011_v60  ;;  %v7014_v32 = vld [vmem:[#allocation5 + $0x2f8] sm:$0xff] }
 0x207   :  { %10759 = vst [vmem:[#allocation89_spill] sm:$0xff] %v6999_v30  ;;  %1735 = vmatpush.msrb.mxu3 %v7014_v32  ;;  %v7017_v30 = vld [vmem:[#allocation5 + $0x60] sm:$0xff] }
 0x208   :  { %10760 = vst [vmem:[#allocation92_spill] sm:$0xff] %v7002_v12  ;;  %1599 = vmatpush.msrb.mxu0 %v7017_v30  ;;  %v7020_v12 = vld [vmem:[#allocation5 + $0x68] sm:$0xff] }
 0x209   :  { %10761 = vst [vmem:[#allocation93_spill] sm:$0xff] %v7005_v17  ;;  %1639 = vmatpush.msra.mxu2 %v7020_v12  ;;  %v7023_v17 = vld [vmem:[#allocation5 + $0x2d0] sm:$0xff] }
 0x20a   :  { %10762 = vst [vmem:[#allocation94_spill] sm:$0xff] %v7008_v13  ;;  %1696 = vmatpush.msra.mxu1 %v7023_v17  ;;  %v7026_v13 = vld [vmem:[#allocation5 + $0x2d8] sm:$0xff] }
 0x20b   :  { %10763 = vst [vmem:[#allocation95_spill] sm:$0xff] %v7011_v60  ;;  %1736 = vmatpush.msrb.mxu3 %v7026_v13  ;;  %v7029_v60 = vld [vmem:[#allocation5 + $0x40] sm:$0xff] }
 0x20c   :  { %10764 = vst [vmem:[#allocation96_spill] sm:$0xff] %v7014_v32  ;;  %1600 = vmatpush.msrb.mxu0 %v7029_v60  ;;  %v7032_v32 = vld [vmem:[#allocation5 + $0x48] sm:$0xff] }
 0x20d   :  { %10765 = vst [vmem:[#allocation97_spill] sm:$0xff] %v7017_v30  ;;  %1640 = vmatpush.msra.mxu2 %v7032_v32  ;;  %v7035_v30 = vld [vmem:[#allocation5 + $0x2b0] sm:$0xff] }
 0x20e   :  { %10766 = vst [vmem:[#allocation98_spill] sm:$0xff] %v7020_v12  ;;  %1697 = vmatpush.msra.mxu1 %v7035_v30  ;;  %v7038_v12 = vld [vmem:[#allocation5 + $0x2b8] sm:$0xff] }
 0x20f   :  { %10767 = vst [vmem:[#allocation99_spill] sm:$0xff] %v7023_v17  ;;  %1737 = vmatpush.msrb.mxu3 %v7038_v12  ;;  %v7041_v17 = vld [vmem:[#allocation5 + $0x20] sm:$0xff] }
 0x210   :  { %10768 = vst [vmem:[#allocation104_spill] sm:$0xff] %v7026_v13  ;;  %1601 = vmatpush.msrb.mxu0 %v7041_v17  ;;  %v7044_v13 = vld [vmem:[#allocation5 + $0x28] sm:$0xff] }
 0x211   :  { %10769 = vst [vmem:[#allocation105_spill] sm:$0xff] %v7029_v60  ;;  %1641 = vmatpush.msra.mxu2 %v7044_v13  ;;  %v7047_v60 = vld [vmem:[#allocation5 + $0x290] sm:$0xff] }
 0x212   :  { %10770 = vst [vmem:[#allocation107_spill] sm:$0xff] %v7032_v32  ;;  %1698 = vmatpush.msra.mxu1 %v7047_v60  ;;  %v7050_v32 = vld [vmem:[#allocation5 + $0x298] sm:$0xff] }
 0x213   :  { %10771 = vst [vmem:[#allocation109_spill] sm:$0xff] %v7035_v30  ;;  %1738 = vmatpush.msrb.mxu3 %v7050_v32  ;;  %v7053_v30 = vld [vmem:[#allocation5] sm:$0xff] }
 0x214   :  { %10772 = vst [vmem:[#allocation110_spill] sm:$0xff] %v7038_v12  ;;  %1602 = vmatpush.msrb.mxu0 %v7053_v30  ;;  %v7056_v12 = vld [vmem:[#allocation5 + $0x8] sm:$0xff] }
 0x215   :  { %10773 = vst [vmem:[#allocation111_spill] sm:$0xff] %v7041_v17  ;;  %1642 = vmatpush.msra.mxu2 %v7056_v12  ;;  %v7059_v17 = vld [vmem:[#allocation5 + $0x270] sm:$0xff] }
 0x216   :  { %10774 = vst [vmem:[#allocation112_spill] sm:$0xff] %v7044_v13  ;;  %1699 = vmatpush.msra.mxu1 %v7059_v17  ;;  %v7062_v13 = vld [vmem:[#allocation5 + $0x278] sm:$0xff] }
 0x217   :  { %10775 = vst [vmem:[#allocation11_spill] sm:$0xff] %v7047_v60  ;;  %1739 = vmatpush.msrb.mxu3 %v7062_v13  ;;  %v7065_v60 = vld [vmem:[#allocation5 + $0x1f0] sm:$0xff] }
 0x218   :  { %10776 = vst [vmem:[#allocation12_spill] sm:$0xff] %v7050_v32  ;;  %1667 = vmatpush.msra.mxu0 %v7065_v60  ;;  %v7068_v32 = vld [vmem:[#allocation5 + $0x1f8] sm:$0xff] }
 0x219   :  { %10777 = vst [vmem:[#allocation13_spill] sm:$0xff] %v7053_v30  ;;  %1707 = vmatpush.msrb.mxu2 %v7068_v32  ;;  %v7071_v30 = vld [vmem:[#allocation5 + $0x250] sm:$0xff] }
 0x21a   :  { %10778 = vst [vmem:[#allocation14_spill] sm:$0xff] %v7056_v12  ;;  %1700 = vmatpush.msra.mxu1 %v7071_v30  ;;  %v7074_v12 = vld [vmem:[#allocation5 + $0x258] sm:$0xff] }
 0x21b   :  { %10779 = vst [vmem:[#allocation15_spill] sm:$0xff] %v7059_v17  ;;  %1740 = vmatpush.msrb.mxu3 %v7074_v12  ;;  %v7077_v17 = vld [vmem:[#allocation5 + $0x1d0] sm:$0xff] }
 0x21c   :  { %10780 = vst [vmem:[#allocation113_spill] sm:$0xff] %v7062_v13  ;;  %1668 = vmatpush.msra.mxu0 %v7077_v17  ;;  %v7080_v13 = vld [vmem:[#allocation5 + $0x1d8] sm:$0xff] }
 0x21d   :  { %10781 = vst [vmem:[#allocation114_spill] sm:$0xff] %v7065_v60  ;;  %1708 = vmatpush.msrb.mxu2 %v7080_v13  ;;  %v7083_v60 = vld [vmem:[#allocation5 + $0x230] sm:$0xff] }
 0x21e   :  { %10782 = vst [vmem:[#allocation115_spill] sm:$0xff] %v7068_v32  ;;  %1701 = vmatpush.msra.mxu1 %v7083_v60  ;;  %v7086_v32 = vld [vmem:[#allocation5 + $0x238] sm:$0xff] }
 0x21f   :  { %10783 = vst [vmem:[#allocation116_spill] sm:$0xff] %v7071_v30  ;;  %1741 = vmatpush.msrb.mxu3 %v7086_v32  ;;  %v7089_v30 = vld [vmem:[#allocation5 + $0x1b0] sm:$0xff] }
 0x220   :  { %10784 = vst [vmem:[#allocation117_spill] sm:$0xff] %v7074_v12  ;;  %1669 = vmatpush.msra.mxu0 %v7089_v30  ;;  %v7092_v12 = vld [vmem:[#allocation5 + $0x1b8] sm:$0xff] }
 0x221   :  { %10785 = vst [vmem:[#allocation118_spill] sm:$0xff] %v7077_v17  ;;  %1709 = vmatpush.msrb.mxu2 %v7092_v12  ;;  %v7095_v17 = vld [vmem:[#allocation5 + $0x210] sm:$0xff] }
 0x222   :  { %10786 = vst [vmem:[#allocation119_spill] sm:$0xff] %v7080_v13  ;;  %1702 = vmatpush.msra.mxu1 %v7095_v17  ;;  %v7098_v13 = vld [vmem:[#allocation5 + $0x218] sm:$0xff] }
 0x223   :  { %10787 = vst [vmem:[#allocation120_spill] sm:$0xff] %v7083_v60  ;;  %1742 = vmatpush.msrb.mxu3 %v7098_v13  ;;  %v7101_v60 = vld [vmem:[#allocation5 + $0x190] sm:$0xff] }
 0x224   :  { %10788 = vst [vmem:[#allocation121_spill] sm:$0xff] %v7086_v32  ;;  %1670 = vmatpush.msra.mxu0 %v7101_v60  ;;  %v7104_v32 = vld [vmem:[#allocation5 + $0x198] sm:$0xff] }
 0x225   :  { %10789 = vst [vmem:[#allocation122_spill] sm:$0xff] %v7089_v30  ;;  %1710 = vmatpush.msrb.mxu2 %v7104_v32  ;;  %v7107_v30 = vld [vmem:[#allocation5 + $0x170] sm:$0xff] }
 0x226   :  { %10790 = vst [vmem:[#allocation123_spill] sm:$0xff] %v7092_v12  ;;  %1671 = vmatpush.msra.mxu0 %v7107_v30  ;;  %v7110_v12 = vld [vmem:[#allocation5 + $0x178] sm:$0xff] }
 0x227   :  { %10791 = vst [vmem:[#allocation124_spill] sm:$0xff] %v7095_v17  ;;  %1711 = vmatpush.msrb.mxu2 %v7110_v12  ;;  %v7113_v17 = vld [vmem:[#allocation5 + $0x150] sm:$0xff] }
 0x228   :  { %10792 = vst [vmem:[#allocation125_spill] sm:$0xff] %v7098_v13  ;;  %1672 = vmatpush.msra.mxu0 %v7113_v17  ;;  %v7116_v13 = vld [vmem:[#allocation5 + $0x158] sm:$0xff] }
 0x229   :  { %10793 = vst [vmem:[#allocation126_spill] sm:$0xff] %v7101_v60  ;;  %1712 = vmatpush.msrb.mxu2 %v7116_v13  ;;  %v7119_v60 = vld [vmem:[#allocation5 + $0x130] sm:$0xff]  ;;  %v1187_v48 = vpop.f32.mrf.mxu3 }
 0x22a   :  { %10794 = vst [vmem:[#allocation127_spill] sm:$0xff] %v7104_v32  ;;  %1673 = vmatpush.msra.mxu0 %v7119_v60  ;;  %v7122_v32 = vld [vmem:[#allocation5 + $0x138] sm:$0xff] }
 0x22b   :  { %10795 = vst [vmem:[#allocation128_spill] sm:$0xff] %v7107_v30  ;;  %1713 = vmatpush.msrb.mxu2 %v7122_v32  ;;  %v7125_v30 = vld [vmem:[#allocation5 + $0x110] sm:$0xff] }
 0x22c   :  { %10796 = vst [vmem:[#allocation129_spill] sm:$0xff] %v7110_v12  ;;  %1674 = vmatpush.msra.mxu0 %v7125_v30  ;;  %v7128_v12 = vld [vmem:[#allocation5 + $0x118] sm:$0xff] }
 0x22d   :  { %10797 = vst [vmem:[#allocation130_spill] sm:$0xff] %v7113_v17  ;;  %1714 = vmatpush.msrb.mxu2 %v7128_v12  ;;  %v7131_v17 = vld [vmem:[#allocation5 + $0xf0] sm:$0xff] }
 0x22e   :  { %10798 = vst [vmem:[#allocation131_spill] sm:$0xff] %v7116_v13  ;;  %1675 = vmatpush.msra.mxu0 %v7131_v17  ;;  %v7134_v13 = vld [vmem:[#allocation5 + $0xf8] sm:$0xff] }
 0x22f   :  { %10799 = vst [vmem:[#allocation132_spill] sm:$0xff] %v7119_v60  ;;  %1715 = vmatpush.msrb.mxu2 %v7134_v13  ;;  %v7137_v60 = vld [vmem:[#allocation5 + $0xd0] sm:$0xff] }
 0x230   :  { %10800 = vst [vmem:[#allocation133_spill] sm:$0xff] %v7122_v32  ;;  %1676 = vmatpush.msra.mxu0 %v7137_v60  ;;  %v7140_v32 = vld [vmem:[#allocation5 + $0xd8] sm:$0xff] }
 0x231   :  { %10801 = vst [vmem:[#allocation134_spill] sm:$0xff] %v7125_v30  ;;  %1716 = vmatpush.msrb.mxu2 %v7140_v32  ;;  %v7143_v30 = vld [vmem:[#allocation5 + $0xb0] sm:$0xff]  ;;  %v1267_v2 = vpop.f32.mrf.mxu3 }
 0x232   :  { %10802 = vst [vmem:[#allocation135_spill] sm:$0xff] %v7128_v12  ;;  %1677 = vmatpush.msra.mxu0 %v7143_v30  ;;  %v7146_v12 = vld [vmem:[#allocation5 + $0xb8] sm:$0xff] }
 0x233   :  { %10803 = vst [vmem:[#allocation136_spill] sm:$0xff] %v7131_v17  ;;  %1717 = vmatpush.msrb.mxu2 %v7146_v12  ;;  %v7149_v17 = vld [vmem:[#allocation5 + $0x90] sm:$0xff] }
 0x234   :  { %10804 = vst [vmem:[#allocation137_spill] sm:$0xff] %v7134_v13  ;;  %1678 = vmatpush.msra.mxu0 %v7149_v17  ;;  %v7152_v13 = vld [vmem:[#allocation5 + $0x98] sm:$0xff] }
 0x235   :  { %10805 = vst [vmem:[#allocation138_spill] sm:$0xff] %v7137_v60  ;;  %1718 = vmatpush.msrb.mxu2 %v7152_v13  ;;  %v7155_v60 = vld [vmem:[#allocation5 + $0x70] sm:$0xff] }
 0x236   :  { %10806 = vst [vmem:[#allocation139_spill] sm:$0xff] %v7140_v32  ;;  %1679 = vmatpush.msra.mxu0 %v7155_v60  ;;  %v7158_v32 = vld [vmem:[#allocation5 + $0x78] sm:$0xff] }
 0x237   :  { %10807 = vst [vmem:[#allocation140_spill] sm:$0xff] %v7143_v30  ;;  %1719 = vmatpush.msrb.mxu2 %v7158_v32  ;;  %v7161_v30 = vld [vmem:[#allocation5 + $0x50] sm:$0xff]  ;;  %v1127_v16 = vpop.f32.mrf.mxu0 }
 0x238   :  { %10808 = vst [vmem:[#allocation141_spill] sm:$0xff] %v7146_v12  ;;  %1680 = vmatpush.msra.mxu0 %v7161_v30  ;;  %v7164_v12 = vld [vmem:[#allocation5 + $0x58] sm:$0xff] }
 0x239   :  { %10809 = vst [vmem:[#allocation142_spill] sm:$0xff] %v7149_v17  ;;  %1720 = vmatpush.msrb.mxu2 %v7164_v12  ;;  %v7167_v17 = vld [vmem:[#allocation5 + $0x30] sm:$0xff] }
 0x23a   :  { %10810 = vst [vmem:[#allocation143_spill] sm:$0xff] %v7152_v13  ;;  %1681 = vmatpush.msra.mxu0 %v7167_v17  ;;  %v7170_v13 = vld [vmem:[#allocation5 + $0x38] sm:$0xff] }
 0x23b   :  { %10811 = vst [vmem:[#allocation144_spill] sm:$0xff] %v7155_v60  ;;  %1721 = vmatpush.msrb.mxu2 %v7170_v13  ;;  %v7173_v60 = vld [vmem:[#allocation5 + $0x10] sm:$0xff] }
 0x23c   :  { %10812 = vst [vmem:[#allocation145_spill] sm:$0xff] %v7158_v32  ;;  %1682 = vmatpush.msra.mxu0 %v7173_v60  ;;  %v7176_v32 = vld [vmem:[#allocation5 + $0x18] sm:$0xff] }
 0x23d   :  { %10813 = vst [vmem:[#allocation146_spill] sm:$0xff] %v7161_v30  ;;  %1722 = vmatpush.msrb.mxu2 %v7176_v32  ;;  %v1147_v30 = vpop.f32.mrf.mxu1  ;;  %v1167_v24 = vpop.f32.mrf.mxu2 }
 0x23e   :  { %10814 = vst [vmem:[#allocation147_spill] sm:$0xff] %v7164_v12  ;;  %v1128_v12 = vadd.f32 %v1127_v16, %v10819_v3  ;;  %v10821_v16 = vld [vmem:[#allocation102_spill] sm:$0xff] }
 0x23f   :  { %10815 = vst [vmem:[#allocation148_spill] sm:$0xff] %v7167_v17 }
 0x240   :  { %10816 = vst [vmem:[#allocation149_spill] sm:$0xff] %v7170_v13  ;;  %v1148_v50 = vadd.f32 %v1147_v30, %v1128_v12  ;;  %v1168_v13 = vadd.f32 %v1167_v24, %v10820_v8  ;;  %v10822_v30 = vld [vmem:[#allocation18_spill] sm:$0xff] }
 0x241   :  { %10817 = vst [vmem:[#allocation150_spill] sm:$0xff] %v7173_v60 }
 0x242   :  { %10818 = vst [vmem:[#allocation151_spill] sm:$0xff] %v7176_v32  ;;  %v4289_v17 = vmul.f32 -1.442695, %v1148_v50  ;;  %v1188_v46 = vadd.f32 %v1187_v48, %v1168_v13  ;;  %v1207_v13 = vpop.f32.mrf.mxu0 }
 0x243   :  { %v1208_v36 = vadd.f32 %v1207_v13, %v10824_v34 }
 0x244   :  { %4434 = vpow2.f32 %v4289_v17  ;;  %v4290_v31 = vmul.f32 -1.442695, %v1188_v46 }
 0x245   :  { %v1227_v52 = vpop.f32.mrf.mxu1 }
 0x246   :  { %4436 = vpow2.f32 %v4290_v31 }
 0x247   :  { %v1247_v62 = vpop.f32.mrf.mxu2 }
 0x248   :  { %v1248_v12 = vadd.f32 %v1247_v62, %v10822_v30 }
 0x249   :  { %v1413_v48 = vpop.f32.mrf.mxu3 }
 0x24a   :  { %v4435_v25 = vpop.eup %4434  ;;  %v1268_v29 = vadd.f32 %v1267_v2, %v1248_v12  ;;  %v1427_v27 = vrot.slane %v1413_v48, 7 }
 0x24b   :  { %v1273_v32 = vadd.f32 1.0, %v4435_v25 }
 0x24c   :  { %v4437_v50 = vpop.eup %4436  ;;  %v4291_v8 = vmul.f32 -1.442695, %v1268_v29 }
 0x24d   :  { %v1373_v60 = vpop.f32.mrf.mxu1  ;;  %4438 = vrcp.f32 %v1273_v32  ;;  %v1292_v24 = vadd.f32 1.0, %v4437_v50  ;;  %v1228_v50 = vadd.f32 %v1227_v52, %v1208_v36  ;;  %vm1279_vm3 = vweird.f32 %v1273_v32 }
 0x24e   :  { %v1421_v10 = vrot.slane %v1373_v60, 6  ;;  %v1425_v37 = vrot.slane %v1373_v60, 7  ;;  %v1423_v60 = vrot.slane %v1413_v48, 6  ;;  %v1283_v48 = vand.u32 2147483647, %v1273_v32 }
 0x24f   :  { %4440 = vrcp.f32 %v1292_v24  ;;  %v1302_v36 = vand.u32 2147483647, %v1292_v24  ;;  %vm1298_vm6 = vweird.f32 %v1292_v24 }
 0x250   :  { %v1437_v3 = vadd.f32 %v1421_v10, %v10821_v16  ;;  %v1441_v17 = vadd.f32 %v1425_v37, %v10823_v43  ;;  %4442 = vpow2.f32 %v4291_v8  ;;  %v10825_v37 = vld [vmem:[#allocation100_spill] sm:$0xff]  ;;  %vm1284_vm7 = vcmp.eq.f32.partialorder %v1283_v48, 8.507059e+37 }
 0x251   :  { %v1439_v2 = vadd.f32 %v1423_v60, %v10825_v37  ;;  %vm1303_vm9 = vcmp.eq.f32.partialorder %v1302_v36, 8.507059e+37 }
 0x252   :  { %v4294_v46 = vmul.f32 -1.442695, %v1437_v3  ;;  %v4295_v25 = vmul.f32 -1.442695, %v1441_v17  ;;  %v10826_v3 = vld [vmem:[#allocation101_spill] sm:$0xff]  ;;  %v1285_v17 = vand.u32 2147483648, %v1273_v32 }
 0x253   :  { %v4439_v40 = vpop.eup %4438  ;;  %v1443_v30 = vadd.f32 %v1427_v27, %v10826_v3  ;;  %v4296_v8 = vmul.f32 -1.442695, %v1439_v2 }
 0x254   :  { %v1275_v31 = vmul.f32 %v4439_v40, %v1273_v32  ;;  %4444 = vpow2.f32 %v4294_v46  ;;  %vm1280_vm2 = vweird.f32 %v4439_v40  ;;  %v1304_v46 = vand.u32 2147483648, %v1292_v24 }
 0x255   :  { %4446 = vpow2.f32 %v4295_v25  ;;  %v4441_v12 = vpop.eup %4440  ;;  %vm7189_vm4 = vmor %vm1279_vm3, %vm1280_vm2  ;;  %v4297_v27 = vmul.f32 -1.442695, %v1443_v30 }
 0x256   :  { %v1276_v10 = vsub.f32 1.0, %v1275_v31  ;;  %v1294_v29 = vmul.f32 %v4441_v12, %v1292_v24  ;;  %v4443_v43 = vpop.eup %4442  ;;  %4448 = vtanh.f32 %v1228_v50  ;;  %vm1299_vm5 = vweird.f32 %v4441_v12  ;;  %v10829_v24 = vld [vmem:[#allocation20_spill] sm:$0xff] }
 0x257   :  { %v7187_v31 = vadd.f32 1.0, %v4443_v43  ;;  %v1286_v43 = vor.u32 1.1754944e-38, %v1285_v17  ;;  %vm1300_vm8 = vmor %vm1298_vm6, %vm1299_vm5  ;;  %v1305_v2 = vor.u32 1.1754944e-38, %v1304_v46  ;;  %v10831_v46 = vld [vmem:[#allocation80_spill] sm:$0xff] }
 0x258   :  { %v1277_v62 = vmul.f32 %v4439_v40, %v1276_v10  ;;  %v1295_v13 = vsub.f32 1.0, %v1294_v29 }
 0x259   :  { %4450 = vrcp.f32 %v7187_v31  ;;  %vm1318_vm12 = vweird.f32 %v7187_v31 }
 0x25a   :  { %v1278_v16 = vadd.f32 %v4439_v40, %v1277_v62  ;;  %v4445_v26 = vpop.eup %4444  ;;  %v1296_v60 = vmul.f32 %v4441_v12, %v1295_v13  ;;  %4452 = vpow2.f32 %v4296_v8  ;;  %v10830_v8 = vld [vmem:[#allocation77_spill] sm:$0xff] }
 0x25b   :  { %v4447_v52 = vpop.eup %4446  ;;  %v7196_v32 = vadd.f32 1.0, %v4445_v26  ;;  %4454 = vpow2.f32 %v4297_v27  ;;  %v1353_v50 = vpop.f32.mrf.mxu0 }
 0x25c   :  { %v1282_v10 = vsel %vm7189_vm4, %v4439_v40, %v1278_v16  ;;  %v1297_v62 = vadd.f32 %v4441_v12, %v1296_v60  ;;  %v7198_v29 = vadd.f32 1.0, %v4447_v52  ;;  %v1420_v25 = vrot.slane %v1353_v50, 6  ;;  %v4449_v16 = vpop.eup %4448 }
 0x25d   :  { %v1287_v30 = vsel %vm1284_vm7, %v1286_v43, %v1282_v10  ;;  %v1424_v40 = vrot.slane %v1353_v50, 7  ;;  %4456 = vrcp.f32 %v7196_v32  ;;  %vm1495_vm15 = vweird.f32 %v7196_v32 }
 0x25e   :  { %v1301_v13 = vsel %vm1300_vm8, %v4441_v12, %v1297_v62  ;;  %v1329_v60 = vmul.f32 %v4449_v16, %v1287_v30  ;;  %v1436_v3 = vadd.f32 %v1420_v25, %v10830_v8  ;;  %4458 = vrcp.f32 %v7198_v29 }
 0x25f   :  { %v1306_v26 = vsel %vm1303_vm9, %v1305_v2, %v1301_v13  ;;  %v4451_v17 = vpop.eup %4450  ;;  %v1440_v52 = vadd.f32 %v1424_v40, %v10831_v46  ;;  %v1322_v16 = vand.u32 2147483647, %v7187_v31  ;;  %vm1510_vm1 = vweird.f32 %v7198_v29 }
 0x260   :  { %v1328_v48 = vmul.f32 %v1306_v26, %v10829_v24  ;;  %v1314_v27 = vmul.f32 %v4451_v17, %v7187_v31  ;;  %v4453_v12 = vpop.eup %4452  ;;  %v4292_v10 = vmul.f32 -1.442695, %v1436_v3  ;;  %vm1319_vm11 = vweird.f32 %v4451_v17 }
 0x261   :  { %v4293_v43 = vmul.f32 -1.442695, %v1440_v52  ;;  %v4455_v62 = vpop.eup %4454  ;;  %v7211_v30 = vadd.f32 1.0, %v4453_v12  ;;  %v1324_v26 = vand.u32 2147483648, %v7187_v31  ;;  %vm1320_vm13 = vmor %vm1318_vm12, %vm1319_vm11  ;;  %vm1323_vm14 = vcmp.eq.f32.partialorder %v1322_v16, 8.507059e+37 }
 0x262   :  { %v7206_v36 = vadd.f32 %v1329_v60, %v1328_v48  ;;  %v1315_v50 = vsub.f32 1.0, %v1314_v27  ;;  %v7213_v13 = vadd.f32 1.0, %v4455_v62 }
 0x263   :  { %v7209_v2 = vpop.eup %4456  ;;  %v1325_v52 = vor.u32 1.1754944e-38, %v1324_v26 }
 0x264   :  { %10832 = vst [vmem:[#allocation20_spill] sm:$0xff] %v7206_v36  ;;  %4460 = vtanh.f32 %v7206_v36  ;;  %v7215_v25 = vpop.eup %4458  ;;  %v1316_v40 = vmul.f32 %v4451_v17, %v1315_v50  ;;  %v1491_v3 = vmul.f32 %v7209_v2, %v7196_v32  ;;  %v1393_v50 = vpop.f32.mrf.mxu2  ;;  %vm1496_vm0 = vweird.f32 %v7209_v2 }
 0x265   :  { %4462 = vpow2.f32 %v4292_v10  ;;  %v1506_v60 = vmul.f32 %v7215_v25, %v7198_v29  ;;  %v1422_v26 = vrot.slane %v1393_v50, 6  ;;  %v1426_v16 = vrot.slane %v1393_v50, 7  ;;  %v10833_v50 = vld [vmem:[#allocation106_spill] sm:$0xff]  ;;  %vm7273_vm4 = vmor %vm1495_vm15, %vm1496_vm0 }
 0x266   :  { %4464 = vpow2.f32 %v4293_v43  ;;  %v1317_v24 = vadd.f32 %v4451_v17, %v1316_v40  ;;  %v1492_v43 = vsub.f32 1.0, %v1491_v3  ;;  %vm1511_vm3 = vweird.f32 %v7215_v25 }
 0x267   :  { %4466 = vrcp.f32 %v7211_v30  ;;  %v1507_v46 = vsub.f32 1.0, %v1506_v60  ;;  %vm7288_vm5 = vmor %vm1510_vm1, %vm1511_vm3  ;;  %vm1550_vm3 = vweird.f32 %v7213_v13 }
 0x268   :  { %4468 = vrcp.f32 %v7213_v13  ;;  %v1321_v12 = vsel %vm1320_vm13, %v4451_v17, %v1317_v24  ;;  %v1493_v17 = vmul.f32 %v7209_v2, %v1492_v43 }
 0x269   :  { %v1326_v36 = vsel %vm1323_vm14, %v1325_v52, %v1321_v12  ;;  %v1501_v52 = vand.u32 2147483648, %v7196_v32  ;;  %v1508_v60 = vmul.f32 %v7215_v25, %v1507_v46  ;;  %v10834_v46 = vld [vmem:[#allocation108_spill] sm:$0xff] }
 0x26a   :  { %v4461_v48 = vpop.eup %4460 }
 0x26b   :  { %v4463_v27 = vpop.eup %4462  ;;  %v1332_v31 = vmul.f32 %v4461_v48, %v1326_v36  ;;  %v1499_v36 = vand.u32 2147483647, %v7196_v32  ;;  %v1442_v48 = vadd.f32 %v1426_v16, %v10834_v46  ;;  %v1502_v47 = vor.u32 1.1754944e-38, %v1501_v52 }
 0x26c   :  { %v4465_v10 = vpop.eup %4464  ;;  %v7226_v62 = vadd.f32 1.0, %v4463_v27  ;;  %v1516_v27 = vand.u32 2147483648, %v7198_v29  ;;  %v1509_v52 = vadd.f32 %v7215_v25, %v1508_v60 }
 0x26d   :  { %v7228_v40 = vadd.f32 1.0, %v4465_v10  ;;  %v7231_v8 = vpop.eup %4466  ;;  %v1582_v3 = vrot.slane %v1332_v31, 6  ;;  %v1438_v31 = vadd.f32 %v1422_v26, %v10833_v50  ;;  %vm7259_vm2 = vcmp.eq.f32.partialorder %v1499_v36, 8.507059e+37 }
 0x26e   :  { %4470 = vrcp.f32 %v7226_v62  ;;  %v7234_v37 = vpop.eup %4468  ;;  %v1531_v10 = vmul.f32 %v7231_v8, %v7211_v30  ;;  %v1514_v26 = vand.u32 2147483647, %v7198_v29  ;;  %v1463_v60 = vand.u32 2147483648, %v7226_v62 }
 0x26f   :  { %4472 = vrcp.f32 %v7228_v40  ;;  %v1584_v12 = vrot.slane %v1582_v3, 2  ;;  %v7248_v43 = vmul.f32 %v7234_v37, %v7213_v13  ;;  %v1494_v3 = vadd.f32 %v7209_v2, %v1493_v17 }
 0x270   :  { %v1517_v17 = vor.u32 1.1754944e-38, %v1516_v27  ;;  %v1532_v46 = vsub.f32 1.0, %v1531_v10  ;;  %4474 = vtanh.f32 %v1438_v31  ;;  %v1476_v29 = vand.u32 2147483647, %v7228_v40  ;;  %v10847_v27 = vld [vmem:[#allocation23_spill] sm:$0xff] }
 0x271   :  { %1623 = vmatmul.f32.vlgmr.msrb.gmra.mxu1 %v1584_v12  ;;  %1663 = vmatmul.f32.vlgmr.msra.gmra.mxu3 %v1584_v12  ;;  %v1498_v32 = vsel %vm7273_vm4, %v7209_v2, %v1494_v3  ;;  %4476 = vtanh.f32 %v1442_v48  ;;  %v1513_v48 = vsel %vm7288_vm5, %v7215_v25, %v1509_v52  ;;  %vm1457_vm8 = vweird.f32 %v7226_v62 }
 0x272   :  { %1834 = vmatpush.msrb.mxu1 %v6623_v1  ;;  %1874 = vmatpush.msra.mxu3 %v6626_v58  ;;  %v1547_v1 = vsub.f32 1.0, %v7248_v43  ;;  %v1533_v10 = vmul.f32 %v7231_v8, %v1532_v46  ;;  %vm1515_vm9 = vcmp.eq.f32.partialorder %v1514_v26, 8.507059e+37  ;;  %vm1472_vm12 = vweird.f32 %v7228_v40 }
 0x273   :  { %v1503_v25 = vsel %vm7259_vm2, %v1502_v47, %v1498_v32  ;;  %v1518_v31 = vsel %vm1515_vm9, %v1517_v17, %v1513_v48  ;;  %vm1477_vm15 = vcmp.eq.f32.partialorder %v1476_v29, 8.507059e+37  ;;  %v10843_v3 = vrot.slane %v6651_v21, 7  ;;  %v7401_v32 = vld [vmem:[#allocation2 + $0x170] sm:$0xff]  ;;  %v10850_v29 = vld [vmem:[#allocation26_spill] sm:$0xff] }
 0x274   :  { %v7251_v24 = vpop.eup %4470  ;;  %1835 = vmatpush.msrb.mxu1 %v6632_v38  ;;  %1875 = vmatpush.msra.mxu3 %v6635_v51  ;;  %v1461_v51 = vand.u32 2147483647, %v7226_v62  ;;  %v1548_v11 = vmul.f32 %v7234_v37, %v1547_v1  ;;  %v10844_v17 = vrot.slane %v6640_v61, 7  ;;  %v1534_v21 = vadd.f32 %v7231_v8, %v1533_v10  ;;  %v7414_v48 = vld [vmem:[#allocation2 + $0x120] sm:$0xff]  ;;  %v7417_v10 = vld [vmem:[#allocation2 + $0x130] sm:$0xff] }
 0x275   :  { %v4473_v34 = vpop.eup %4472  ;;  %v1453_v0 = vmul.f32 %v7251_v24, %v7226_v62  ;;  %vm1458_vm6 = vweird.f32 %v7251_v24  ;;  %v1566_v26 = vmul.f32 %v10843_v3, %v1503_v25  ;;  %vm1536_vm0 = vweird.f32 %v7231_v8  ;;  %v10853_v25 = vld [vmem:[#allocation31_spill] sm:$0xff] }
 0x276   :  { %v1468_v16 = vmul.f32 %v4473_v34, %v7228_v40  ;;  %1836 = vmatpush.msrb.mxu1 %v6644_v33  ;;  %1876 = vmatpush.msra.mxu3 %v6647_v35  ;;  %vm1473_vm7 = vweird.f32 %v4473_v34  ;;  %vm7309_vm11 = vmor %vm1457_vm8, %vm1458_vm6  ;;  %v1464_v35 = vor.u32 1.1754944e-38, %v1463_v60  ;;  %v4475_v62 = vpop.eup %4474  ;;  %vm1462_vm13 = vcmp.eq.f32.partialorder %v1461_v51, 8.507059e+37  ;;  %v7398_v60 = vld [vmem:[#allocation2 + $0x160] sm:$0xff]  ;;  %v10852_v33 = vld [vmem:[#allocation28_spill] sm:$0xff] }
 0x277   :  { %v1454_v50 = vsub.f32 1.0, %v1453_v0  ;;  %v1478_v0 = vand.u32 2147483648, %v7228_v40  ;;  %vm1474_vm14 = vmor %vm1472_vm12, %vm1473_vm7  ;;  %v4477_v40 = vpop.eup %4476  ;;  %v1541_v61 = vand.u32 2147483648, %v7211_v30  ;;  %vm1551_vm1 = vweird.f32 %v7234_v37  ;;  %v7406_v51 = vld [vmem:[#allocation2 + $0x140] sm:$0xff] }
 0x278   :  { %v1469_v58 = vsub.f32 1.0, %v1468_v16  ;;  %1837 = vmatpush.msrb.mxu1 %v6656_v49  ;;  %1877 = vmatpush.msra.mxu3 %v6659_v6  ;;  %vm1535_vm2 = vweird.f32 %v7211_v30  ;;  %vm1552_vm5 = vmor %vm1550_vm3, %vm1551_vm1  ;;  %vm1579_vm8 = vcmask 1043459   ;;  %v7446_v3 = vld [vmem:[#allocation2 + $0xa0] sm:$0xff] }
 0x279   :  { %v1455_v38 = vmul.f32 %v7251_v24, %v1454_v50  ;;  %1703 = vmatmul.f32.vlgmr.msra.gmra.mxu1 %v1584_v12  ;;  %1743 = vmatmul.f32.vlgmr.msrb.gmra.mxu3 %v1584_v12  ;;  %v1479_v6 = vor.u32 1.1754944e-38, %v1478_v0  ;;  %vm1537_vm4 = vmor %vm1535_vm2, %vm1536_vm0  ;;  %v7409_v0 = vld [vmem:[#allocation2 + $0x150] sm:$0xff] }
 0x27a   :  { %v1470_v2 = vmul.f32 %v4473_v34, %v1469_v58  ;;  %1838 = vmatpush.msrb.mxu1 %v6672_v57  ;;  %1878 = vmatpush.msra.mxu3 %v6675_v7  ;;  %v1567_v57 = vmul.f32 %v10844_v17, %v1518_v31  ;;  %v7395_v58 = vld [vmem:[#allocation2 + $0x190] sm:$0xff]  ;;  %v10855_v31 = vld [vmem:[#allocation35_spill] sm:$0xff] }
 0x27b   :  { %v1456_v43 = vadd.f32 %v7251_v24, %v1455_v38  ;;  %v10848_v38 = vld [vmem:[#allocation24_spill] sm:$0xff] }
 0x27c   :  { %v1471_v50 = vadd.f32 %v4473_v34, %v1470_v2  ;;  %1839 = vmatpush.msrb.mxu1 %v6687_v54  ;;  %1879 = vmatpush.msra.mxu3 %v6690_v20  ;;  %v1549_v54 = vadd.f32 %v7234_v37, %v1548_v11  ;;  %v1556_v20 = vand.u32 2147483648, %v7213_v13  ;;  %v10849_v2 = vld [vmem:[#allocation25_spill] sm:$0xff]  ;;  %v7438_v11 = vld [vmem:[#allocation2 + $0xc0] sm:$0xff]  ;;  %v10860_v17 = vld [vmem:[#allocation44_spill] sm:$0xff] }
 0x27d   :  { %v1460_v49 = vsel %vm7309_vm11, %v7251_v24, %v1456_v43  ;;  %v10851_v43 = vld [vmem:[#allocation27_spill] sm:$0xff] }
 0x27e   :  { %v1465_v47 = vsel %vm1462_vm13, %v1464_v35, %v1460_v49  ;;  %v1475_v46 = vsel %vm1474_vm14, %v4473_v34, %v1471_v50  ;;  %1840 = vmatpush.msrb.mxu1 %v6696_v14  ;;  %1880 = vmatpush.msra.mxu3 %v6699_v44  ;;  %v1539_v14 = vand.u32 2147483647, %v7211_v30  ;;  %v1554_v44 = vand.u32 2147483647, %v7213_v13  ;;  %v7422_v35 = vld [vmem:[#allocation2 + $0x100] sm:$0xff]  ;;  %v7425_v50 = vld [vmem:[#allocation2 + $0x110] sm:$0xff] }
 0x27f   :  { %v1480_v12 = vsel %vm1477_vm15, %v1479_v6, %v1475_v46  ;;  %v1568_v24 = vmul.f32 %v4475_v62, %v1465_v47  ;;  %v1553_v52 = vsel %vm1552_vm5, %v7234_v37, %v1549_v54  ;;  %v1557_v30 = vor.u32 1.1754944e-38, %v1556_v20  ;;  %v10854_v62 = vld [vmem:[#allocation32_spill] sm:$0xff]  ;;  %v7430_v49 = vld [vmem:[#allocation2 + $0xe0] sm:$0xff] }
 0x280   :  { %v1569_v16 = vmul.f32 %v4477_v40, %v1480_v12  ;;  %1841 = vmatpush.msrb.mxu1 %v6702_v55  ;;  %1881 = vmatpush.msra.mxu3 %v6705_v15  ;;  %v1538_v55 = vsel %vm1537_vm4, %v7231_v8, %v1534_v21  ;;  %v1542_v15 = vor.u32 1.1754944e-38, %v1541_v61  ;;  %vm1540_vm6 = vcmp.eq.f32.partialorder %v1539_v14, 8.507059e+37  ;;  %v7433_v6 = vld [vmem:[#allocation2 + $0xf0] sm:$0xff]  ;;  %v10857_v46 = vld [vmem:[#allocation39_spill] sm:$0xff] }
 0x281   :  { %v7329_v7 = vadd.f32 %v1568_v24, %v1566_v26  ;;  %vm1555_vm7 = vcmp.eq.f32.partialorder %v1554_v44, 8.507059e+37  ;;  %v10856_v40 = vld [vmem:[#allocation36_spill] sm:$0xff]  ;;  %v10859_v24 = vld [vmem:[#allocation43_spill] sm:$0xff] }
 0x282   :  { %v7333_v34 = vadd.f32 %v1569_v16, %v1567_v57  ;;  %1842 = vmatpush.msrb.mxu1 %v6708_v4  ;;  %1882 = vmatpush.msra.mxu3 %v6711_v53  ;;  %v1543_v4 = vsel %vm1540_vm6, %v1542_v15, %v1538_v55  ;;  %v1558_v13 = vsel %vm1555_vm7, %v1557_v30, %v1553_v52  ;;  %v7441_v47 = vld [vmem:[#allocation2 + $0xd0] sm:$0xff]  ;;  %v7454_v57 = vld [vmem:[#allocation2 + $0x80] sm:$0xff] }
 0x283   :  { %4478 = vtanh.f32 %v7329_v7  ;;  %v10858_v12 = vld [vmem:[#allocation40_spill] sm:$0xff]  ;;  %v10861_v21 = vld [vmem:[#allocation47_spill] sm:$0xff] }
 0x284   :  { %4480 = vtanh.f32 %v7333_v34  ;;  %1843 = vmatpush.msrb.mxu1 %v6714_v42  ;;  %1883 = vmatpush.msra.mxu3 %v6717_v22  ;;  %v7449_v26 = vld [vmem:[#allocation2 + $0xb0] sm:$0xff]  ;;  %v7462_v54 = vld [vmem:[#allocation2 + $0x60] sm:$0xff] }
 0x285   :  { %v7457_v16 = vld [vmem:[#allocation2 + $0x90] sm:$0xff]  ;;  %v10863_v14 = vld [vmem:[#allocation51_spill] sm:$0xff] }
 0x286   :  { %1844 = vmatpush.msrb.mxu1 %v6723_v28  ;;  %1884 = vmatpush.msra.mxu3 %v6726_v63  ;;  %v10862_v61 = vld [vmem:[#allocation48_spill] sm:$0xff]  ;;  %v7470_v55 = vld [vmem:[#allocation2 + $0x40] sm:$0xff] }
 0x287   :  { %v7465_v20 = vld [vmem:[#allocation2 + $0x70] sm:$0xff]  ;;  %v10865_v52 = vld [vmem:[#allocation55_spill] sm:$0xff] }
 0x288   :  { %1845 = vmatpush.msrb.mxu1 %v6731_v39  ;;  %1885 = vmatpush.msra.mxu3 %v6734_v45  ;;  %v7368_v45 = vld [vmem:[#allocation2 + $0x1e0] sm:$0xff]  ;;  %v10864_v44 = vld [vmem:[#allocation52_spill] sm:$0xff] }
 0x289   :  { %v4479_v36 = vpop.eup %4478  ;;  %v7473_v15 = vld [vmem:[#allocation2 + $0x50] sm:$0xff] }
 0x28a   :  { %v4481_v53 = vpop.eup %4480  ;;  %v1574_v8 = vmul.f32 %v4479_v36, %v1543_v4  ;;  %1846 = vmatpush.msrb.mxu1 %v6739_v9  ;;  %1886 = vmatpush.msra.mxu3 %v6742_v56  ;;  %v7371_v9 = vld [vmem:[#allocation2 + $0x1f0] sm:$0xff]  ;;  %v7376_v56 = vld [vmem:[#allocation2 + $0x1c0] sm:$0xff] }
 0x28b   :  { %v1575_v42 = vmul.f32 %v4481_v53, %v1558_v13  ;;  %v10866_v30 = vld [vmem:[#allocation56_spill] sm:$0xff]  ;;  %v7478_v36 = vld [vmem:[#allocation2 + $0x20] sm:$0xff] }
 0x28c   :  { %v1810_v22 = vrot.slane %v1574_v8, 2  ;;  %1847 = vmatpush.msrb.mxu1 %v6747_v19  ;;  %1887 = vmatpush.msra.mxu3 %v6750_v5  ;;  %v7379_v19 = vld [vmem:[#allocation2 + $0x1d0] sm:$0xff]  ;;  %v7384_v5 = vld [vmem:[#allocation2 + $0x1a0] sm:$0xff] }
 0x28d   :  { %v1578_v37 = vrot.slane %v1575_v42, 7  ;;  %v1811_v28 = vrot.slane %v1575_v42, 1  ;;  %v7481_v4 = vld [vmem:[#allocation2 + $0x30] sm:$0xff]  ;;  %v10867_v53 = vld [vmem:[#allocation59_spill] sm:$0xff] }
 0x28e   :  { %1848 = vmatpush.msrb.mxu1 %v6755_v59  ;;  %1888 = vmatpush.msra.mxu3 %v6758_v18  ;;  %v7387_v59 = vld [vmem:[#allocation2 + $0x1b0] sm:$0xff] }
 0x28f   :  { %v1580_v1 = vsel %vm1579_vm8, %v1578_v37, %v1574_v8  ;;  %v7364_v63 = vsel %vm637_vm10, %v1811_v28, %v1810_v22  ;;  %v10845_v18 = vld [vmem:[#allocation21_spill] sm:$0xff]  ;;  %v10868_v13 = vld [vmem:[#allocation60_spill] sm:$0xff]  ;;  %v7486_v8 = vld [vmem:[#allocation2] sm:$0xff] }
 0x290   :  { %v1583_v39 = vrot.slane %v1580_v1, 2  ;;  %1849 = vmatpush.msrb.mxu1 %v6761_v41  ;;  %1889 = vmatpush.msra.mxu3 %v6764_v23  ;;  %v10846_v41 = vld [vmem:[#allocation22_spill] sm:$0xff]  ;;  %10869 = vst [vmem:[#allocation21_spill] sm:$0xff] %v7486_v8  ;;  %v7489_v42 = vld [vmem:[#allocation2 + $0x10] sm:$0xff]  ;;  %v10871_v22 = vld [vmem:[#allocation67_spill] sm:$0xff] }
 0x291   :  { %1850 = vmatmul.f32.vlgmr.msrb.gmra.mxu1 %v7364_v63  ;;  %1890 = vmatmul.f32.vlgmr.msra.gmra.mxu3 %v7364_v63  ;;  %v7392_v23 = vld [vmem:[#allocation2 + $0x180] sm:$0xff]  ;;  %10870 = vst [vmem:[#allocation22_spill] sm:$0xff] %v7489_v42  ;;  %v10872_v37 = vld [vmem:[#allocation29_spill] sm:$0xff]  ;;  %v10874_v1 = vld [vmem:[#allocation64_spill] sm:$0xff] }
 0x292   :  { %1603 = vmatmul.f32.vlgmr.msrb.gmra.mxu0 %v1583_v39  ;;  %1643 = vmatmul.f32.vlgmr.msra.gmra.mxu2 %v1583_v39  ;;  %v10873_v28 = vld [vmem:[#allocation63_spill] sm:$0xff] }
 0x293   :  { %1814 = vmatpush.msrb.mxu0 %v7368_v45  ;;  %1854 = vmatpush.msra.mxu2 %v7371_v9 }
 0x294   :  { %2085 = vmatpush.msra.mxu1 %v10845_v18  ;;  %2125 = vmatpush.msrb.mxu3 %v10846_v41  ;;  %v10876_v18 = vld [vmem:[#allocation71_spill] sm:$0xff]  ;;  %v10877_v41 = vld [vmem:[#allocation30_spill] sm:$0xff] }
 0x295   :  { %1815 = vmatpush.msrb.mxu0 %v7376_v56  ;;  %1855 = vmatpush.msra.mxu2 %v7379_v19 }
 0x296   :  { %2086 = vmatpush.msra.mxu1 %v10847_v27  ;;  %2126 = vmatpush.msrb.mxu3 %v10848_v38  ;;  %v10878_v27 = vld [vmem:[#allocation68_spill] sm:$0xff]  ;;  %v10879_v38 = vld [vmem:[#allocation37_spill] sm:$0xff] }
 0x297   :  { %1816 = vmatpush.msrb.mxu0 %v7384_v5  ;;  %1856 = vmatpush.msra.mxu2 %v7387_v59 }
 0x298   :  { %2087 = vmatpush.msra.mxu1 %v10849_v2  ;;  %2127 = vmatpush.msrb.mxu3 %v10850_v29  ;;  %v10880_v2 = vld [vmem:[#allocation75_spill] sm:$0xff]  ;;  %v10882_v29 = vld [vmem:[#allocation72_spill] sm:$0xff] }
 0x299   :  { %1817 = vmatpush.msrb.mxu0 %v7392_v23  ;;  %1857 = vmatpush.msra.mxu2 %v7395_v58 }
 0x29a   :  { %1683 = vmatmul.f32.vlgmr.msra.gmra.mxu0 %v1583_v39  ;;  %1723 = vmatmul.f32.vlgmr.msrb.gmra.mxu2 %v1583_v39  ;;  %v10875_v39 = vld [vmem:[#allocation33_spill] sm:$0xff] }
 0x29b   :  { %1818 = vmatpush.msrb.mxu0 %v7398_v60  ;;  %1858 = vmatpush.msra.mxu2 %v7401_v32 }
 0x29c   :  { %2088 = vmatpush.msra.mxu1 %v10851_v43  ;;  %2128 = vmatpush.msrb.mxu3 %v10852_v33  ;;  %v10883_v43 = vld [vmem:[#allocation41_spill] sm:$0xff]  ;;  %v10884_v33 = vld [vmem:[#allocation42_spill] sm:$0xff] }
 0x29d   :  { %1819 = vmatpush.msrb.mxu0 %v7406_v51  ;;  %1859 = vmatpush.msra.mxu2 %v7409_v0 }
 0x29e   :  { %2089 = vmatpush.msra.mxu1 %v10853_v25  ;;  %2129 = vmatpush.msrb.mxu3 %v10854_v62  ;;  %v10885_v25 = vld [vmem:[#allocation45_spill] sm:$0xff]  ;;  %v10886_v62 = vld [vmem:[#allocation46_spill] sm:$0xff] }
 0x29f   :  { %1820 = vmatpush.msrb.mxu0 %v7414_v48  ;;  %1860 = vmatpush.msra.mxu2 %v7417_v10 }
 0x2a0   :  { %2090 = vmatpush.msra.mxu1 %v10855_v31  ;;  %2130 = vmatpush.msrb.mxu3 %v10856_v40  ;;  %v10887_v31 = vld [vmem:[#allocation38_spill] sm:$0xff]  ;;  %v10888_v40 = vld [vmem:[#allocation76_spill] sm:$0xff] }
 0x2a1   :  { %1821 = vmatpush.msrb.mxu0 %v7422_v35  ;;  %1861 = vmatpush.msra.mxu2 %v7425_v50 }
 0x2a2   :  { %2091 = vmatpush.msra.mxu1 %v10857_v46  ;;  %2131 = vmatpush.msrb.mxu3 %v10858_v12  ;;  %v10889_v46 = vld [vmem:[#allocation86_spill] sm:$0xff] }
 0x2a3   :  { %1822 = vmatpush.msrb.mxu0 %v7430_v49  ;;  %1862 = vmatpush.msra.mxu2 %v7433_v6  ;;  %v10890_v12 = vld [vmem:[#allocation50_spill] sm:$0xff] }
 0x2a4   :  { %2092 = vmatpush.msra.mxu1 %v10859_v24  ;;  %2132 = vmatpush.msrb.mxu3 %v10860_v17  ;;  %v10891_v24 = vld [vmem:[#allocation83_spill] sm:$0xff]  ;;  %v10892_v17 = vld [vmem:[#allocation49_spill] sm:$0xff] }
 0x2a5   :  { %1823 = vmatpush.msrb.mxu0 %v7438_v11  ;;  %1863 = vmatpush.msra.mxu2 %v7441_v47 }
 0x2a6   :  { %2093 = vmatpush.msra.mxu1 %v10861_v21  ;;  %2133 = vmatpush.msrb.mxu3 %v10862_v61  ;;  %v10893_v21 = vld [vmem:[#allocation90_spill] sm:$0xff] }
 0x2a7   :  { %1824 = vmatpush.msrb.mxu0 %v7446_v3  ;;  %1864 = vmatpush.msra.mxu2 %v7449_v26  ;;  %v10894_v61 = vld [vmem:[#allocation54_spill] sm:$0xff] }
 0x2a8   :  { %2094 = vmatpush.msra.mxu1 %v10863_v14  ;;  %2134 = vmatpush.msrb.mxu3 %v10864_v44  ;;  %v10895_v14 = vld [vmem:[#allocation87_spill] sm:$0xff]  ;;  %v10896_v44 = vld [vmem:[#allocation53_spill] sm:$0xff] }
 0x2a9   :  { %1825 = vmatpush.msrb.mxu0 %v7454_v57  ;;  %1865 = vmatpush.msra.mxu2 %v7457_v16 }
 0x2aa   :  { %2095 = vmatpush.msra.mxu1 %v10865_v52  ;;  %2135 = vmatpush.msrb.mxu3 %v10866_v30  ;;  %v10897_v52 = vld [vmem:[#allocation58_spill] sm:$0xff]  ;;  %v10898_v30 = vld [vmem:[#allocation61_spill] sm:$0xff] }
 0x2ab   :  { %1826 = vmatpush.msrb.mxu0 %v7462_v54  ;;  %1866 = vmatpush.msra.mxu2 %v7465_v20 }
 0x2ac   :  { %2096 = vmatpush.msra.mxu1 %v10867_v53  ;;  %2136 = vmatpush.msrb.mxu3 %v10868_v13  ;;  %v10899_v53 = vld [vmem:[#allocation91_spill] sm:$0xff]  ;;  %v10900_v13 = vld [vmem:[#allocation57_spill] sm:$0xff] }
 0x2ad   :  { %1827 = vmatpush.msrb.mxu0 %v7470_v55  ;;  %1867 = vmatpush.msra.mxu2 %v7473_v15 }
 0x2ae   :  { %2097 = vmatpush.msra.mxu1 %v10871_v22  ;;  %2137 = vmatpush.msrb.mxu3 %v10872_v37  ;;  %v10901_v22 = vld [vmem:[#allocation66_spill] sm:$0xff]  ;;  %v10902_v37 = vld [vmem:[#allocation69_spill] sm:$0xff] }
 0x2af   :  { %1828 = vmatpush.msrb.mxu0 %v7478_v36  ;;  %1868 = vmatpush.msra.mxu2 %v7481_v4 }
 0x2b0   :  { %2098 = vmatpush.msra.mxu1 %v10875_v39  ;;  %2138 = vmatpush.msrb.mxu3 %v10876_v18  ;;  %v10905_v39 = vld [vmem:[#allocation74_spill] sm:$0xff] }
 0x2b1   :  { %1829 = vmatpush.msrb.mxu0 %v7486_v8  ;;  %1869 = vmatpush.msra.mxu2 %v7489_v42  ;;  %v10906_v18 = vld [vmem:[#allocation78_spill] sm:$0xff]  ;;  %v7710_v8 = vld [vmem:[#allocation2 + $0x1e8] sm:$0xff] }
 0x2b2   :  { %1830 = vmatmul.f32.vlgmr.msrb.gmra.mxu0 %v7364_v63  ;;  %1870 = vmatmul.f32.vlgmr.msra.gmra.mxu2 %v7364_v63  ;;  %v10881_v63 = vld [vmem:[#allocation34_spill] sm:$0xff] }
 0x2b3   :  { %2065 = vmatpush.msra.mxu0 %v10873_v28  ;;  %2105 = vmatpush.msrb.mxu2 %v10874_v1  ;;  %v10903_v28 = vld [vmem:[#allocation62_spill] sm:$0xff]  ;;  %v10904_v1 = vld [vmem:[#allocation65_spill] sm:$0xff] }
 0x2b4   :  { %2099 = vmatpush.msra.mxu1 %v10879_v38  ;;  %2139 = vmatpush.msrb.mxu3 %v10880_v2  ;;  %v10909_v38 = vld [vmem:[#allocation82_spill] sm:$0xff]  ;;  %v10910_v2 = vld [vmem:[#allocation84_spill] sm:$0xff] }
 0x2b5   :  { %2066 = vmatpush.msra.mxu0 %v10877_v41  ;;  %2106 = vmatpush.msrb.mxu2 %v10878_v27  ;;  %v10907_v41 = vld [vmem:[#allocation70_spill] sm:$0xff]  ;;  %v10908_v27 = vld [vmem:[#allocation73_spill] sm:$0xff] }
 0x2b6   :  { %2100 = vmatpush.msra.mxu1 %v10883_v43  ;;  %2140 = vmatpush.msrb.mxu3 %v10884_v33  ;;  %v10913_v43 = vld [vmem:[#allocation89_spill] sm:$0xff]  ;;  %v10914_v33 = vld [vmem:[#allocation92_spill] sm:$0xff] }
 0x2b7   :  { %2067 = vmatpush.msra.mxu0 %v10881_v63  ;;  %2107 = vmatpush.msrb.mxu2 %v10882_v29  ;;  %v10911_v63 = vld [vmem:[#allocation79_spill] sm:$0xff]  ;;  %v10912_v29 = vld [vmem:[#allocation81_spill] sm:$0xff] }
 0x2b8   :  { %2165 = vmatpush.msrb.mxu1 %v10885_v25  ;;  %2205 = vmatpush.msra.mxu3 %v10886_v62  ;;  %v10915_v25 = vld [vmem:[#allocation85_spill] sm:$0xff]  ;;  %v10916_v62 = vld [vmem:[#allocation88_spill] sm:$0xff] }
 0x2b9   :  { %2068 = vmatpush.msra.mxu0 %v10887_v31  ;;  %2108 = vmatpush.msrb.mxu2 %v10888_v40  ;;  %v10917_v31 = vld [vmem:[#allocation95_spill] sm:$0xff]  ;;  %v10918_v40 = vld [vmem:[#allocation96_spill] sm:$0xff] }
 0x2ba   :  { %2166 = vmatpush.msrb.mxu1 %v10889_v46  ;;  %2206 = vmatpush.msra.mxu3 %v10890_v12  ;;  %v10919_v46 = vld [vmem:[#allocation93_spill] sm:$0xff]  ;;  %v10920_v12 = vld [vmem:[#allocation94_spill] sm:$0xff] }
 0x2bb   :  { %2069 = vmatpush.msra.mxu0 %v10891_v24  ;;  %2109 = vmatpush.msrb.mxu2 %v10892_v17  ;;  %v10921_v24 = vld [vmem:[#allocation99_spill] sm:$0xff]  ;;  %v10922_v17 = vld [vmem:[#allocation104_spill] sm:$0xff] }
 0x2bc   :  { %2167 = vmatpush.msrb.mxu1 %v10893_v21  ;;  %2207 = vmatpush.msra.mxu3 %v10894_v61  ;;  %v10923_v21 = vld [vmem:[#allocation97_spill] sm:$0xff]  ;;  %v10924_v61 = vld [vmem:[#allocation98_spill] sm:$0xff] }
 0x2bd   :  { %2070 = vmatpush.msra.mxu0 %v10895_v14  ;;  %2110 = vmatpush.msrb.mxu2 %v10896_v44  ;;  %v10925_v14 = vld [vmem:[#allocation109_spill] sm:$0xff]  ;;  %v10926_v44 = vld [vmem:[#allocation110_spill] sm:$0xff] }
 0x2be   :  { %2168 = vmatpush.msrb.mxu1 %v10897_v52  ;;  %2208 = vmatpush.msra.mxu3 %v10898_v30  ;;  %v10927_v52 = vld [vmem:[#allocation105_spill] sm:$0xff]  ;;  %v10928_v30 = vld [vmem:[#allocation107_spill] sm:$0xff] }
 0x2bf   :  { %2071 = vmatpush.msra.mxu0 %v10899_v53  ;;  %2111 = vmatpush.msrb.mxu2 %v10900_v13  ;;  %v10929_v53 = vld [vmem:[#allocation11_spill] sm:$0xff]  ;;  %v10930_v13 = vld [vmem:[#allocation12_spill] sm:$0xff] }
 0x2c0   :  { %2169 = vmatpush.msrb.mxu1 %v10901_v22  ;;  %2209 = vmatpush.msra.mxu3 %v10902_v37  ;;  %v10931_v22 = vld [vmem:[#allocation111_spill] sm:$0xff]  ;;  %v10932_v37 = vld [vmem:[#allocation112_spill] sm:$0xff] }
 0x2c1   :  { %2072 = vmatpush.msra.mxu0 %v10903_v28  ;;  %2112 = vmatpush.msrb.mxu2 %v10904_v1  ;;  %v10933_v28 = vld [vmem:[#allocation15_spill] sm:$0xff]  ;;  %v10934_v1 = vld [vmem:[#allocation113_spill] sm:$0xff] }
 0x2c2   :  { %2170 = vmatpush.msrb.mxu1 %v10905_v39  ;;  %2210 = vmatpush.msra.mxu3 %v10906_v18  ;;  %v10935_v39 = vld [vmem:[#allocation13_spill] sm:$0xff]  ;;  %v10936_v18 = vld [vmem:[#allocation14_spill] sm:$0xff] }
 0x2c3   :  { %2073 = vmatpush.msra.mxu0 %v10907_v41  ;;  %2113 = vmatpush.msrb.mxu2 %v10908_v27  ;;  %v10937_v41 = vld [vmem:[#allocation114_spill] sm:$0xff]  ;;  %v10938_v27 = vld [vmem:[#allocation116_spill] sm:$0xff] }
 0x2c4   :  { %2171 = vmatpush.msrb.mxu1 %v10909_v38  ;;  %2211 = vmatpush.msra.mxu3 %v10910_v2  ;;  %v10939_v38 = vld [vmem:[#allocation115_spill] sm:$0xff]  ;;  %v10940_v2 = vld [vmem:[#allocation117_spill] sm:$0xff] }
 0x2c5   :  { %2074 = vmatpush.msra.mxu0 %v10911_v63  ;;  %2114 = vmatpush.msrb.mxu2 %v10912_v29  ;;  %v10941_v63 = vld [vmem:[#allocation118_spill] sm:$0xff]  ;;  %v10942_v29 = vld [vmem:[#allocation120_spill] sm:$0xff] }
 0x2c6   :  { %2172 = vmatpush.msrb.mxu1 %v10913_v43  ;;  %2212 = vmatpush.msra.mxu3 %v10914_v33  ;;  %v10943_v43 = vld [vmem:[#allocation119_spill] sm:$0xff]  ;;  %v10944_v33 = vld [vmem:[#allocation121_spill] sm:$0xff] }
 0x2c7   :  { %2075 = vmatpush.msra.mxu0 %v10915_v25  ;;  %2115 = vmatpush.msrb.mxu2 %v10916_v62  ;;  %v10945_v25 = vld [vmem:[#allocation122_spill] sm:$0xff]  ;;  %v10946_v62 = vld [vmem:[#allocation124_spill] sm:$0xff] }
 0x2c8   :  { %2173 = vmatpush.msrb.mxu1 %v10917_v31  ;;  %2213 = vmatpush.msra.mxu3 %v10918_v40  ;;  %v10947_v31 = vld [vmem:[#allocation123_spill] sm:$0xff]  ;;  %v10948_v40 = vld [vmem:[#allocation125_spill] sm:$0xff] }
 0x2c9   :  { %2076 = vmatpush.msra.mxu0 %v10919_v46  ;;  %2116 = vmatpush.msrb.mxu2 %v10920_v12  ;;  %v10949_v46 = vld [vmem:[#allocation126_spill] sm:$0xff]  ;;  %v10950_v12 = vld [vmem:[#allocation127_spill] sm:$0xff] }
 0x2ca   :  { %2174 = vmatpush.msrb.mxu1 %v10921_v24  ;;  %2214 = vmatpush.msra.mxu3 %v10922_v17  ;;  %v10951_v24 = vld [vmem:[#allocation128_spill] sm:$0xff]  ;;  %v10952_v17 = vld [vmem:[#allocation129_spill] sm:$0xff] }
 0x2cb   :  { %2077 = vmatpush.msra.mxu0 %v10923_v21  ;;  %2117 = vmatpush.msrb.mxu2 %v10924_v61  ;;  %v10953_v21 = vld [vmem:[#allocation130_spill] sm:$0xff]  ;;  %v10954_v61 = vld [vmem:[#allocation131_spill] sm:$0xff] }
 0x2cc   :  { %2175 = vmatpush.msrb.mxu1 %v10925_v14  ;;  %2215 = vmatpush.msra.mxu3 %v10926_v44  ;;  %v10955_v14 = vld [vmem:[#allocation132_spill] sm:$0xff]  ;;  %v10956_v44 = vld [vmem:[#allocation133_spill] sm:$0xff] }
 0x2cd   :  { %2078 = vmatpush.msra.mxu0 %v10927_v52  ;;  %2118 = vmatpush.msrb.mxu2 %v10928_v30  ;;  %v10957_v52 = vld [vmem:[#allocation134_spill] sm:$0xff]  ;;  %v10958_v30 = vld [vmem:[#allocation135_spill] sm:$0xff] }
 0x2ce   :  { %2176 = vmatpush.msrb.mxu1 %v10929_v53  ;;  %2216 = vmatpush.msra.mxu3 %v10930_v13  ;;  %v10959_v53 = vld [vmem:[#allocation136_spill] sm:$0xff]  ;;  %v10960_v13 = vld [vmem:[#allocation137_spill] sm:$0xff] }
 0x2cf   :  { %2079 = vmatpush.msra.mxu0 %v10931_v22  ;;  %2119 = vmatpush.msrb.mxu2 %v10932_v37  ;;  %v10961_v22 = vld [vmem:[#allocation138_spill] sm:$0xff]  ;;  %v10962_v37 = vld [vmem:[#allocation139_spill] sm:$0xff] }
 0x2d0   :  { %2177 = vmatpush.msrb.mxu1 %v10933_v28  ;;  %2217 = vmatpush.msra.mxu3 %v10934_v1  ;;  %v10963_v28 = vld [vmem:[#allocation140_spill] sm:$0xff]  ;;  %v10964_v1 = vld [vmem:[#allocation141_spill] sm:$0xff] }
 0x2d1   :  { %2080 = vmatpush.msra.mxu0 %v10935_v39  ;;  %2120 = vmatpush.msrb.mxu2 %v10936_v18  ;;  %v10965_v39 = vld [vmem:[#allocation142_spill] sm:$0xff]  ;;  %v10966_v18 = vld [vmem:[#allocation143_spill] sm:$0xff] }
 0x2d2   :  { %2178 = vmatpush.msrb.mxu1 %v10938_v27  ;;  %2218 = vmatpush.msra.mxu3 %v10940_v2  ;;  %v10968_v27 = vld [vmem:[#allocation145_spill] sm:$0xff]  ;;  %v10970_v2 = vld [vmem:[#allocation147_spill] sm:$0xff] }
 0x2d3   :  { %2145 = vmatpush.msrb.mxu0 %v10937_v41  ;;  %2185 = vmatpush.msra.mxu2 %v10939_v38  ;;  %v10967_v41 = vld [vmem:[#allocation144_spill] sm:$0xff]  ;;  %v10969_v38 = vld [vmem:[#allocation146_spill] sm:$0xff] }
 0x2d4   :  { %2179 = vmatpush.msrb.mxu1 %v10942_v29  ;;  %2219 = vmatpush.msra.mxu3 %v10944_v33  ;;  %v10972_v29 = vld [vmem:[#allocation149_spill] sm:$0xff]  ;;  %v10974_v33 = vld [vmem:[#allocation151_spill] sm:$0xff] }
 0x2d5   :  { %2146 = vmatpush.msrb.mxu0 %v10941_v63  ;;  %2186 = vmatpush.msra.mxu2 %v10943_v43  ;;  %v10971_v63 = vld [vmem:[#allocation148_spill] sm:$0xff]  ;;  %v10973_v43 = vld [vmem:[#allocation150_spill] sm:$0xff] }
 0x2d6   :  { %2180 = vmatpush.msrb.mxu1 %v10946_v62  ;;  %2220 = vmatpush.msra.mxu3 %v10948_v40 }
 0x2d7   :  { %2147 = vmatpush.msrb.mxu0 %v10945_v25  ;;  %2187 = vmatpush.msra.mxu2 %v10947_v31 }
 0x2d9   :  { %2148 = vmatpush.msrb.mxu0 %v10949_v46  ;;  %2188 = vmatpush.msra.mxu2 %v10950_v12  ;;  %v10975_v46 = vld [vmem:[#allocation16_spill] sm:$0xff] }
 0x2db   :  { %2149 = vmatpush.msrb.mxu0 %v10951_v24  ;;  %2189 = vmatpush.msra.mxu2 %v10952_v17 }
 0x2dd   :  { %2150 = vmatpush.msrb.mxu0 %v10953_v21  ;;  %2190 = vmatpush.msra.mxu2 %v10954_v61 }
 0x2df   :  { %2151 = vmatpush.msrb.mxu0 %v10955_v14  ;;  %2191 = vmatpush.msra.mxu2 %v10956_v44  ;;  %v10976_v44 = vld [vmem:[#allocation17_spill] sm:$0xff] }
 0x2e1   :  { %2152 = vmatpush.msrb.mxu0 %v10957_v52  ;;  %2192 = vmatpush.msra.mxu2 %v10958_v30 }
 0x2e3   :  { %2153 = vmatpush.msrb.mxu0 %v10959_v53  ;;  %2193 = vmatpush.msra.mxu2 %v10960_v13 }
 0x2e5   :  { %2154 = vmatpush.msrb.mxu0 %v10961_v22  ;;  %2194 = vmatpush.msra.mxu2 %v10962_v37  ;;  %v10977_v22 = vld [vmem:[#allocation102_spill] sm:$0xff] }
 0x2e7   :  { %2155 = vmatpush.msrb.mxu0 %v10963_v28  ;;  %2195 = vmatpush.msra.mxu2 %v10964_v1 }
 0x2e9   :  { %2156 = vmatpush.msrb.mxu0 %v10965_v39  ;;  %2196 = vmatpush.msra.mxu2 %v10966_v18  ;;  %v10978_v39 = vld [vmem:[#allocation103_spill] sm:$0xff] }
 0x2eb   :  { %2157 = vmatpush.msrb.mxu0 %v10967_v41  ;;  %2197 = vmatpush.msra.mxu2 %v10968_v27 }
 0x2ed   :  { %2158 = vmatpush.msrb.mxu0 %v10969_v38  ;;  %2198 = vmatpush.msra.mxu2 %v10970_v2  ;;  %v10979_v2 = vld [vmem:[#allocation18_spill] sm:$0xff] }
 0x2ee   :  { %v1624_v25 = vpop.f32.mrf.mxu1 }
 0x2ef   :  { %2159 = vmatpush.msrb.mxu0 %v10971_v63  ;;  %2199 = vmatpush.msra.mxu2 %v10972_v29 }
 0x2f1   :  { %2160 = vmatpush.msrb.mxu0 %v10973_v43  ;;  %2200 = vmatpush.msra.mxu2 %v10974_v33 }
 0x2f4   :  { %v1664_v31 = vpop.f32.mrf.mxu3 }
 0x2f6   :  { %v1704_v62 = vpop.f32.mrf.mxu1 }
 0x2fc   :  { %v1744_v30 = vpop.f32.mrf.mxu3 }
 0x30e   :  { %v1851_v17 = vpop.f32.mrf.mxu1 }
 0x30f   :  { %v1604_v40 = vpop.f32.mrf.mxu0  ;;  %v1899_v14 = vrot.slane %v1851_v17, 5  ;;  %v1903_v53 = vrot.slane %v1851_v17, 6  ;;  %v10980_v17 = vld [vmem:[#allocation19_spill] sm:$0xff] }
 0x310   :  { %v1605_v12 = vadd.f32 %v1604_v40, %v10975_v46 }
 0x311   :  { %v1915_v37 = vadd.f32 %v1899_v14, %v10977_v22  ;;  %v1919_v18 = vadd.f32 %v1903_v53, %v10978_v39  ;;  %v10981_v53 = vld [vmem:[#allocation100_spill] sm:$0xff] }
 0x312   :  { %v1625_v24 = vadd.f32 %v1624_v25, %v1605_v12 }
 0x313   :  { %v4303_v38 = vmul.f32 -1.442695, %v1915_v37  ;;  %v4304_v43 = vmul.f32 -1.442695, %v1919_v18 }
 0x314   :  { %v4298_v21 = vmul.f32 -1.442695, %v1625_v24  ;;  %v1891_v29 = vpop.f32.mrf.mxu3 }
 0x315   :  { %v1644_v61 = vpop.f32.mrf.mxu2 }
 0x316   :  { %4482 = vpow2.f32 %v4298_v21  ;;  %v1645_v52 = vadd.f32 %v1644_v61, %v10976_v44 }
 0x317   :  { %v1684_v25 = vpop.f32.mrf.mxu0 }
 0x318   :  { %v1665_v13 = vadd.f32 %v1664_v31, %v1645_v52  ;;  %v1901_v31 = vrot.slane %v1891_v29, 5  ;;  %v1685_v21 = vadd.f32 %v1684_v25, %v10980_v17  ;;  %v1905_v52 = vrot.slane %v1891_v29, 6 }
 0x31a   :  { %v4299_v28 = vmul.f32 -1.442695, %v1665_v13  ;;  %v1917_v13 = vadd.f32 %v1901_v31, %v10981_v53 }
 0x31c   :  { %v4483_v1 = vpop.eup %4482  ;;  %4484 = vpow2.f32 %v4299_v28 }
 0x31d   :  { %v1750_v41 = vadd.f32 1.0, %v4483_v1  ;;  %v1724_v27 = vpop.f32.mrf.mxu2  ;;  %v1705_v1 = vadd.f32 %v1704_v62, %v1685_v21 }
 0x31e   :  { %v1725_v63 = vadd.f32 %v1724_v27, %v10979_v2  ;;  %v10982_v27 = vld [vmem:[#allocation101_spill] sm:$0xff]  ;;  %v10986_v2 = vld [vmem:[#allocation80_spill] sm:$0xff] }
 0x31f   :  { %4486 = vrcp.f32 %v1750_v41  ;;  %vm1756_vm11 = vweird.f32 %v1750_v41  ;;  %v1760_v31 = vand.u32 2147483647, %v1750_v41 }
 0x320   :  { %v1745_v33 = vadd.f32 %v1744_v30, %v1725_v63  ;;  %4488 = vpow2.f32 %v4303_v38  ;;  %v1921_v38 = vadd.f32 %v1905_v52, %v10982_v27  ;;  %v4305_v63 = vmul.f32 -1.442695, %v1917_v13 }
 0x321   :  { %4490 = vpow2.f32 %v4304_v43  ;;  %vm1761_vm15 = vcmp.eq.f32.partialorder %v1760_v31, 8.507059e+37 }
 0x322   :  { %v4485_v40 = vpop.eup %4484  ;;  %v4300_v24 = vmul.f32 -1.442695, %v1745_v33  ;;  %v4306_v62 = vmul.f32 -1.442695, %v1921_v38 }
 0x323   :  { %v1769_v12 = vadd.f32 1.0, %v4485_v40 }
 0x325   :  { %v4487_v61 = vpop.eup %4486  ;;  %4492 = vrcp.f32 %v1769_v12  ;;  %v1781_v52 = vand.u32 2147483648, %v1769_v12  ;;  %vm1775_vm14 = vweird.f32 %v1769_v12 }
 0x326   :  { %v1752_v14 = vmul.f32 %v4487_v61, %v1750_v41  ;;  %4494 = vpow2.f32 %v4300_v24  ;;  %v4489_v37 = vpop.eup %4488  ;;  %vm1757_vm9 = vweird.f32 %v4487_v61  ;;  %v1762_v24 = vand.u32 2147483648, %v1750_v41 }
 0x327   :  { %v4491_v30 = vpop.eup %4490  ;;  %v7606_v33 = vadd.f32 1.0, %v4489_v37  ;;  %4496 = vtanh.f32 %v1705_v1  ;;  %vm7613_vm12 = vmor %vm1756_vm11, %vm1757_vm9  ;;  %v1779_v37 = vand.u32 2147483647, %v1769_v12 }
 0x328   :  { %v1753_v28 = vsub.f32 1.0, %v1752_v14  ;;  %v7608_v29 = vadd.f32 1.0, %v4491_v30  ;;  %4498 = vpow2.f32 %v4305_v63  ;;  %v1763_v41 = vor.u32 1.1754944e-38, %v1762_v24 }
 0x329   :  { %4500 = vrcp.f32 %v7606_v33  ;;  %vm1780_vm1 = vcmp.eq.f32.partialorder %v1779_v37, 8.507059e+37  ;;  %vm1973_vm6 = vweird.f32 %v7606_v33 }
 0x32a   :  { %v1754_v18 = vmul.f32 %v4487_v61, %v1753_v28  ;;  %vm1988_vm8 = vweird.f32 %v7608_v29 }
 0x32b   :  { %v4493_v40 = vpop.eup %4492 }
 0x32c   :  { %v1771_v43 = vmul.f32 %v4493_v40, %v1769_v12  ;;  %v1755_v25 = vadd.f32 %v4487_v61, %v1754_v18  ;;  %v4495_v17 = vpop.eup %4494  ;;  %vm1776_vm13 = vweird.f32 %v4493_v40  ;;  %v10987_v12 = vld [vmem:[#allocation20_spill] sm:$0xff] }
 0x32d   :  { %v7610_v21 = vadd.f32 1.0, %v4495_v17  ;;  %v4497_v38 = vpop.eup %4496  ;;  %vm1777_vm0 = vmor %vm1775_vm14, %vm1776_vm13 }
 0x32e   :  { %v1772_v14 = vsub.f32 1.0, %v1771_v43  ;;  %v1759_v30 = vsel %vm7613_vm12, %v4487_v61, %v1755_v25  ;;  %v1782_v43 = vor.u32 1.1754944e-38, %v1781_v52  ;;  %v4499_v61 = vpop.eup %4498 }
 0x32f   :  { %v1831_v28 = vpop.f32.mrf.mxu0  ;;  %4502 = vrcp.f32 %v7610_v21  ;;  %v1764_v27 = vsel %vm1761_vm15, %v1763_v41, %v1759_v30  ;;  %v7623_v39 = vpop.eup %4500  ;;  %vm1795_vm3 = vweird.f32 %v7610_v21 }
 0x330   :  { %v1773_v1 = vmul.f32 %v4493_v40, %v1772_v14  ;;  %4504 = vrcp.f32 %v7608_v29  ;;  %v1898_v17 = vrot.slane %v1831_v28, 5  ;;  %v1902_v18 = vrot.slane %v1831_v28, 6  ;;  %v10985_v14 = vld [vmem:[#allocation77_spill] sm:$0xff] }
 0x331   :  { %4506 = vpow2.f32 %v4306_v62  ;;  %vm1974_vm7 = vweird.f32 %v7623_v39 }
 0x332   :  { %v1774_v63 = vadd.f32 %v4493_v40, %v1773_v1  ;;  %v1914_v53 = vadd.f32 %v1898_v17, %v10985_v14  ;;  %v1918_v13 = vadd.f32 %v1902_v18, %v10986_v2  ;;  %v1806_v1 = vmul.f32 %v4497_v38, %v1764_v27  ;;  %vm7684_vm11 = vmor %vm1973_vm6, %vm1974_vm7 }
 0x333   :  { %v7631_v17 = vadd.f32 1.0, %v4499_v61 }
 0x334   :  { %v1778_v25 = vsel %vm1777_vm0, %v4493_v40, %v1774_v63  ;;  %v4301_v22 = vmul.f32 -1.442695, %v1914_v53  ;;  %v4302_v28 = vmul.f32 -1.442695, %v1918_v13  ;;  %v1969_v40 = vmul.f32 %v7623_v39, %v7606_v33 }
 0x335   :  { %v1783_v24 = vsel %vm1780_vm1, %v1782_v43, %v1778_v25  ;;  %v4503_v44 = vpop.eup %4502  ;;  %v1799_v13 = vand.u32 2147483647, %v7610_v21 }
 0x336   :  { %v1805_v31 = vmul.f32 %v1783_v24, %v10987_v12  ;;  %v7626_v62 = vpop.eup %4504  ;;  %v1791_v52 = vmul.f32 %v4503_v44, %v7610_v21  ;;  %4508 = vpow2.f32 %v4301_v22  ;;  %vm1796_vm2 = vweird.f32 %v4503_v44 }
 0x337   :  { %v4507_v30 = vpop.eup %4506  ;;  %4510 = vpow2.f32 %v4302_v28  ;;  %v1984_v37 = vmul.f32 %v7626_v62, %v7608_v29  ;;  %v1801_v22 = vand.u32 2147483648, %v7610_v21  ;;  %v1970_v63 = vsub.f32 1.0, %v1969_v40  ;;  %v1871_v28 = vpop.f32.mrf.mxu2  ;;  %vm1797_vm4 = vmor %vm1795_vm3, %vm1796_vm2 }
 0x338   :  { %v7629_v41 = vadd.f32 %v1806_v1, %v1805_v31  ;;  %v1792_v53 = vsub.f32 1.0, %v1791_v52  ;;  %v7638_v27 = vadd.f32 1.0, %v4507_v30  ;;  %v1900_v21 = vrot.slane %v1871_v28, 5 }
 0x339   :  { %v1985_v25 = vsub.f32 1.0, %v1984_v37  ;;  %v1802_v52 = vor.u32 1.1754944e-38, %v1801_v22  ;;  %v1971_v30 = vmul.f32 %v7623_v39, %v1970_v63  ;;  %vm1800_vm5 = vcmp.eq.f32.partialorder %v1799_v13, 8.507059e+37 }
 0x33a   :  { %10988 = vst [vmem:[#allocation23_spill] sm:$0xff] %v7629_v41  ;;  %4512 = vtanh.f32 %v7629_v41  ;;  %v1793_v18 = vmul.f32 %v4503_v44, %v1792_v53  ;;  %v1904_v37 = vrot.slane %v1871_v28, 6  ;;  %v1977_v63 = vand.u32 2147483647, %v7606_v33  ;;  %v10989_v28 = vld [vmem:[#allocation106_spill] sm:$0xff] }
 0x33b   :  { %4514 = vrcp.f32 %v7631_v17  ;;  %v1986_v53 = vmul.f32 %v7626_v62, %v1985_v25  ;;  %vm1989_vm9 = vweird.f32 %v7626_v62 }
 0x33c   :  { %v4509_v38 = vpop.eup %4508  ;;  %v1794_v43 = vadd.f32 %v4503_v44, %v1793_v18  ;;  %4516 = vrcp.f32 %v7638_v27  ;;  %vm7692_vm12 = vcmp.eq.f32.partialorder %v1977_v63, 8.507059e+37  ;;  %vm7697_vm13 = vmor %vm1988_vm8, %vm1989_vm9  ;;  %vm2013_vm9 = vweird.f32 %v7631_v17 }
 0x33d   :  { %v4511_v61 = vpop.eup %4510  ;;  %v7644_v24 = vadd.f32 1.0, %v4509_v38  ;;  %v1987_v22 = vadd.f32 %v7626_v62, %v1986_v53 }
 0x33e   :  { %v7647_v12 = vadd.f32 1.0, %v4511_v61  ;;  %v1798_v31 = vsel %vm1797_vm4, %v4503_v44, %v1794_v43  ;;  %v1979_v44 = vand.u32 2147483648, %v7606_v33  ;;  %v1994_v43 = vand.u32 2147483648, %v7608_v29 }
 0x33f   :  { %4518 = vrcp.f32 %v7644_v24  ;;  %v1803_v18 = vsel %vm1800_vm5, %v1802_v52, %v1798_v31  ;;  %v1916_v31 = vadd.f32 %v1900_v21, %v10989_v28  ;;  %v1972_v52 = vadd.f32 %v7623_v39, %v1971_v30  ;;  %v7726_v30 = vld [vmem:[#allocation2 + $0x1d8] sm:$0xff] }
 0x340   :  { %v4513_v1 = vpop.eup %4512  ;;  %4520 = vrcp.f32 %v7647_v12  ;;  %v1980_v14 = vor.u32 1.1754944e-38, %v1979_v44  ;;  %v1995_v46 = vor.u32 1.1754944e-38, %v1994_v43  ;;  %v1941_v42 = vand.u32 2147483648, %v7644_v24  ;;  %10997 = vst [vmem:[#allocation24_spill] sm:$0xff] %v7726_v30 }
 0x341   :  { %v7652_v40 = vpop.eup %4514  ;;  %v1809_v61 = vmul.f32 %v4513_v1, %v1803_v18  ;;  %v10990_v1 = vld [vmem:[#allocation108_spill] sm:$0xff]  ;;  %4522 = vtanh.f32 %v1916_v31  ;;  %v1939_v31 = vand.u32 2147483647, %v7644_v24  ;;  %vm1935_vm0 = vweird.f32 %v7644_v24 }
 0x342   :  { %v7662_v13 = vpop.eup %4516  ;;  %v2009_v25 = vmul.f32 %v7652_v40, %v7631_v17  ;;  %v1920_v18 = vadd.f32 %v1904_v37, %v10990_v1  ;;  %v1976_v1 = vsel %vm7684_vm11, %v7623_v39, %v1972_v52  ;;  %v1956_v52 = vand.u32 2147483648, %v7647_v12 }
 0x343   :  { %v2060_v38 = vrot.slane %v1809_v61, 5  ;;  %v2024_v53 = vmul.f32 %v7662_v13, %v7638_v27  ;;  %vm1950_vm3 = vweird.f32 %v7647_v12  ;;  %vm1940_vm4 = vcmp.eq.f32.partialorder %v1939_v31, 8.507059e+37 }
 0x344   :  { %v2010_v33 = vsub.f32 1.0, %v2009_v25  ;;  %4524 = vtanh.f32 %v1920_v18  ;;  %v7713_v25 = vld [vmem:[#allocation2 + $0x1f8] sm:$0xff]  ;;  %v7723_v18 = vld [vmem:[#allocation2 + $0x1c8] sm:$0xff]  ;;  %v11002_v31 = vrot.slane %v7329_v7, 7  ;;  %vm2014_vm7 = vweird.f32 %v7652_v40 }
 0x345   :  { %v7668_v41 = vpop.eup %4518  ;;  %v7678_v28 = vrot.slane %v2060_v38, 3  ;;  %v1992_v38 = vand.u32 2147483647, %v7608_v29  ;;  %v1991_v29 = vsel %vm7697_vm13, %v7626_v62, %v1987_v22  ;;  %v1954_v22 = vand.u32 2147483647, %v7647_v12 }
 0x346   :  { %v7674_v2 = vpop.eup %4520  ;;  %v1931_v21 = vmul.f32 %v7668_v41, %v7644_v24  ;;  %vm1936_vm14 = vweird.f32 %v7668_v41  ;;  %v7745_v24 = vld [vmem:[#allocation2 + $0x1b8] sm:$0xff]  ;;  %vm2029_vm8 = vweird.f32 %v7662_v13  ;;  %vm2028_vm11 = vweird.f32 %v7638_v27 }
 0x347   :  { %v1946_v37 = vmul.f32 %v7674_v2, %v7647_v12  ;;  %2101 = vmatmul.f32.vlgmr.msra.gmra.mxu1 %v7678_v28  ;;  %2141 = vmatmul.f32.vlgmr.msrb.gmra.mxu3 %v7678_v28  ;;  %vm1951_vm15 = vweird.f32 %v7674_v2  ;;  %vm1993_vm1 = vcmp.eq.f32.partialorder %v1992_v38, 8.507059e+37  ;;  %vm7734_vm2 = vmor %vm1935_vm0, %vm1936_vm14  ;;  %11001 = vst [vmem:[#allocation26_spill] sm:$0xff] %v7745_v24  ;;  %v4523_v38 = vpop.eup %4522  ;;  %v1957_v12 = vor.u32 1.1754944e-38, %v1956_v52 }
 0x348   :  { %v1932_v61 = vsub.f32 1.0, %v1931_v21  ;;  %2312 = vmatpush.msra.mxu1 %v7710_v8  ;;  %2352 = vmatpush.msrb.mxu3 %v7713_v25  ;;  %v2025_v21 = vsub.f32 1.0, %v2024_v53  ;;  %vm1952_vm5 = vmor %vm1950_vm3, %vm1951_vm15  ;;  %v1996_v44 = vsel %vm1993_vm1, %v1995_v46, %v1991_v29  ;;  %vm1955_vm6 = vcmp.eq.f32.partialorder %v1954_v22, 8.507059e+37  ;;  %v7767_v22 = vld [vmem:[#allocation2 + $0x168] sm:$0xff] }
 0x349   :  { %v1947_v63 = vsub.f32 1.0, %v1946_v37  ;;  %v2011_v37 = vmul.f32 %v7652_v40, %v2010_v33  ;;  %v7742_v33 = vld [vmem:[#allocation2 + $0x1a8] sm:$0xff]  ;;  %vm7816_vm13 = vmor %vm2028_vm11, %vm2029_vm8  ;;  %vm2057_vm0 = vcmask 1044484  }
 0x34a   :  { %v1933_v39 = vmul.f32 %v7668_v41, %v1932_v61  ;;  %2313 = vmatpush.msra.mxu1 %v7723_v18  ;;  %2353 = vmatpush.msrb.mxu3 %v7726_v30  ;;  %v1942_v61 = vor.u32 1.1754944e-38, %v1941_v42  ;;  %v1981_v30 = vsel %vm7692_vm12, %v1980_v14, %v1976_v1  ;;  %11000 = vst [vmem:[#allocation25_spill] sm:$0xff] %v7742_v33  ;;  %v4525_v14 = vpop.eup %4524  ;;  %vm7800_vm12 = vmor %vm2013_vm9, %vm2014_vm7 }
 0x34b   :  { %v1948_v62 = vmul.f32 %v7674_v2, %v1947_v63  ;;  %v2026_v1 = vmul.f32 %v7662_v13, %v2025_v21  ;;  %v2044_v52 = vmul.f32 %v11002_v31, %v1981_v30  ;;  %v7777_v30 = vld [vmem:[#allocation2 + $0x148] sm:$0xff] }
 0x34c   :  { %v1934_v43 = vadd.f32 %v7668_v41, %v1933_v39  ;;  %2314 = vmatpush.msra.mxu1 %v7742_v33  ;;  %2354 = vmatpush.msrb.mxu3 %v7745_v24  ;;  %v7755_v33 = vld [vmem:[#allocation2 + $0x188] sm:$0xff]  ;;  %v7758_v24 = vld [vmem:[#allocation2 + $0x198] sm:$0xff] }
 0x34d   :  { %v1949_v63 = vadd.f32 %v7674_v2, %v1948_v62 }
 0x34e   :  { %v1938_v42 = vsel %vm7734_vm2, %v7668_v41, %v1934_v43  ;;  %2315 = vmatpush.msra.mxu1 %v7755_v33  ;;  %2355 = vmatpush.msrb.mxu3 %v7758_v24  ;;  %v7770_v43 = vld [vmem:[#allocation2 + $0x178] sm:$0xff] }
 0x34f   :  { %v1943_v39 = vsel %vm1940_vm4, %v1942_v61, %v1938_v42  ;;  %v1953_v62 = vsel %vm1952_vm5, %v7674_v2, %v1949_v63  ;;  %2181 = vmatmul.f32.vlgmr.msrb.gmra.mxu1 %v7678_v28  ;;  %2221 = vmatmul.f32.vlgmr.msra.gmra.mxu3 %v7678_v28  ;;  %v11003_v2 = vrot.slane %v7333_v34, 7  ;;  %v7780_v28 = vld [vmem:[#allocation2 + $0x158] sm:$0xff]  ;;  %v2012_v34 = vadd.f32 %v7652_v40, %v2011_v37  ;;  %v7791_v42 = vld [vmem:[#allocation2 + $0x128] sm:$0xff] }
 0x350   :  { %v1958_v41 = vsel %vm1955_vm6, %v1957_v12, %v1953_v62  ;;  %v2046_v46 = vmul.f32 %v4523_v38, %v1943_v39  ;;  %2316 = vmatpush.msra.mxu1 %v7767_v22  ;;  %2356 = vmatpush.msrb.mxu3 %v7770_v43  ;;  %v2019_v61 = vand.u32 2147483648, %v7631_v17  ;;  %v2027_v63 = vadd.f32 %v7662_v13, %v2026_v1  ;;  %v7794_v12 = vld [vmem:[#allocation2 + $0x138] sm:$0xff]  ;;  %v7805_v1 = vld [vmem:[#allocation2 + $0x108] sm:$0xff] }
 0x351   :  { %v2045_v29 = vmul.f32 %v11003_v2, %v1996_v44  ;;  %v2047_v21 = vmul.f32 %v4525_v14, %v1958_v41  ;;  %v2034_v38 = vand.u32 2147483648, %v7638_v27  ;;  %v2017_v37 = vand.u32 2147483647, %v7631_v17  ;;  %v7808_v39 = vld [vmem:[#allocation2 + $0x118] sm:$0xff]  ;;  %v7841_v62 = vld [vmem:[#allocation2 + $0x88] sm:$0xff] }
 0x352   :  { %v7773_v53 = vadd.f32 %v2046_v46, %v2044_v52  ;;  %2317 = vmatpush.msra.mxu1 %v7777_v30  ;;  %2357 = vmatpush.msrb.mxu3 %v7780_v28  ;;  %v2032_v14 = vand.u32 2147483647, %v7638_v27  ;;  %v2016_v17 = vsel %vm7800_vm12, %v7652_v40, %v2012_v34  ;;  %v2020_v41 = vor.u32 1.1754944e-38, %v2019_v61  ;;  %v7823_v52 = vld [vmem:[#allocation2 + $0xe8] sm:$0xff]  ;;  %v7826_v46 = vld [vmem:[#allocation2 + $0xf8] sm:$0xff] }
 0x353   :  { %v7775_v7 = vadd.f32 %v2047_v21, %v2045_v29  ;;  %v2031_v27 = vsel %vm7816_vm13, %v7662_v13, %v2027_v63  ;;  %v2035_v31 = vor.u32 1.1754944e-38, %v2034_v38  ;;  %vm2018_vm14 = vcmp.eq.f32.partialorder %v2017_v37, 8.507059e+37  ;;  %v7829_v21 = vld [vmem:[#allocation2 + $0xc8] sm:$0xff]  ;;  %v7832_v34 = vld [vmem:[#allocation2 + $0xd8] sm:$0xff] }
 0x354   :  { %4526 = vtanh.f32 %v7773_v53  ;;  %2318 = vmatpush.msra.mxu1 %v7791_v42  ;;  %2358 = vmatpush.msrb.mxu3 %v7794_v12  ;;  %v2021_v2 = vsel %vm2018_vm14, %v2020_v41, %v2016_v17  ;;  %vm2033_vm15 = vcmp.eq.f32.partialorder %v2032_v14, 8.507059e+37  ;;  %v7835_v38 = vld [vmem:[#allocation2 + $0xa8] sm:$0xff]  ;;  %v7838_v37 = vld [vmem:[#allocation2 + $0xb8] sm:$0xff] }
 0x355   :  { %4528 = vtanh.f32 %v7775_v7  ;;  %v2036_v13 = vsel %vm2033_vm15, %v2035_v31, %v2031_v27  ;;  %v7844_v41 = vld [vmem:[#allocation2 + $0x98] sm:$0xff] }
 0x356   :  { %2319 = vmatpush.msra.mxu1 %v7805_v1  ;;  %2359 = vmatpush.msrb.mxu3 %v7808_v39 }
 0x358   :  { %2320 = vmatpush.msra.mxu1 %v7823_v52  ;;  %2360 = vmatpush.msrb.mxu3 %v7826_v46 }
 0x35a   :  { %v4527_v40 = vpop.eup %4526  ;;  %2321 = vmatpush.msra.mxu1 %v7829_v21  ;;  %2361 = vmatpush.msrb.mxu3 %v7832_v34 }
 0x35b   :  { %v4529_v29 = vpop.eup %4528  ;;  %v2052_v61 = vmul.f32 %v4527_v40, %v2021_v2  ;;  %v7850_v40 = vld [vmem:[#allocation2 + $0x68] sm:$0xff]  ;;  %v7853_v2 = vld [vmem:[#allocation2 + $0x78] sm:$0xff] }
 0x35c   :  { %v2053_v63 = vmul.f32 %v4529_v29, %v2036_v13  ;;  %2322 = vmatpush.msra.mxu1 %v7835_v38  ;;  %2362 = vmatpush.msrb.mxu3 %v7838_v37  ;;  %v7857_v13 = vld [vmem:[#allocation2 + $0x48] sm:$0xff] }
 0x35d   :  { %v2288_v44 = vrot.slane %v2052_v61, 3 }
 0x35e   :  { %v2056_v14 = vrot.slane %v2053_v63, 7  ;;  %v2289_v17 = vrot.slane %v2053_v63, 2  ;;  %2323 = vmatpush.msra.mxu1 %v7841_v62  ;;  %2363 = vmatpush.msrb.mxu3 %v7844_v41  ;;  %v7865_v63 = vld [vmem:[#allocation2 + $0x28] sm:$0xff] }
 0x360   :  { %v2058_v27 = vsel %vm2057_vm0, %v2056_v14, %v2052_v61  ;;  %v7848_v31 = vsel %vm637_vm10, %v2289_v17, %v2288_v44  ;;  %2324 = vmatpush.msra.mxu1 %v7850_v40  ;;  %2364 = vmatpush.msrb.mxu3 %v7853_v2  ;;  %v7861_v61 = vld [vmem:[#allocation2 + $0x58] sm:$0xff]  ;;  %v7988_v14 = vld [vmem:[#allocation5 + $0x260] sm:$0xff]  ;;  %v7991_v17 = vld [vmem:[#allocation5 + $0x268] sm:$0xff] }
 0x361   :  { %v2061_v29 = vrot.slane %v2058_v27, 3  ;;  %v7869_v44 = vld [vmem:[#allocation2 + $0x38] sm:$0xff]  ;;  %11039 = vst [vmem:[#allocation72_spill] sm:$0xff] %v7988_v14  ;;  %v7994_v27 = vld [vmem:[#allocation5 + $0x1c0] sm:$0xff] }
 0x362   :  { %2325 = vmatpush.msra.mxu1 %v7857_v13  ;;  %2365 = vmatpush.msrb.mxu3 %v7861_v61  ;;  %11008 = vst [vmem:[#allocation27_spill] sm:$0xff] %v7869_v44 }
 0x363   :  { %2081 = vmatmul.f32.vlgmr.msra.gmra.mxu0 %v2061_v29  ;;  %2121 = vmatmul.f32.vlgmr.msrb.gmra.mxu2 %v2061_v29  ;;  %11040 = vst [vmem:[#allocation41_spill] sm:$0xff] %v7991_v17 }
 0x364   :  { %2292 = vmatpush.msra.mxu0 %v7368_v45  ;;  %2332 = vmatpush.msrb.mxu2 %v7371_v9  ;;  %v7873_v45 = vld [vmem:[#allocation2 + $0x8] sm:$0xff]  ;;  %v7877_v9 = vld [vmem:[#allocation2 + $0x18] sm:$0xff]  ;;  %11041 = vst [vmem:[#allocation42_spill] sm:$0xff] %v7994_v27 }
 0x365   :  { %2326 = vmatpush.msra.mxu1 %v7865_v63  ;;  %2366 = vmatpush.msrb.mxu3 %v7869_v44  ;;  %11009 = vst [vmem:[#allocation28_spill] sm:$0xff] %v7873_v45 }
 0x366   :  { %2293 = vmatpush.msra.mxu0 %v7376_v56  ;;  %2333 = vmatpush.msrb.mxu2 %v7379_v19  ;;  %11010 = vst [vmem:[#allocation31_spill] sm:$0xff] %v7877_v9  ;;  %v7886_v56 = vld [vmem:[#allocation5 + $0x3e0] sm:$0xff]  ;;  %v7889_v19 = vld [vmem:[#allocation5 + $0x3e8] sm:$0xff] }
 0x367   :  { %2327 = vmatpush.msra.mxu1 %v7873_v45  ;;  %2367 = vmatpush.msrb.mxu3 %v7877_v9  ;;  %11011 = vst [vmem:[#allocation32_spill] sm:$0xff] %v7886_v56 }
 0x368   :  { %2294 = vmatpush.msra.mxu0 %v7384_v5  ;;  %2334 = vmatpush.msrb.mxu2 %v7387_v59  ;;  %11012 = vst [vmem:[#allocation35_spill] sm:$0xff] %v7889_v19  ;;  %v7894_v5 = vld [vmem:[#allocation5 + $0x3c0] sm:$0xff]  ;;  %v7897_v59 = vld [vmem:[#allocation5 + $0x3c8] sm:$0xff] }
 0x369   :  { %2328 = vmatmul.f32.vlgmr.msra.gmra.mxu1 %v7848_v31  ;;  %2368 = vmatmul.f32.vlgmr.msrb.gmra.mxu3 %v7848_v31  ;;  %11013 = vst [vmem:[#allocation36_spill] sm:$0xff] %v7894_v5 }
 0x36a   :  { %2295 = vmatpush.msra.mxu0 %v7392_v23  ;;  %2335 = vmatpush.msrb.mxu2 %v7395_v58  ;;  %11014 = vst [vmem:[#allocation39_spill] sm:$0xff] %v7897_v59  ;;  %v7902_v23 = vld [vmem:[#allocation5 + $0x3a0] sm:$0xff]  ;;  %v7905_v58 = vld [vmem:[#allocation5 + $0x3a8] sm:$0xff] }
 0x36b   :  { %2161 = vmatmul.f32.vlgmr.msrb.gmra.mxu0 %v2061_v29  ;;  %2201 = vmatmul.f32.vlgmr.msra.gmra.mxu2 %v2061_v29  ;;  %11015 = vst [vmem:[#allocation40_spill] sm:$0xff] %v7902_v23  ;;  %v8000_v29 = vld [vmem:[#allocation5 + $0x240] sm:$0xff] }
 0x36c   :  { %2296 = vmatpush.msra.mxu0 %v7398_v60  ;;  %2336 = vmatpush.msrb.mxu2 %v7401_v32  ;;  %11016 = vst [vmem:[#allocation43_spill] sm:$0xff] %v7905_v58  ;;  %v7910_v60 = vld [vmem:[#allocation5 + $0x380] sm:$0xff]  ;;  %v7913_v32 = vld [vmem:[#allocation5 + $0x388] sm:$0xff] }
 0x36d   :  { %2563 = vmatpush.msrb.mxu1 %v7886_v56  ;;  %2603 = vmatpush.msra.mxu3 %v7889_v19  ;;  %11017 = vst [vmem:[#allocation44_spill] sm:$0xff] %v7910_v60 }
 0x36e   :  { %2297 = vmatpush.msra.mxu0 %v7406_v51  ;;  %2337 = vmatpush.msrb.mxu2 %v7409_v0  ;;  %11018 = vst [vmem:[#allocation47_spill] sm:$0xff] %v7913_v32  ;;  %v7918_v51 = vld [vmem:[#allocation5 + $0x360] sm:$0xff]  ;;  %v7921_v0 = vld [vmem:[#allocation5 + $0x368] sm:$0xff] }
 0x36f   :  { %2564 = vmatpush.msrb.mxu1 %v7894_v5  ;;  %2604 = vmatpush.msra.mxu3 %v7897_v59  ;;  %11019 = vst [vmem:[#allocation48_spill] sm:$0xff] %v7918_v51 }
 0x370   :  { %2298 = vmatpush.msra.mxu0 %v7414_v48  ;;  %2338 = vmatpush.msrb.mxu2 %v7417_v10  ;;  %11020 = vst [vmem:[#allocation51_spill] sm:$0xff] %v7921_v0  ;;  %v7926_v48 = vld [vmem:[#allocation5 + $0x340] sm:$0xff]  ;;  %v7929_v10 = vld [vmem:[#allocation5 + $0x348] sm:$0xff] }
 0x371   :  { %2565 = vmatpush.msrb.mxu1 %v7902_v23  ;;  %2605 = vmatpush.msra.mxu3 %v7905_v58  ;;  %11021 = vst [vmem:[#allocation52_spill] sm:$0xff] %v7926_v48 }
 0x372   :  { %2299 = vmatpush.msra.mxu0 %v7422_v35  ;;  %2339 = vmatpush.msrb.mxu2 %v7425_v50  ;;  %11022 = vst [vmem:[#allocation55_spill] sm:$0xff] %v7929_v10  ;;  %v7934_v35 = vld [vmem:[#allocation5 + $0x320] sm:$0xff]  ;;  %v7937_v50 = vld [vmem:[#allocation5 + $0x328] sm:$0xff] }
 0x373   :  { %2566 = vmatpush.msrb.mxu1 %v7910_v60  ;;  %2606 = vmatpush.msra.mxu3 %v7913_v32  ;;  %11023 = vst [vmem:[#allocation56_spill] sm:$0xff] %v7934_v35 }
 0x374   :  { %2300 = vmatpush.msra.mxu0 %v7430_v49  ;;  %2340 = vmatpush.msrb.mxu2 %v7433_v6  ;;  %11024 = vst [vmem:[#allocation59_spill] sm:$0xff] %v7937_v50  ;;  %v7942_v49 = vld [vmem:[#allocation5 + $0x300] sm:$0xff]  ;;  %v7945_v6 = vld [vmem:[#allocation5 + $0x308] sm:$0xff] }
 0x375   :  { %2567 = vmatpush.msrb.mxu1 %v7918_v51  ;;  %2607 = vmatpush.msra.mxu3 %v7921_v0  ;;  %11025 = vst [vmem:[#allocation60_spill] sm:$0xff] %v7942_v49 }
 0x376   :  { %2301 = vmatpush.msra.mxu0 %v7438_v11  ;;  %2341 = vmatpush.msrb.mxu2 %v7441_v47  ;;  %11026 = vst [vmem:[#allocation67_spill] sm:$0xff] %v7945_v6  ;;  %v7950_v11 = vld [vmem:[#allocation5 + $0x2e0] sm:$0xff]  ;;  %v7953_v47 = vld [vmem:[#allocation5 + $0x2e8] sm:$0xff] }
 0x377   :  { %2568 = vmatpush.msrb.mxu1 %v7926_v48  ;;  %2608 = vmatpush.msra.mxu3 %v7929_v10  ;;  %11027 = vst [vmem:[#allocation29_spill] sm:$0xff] %v7950_v11 }
 0x378   :  { %2302 = vmatpush.msra.mxu0 %v7446_v3  ;;  %2342 = vmatpush.msrb.mxu2 %v7449_v26  ;;  %11028 = vst [vmem:[#allocation63_spill] sm:$0xff] %v7953_v47  ;;  %v7958_v3 = vld [vmem:[#allocation5 + $0x2c0] sm:$0xff]  ;;  %v7961_v26 = vld [vmem:[#allocation5 + $0x2c8] sm:$0xff] }
 0x379   :  { %2569 = vmatpush.msrb.mxu1 %v7934_v35  ;;  %2609 = vmatpush.msra.mxu3 %v7937_v50  ;;  %11029 = vst [vmem:[#allocation64_spill] sm:$0xff] %v7958_v3  ;;  %v11144_v50 = vld [vmem:[#allocation103_spill] sm:$0xff] }
 0x37a   :  { %2303 = vmatpush.msra.mxu0 %v7454_v57  ;;  %2343 = vmatpush.msrb.mxu2 %v7457_v16  ;;  %11030 = vst [vmem:[#allocation33_spill] sm:$0xff] %v7961_v26  ;;  %v7966_v57 = vld [vmem:[#allocation5 + $0x2a0] sm:$0xff]  ;;  %v7969_v16 = vld [vmem:[#allocation5 + $0x2a8] sm:$0xff] }
 0x37b   :  { %2570 = vmatpush.msrb.mxu1 %v7942_v49  ;;  %2610 = vmatpush.msra.mxu3 %v7945_v6  ;;  %11031 = vst [vmem:[#allocation71_spill] sm:$0xff] %v7966_v57  ;;  %v11143_v6 = vld [vmem:[#allocation102_spill] sm:$0xff] }
 0x37c   :  { %2304 = vmatpush.msra.mxu0 %v7462_v54  ;;  %2344 = vmatpush.msrb.mxu2 %v7465_v20  ;;  %11032 = vst [vmem:[#allocation30_spill] sm:$0xff] %v7969_v16  ;;  %v11033_v54 = vld [vmem:[#allocation21_spill] sm:$0xff]  ;;  %v11034_v20 = vld [vmem:[#allocation22_spill] sm:$0xff] }
 0x37d   :  { %2571 = vmatpush.msrb.mxu1 %v7950_v11  ;;  %2611 = vmatpush.msra.mxu3 %v7953_v47  ;;  %11043 = vst [vmem:[#allocation46_spill] sm:$0xff] %v8000_v29 }
 0x37e   :  { %2305 = vmatpush.msra.mxu0 %v7470_v55  ;;  %2345 = vmatpush.msrb.mxu2 %v7473_v15  ;;  %v7976_v55 = vld [vmem:[#allocation5 + $0x280] sm:$0xff]  ;;  %v7979_v15 = vld [vmem:[#allocation5 + $0x288] sm:$0xff] }
 0x37f   :  { %2572 = vmatpush.msrb.mxu1 %v7958_v3  ;;  %2612 = vmatpush.msra.mxu3 %v7961_v26  ;;  %11035 = vst [vmem:[#allocation68_spill] sm:$0xff] %v7976_v55 }
 0x380   :  { %2306 = vmatpush.msra.mxu0 %v7478_v36  ;;  %2346 = vmatpush.msrb.mxu2 %v7481_v4  ;;  %11036 = vst [vmem:[#allocation37_spill] sm:$0xff] %v7979_v15  ;;  %v7982_v36 = vld [vmem:[#allocation5 + $0x1e0] sm:$0xff]  ;;  %v7985_v4 = vld [vmem:[#allocation5 + $0x1e8] sm:$0xff] }
 0x381   :  { %2573 = vmatpush.msrb.mxu1 %v7966_v57  ;;  %2613 = vmatpush.msra.mxu3 %v7969_v16  ;;  %11037 = vst [vmem:[#allocation75_spill] sm:$0xff] %v7982_v36 }
 0x382   :  { %2307 = vmatpush.msra.mxu0 %v11033_v54  ;;  %2347 = vmatpush.msrb.mxu2 %v11034_v20  ;;  %11038 = vst [vmem:[#allocation34_spill] sm:$0xff] %v7985_v4  ;;  %v8003_v54 = vld [vmem:[#allocation5 + $0x248] sm:$0xff]  ;;  %v8006_v20 = vld [vmem:[#allocation5 + $0x1a0] sm:$0xff] }
 0x383   :  { %2308 = vmatmul.f32.vlgmr.msra.gmra.mxu0 %v7848_v31  ;;  %2348 = vmatmul.f32.vlgmr.msrb.gmra.mxu2 %v7848_v31  ;;  %v7997_v31 = vld [vmem:[#allocation5 + $0x1c8] sm:$0xff]  ;;  %11044 = vst [vmem:[#allocation38_spill] sm:$0xff] %v8003_v54 }
 0x384   :  { %2574 = vmatpush.msrb.mxu1 %v7976_v55  ;;  %2614 = vmatpush.msra.mxu3 %v7979_v15  ;;  %11042 = vst [vmem:[#allocation45_spill] sm:$0xff] %v7997_v31 }
 0x385   :  { %2543 = vmatpush.msrb.mxu0 %v7982_v36  ;;  %2583 = vmatpush.msra.mxu2 %v7985_v4  ;;  %11045 = vst [vmem:[#allocation76_spill] sm:$0xff] %v8006_v20  ;;  %v11141_v36 = vld [vmem:[#allocation16_spill] sm:$0xff] }
 0x386   :  { %2575 = vmatpush.msrb.mxu1 %v7988_v14  ;;  %2615 = vmatpush.msra.mxu3 %v7991_v17  ;;  %v8009_v17 = vld [vmem:[#allocation5 + $0x1a8] sm:$0xff] }
 0x387   :  { %2544 = vmatpush.msrb.mxu0 %v7994_v27  ;;  %2584 = vmatpush.msra.mxu2 %v7997_v31  ;;  %11046 = vst [vmem:[#allocation86_spill] sm:$0xff] %v8009_v17  ;;  %v8012_v27 = vld [vmem:[#allocation5 + $0x220] sm:$0xff]  ;;  %v8015_v31 = vld [vmem:[#allocation5 + $0x228] sm:$0xff] }
 0x388   :  { %2576 = vmatpush.msrb.mxu1 %v8000_v29  ;;  %2616 = vmatpush.msra.mxu3 %v8003_v54  ;;  %11047 = vst [vmem:[#allocation50_spill] sm:$0xff] %v8012_v27  ;;  %v8018_v29 = vld [vmem:[#allocation5 + $0x180] sm:$0xff]  ;;  %v8021_v54 = vld [vmem:[#allocation5 + $0x188] sm:$0xff] }
 0x389   :  { %2545 = vmatpush.msrb.mxu0 %v8006_v20  ;;  %2585 = vmatpush.msra.mxu2 %v8009_v17  ;;  %11048 = vst [vmem:[#allocation83_spill] sm:$0xff] %v8015_v31  ;;  %v8024_v20 = vld [vmem:[#allocation5 + $0x200] sm:$0xff]  ;;  %v8027_v17 = vld [vmem:[#allocation5 + $0x208] sm:$0xff] }
 0x38a   :  { %2577 = vmatpush.msrb.mxu1 %v8012_v27  ;;  %2617 = vmatpush.msra.mxu3 %v8015_v31  ;;  %11049 = vst [vmem:[#allocation49_spill] sm:$0xff] %v8018_v29  ;;  %v8030_v27 = vld [vmem:[#allocation5 + $0x3f0] sm:$0xff]  ;;  %v8033_v31 = vld [vmem:[#allocation5 + $0x3f8] sm:$0xff] }
 0x38b   :  { %2546 = vmatpush.msrb.mxu0 %v8018_v29  ;;  %11050 = vst [vmem:[#allocation90_spill] sm:$0xff] %v8021_v54  ;;  %2586 = vmatpush.msra.mxu2 %v8021_v54  ;;  %v8036_v29 = vld [vmem:[#allocation5 + $0x160] sm:$0xff]  ;;  %v8039_v54 = vld [vmem:[#allocation5 + $0x168] sm:$0xff] }
 0x38c   :  { %11051 = vst [vmem:[#allocation54_spill] sm:$0xff] %v8024_v20  ;;  %2578 = vmatpush.msrb.mxu1 %v8024_v20  ;;  %2618 = vmatpush.msra.mxu3 %v8027_v17  ;;  %v8042_v20 = vld [vmem:[#allocation5 + $0x3d0] sm:$0xff] }
 0x38d   :  { %11052 = vst [vmem:[#allocation87_spill] sm:$0xff] %v8027_v17  ;;  %2547 = vmatpush.msrb.mxu0 %v8036_v29  ;;  %2587 = vmatpush.msra.mxu2 %v8039_v54  ;;  %v8045_v17 = vld [vmem:[#allocation5 + $0x3d8] sm:$0xff] }
 0x38e   :  { %11053 = vst [vmem:[#allocation53_spill] sm:$0xff] %v8030_v27  ;;  %2643 = vmatpush.msra.mxu1 %v8030_v27  ;;  %2683 = vmatpush.msrb.mxu3 %v8033_v31  ;;  %v8048_v27 = vld [vmem:[#allocation5 + $0x140] sm:$0xff] }
 0x38f   :  { %11054 = vst [vmem:[#allocation58_spill] sm:$0xff] %v8033_v31  ;;  %2548 = vmatpush.msrb.mxu0 %v8048_v27  ;;  %v8051_v31 = vld [vmem:[#allocation5 + $0x148] sm:$0xff] }
 0x390   :  { %11055 = vst [vmem:[#allocation61_spill] sm:$0xff] %v8036_v29  ;;  %2644 = vmatpush.msra.mxu1 %v8042_v20  ;;  %2684 = vmatpush.msrb.mxu3 %v8045_v17  ;;  %v8054_v29 = vld [vmem:[#allocation5 + $0x3b0] sm:$0xff] }
 0x391   :  { %11056 = vst [vmem:[#allocation91_spill] sm:$0xff] %v8039_v54  ;;  %2588 = vmatpush.msra.mxu2 %v8051_v31  ;;  %v8057_v54 = vld [vmem:[#allocation5 + $0x3b8] sm:$0xff] }
 0x392   :  { %11057 = vst [vmem:[#allocation57_spill] sm:$0xff] %v8042_v20  ;;  %2645 = vmatpush.msra.mxu1 %v8054_v29  ;;  %2685 = vmatpush.msrb.mxu3 %v8057_v54  ;;  %v8060_v20 = vld [vmem:[#allocation5 + $0x120] sm:$0xff] }
 0x393   :  { %11058 = vst [vmem:[#allocation66_spill] sm:$0xff] %v8045_v17  ;;  %2549 = vmatpush.msrb.mxu0 %v8060_v20  ;;  %v8063_v17 = vld [vmem:[#allocation5 + $0x128] sm:$0xff] }
 0x394   :  { %11059 = vst [vmem:[#allocation69_spill] sm:$0xff] %v8048_v27  ;;  %2589 = vmatpush.msra.mxu2 %v8063_v17  ;;  %v8066_v27 = vld [vmem:[#allocation5 + $0x390] sm:$0xff] }
 0x395   :  { %11060 = vst [vmem:[#allocation62_spill] sm:$0xff] %v8051_v31  ;;  %2646 = vmatpush.msra.mxu1 %v8066_v27  ;;  %v8069_v31 = vld [vmem:[#allocation5 + $0x398] sm:$0xff] }
 0x396   :  { %11061 = vst [vmem:[#allocation65_spill] sm:$0xff] %v8054_v29  ;;  %2686 = vmatpush.msrb.mxu3 %v8069_v31  ;;  %v8072_v29 = vld [vmem:[#allocation5 + $0x100] sm:$0xff] }
 0x397   :  { %11062 = vst [vmem:[#allocation74_spill] sm:$0xff] %v8057_v54  ;;  %2550 = vmatpush.msrb.mxu0 %v8072_v29  ;;  %v8075_v54 = vld [vmem:[#allocation5 + $0x108] sm:$0xff] }
 0x398   :  { %11063 = vst [vmem:[#allocation78_spill] sm:$0xff] %v8060_v20  ;;  %2590 = vmatpush.msra.mxu2 %v8075_v54  ;;  %v8078_v20 = vld [vmem:[#allocation5 + $0x370] sm:$0xff] }
 0x399   :  { %11064 = vst [vmem:[#allocation70_spill] sm:$0xff] %v8063_v17  ;;  %2647 = vmatpush.msra.mxu1 %v8078_v20  ;;  %v8081_v17 = vld [vmem:[#allocation5 + $0x378] sm:$0xff] }
 0x39a   :  { %11065 = vst [vmem:[#allocation73_spill] sm:$0xff] %v8066_v27  ;;  %2687 = vmatpush.msrb.mxu3 %v8081_v17  ;;  %v8084_v27 = vld [vmem:[#allocation5 + $0xe0] sm:$0xff] }
 0x39b   :  { %11066 = vst [vmem:[#allocation82_spill] sm:$0xff] %v8069_v31  ;;  %2551 = vmatpush.msrb.mxu0 %v8084_v27  ;;  %v8087_v31 = vld [vmem:[#allocation5 + $0xe8] sm:$0xff] }
 0x39c   :  { %11067 = vst [vmem:[#allocation84_spill] sm:$0xff] %v8072_v29  ;;  %2591 = vmatpush.msra.mxu2 %v8087_v31  ;;  %v8090_v29 = vld [vmem:[#allocation5 + $0x350] sm:$0xff] }
 0x39d   :  { %11068 = vst [vmem:[#allocation79_spill] sm:$0xff] %v8075_v54  ;;  %2648 = vmatpush.msra.mxu1 %v8090_v29  ;;  %v8093_v54 = vld [vmem:[#allocation5 + $0x358] sm:$0xff] }
 0x39e   :  { %11069 = vst [vmem:[#allocation81_spill] sm:$0xff] %v8078_v20  ;;  %2688 = vmatpush.msrb.mxu3 %v8093_v54  ;;  %v8096_v20 = vld [vmem:[#allocation5 + $0xc0] sm:$0xff] }
 0x39f   :  { %11070 = vst [vmem:[#allocation89_spill] sm:$0xff] %v8081_v17  ;;  %2552 = vmatpush.msrb.mxu0 %v8096_v20  ;;  %v8099_v17 = vld [vmem:[#allocation5 + $0xc8] sm:$0xff] }
 0x3a0   :  { %11071 = vst [vmem:[#allocation92_spill] sm:$0xff] %v8084_v27  ;;  %2592 = vmatpush.msra.mxu2 %v8099_v17  ;;  %v8102_v27 = vld [vmem:[#allocation5 + $0x330] sm:$0xff] }
 0x3a1   :  { %11072 = vst [vmem:[#allocation85_spill] sm:$0xff] %v8087_v31  ;;  %2649 = vmatpush.msra.mxu1 %v8102_v27  ;;  %v8105_v31 = vld [vmem:[#allocation5 + $0x338] sm:$0xff] }
 0x3a2   :  { %11073 = vst [vmem:[#allocation88_spill] sm:$0xff] %v8090_v29  ;;  %2689 = vmatpush.msrb.mxu3 %v8105_v31  ;;  %v8108_v29 = vld [vmem:[#allocation5 + $0xa0] sm:$0xff] }
 0x3a3   :  { %11074 = vst [vmem:[#allocation95_spill] sm:$0xff] %v8093_v54  ;;  %2553 = vmatpush.msrb.mxu0 %v8108_v29  ;;  %v8111_v54 = vld [vmem:[#allocation5 + $0xa8] sm:$0xff] }
 0x3a4   :  { %11075 = vst [vmem:[#allocation96_spill] sm:$0xff] %v8096_v20  ;;  %2593 = vmatpush.msra.mxu2 %v8111_v54  ;;  %v8114_v20 = vld [vmem:[#allocation5 + $0x310] sm:$0xff] }
 0x3a5   :  { %11076 = vst [vmem:[#allocation93_spill] sm:$0xff] %v8099_v17  ;;  %2650 = vmatpush.msra.mxu1 %v8114_v20  ;;  %v8117_v17 = vld [vmem:[#allocation5 + $0x318] sm:$0xff] }
 0x3a6   :  { %11077 = vst [vmem:[#allocation94_spill] sm:$0xff] %v8102_v27  ;;  %2690 = vmatpush.msrb.mxu3 %v8117_v17  ;;  %v8120_v27 = vld [vmem:[#allocation5 + $0x80] sm:$0xff] }
 0x3a7   :  { %11078 = vst [vmem:[#allocation99_spill] sm:$0xff] %v8105_v31  ;;  %2554 = vmatpush.msrb.mxu0 %v8120_v27  ;;  %v8123_v31 = vld [vmem:[#allocation5 + $0x88] sm:$0xff] }
 0x3a8   :  { %11079 = vst [vmem:[#allocation104_spill] sm:$0xff] %v8108_v29  ;;  %2594 = vmatpush.msra.mxu2 %v8123_v31  ;;  %v8126_v29 = vld [vmem:[#allocation5 + $0x2f0] sm:$0xff] }
 0x3a9   :  { %11080 = vst [vmem:[#allocation97_spill] sm:$0xff] %v8111_v54  ;;  %2651 = vmatpush.msra.mxu1 %v8126_v29  ;;  %v8129_v54 = vld [vmem:[#allocation5 + $0x2f8] sm:$0xff] }
 0x3aa   :  { %11081 = vst [vmem:[#allocation98_spill] sm:$0xff] %v8114_v20  ;;  %2691 = vmatpush.msrb.mxu3 %v8129_v54  ;;  %v8132_v20 = vld [vmem:[#allocation5 + $0x60] sm:$0xff] }
 0x3ab   :  { %11082 = vst [vmem:[#allocation109_spill] sm:$0xff] %v8117_v17  ;;  %2555 = vmatpush.msrb.mxu0 %v8132_v20  ;;  %v8135_v17 = vld [vmem:[#allocation5 + $0x68] sm:$0xff] }
 0x3ac   :  { %11083 = vst [vmem:[#allocation110_spill] sm:$0xff] %v8120_v27  ;;  %2595 = vmatpush.msra.mxu2 %v8135_v17  ;;  %v8138_v27 = vld [vmem:[#allocation5 + $0x2d0] sm:$0xff] }
 0x3ad   :  { %11084 = vst [vmem:[#allocation105_spill] sm:$0xff] %v8123_v31  ;;  %2652 = vmatpush.msra.mxu1 %v8138_v27  ;;  %v8141_v31 = vld [vmem:[#allocation5 + $0x2d8] sm:$0xff] }
 0x3ae   :  { %11085 = vst [vmem:[#allocation107_spill] sm:$0xff] %v8126_v29  ;;  %2692 = vmatpush.msrb.mxu3 %v8141_v31  ;;  %v8144_v29 = vld [vmem:[#allocation5 + $0x40] sm:$0xff] }
 0x3af   :  { %11086 = vst [vmem:[#allocation11_spill] sm:$0xff] %v8129_v54  ;;  %2556 = vmatpush.msrb.mxu0 %v8144_v29  ;;  %v8147_v54 = vld [vmem:[#allocation5 + $0x48] sm:$0xff] }
 0x3b0   :  { %11087 = vst [vmem:[#allocation12_spill] sm:$0xff] %v8132_v20  ;;  %2596 = vmatpush.msra.mxu2 %v8147_v54  ;;  %v8150_v20 = vld [vmem:[#allocation5 + $0x2b0] sm:$0xff] }
 0x3b1   :  { %11088 = vst [vmem:[#allocation111_spill] sm:$0xff] %v8135_v17  ;;  %2653 = vmatpush.msra.mxu1 %v8150_v20  ;;  %v8153_v17 = vld [vmem:[#allocation5 + $0x2b8] sm:$0xff] }
 0x3b2   :  { %11089 = vst [vmem:[#allocation112_spill] sm:$0xff] %v8138_v27  ;;  %2693 = vmatpush.msrb.mxu3 %v8153_v17  ;;  %v8156_v27 = vld [vmem:[#allocation5 + $0x20] sm:$0xff] }
 0x3b3   :  { %11090 = vst [vmem:[#allocation15_spill] sm:$0xff] %v8141_v31  ;;  %2557 = vmatpush.msrb.mxu0 %v8156_v27  ;;  %v8159_v31 = vld [vmem:[#allocation5 + $0x28] sm:$0xff] }
 0x3b4   :  { %11091 = vst [vmem:[#allocation113_spill] sm:$0xff] %v8144_v29  ;;  %2597 = vmatpush.msra.mxu2 %v8159_v31  ;;  %v8162_v29 = vld [vmem:[#allocation5 + $0x290] sm:$0xff] }
 0x3b5   :  { %11092 = vst [vmem:[#allocation13_spill] sm:$0xff] %v8147_v54  ;;  %2654 = vmatpush.msra.mxu1 %v8162_v29  ;;  %v8165_v54 = vld [vmem:[#allocation5 + $0x298] sm:$0xff] }
 0x3b6   :  { %11093 = vst [vmem:[#allocation14_spill] sm:$0xff] %v8150_v20  ;;  %2694 = vmatpush.msrb.mxu3 %v8165_v54  ;;  %v8168_v20 = vld [vmem:[#allocation5] sm:$0xff] }
 0x3b7   :  { %11094 = vst [vmem:[#allocation114_spill] sm:$0xff] %v8153_v17  ;;  %2558 = vmatpush.msrb.mxu0 %v8168_v20  ;;  %v8171_v17 = vld [vmem:[#allocation5 + $0x8] sm:$0xff] }
 0x3b8   :  { %11095 = vst [vmem:[#allocation116_spill] sm:$0xff] %v8156_v27  ;;  %2598 = vmatpush.msra.mxu2 %v8171_v17  ;;  %v8174_v27 = vld [vmem:[#allocation5 + $0x270] sm:$0xff] }
 0x3b9   :  { %11096 = vst [vmem:[#allocation115_spill] sm:$0xff] %v8159_v31  ;;  %2655 = vmatpush.msra.mxu1 %v8174_v27  ;;  %v8177_v31 = vld [vmem:[#allocation5 + $0x278] sm:$0xff] }
 0x3ba   :  { %11097 = vst [vmem:[#allocation117_spill] sm:$0xff] %v8162_v29  ;;  %2695 = vmatpush.msrb.mxu3 %v8177_v31  ;;  %v8180_v29 = vld [vmem:[#allocation5 + $0x1f0] sm:$0xff] }
 0x3bb   :  { %11098 = vst [vmem:[#allocation118_spill] sm:$0xff] %v8165_v54  ;;  %2623 = vmatpush.msra.mxu0 %v8180_v29  ;;  %v8183_v54 = vld [vmem:[#allocation5 + $0x1f8] sm:$0xff] }
 0x3bc   :  { %11099 = vst [vmem:[#allocation120_spill] sm:$0xff] %v8168_v20  ;;  %2663 = vmatpush.msrb.mxu2 %v8183_v54  ;;  %v8186_v20 = vld [vmem:[#allocation5 + $0x250] sm:$0xff] }
 0x3bd   :  { %11100 = vst [vmem:[#allocation119_spill] sm:$0xff] %v8171_v17  ;;  %2656 = vmatpush.msra.mxu1 %v8186_v20  ;;  %v8189_v17 = vld [vmem:[#allocation5 + $0x258] sm:$0xff] }
 0x3be   :  { %11101 = vst [vmem:[#allocation121_spill] sm:$0xff] %v8174_v27  ;;  %2696 = vmatpush.msrb.mxu3 %v8189_v17  ;;  %v8192_v27 = vld [vmem:[#allocation5 + $0x1d0] sm:$0xff] }
 0x3bf   :  { %11102 = vst [vmem:[#allocation122_spill] sm:$0xff] %v8177_v31  ;;  %2624 = vmatpush.msra.mxu0 %v8192_v27  ;;  %v8195_v31 = vld [vmem:[#allocation5 + $0x1d8] sm:$0xff] }
 0x3c0   :  { %11103 = vst [vmem:[#allocation124_spill] sm:$0xff] %v8180_v29  ;;  %2664 = vmatpush.msrb.mxu2 %v8195_v31  ;;  %v8198_v29 = vld [vmem:[#allocation5 + $0x230] sm:$0xff] }
 0x3c1   :  { %11104 = vst [vmem:[#allocation123_spill] sm:$0xff] %v8183_v54  ;;  %2657 = vmatpush.msra.mxu1 %v8198_v29  ;;  %v8201_v54 = vld [vmem:[#allocation5 + $0x238] sm:$0xff] }
 0x3c2   :  { %11105 = vst [vmem:[#allocation125_spill] sm:$0xff] %v8186_v20  ;;  %2697 = vmatpush.msrb.mxu3 %v8201_v54  ;;  %v8204_v20 = vld [vmem:[#allocation5 + $0x1b0] sm:$0xff] }
 0x3c3   :  { %11106 = vst [vmem:[#allocation126_spill] sm:$0xff] %v8189_v17  ;;  %2625 = vmatpush.msra.mxu0 %v8204_v20  ;;  %v8207_v17 = vld [vmem:[#allocation5 + $0x1b8] sm:$0xff] }
 0x3c4   :  { %11107 = vst [vmem:[#allocation127_spill] sm:$0xff] %v8192_v27  ;;  %2665 = vmatpush.msrb.mxu2 %v8207_v17  ;;  %v8210_v27 = vld [vmem:[#allocation5 + $0x210] sm:$0xff] }
 0x3c5   :  { %11108 = vst [vmem:[#allocation128_spill] sm:$0xff] %v8195_v31  ;;  %2658 = vmatpush.msra.mxu1 %v8210_v27  ;;  %v8213_v31 = vld [vmem:[#allocation5 + $0x218] sm:$0xff] }
 0x3c6   :  { %11109 = vst [vmem:[#allocation129_spill] sm:$0xff] %v8198_v29  ;;  %2698 = vmatpush.msrb.mxu3 %v8213_v31  ;;  %v8216_v29 = vld [vmem:[#allocation5 + $0x190] sm:$0xff] }
 0x3c7   :  { %11110 = vst [vmem:[#allocation130_spill] sm:$0xff] %v8201_v54  ;;  %2626 = vmatpush.msra.mxu0 %v8216_v29  ;;  %v8219_v54 = vld [vmem:[#allocation5 + $0x198] sm:$0xff] }
 0x3c8   :  { %11111 = vst [vmem:[#allocation131_spill] sm:$0xff] %v8204_v20  ;;  %2666 = vmatpush.msrb.mxu2 %v8219_v54  ;;  %v8222_v20 = vld [vmem:[#allocation5 + $0x170] sm:$0xff] }
 0x3c9   :  { %11112 = vst [vmem:[#allocation132_spill] sm:$0xff] %v8207_v17  ;;  %2627 = vmatpush.msra.mxu0 %v8222_v20  ;;  %v8225_v17 = vld [vmem:[#allocation5 + $0x178] sm:$0xff] }
 0x3ca   :  { %11113 = vst [vmem:[#allocation133_spill] sm:$0xff] %v8210_v27  ;;  %2667 = vmatpush.msrb.mxu2 %v8225_v17  ;;  %v8228_v27 = vld [vmem:[#allocation5 + $0x150] sm:$0xff]  ;;  %v2142_v14 = vpop.f32.mrf.mxu3 }
 0x3cb   :  { %11114 = vst [vmem:[#allocation134_spill] sm:$0xff] %v8213_v31  ;;  %2628 = vmatpush.msra.mxu0 %v8228_v27  ;;  %v8231_v31 = vld [vmem:[#allocation5 + $0x158] sm:$0xff] }
 0x3cc   :  { %11115 = vst [vmem:[#allocation135_spill] sm:$0xff] %v8216_v29  ;;  %2668 = vmatpush.msrb.mxu2 %v8231_v31  ;;  %v8234_v29 = vld [vmem:[#allocation5 + $0x130] sm:$0xff] }
 0x3cd   :  { %11116 = vst [vmem:[#allocation136_spill] sm:$0xff] %v8219_v54  ;;  %2629 = vmatpush.msra.mxu0 %v8234_v29  ;;  %v8237_v54 = vld [vmem:[#allocation5 + $0x138] sm:$0xff] }
 0x3ce   :  { %11117 = vst [vmem:[#allocation137_spill] sm:$0xff] %v8222_v20  ;;  %2669 = vmatpush.msrb.mxu2 %v8237_v54  ;;  %v8240_v20 = vld [vmem:[#allocation5 + $0x110] sm:$0xff] }
 0x3cf   :  { %11118 = vst [vmem:[#allocation138_spill] sm:$0xff] %v8225_v17  ;;  %2630 = vmatpush.msra.mxu0 %v8240_v20  ;;  %v8243_v17 = vld [vmem:[#allocation5 + $0x118] sm:$0xff] }
 0x3d0   :  { %11119 = vst [vmem:[#allocation139_spill] sm:$0xff] %v8228_v27  ;;  %2670 = vmatpush.msrb.mxu2 %v8243_v17  ;;  %v8246_v27 = vld [vmem:[#allocation5 + $0xf0] sm:$0xff] }
 0x3d1   :  { %11120 = vst [vmem:[#allocation140_spill] sm:$0xff] %v8231_v31  ;;  %2631 = vmatpush.msra.mxu0 %v8246_v27  ;;  %v8249_v31 = vld [vmem:[#allocation5 + $0xf8] sm:$0xff] }
 0x3d2   :  { %11121 = vst [vmem:[#allocation141_spill] sm:$0xff] %v8234_v29  ;;  %2671 = vmatpush.msrb.mxu2 %v8249_v31  ;;  %v8252_v29 = vld [vmem:[#allocation5 + $0xd0] sm:$0xff]  ;;  %v2222_v3 = vpop.f32.mrf.mxu3 }
 0x3d3   :  { %11122 = vst [vmem:[#allocation142_spill] sm:$0xff] %v8237_v54  ;;  %2632 = vmatpush.msra.mxu0 %v8252_v29  ;;  %v8255_v54 = vld [vmem:[#allocation5 + $0xd8] sm:$0xff] }
 0x3d4   :  { %11123 = vst [vmem:[#allocation143_spill] sm:$0xff] %v8240_v20  ;;  %2672 = vmatpush.msrb.mxu2 %v8255_v54  ;;  %v8258_v20 = vld [vmem:[#allocation5 + $0xb0] sm:$0xff] }
 0x3d5   :  { %11124 = vst [vmem:[#allocation144_spill] sm:$0xff] %v8243_v17  ;;  %2633 = vmatpush.msra.mxu0 %v8258_v20  ;;  %v8261_v17 = vld [vmem:[#allocation5 + $0xb8] sm:$0xff] }
 0x3d6   :  { %11125 = vst [vmem:[#allocation145_spill] sm:$0xff] %v8246_v27  ;;  %2673 = vmatpush.msrb.mxu2 %v8261_v17  ;;  %v8264_v27 = vld [vmem:[#allocation5 + $0x90] sm:$0xff] }
 0x3d7   :  { %11126 = vst [vmem:[#allocation146_spill] sm:$0xff] %v8249_v31  ;;  %2634 = vmatpush.msra.mxu0 %v8264_v27  ;;  %v8267_v31 = vld [vmem:[#allocation5 + $0x98] sm:$0xff] }
 0x3d8   :  { %11127 = vst [vmem:[#allocation147_spill] sm:$0xff] %v8252_v29  ;;  %2674 = vmatpush.msrb.mxu2 %v8267_v31  ;;  %v8270_v29 = vld [vmem:[#allocation5 + $0x70] sm:$0xff] }
 0x3d9   :  { %11128 = vst [vmem:[#allocation148_spill] sm:$0xff] %v8255_v54  ;;  %2635 = vmatpush.msra.mxu0 %v8270_v29  ;;  %v8273_v54 = vld [vmem:[#allocation5 + $0x78] sm:$0xff] }
 0x3da   :  { %11129 = vst [vmem:[#allocation149_spill] sm:$0xff] %v8258_v20  ;;  %2675 = vmatpush.msrb.mxu2 %v8273_v54  ;;  %v8276_v20 = vld [vmem:[#allocation5 + $0x50] sm:$0xff] }
 0x3db   :  { %11130 = vst [vmem:[#allocation150_spill] sm:$0xff] %v8261_v17  ;;  %2636 = vmatpush.msra.mxu0 %v8276_v20  ;;  %v8279_v17 = vld [vmem:[#allocation5 + $0x58] sm:$0xff] }
 0x3dc   :  { %11131 = vst [vmem:[#allocation151_spill] sm:$0xff] %v8264_v27  ;;  %2676 = vmatpush.msrb.mxu2 %v8279_v17  ;;  %v8282_v27 = vld [vmem:[#allocation5 + $0x30] sm:$0xff] }
 0x3dd   :  { %11132 = vst [vmem:[#allocation20_spill] sm:$0xff] %v8267_v31  ;;  %2637 = vmatpush.msra.mxu0 %v8282_v27  ;;  %v8285_v31 = vld [vmem:[#allocation5 + $0x38] sm:$0xff] }
 0x3de   :  { %11133 = vst [vmem:[#allocation21_spill] sm:$0xff] %v8270_v29  ;;  %2677 = vmatpush.msrb.mxu2 %v8285_v31  ;;  %v8288_v29 = vld [vmem:[#allocation5 + $0x10] sm:$0xff] }
 0x3df   :  { %11134 = vst [vmem:[#allocation22_spill] sm:$0xff] %v8273_v54  ;;  %2638 = vmatpush.msra.mxu0 %v8288_v29  ;;  %v8291_v54 = vld [vmem:[#allocation5 + $0x18] sm:$0xff] }
 0x3e0   :  { %11135 = vst [vmem:[#allocation152_spill] sm:$0xff] %v8276_v20  ;;  %2678 = vmatpush.msrb.mxu2 %v8291_v54  ;;  %v2102_v20 = vpop.f32.mrf.mxu1 }
 0x3e1   :  { %11136 = vst [vmem:[#allocation153_spill] sm:$0xff] %v8279_v17  ;;  %v2082_v17 = vpop.f32.mrf.mxu0 }
 0x3e2   :  { %11137 = vst [vmem:[#allocation154_spill] sm:$0xff] %v8282_v27  ;;  %v2083_v15 = vadd.f32 %v2082_v17, %v11141_v36 }
 0x3e3   :  { %11138 = vst [vmem:[#allocation155_spill] sm:$0xff] %v8285_v31  ;;  %v11142_v31 = vld [vmem:[#allocation17_spill] sm:$0xff] }
 0x3e4   :  { %11139 = vst [vmem:[#allocation156_spill] sm:$0xff] %v8288_v29  ;;  %v2103_v55 = vadd.f32 %v2102_v20, %v2083_v15  ;;  %v11145_v20 = vld [vmem:[#allocation18_spill] sm:$0xff] }
 0x3e5   :  { %11140 = vst [vmem:[#allocation157_spill] sm:$0xff] %v8291_v54 }
 0x3e6   :  { %v4307_v27 = vmul.f32 -1.442695, %v2103_v55  ;;  %v2122_v16 = vpop.f32.mrf.mxu2 }
 0x3e7   :  { %v2123_v26 = vadd.f32 %v2122_v16, %v11142_v31 }
 0x3e8   :  { %v2182_v4 = vpop.f32.mrf.mxu1  ;;  %4530 = vpow2.f32 %v4307_v27 }
 0x3e9   :  { %v2143_v11 = vadd.f32 %v2142_v14, %v2123_v26  ;;  %v2162_v31 = vpop.f32.mrf.mxu0  ;;  %v11146_v14 = vld [vmem:[#allocation19_spill] sm:$0xff] }
 0x3eb   :  { %v4308_v54 = vmul.f32 -1.442695, %v2143_v11 }
 0x3ec   :  { %v2369_v27 = vpop.f32.mrf.mxu3 }
 0x3ed   :  { %4532 = vpow2.f32 %v4308_v54 }
 0x3ee   :  { %v4531_v10 = vpop.eup %4530  ;;  %v2202_v15 = vpop.f32.mrf.mxu2 }
 0x3ef   :  { %v2228_v48 = vadd.f32 1.0, %v4531_v10  ;;  %v2203_v36 = vadd.f32 %v2202_v15, %v11145_v20  ;;  %v2383_v10 = vrot.slane %v2369_v27, 5 }
 0x3f0   :  { %v2329_v57 = vpop.f32.mrf.mxu1 }
 0x3f1   :  { %v2377_v47 = vrot.slane %v2329_v57, 4  ;;  %v2381_v29 = vrot.slane %v2329_v57, 5  ;;  %4534 = vrcp.f32 %v2228_v48  ;;  %v2379_v57 = vrot.slane %v2369_v27, 4 }
 0x3f2   :  { %v2223_v26 = vadd.f32 %v2222_v3, %v2203_v36  ;;  %vm2234_vm2 = vweird.f32 %v2228_v48 }
 0x3f3   :  { %v2393_v49 = vadd.f32 %v2377_v47, %v11143_v6  ;;  %v2397_v35 = vadd.f32 %v2381_v29, %v11144_v50  ;;  %v4533_v16 = vpop.eup %4532  ;;  %v2163_v29 = vadd.f32 %v2162_v31, %v11146_v14 }
 0x3f4   :  { %v2247_v47 = vadd.f32 1.0, %v4533_v16  ;;  %v4309_v6 = vmul.f32 -1.442695, %v2223_v26  ;;  %v2240_v26 = vand.u32 2147483648, %v2228_v48 }
 0x3f5   :  { %v4312_v17 = vmul.f32 -1.442695, %v2393_v49  ;;  %v4313_v55 = vmul.f32 -1.442695, %v2397_v35  ;;  %v11147_v49 = vld [vmem:[#allocation100_spill] sm:$0xff]  ;;  %v2183_v15 = vadd.f32 %v2182_v4, %v2163_v29 }
 0x3f6   :  { %v2395_v50 = vadd.f32 %v2379_v57, %v11147_v49  ;;  %vm2253_vm6 = vweird.f32 %v2247_v47  ;;  %v11154_v49 = vld [vmem:[#allocation80_spill] sm:$0xff] }
 0x3f7   :  { %4536 = vpow2.f32 %v4312_v17  ;;  %v4535_v11 = vpop.eup %4534  ;;  %v11148_v17 = vld [vmem:[#allocation101_spill] sm:$0xff] }
 0x3f8   :  { %4538 = vpow2.f32 %v4313_v55  ;;  %v2230_v54 = vmul.f32 %v4535_v11, %v2228_v48  ;;  %v2399_v32 = vadd.f32 %v2383_v10, %v11148_v17  ;;  %v4314_v60 = vmul.f32 -1.442695, %v2395_v50 }
 0x3f9   :  { %4540 = vrcp.f32 %v2247_v47  ;;  %v2238_v55 = vand.u32 2147483647, %v2228_v48  ;;  %vm2235_vm1 = vweird.f32 %v4535_v11 }
 0x3fa   :  { %v2231_v0 = vsub.f32 1.0, %v2230_v54  ;;  %4542 = vpow2.f32 %v4309_v6  ;;  %v4315_v54 = vmul.f32 -1.442695, %v2399_v32  ;;  %vm8312_vm5 = vmor %vm2234_vm2, %vm2235_vm1 }
 0x3fb   :  { %4544 = vtanh.f32 %v2183_v15  ;;  %vm8307_vm3 = vcmp.eq.f32.partialorder %v2238_v55, 8.507059e+37 }
 0x3fc   :  { %v2232_v20 = vmul.f32 %v4535_v11, %v2231_v0  ;;  %4546 = vpow2.f32 %v4314_v60  ;;  %v2259_v0 = vand.u32 2147483648, %v2247_v47 }
 0x3fd   :  { %v4537_v35 = vpop.eup %4536 }
 0x3fe   :  { %v4539_v51 = vpop.eup %4538  ;;  %v8302_v36 = vadd.f32 1.0, %v4537_v35  ;;  %v2233_v27 = vadd.f32 %v4535_v11, %v2232_v20  ;;  %v2257_v20 = vand.u32 2147483647, %v2247_v47  ;;  %v2241_v35 = vor.u32 1.1754944e-38, %v2240_v26 }
 0x3ff   :  { %v4541_v3 = vpop.eup %4540  ;;  %v8304_v16 = vadd.f32 1.0, %v4539_v51 }
 0x400   :  { %v2249_v31 = vmul.f32 %v4541_v3, %v2247_v47  ;;  %4548 = vrcp.f32 %v8302_v36  ;;  %v4543_v6 = vpop.eup %4542  ;;  %vm2254_vm4 = vweird.f32 %v4541_v3  ;;  %v2309_v60 = vpop.f32.mrf.mxu0  ;;  %v2237_v32 = vsel %vm8312_vm5, %v4535_v11, %v2233_v27 }
 0x401   :  { %4550 = vrcp.f32 %v8304_v16  ;;  %v8318_v29 = vadd.f32 1.0, %v4543_v6  ;;  %v2376_v48 = vrot.slane %v2309_v60, 4  ;;  %v2380_v10 = vrot.slane %v2309_v60, 5  ;;  %v4545_v55 = vpop.eup %4544  ;;  %vm2255_vm7 = vmor %vm2253_vm6, %vm2254_vm4 }
 0x402   :  { %v2250_v57 = vsub.f32 1.0, %v2249_v31  ;;  %4552 = vpow2.f32 %v4315_v54  ;;  %v2260_v31 = vor.u32 1.1754944e-38, %v2259_v0  ;;  %v4547_v58 = vpop.eup %4546  ;;  %v2242_v11 = vsel %vm8307_vm3, %v2241_v35, %v2237_v32  ;;  %v11155_v0 = vld [vmem:[#allocation23_spill] sm:$0xff] }
 0x403   :  { %4554 = vrcp.f32 %v8318_v29  ;;  %v2396_v14 = vadd.f32 %v2380_v10, %v11154_v49  ;;  %vm2258_vm8 = vcmp.eq.f32.partialorder %v2257_v20, 8.507059e+37  ;;  %v2284_v60 = vmul.f32 %v4545_v55, %v2242_v11 }
 0x404   :  { %v2251_v51 = vmul.f32 %v4541_v3, %v2250_v57  ;;  %v11153_v57 = vld [vmem:[#allocation77_spill] sm:$0xff]  ;;  %v8330_v23 = vadd.f32 1.0, %v4547_v58  ;;  %vm2451_vm9 = vweird.f32 %v8302_v36  ;;  %vm2273_vm12 = vweird.f32 %v8318_v29 }
 0x405   :  { %v2392_v17 = vadd.f32 %v2376_v48, %v11153_v57  ;;  %v4311_v54 = vmul.f32 -1.442695, %v2396_v14  ;;  %vm2466_vm13 = vweird.f32 %v8304_v16  ;;  %v2470_v55 = vand.u32 2147483647, %v8304_v16 }
 0x406   :  { %v2252_v15 = vadd.f32 %v4541_v3, %v2251_v51  ;;  %v8325_v6 = vpop.eup %4548 }
 0x407   :  { %v4310_v26 = vmul.f32 -1.442695, %v2392_v17  ;;  %v8327_v51 = vpop.eup %4550  ;;  %vm2452_vm0 = vweird.f32 %v8325_v6  ;;  %vm8380_vm3 = vcmp.eq.f32.partialorder %v2470_v55, 8.507059e+37 }
 0x408   :  { %v2256_v27 = vsel %vm2255_vm7, %v4541_v3, %v2252_v15  ;;  %v4553_v48 = vpop.eup %4552  ;;  %v2447_v3 = vmul.f32 %v8325_v6, %v8302_v36  ;;  %v2462_v14 = vmul.f32 %v8327_v51, %v8304_v16  ;;  %vm2467_vm1 = vweird.f32 %v8327_v51  ;;  %vm8386_vm4 = vmor %vm2451_vm9, %vm2452_vm0 }
 0x409   :  { %v2261_v47 = vsel %vm2258_vm8, %v2260_v31, %v2256_v27  ;;  %4556 = vpow2.f32 %v4310_v26  ;;  %v4555_v10 = vpop.eup %4554  ;;  %v8337_v17 = vadd.f32 1.0, %v4553_v48  ;;  %v2349_v27 = vpop.f32.mrf.mxu2  ;;  %v2455_v31 = vand.u32 2147483647, %v8302_v36  ;;  %vm8402_vm5 = vmor %vm2466_vm13, %vm2467_vm1 }
 0x40a   :  { %v2283_v4 = vmul.f32 %v2261_v47, %v11155_v0  ;;  %4558 = vpow2.f32 %v4311_v54  ;;  %v2269_v20 = vmul.f32 %v4555_v10, %v8318_v29  ;;  %v2448_v35 = vsub.f32 1.0, %v2447_v3 }
 0x40b   :  { %4560 = vrcp.f32 %v8330_v23  ;;  %v2279_v54 = vand.u32 2147483648, %v8318_v29  ;;  %v2463_v0 = vsub.f32 1.0, %v2462_v14  ;;  %vm2274_vm11 = vweird.f32 %v4555_v10 }
 0x40c   :  { %v8334_v50 = vadd.f32 %v2284_v60, %v2283_v4  ;;  %v2270_v58 = vsub.f32 1.0, %v2269_v20  ;;  %v2277_v4 = vand.u32 2147483647, %v8318_v29  ;;  %v2449_v48 = vmul.f32 %v8325_v6, %v2448_v35  ;;  %vm2275_vm14 = vmor %vm2273_vm12, %vm2274_vm11  ;;  %v11157_v29 = vld [vmem:[#allocation106_spill] sm:$0xff] }
 0x40d   :  { %v2457_v3 = vand.u32 2147483648, %v8302_v36  ;;  %v2378_v20 = vrot.slane %v2349_v27, 4  ;;  %v2280_v35 = vor.u32 1.1754944e-38, %v2279_v54  ;;  %v11158_v54 = vld [vmem:[#allocation108_spill] sm:$0xff]  ;;  %vm8376_vm2 = vcmp.eq.f32.partialorder %v2455_v31, 8.507059e+37 }
 0x40e   :  { %11156 = vst [vmem:[#allocation23_spill] sm:$0xff] %v8334_v50  ;;  %4562 = vtanh.f32 %v8334_v50  ;;  %v2271_v47 = vmul.f32 %v4555_v10, %v2270_v58  ;;  %v2472_v58 = vand.u32 2147483648, %v8304_v16  ;;  %v2464_v50 = vmul.f32 %v8327_v51, %v2463_v0 }
 0x40f   :  { %v4557_v32 = vpop.eup %4556  ;;  %4564 = vrcp.f32 %v8337_v17  ;;  %vm2278_vm15 = vcmp.eq.f32.partialorder %v2277_v4, 8.507059e+37  ;;  %v2450_v59 = vadd.f32 %v8325_v6, %v2449_v48  ;;  %v2458_v56 = vor.u32 1.1754944e-38, %v2457_v3 }
 0x410   :  { %v4559_v15 = vpop.eup %4558  ;;  %v8345_v11 = vadd.f32 1.0, %v4557_v32  ;;  %v2382_v32 = vrot.slane %v2349_v27, 5  ;;  %v2473_v9 = vor.u32 1.1754944e-38, %v2472_v58  ;;  %v2465_v3 = vadd.f32 %v8327_v51, %v2464_v50 }
 0x411   :  { %v8349_v26 = vadd.f32 1.0, %v4559_v15  ;;  %v8354_v60 = vpop.eup %4560  ;;  %v2272_v15 = vadd.f32 %v4555_v10, %v2271_v47  ;;  %v2394_v47 = vadd.f32 %v2378_v20, %v11157_v29  ;;  %v2454_v55 = vsel %vm8386_vm4, %v8325_v6, %v2450_v59 }
 0x412   :  { %4566 = vrcp.f32 %v8345_v11  ;;  %v2487_v49 = vmul.f32 %v8354_v60, %v8330_v23  ;;  %v2398_v45 = vadd.f32 %v2382_v32, %v11158_v54  ;;  %vm2413_vm8 = vweird.f32 %v8345_v11 }
 0x413   :  { %4568 = vrcp.f32 %v8349_v26  ;;  %v2276_v57 = vsel %vm2275_vm14, %v4555_v10, %v2272_v15  ;;  %v2419_v15 = vand.u32 2147483648, %v8345_v11  ;;  %v2434_v59 = vand.u32 2147483648, %v8349_v26 }
 0x414   :  { %v4563_v14 = vpop.eup %4562  ;;  %v2281_v5 = vsel %vm2278_vm15, %v2280_v35, %v2276_v57  ;;  %4570 = vtanh.f32 %v2394_v47  ;;  %v2417_v35 = vand.u32 2147483647, %v8345_v11  ;;  %v2432_v47 = vand.u32 2147483647, %v8349_v26 }
 0x415   :  { %v8368_v27 = vpop.eup %4564  ;;  %v2287_v0 = vmul.f32 %v4563_v14, %v2281_v5  ;;  %v2488_v5 = vsub.f32 1.0, %v2487_v49  ;;  %4572 = vtanh.f32 %v2398_v45  ;;  %v2469_v45 = vsel %vm8402_vm5, %v8327_v51, %v2465_v3 }
 0x416   :  { %v2502_v31 = vmul.f32 %v8368_v27, %v8337_v17  ;;  %vm2428_vm11 = vweird.f32 %v8349_v26  ;;  %vm2418_vm12 = vcmp.eq.f32.partialorder %v2417_v35, 8.507059e+37  ;;  %vm2433_vm14 = vcmp.eq.f32.partialorder %v2432_v47, 8.507059e+37  ;;  %v8508_v47 = vld [vmem:[#allocation2 + $0x170] sm:$0xff] }
 0x417   :  { %v2538_v58 = vrot.slane %v2287_v0, 4  ;;  %v2489_v57 = vmul.f32 %v8354_v60, %v2488_v5  ;;  %vm2492_vm15 = vweird.f32 %v8354_v60  ;;  %vm2507_vm0 = vweird.f32 %v8368_v27 }
 0x418   :  { %v4567_v19 = vpop.eup %4566  ;;  %v2503_v16 = vsub.f32 1.0, %v2502_v31  ;;  %v11168_v31 = vrot.slane %v7773_v53, 7  ;;  %vm2491_vm1 = vweird.f32 %v8330_v23 }
 0x419   :  { %v4569_v44 = vpop.eup %4568  ;;  %v2409_v10 = vmul.f32 %v4567_v19, %v8345_v11  ;;  %v2540_v14 = vrot.slane %v2538_v58, 4  ;;  %vm2414_vm6 = vweird.f32 %v4567_v19  ;;  %v2435_v11 = vor.u32 1.1754944e-38, %v2434_v59 }
 0x41a   :  { %v2424_v48 = vmul.f32 %v4569_v44, %v8349_v26  ;;  %vm2429_vm7 = vweird.f32 %v4569_v44  ;;  %vm2415_vm9 = vmor %vm2413_vm8, %vm2414_vm6  ;;  %v4571_v51 = vpop.eup %4570 }
 0x41b   :  { %v2410_v32 = vsub.f32 1.0, %v2409_v10  ;;  %2579 = vmatmul.f32.vlgmr.msrb.gmra.mxu1 %v2540_v14  ;;  %2619 = vmatmul.f32.vlgmr.msra.gmra.mxu3 %v2540_v14  ;;  %v2459_v10 = vsel %vm8376_vm2, %v2458_v56, %v2454_v55  ;;  %vm2430_vm13 = vmor %vm2428_vm11, %vm2429_vm7  ;;  %v2474_v56 = vsel %vm8380_vm3, %v2473_v9, %v2469_v45  ;;  %v11171_v9 = vrot.slane %v7775_v7, 7  ;;  %v11175_v45 = vld [vmem:[#allocation32_spill] sm:$0xff] }
 0x41c   :  { %v2425_v36 = vsub.f32 1.0, %v2424_v48  ;;  %2790 = vmatpush.msrb.mxu1 %v7710_v8  ;;  %2830 = vmatpush.msra.mxu3 %v7713_v25  ;;  %v2420_v48 = vor.u32 1.1754944e-38, %v2419_v15  ;;  %v11167_v8 = vld [vmem:[#allocation24_spill] sm:$0xff]  ;;  %v4573_v25 = vpop.eup %4572  ;;  %v2522_v26 = vmul.f32 %v11168_v31, %v2459_v10  ;;  %v11170_v15 = vld [vmem:[#allocation26_spill] sm:$0xff]  ;;  %v2497_v7 = vand.u32 2147483648, %v8330_v23  ;;  %vm2493_vm3 = vmor %vm2491_vm1, %vm2492_vm15 }
 0x41d   :  { %v2411_v50 = vmul.f32 %v4567_v19, %v2410_v32  ;;  %vm2506_vm2 = vweird.f32 %v8337_v17  ;;  %vm2535_vm7 = vcmask 1045509   ;;  %v8516_v10 = vld [vmem:[#allocation2 + $0x150] sm:$0xff] }
 0x41e   :  { %v2426_v6 = vmul.f32 %v4569_v44, %v2425_v36  ;;  %2791 = vmatpush.msrb.mxu1 %v7723_v18  ;;  %2831 = vmatpush.msra.mxu3 %v11167_v8  ;;  %v11169_v36 = vld [vmem:[#allocation25_spill] sm:$0xff]  ;;  %v2523_v18 = vmul.f32 %v11171_v9, %v2474_v56  ;;  %vm2508_vm4 = vmor %vm2506_vm2, %vm2507_vm0  ;;  %v8529_v56 = vld [vmem:[#allocation2 + $0x100] sm:$0xff] }
 0x41f   :  { %v2412_v0 = vadd.f32 %v4567_v19, %v2411_v50  ;;  %v2498_v50 = vor.u32 1.1754944e-38, %v2497_v7  ;;  %v8532_v8 = vld [vmem:[#allocation2 + $0x110] sm:$0xff]  ;;  %v8553_v9 = vld [vmem:[#allocation2 + $0xa0] sm:$0xff] }
 0x420   :  { %v2427_v58 = vadd.f32 %v4569_v44, %v2426_v6  ;;  %2792 = vmatpush.msrb.mxu1 %v11169_v36  ;;  %2832 = vmatpush.msra.mxu3 %v11170_v15  ;;  %v8540_v31 = vld [vmem:[#allocation2 + $0xf0] sm:$0xff]  ;;  %v11186_v15 = vld [vmem:[#allocation55_spill] sm:$0xff] }
 0x421   :  { %v2416_v3 = vsel %vm2415_vm9, %v4567_v19, %v2412_v0  ;;  %v2504_v19 = vmul.f32 %v8368_v27, %v2503_v16  ;;  %v11176_v16 = vld [vmem:[#allocation35_spill] sm:$0xff]  ;;  %v11185_v36 = vld [vmem:[#allocation52_spill] sm:$0xff] }
 0x422   :  { %v2421_v4 = vsel %vm2418_vm12, %v2420_v48, %v2416_v3  ;;  %v2431_v5 = vsel %vm2430_vm13, %v4569_v44, %v2427_v58  ;;  %2793 = vmatpush.msrb.mxu1 %v7755_v33  ;;  %2833 = vmatpush.msra.mxu3 %v7758_v24  ;;  %v2490_v44 = vadd.f32 %v8354_v60, %v2489_v57  ;;  %v2512_v24 = vand.u32 2147483648, %v8337_v17  ;;  %v8513_v0 = vld [vmem:[#allocation2 + $0x140] sm:$0xff]  ;;  %v11177_v57 = vld [vmem:[#allocation36_spill] sm:$0xff] }
 0x423   :  { %v2436_v32 = vsel %vm2433_vm14, %v2435_v11, %v2431_v5  ;;  %v2524_v55 = vmul.f32 %v4571_v51, %v2421_v4  ;;  %2659 = vmatmul.f32.vlgmr.msra.gmra.mxu1 %v2540_v14  ;;  %2699 = vmatmul.f32.vlgmr.msrb.gmra.mxu3 %v2540_v14  ;;  %v2505_v33 = vadd.f32 %v8368_v27, %v2504_v19  ;;  %v2495_v14 = vand.u32 2147483647, %v8330_v23  ;;  %v11178_v48 = vld [vmem:[#allocation39_spill] sm:$0xff]  ;;  %v8524_v51 = vld [vmem:[#allocation2 + $0x130] sm:$0xff] }
 0x424   :  { %v2525_v20 = vmul.f32 %v4573_v25, %v2436_v32  ;;  %2794 = vmatpush.msrb.mxu1 %v7767_v22  ;;  %2834 = vmatpush.msra.mxu3 %v7770_v43  ;;  %v2510_v22 = vand.u32 2147483647, %v8337_v17  ;;  %v2494_v43 = vsel %vm2493_vm3, %v8354_v60, %v2490_v44  ;;  %v2513_v23 = vor.u32 1.1754944e-38, %v2512_v24  ;;  %v8521_v58 = vld [vmem:[#allocation2 + $0x120] sm:$0xff]  ;;  %v11179_v3 = vld [vmem:[#allocation40_spill] sm:$0xff] }
 0x425   :  { %v8432_v49 = vadd.f32 %v2524_v55, %v2522_v26  ;;  %v2509_v35 = vsel %vm2508_vm4, %v8368_v27, %v2505_v33  ;;  %vm2496_vm5 = vcmp.eq.f32.partialorder %v2495_v14, 8.507059e+37  ;;  %v11180_v11 = vld [vmem:[#allocation43_spill] sm:$0xff]  ;;  %v11181_v25 = vld [vmem:[#allocation44_spill] sm:$0xff] }
 0x426   :  { %v8436_v53 = vadd.f32 %v2525_v20, %v2523_v18  ;;  %2795 = vmatpush.msrb.mxu1 %v7777_v30  ;;  %2835 = vmatpush.msra.mxu3 %v7780_v28  ;;  %v2499_v30 = vsel %vm2496_vm5, %v2498_v50, %v2494_v43  ;;  %vm2511_vm6 = vcmp.eq.f32.partialorder %v2510_v22, 8.507059e+37  ;;  %v11182_v4 = vld [vmem:[#allocation47_spill] sm:$0xff]  ;;  %v11183_v26 = vld [vmem:[#allocation48_spill] sm:$0xff]  ;;  %v11191_v50 = vld [vmem:[#allocation29_spill] sm:$0xff] }
 0x427   :  { %4574 = vtanh.f32 %v8432_v49  ;;  %v2514_v17 = vsel %vm2511_vm6, %v2513_v23, %v2509_v35  ;;  %v8537_v5 = vld [vmem:[#allocation2 + $0xe0] sm:$0xff]  ;;  %v8548_v55 = vld [vmem:[#allocation2 + $0xd0] sm:$0xff] }
 0x428   :  { %4576 = vtanh.f32 %v8436_v53  ;;  %2796 = vmatpush.msrb.mxu1 %v7791_v42  ;;  %2836 = vmatpush.msra.mxu3 %v7794_v12  ;;  %v11184_v19 = vld [vmem:[#allocation51_spill] sm:$0xff]  ;;  %v8556_v18 = vld [vmem:[#allocation2 + $0xb0] sm:$0xff] }
 0x429   :  { %v8545_v32 = vld [vmem:[#allocation2 + $0xc0] sm:$0xff]  ;;  %v11187_v20 = vld [vmem:[#allocation56_spill] sm:$0xff] }
 0x42a   :  { %2797 = vmatpush.msrb.mxu1 %v7805_v1  ;;  %2837 = vmatpush.msra.mxu3 %v7808_v39  ;;  %v11188_v44 = vld [vmem:[#allocation59_spill] sm:$0xff]  ;;  %v8564_v33 = vld [vmem:[#allocation2 + $0x90] sm:$0xff] }
 0x42b   :  { %v8561_v7 = vld [vmem:[#allocation2 + $0x80] sm:$0xff]  ;;  %v11189_v24 = vld [vmem:[#allocation60_spill] sm:$0xff] }
 0x42c   :  { %2798 = vmatpush.msrb.mxu1 %v7823_v52  ;;  %2838 = vmatpush.msra.mxu3 %v7826_v46  ;;  %v8473_v46 = vld [vmem:[#allocation2 + $0x1e0] sm:$0xff]  ;;  %v8572_v43 = vld [vmem:[#allocation2 + $0x70] sm:$0xff] }
 0x42d   :  { %v4575_v59 = vpop.eup %4574  ;;  %v11190_v14 = vld [vmem:[#allocation67_spill] sm:$0xff] }
 0x42e   :  { %v4577_v28 = vpop.eup %4576  ;;  %v2530_v60 = vmul.f32 %v4575_v59, %v2499_v30  ;;  %2799 = vmatpush.msrb.mxu1 %v7829_v21  ;;  %2839 = vmatpush.msra.mxu3 %v7832_v34  ;;  %v8476_v21 = vld [vmem:[#allocation2 + $0x1f0] sm:$0xff]  ;;  %v8481_v34 = vld [vmem:[#allocation2 + $0x1c0] sm:$0xff] }
 0x42f   :  { %v2531_v42 = vmul.f32 %v4577_v28, %v2514_v17  ;;  %v8569_v22 = vld [vmem:[#allocation2 + $0x60] sm:$0xff]  ;;  %v8580_v59 = vld [vmem:[#allocation2 + $0x50] sm:$0xff] }
 0x430   :  { %v2766_v12 = vrot.slane %v2530_v60, 4  ;;  %2800 = vmatpush.msrb.mxu1 %v7835_v38  ;;  %2840 = vmatpush.msra.mxu3 %v7838_v37  ;;  %v8484_v38 = vld [vmem:[#allocation2 + $0x1d0] sm:$0xff]  ;;  %v11172_v37 = vld [vmem:[#allocation27_spill] sm:$0xff] }
 0x431   :  { %v2534_v27 = vrot.slane %v2531_v42, 7  ;;  %v2767_v1 = vrot.slane %v2531_v42, 3  ;;  %v11192_v35 = vld [vmem:[#allocation63_spill] sm:$0xff]  ;;  %v11193_v30 = vld [vmem:[#allocation64_spill] sm:$0xff]  ;;  %v11194_v28 = vld [vmem:[#allocation33_spill] sm:$0xff] }
 0x432   :  { %2801 = vmatpush.msrb.mxu1 %v7841_v62  ;;  %2841 = vmatpush.msra.mxu3 %v7844_v41  ;;  %v8489_v62 = vld [vmem:[#allocation2 + $0x1a0] sm:$0xff]  ;;  %v8492_v41 = vld [vmem:[#allocation2 + $0x1b0] sm:$0xff] }
 0x433   :  { %v2536_v39 = vsel %vm2535_vm7, %v2534_v27, %v2530_v60  ;;  %v8467_v6 = vsel %vm637_vm10, %v2767_v1, %v2766_v12  ;;  %v8577_v23 = vld [vmem:[#allocation2 + $0x40] sm:$0xff]  ;;  %v8588_v60 = vld [vmem:[#allocation2 + $0x30] sm:$0xff] }
 0x434   :  { %v2539_v52 = vrot.slane %v2536_v39, 4  ;;  %2802 = vmatpush.msrb.mxu1 %v7850_v40  ;;  %2842 = vmatpush.msra.mxu3 %v7853_v2  ;;  %v11173_v40 = vld [vmem:[#allocation28_spill] sm:$0xff]  ;;  %v11174_v2 = vld [vmem:[#allocation31_spill] sm:$0xff]  ;;  %11196 = vst [vmem:[#allocation25_spill] sm:$0xff] %v8588_v60  ;;  %v11198_v12 = vld [vmem:[#allocation30_spill] sm:$0xff] }
 0x435   :  { %v8585_v17 = vld [vmem:[#allocation2 + $0x20] sm:$0xff]  ;;  %v8596_v1 = vld [vmem:[#allocation2 + $0x10] sm:$0xff] }
 0x436   :  { %2559 = vmatmul.f32.vlgmr.msrb.gmra.mxu0 %v2539_v52  ;;  %2599 = vmatmul.f32.vlgmr.msra.gmra.mxu2 %v2539_v52  ;;  %11195 = vst [vmem:[#allocation24_spill] sm:$0xff] %v8585_v17  ;;  %v11197_v42 = vld [vmem:[#allocation71_spill] sm:$0xff]  ;;  %v11201_v39 = vld [vmem:[#allocation68_spill] sm:$0xff] }
 0x437   :  { %2770 = vmatpush.msrb.mxu0 %v8473_v46  ;;  %2810 = vmatpush.msra.mxu2 %v8476_v21  ;;  %v8593_v27 = vld [vmem:[#allocation2] sm:$0xff]  ;;  %11200 = vst [vmem:[#allocation27_spill] sm:$0xff] %v8596_v1 }
 0x438   :  { %2803 = vmatpush.msrb.mxu1 %v7857_v13  ;;  %2843 = vmatpush.msra.mxu3 %v7861_v61  ;;  %v8499_v13 = vld [vmem:[#allocation2 + $0x180] sm:$0xff]  ;;  %v8502_v61 = vld [vmem:[#allocation2 + $0x190] sm:$0xff]  ;;  %11199 = vst [vmem:[#allocation26_spill] sm:$0xff] %v8593_v27 }
 0x439   :  { %2771 = vmatpush.msrb.mxu0 %v8481_v34  ;;  %2811 = vmatpush.msra.mxu2 %v8484_v38 }
 0x43a   :  { %2804 = vmatpush.msrb.mxu1 %v7865_v63  ;;  %2844 = vmatpush.msra.mxu3 %v11172_v37  ;;  %v8505_v63 = vld [vmem:[#allocation2 + $0x160] sm:$0xff] }
 0x43b   :  { %2772 = vmatpush.msrb.mxu0 %v8489_v62  ;;  %2812 = vmatpush.msra.mxu2 %v8492_v41  ;;  %v11203_v37 = vld [vmem:[#allocation75_spill] sm:$0xff] }
 0x43c   :  { %2805 = vmatpush.msrb.mxu1 %v11173_v40  ;;  %2845 = vmatpush.msra.mxu3 %v11174_v2  ;;  %v11204_v40 = vld [vmem:[#allocation34_spill] sm:$0xff]  ;;  %v11205_v2 = vld [vmem:[#allocation72_spill] sm:$0xff] }
 0x43d   :  { %2806 = vmatmul.f32.vlgmr.msrb.gmra.mxu1 %v8467_v6  ;;  %2846 = vmatmul.f32.vlgmr.msra.gmra.mxu3 %v8467_v6 }
 0x43e   :  { %2773 = vmatpush.msrb.mxu0 %v8499_v13  ;;  %2813 = vmatpush.msra.mxu2 %v8502_v61 }
 0x43f   :  { %2639 = vmatmul.f32.vlgmr.msra.gmra.mxu0 %v2539_v52  ;;  %2679 = vmatmul.f32.vlgmr.msrb.gmra.mxu2 %v2539_v52  ;;  %v11202_v52 = vld [vmem:[#allocation37_spill] sm:$0xff] }
 0x440   :  { %2774 = vmatpush.msrb.mxu0 %v8505_v63  ;;  %2814 = vmatpush.msra.mxu2 %v8508_v47 }
 0x441   :  { %3041 = vmatpush.msra.mxu1 %v11175_v45  ;;  %3081 = vmatpush.msrb.mxu3 %v11176_v16  ;;  %v11206_v45 = vld [vmem:[#allocation41_spill] sm:$0xff]  ;;  %v11207_v16 = vld [vmem:[#allocation42_spill] sm:$0xff] }
 0x442   :  { %2775 = vmatpush.msrb.mxu0 %v8513_v0  ;;  %2815 = vmatpush.msra.mxu2 %v8516_v10 }
 0x443   :  { %3042 = vmatpush.msra.mxu1 %v11177_v57  ;;  %3082 = vmatpush.msrb.mxu3 %v11178_v48  ;;  %v11208_v57 = vld [vmem:[#allocation45_spill] sm:$0xff]  ;;  %v11209_v48 = vld [vmem:[#allocation46_spill] sm:$0xff] }
 0x444   :  { %2776 = vmatpush.msrb.mxu0 %v8521_v58  ;;  %2816 = vmatpush.msra.mxu2 %v8524_v51 }
 0x445   :  { %3043 = vmatpush.msra.mxu1 %v11179_v3  ;;  %3083 = vmatpush.msrb.mxu3 %v11180_v11  ;;  %v11210_v3 = vld [vmem:[#allocation38_spill] sm:$0xff] }
 0x446   :  { %2777 = vmatpush.msrb.mxu0 %v8529_v56  ;;  %2817 = vmatpush.msra.mxu2 %v8532_v8  ;;  %v11212_v11 = vld [vmem:[#allocation86_spill] sm:$0xff] }
 0x447   :  { %3044 = vmatpush.msra.mxu1 %v11181_v25  ;;  %3084 = vmatpush.msrb.mxu3 %v11182_v4  ;;  %v11213_v25 = vld [vmem:[#allocation50_spill] sm:$0xff]  ;;  %v11214_v4 = vld [vmem:[#allocation83_spill] sm:$0xff] }
 0x448   :  { %2778 = vmatpush.msrb.mxu0 %v8537_v5  ;;  %2818 = vmatpush.msra.mxu2 %v8540_v31 }
 0x449   :  { %3045 = vmatpush.msra.mxu1 %v11183_v26  ;;  %3085 = vmatpush.msrb.mxu3 %v11184_v19  ;;  %v11215_v26 = vld [vmem:[#allocation49_spill] sm:$0xff]  ;;  %v11216_v19 = vld [vmem:[#allocation90_spill] sm:$0xff] }
 0x44a   :  { %2779 = vmatpush.msrb.mxu0 %v8545_v32  ;;  %2819 = vmatpush.msra.mxu2 %v8548_v55 }
 0x44b   :  { %3046 = vmatpush.msra.mxu1 %v11185_v36  ;;  %3086 = vmatpush.msrb.mxu3 %v11186_v15  ;;  %v11217_v36 = vld [vmem:[#allocation54_spill] sm:$0xff]  ;;  %v11218_v15 = vld [vmem:[#allocation87_spill] sm:$0xff] }
 0x44c   :  { %2780 = vmatpush.msrb.mxu0 %v8553_v9  ;;  %2820 = vmatpush.msra.mxu2 %v8556_v18 }
 0x44d   :  { %3047 = vmatpush.msra.mxu1 %v11187_v20  ;;  %3087 = vmatpush.msrb.mxu3 %v11188_v44  ;;  %v11219_v20 = vld [vmem:[#allocation53_spill] sm:$0xff]  ;;  %v11220_v44 = vld [vmem:[#allocation58_spill] sm:$0xff] }
 0x44e   :  { %2781 = vmatpush.msrb.mxu0 %v8561_v7  ;;  %2821 = vmatpush.msra.mxu2 %v8564_v33 }
 0x44f   :  { %3048 = vmatpush.msra.mxu1 %v11189_v24  ;;  %3088 = vmatpush.msrb.mxu3 %v11190_v14  ;;  %v11221_v24 = vld [vmem:[#allocation61_spill] sm:$0xff]  ;;  %v11222_v14 = vld [vmem:[#allocation91_spill] sm:$0xff] }
 0x450   :  { %2782 = vmatpush.msrb.mxu0 %v8569_v22  ;;  %2822 = vmatpush.msra.mxu2 %v8572_v43 }
 0x451   :  { %3049 = vmatpush.msra.mxu1 %v11191_v50  ;;  %3089 = vmatpush.msrb.mxu3 %v11192_v35  ;;  %v11223_v50 = vld [vmem:[#allocation57_spill] sm:$0xff]  ;;  %v11224_v35 = vld [vmem:[#allocation66_spill] sm:$0xff] }
 0x452   :  { %2783 = vmatpush.msrb.mxu0 %v8577_v23  ;;  %2823 = vmatpush.msra.mxu2 %v8580_v59 }
 0x453   :  { %3050 = vmatpush.msra.mxu1 %v11193_v30  ;;  %3090 = vmatpush.msrb.mxu3 %v11194_v28  ;;  %v11225_v30 = vld [vmem:[#allocation69_spill] sm:$0xff]  ;;  %v11226_v28 = vld [vmem:[#allocation62_spill] sm:$0xff] }
 0x454   :  { %2784 = vmatpush.msrb.mxu0 %v8585_v17  ;;  %2824 = vmatpush.msra.mxu2 %v8588_v60 }
 0x455   :  { %3051 = vmatpush.msra.mxu1 %v11197_v42  ;;  %3091 = vmatpush.msrb.mxu3 %v11198_v12  ;;  %v11227_v42 = vld [vmem:[#allocation65_spill] sm:$0xff]  ;;  %v11228_v12 = vld [vmem:[#allocation74_spill] sm:$0xff] }
 0x456   :  { %2785 = vmatpush.msrb.mxu0 %v8593_v27  ;;  %2825 = vmatpush.msra.mxu2 %v8596_v1 }
 0x457   :  { %2786 = vmatmul.f32.vlgmr.msrb.gmra.mxu0 %v8467_v6  ;;  %2826 = vmatmul.f32.vlgmr.msra.gmra.mxu2 %v8467_v6  ;;  %v11211_v6 = vld [vmem:[#allocation76_spill] sm:$0xff] }
 0x458   :  { %3052 = vmatpush.msra.mxu1 %v11201_v39  ;;  %3092 = vmatpush.msrb.mxu3 %v11202_v52  ;;  %v11229_v39 = vld [vmem:[#allocation78_spill] sm:$0xff] }
 0x459   :  { %3021 = vmatpush.msra.mxu0 %v11203_v37  ;;  %3061 = vmatpush.msrb.mxu2 %v11204_v40  ;;  %v11230_v52 = vld [vmem:[#allocation70_spill] sm:$0xff]  ;;  %v11231_v37 = vld [vmem:[#allocation73_spill] sm:$0xff] }
 0x45a   :  { %3053 = vmatpush.msra.mxu1 %v11205_v2  ;;  %3093 = vmatpush.msrb.mxu3 %v11206_v45  ;;  %v11232_v40 = vld [vmem:[#allocation82_spill] sm:$0xff]  ;;  %v11233_v2 = vld [vmem:[#allocation84_spill] sm:$0xff]  ;;  %v11234_v45 = vld [vmem:[#allocation79_spill] sm:$0xff] }
 0x45b   :  { %3022 = vmatpush.msra.mxu0 %v11207_v16  ;;  %3062 = vmatpush.msrb.mxu2 %v11208_v57  ;;  %v11235_v16 = vld [vmem:[#allocation81_spill] sm:$0xff] }
 0x45c   :  { %3054 = vmatpush.msra.mxu1 %v11209_v48  ;;  %3094 = vmatpush.msrb.mxu3 %v11210_v3  ;;  %v11236_v57 = vld [vmem:[#allocation89_spill] sm:$0xff]  ;;  %v11237_v48 = vld [vmem:[#allocation92_spill] sm:$0xff] }
 0x45d   :  { %3023 = vmatpush.msra.mxu0 %v11211_v6  ;;  %3063 = vmatpush.msrb.mxu2 %v11212_v11  ;;  %v11238_v3 = vld [vmem:[#allocation85_spill] sm:$0xff]  ;;  %v11239_v6 = vld [vmem:[#allocation88_spill] sm:$0xff]  ;;  %v11240_v11 = vld [vmem:[#allocation95_spill] sm:$0xff] }
 0x45e   :  { %3055 = vmatpush.msra.mxu1 %v11213_v25  ;;  %3095 = vmatpush.msrb.mxu3 %v11214_v4  ;;  %v11241_v25 = vld [vmem:[#allocation96_spill] sm:$0xff]  ;;  %v11242_v4 = vld [vmem:[#allocation93_spill] sm:$0xff] }
 0x45f   :  { %3024 = vmatpush.msra.mxu0 %v11215_v26  ;;  %3064 = vmatpush.msrb.mxu2 %v11216_v19  ;;  %v11243_v26 = vld [vmem:[#allocation94_spill] sm:$0xff]  ;;  %v11244_v19 = vld [vmem:[#allocation99_spill] sm:$0xff] }
 0x460   :  { %3056 = vmatpush.msra.mxu1 %v11217_v36  ;;  %3096 = vmatpush.msrb.mxu3 %v11218_v15  ;;  %v11245_v36 = vld [vmem:[#allocation104_spill] sm:$0xff]  ;;  %v11246_v15 = vld [vmem:[#allocation97_spill] sm:$0xff] }
 0x461   :  { %3025 = vmatpush.msra.mxu0 %v11221_v24  ;;  %3065 = vmatpush.msrb.mxu2 %v11222_v14  ;;  %v11249_v24 = vld [vmem:[#allocation110_spill] sm:$0xff]  ;;  %v11250_v14 = vld [vmem:[#allocation105_spill] sm:$0xff] }
 0x462   :  { %3121 = vmatpush.msrb.mxu1 %v11219_v20  ;;  %3161 = vmatpush.msra.mxu3 %v11220_v44  ;;  %v11247_v20 = vld [vmem:[#allocation98_spill] sm:$0xff]  ;;  %v11248_v44 = vld [vmem:[#allocation109_spill] sm:$0xff] }
 0x463   :  { %3026 = vmatpush.msra.mxu0 %v11225_v30  ;;  %3066 = vmatpush.msrb.mxu2 %v11226_v28  ;;  %v11253_v30 = vld [vmem:[#allocation12_spill] sm:$0xff]  ;;  %v11254_v28 = vld [vmem:[#allocation111_spill] sm:$0xff] }
 0x464   :  { %3122 = vmatpush.msrb.mxu1 %v11223_v50  ;;  %3162 = vmatpush.msra.mxu3 %v11224_v35  ;;  %v11251_v50 = vld [vmem:[#allocation107_spill] sm:$0xff] }
 0x465   :  { %3027 = vmatpush.msra.mxu0 %v11229_v39  ;;  %3067 = vmatpush.msrb.mxu2 %v11230_v52  ;;  %v11252_v35 = vld [vmem:[#allocation11_spill] sm:$0xff]  ;;  %v11257_v39 = vld [vmem:[#allocation113_spill] sm:$0xff] }
 0x466   :  { %3123 = vmatpush.msrb.mxu1 %v11227_v42  ;;  %3163 = vmatpush.msra.mxu3 %v11228_v12  ;;  %v11255_v42 = vld [vmem:[#allocation112_spill] sm:$0xff]  ;;  %v11256_v12 = vld [vmem:[#allocation15_spill] sm:$0xff]  ;;  %v11258_v52 = vld [vmem:[#allocation13_spill] sm:$0xff] }
 0x467   :  { %3028 = vmatpush.msra.mxu0 %v11233_v2  ;;  %3068 = vmatpush.msrb.mxu2 %v11234_v45  ;;  %v11261_v2 = vld [vmem:[#allocation116_spill] sm:$0xff]  ;;  %v11262_v45 = vld [vmem:[#allocation115_spill] sm:$0xff] }
 0x468   :  { %3124 = vmatpush.msrb.mxu1 %v11231_v37  ;;  %3164 = vmatpush.msra.mxu3 %v11232_v40  ;;  %v11259_v37 = vld [vmem:[#allocation14_spill] sm:$0xff] }
 0x469   :  { %3029 = vmatpush.msra.mxu0 %v11237_v48  ;;  %3069 = vmatpush.msrb.mxu2 %v11238_v3  ;;  %v11260_v40 = vld [vmem:[#allocation114_spill] sm:$0xff]  ;;  %v11265_v48 = vld [vmem:[#allocation120_spill] sm:$0xff]  ;;  %v11266_v3 = vld [vmem:[#allocation119_spill] sm:$0xff] }
 0x46a   :  { %3125 = vmatpush.msrb.mxu1 %v11235_v16  ;;  %3165 = vmatpush.msra.mxu3 %v11236_v57  ;;  %v11263_v16 = vld [vmem:[#allocation117_spill] sm:$0xff]  ;;  %v11264_v57 = vld [vmem:[#allocation118_spill] sm:$0xff] }
 0x46b   :  { %3030 = vmatpush.msra.mxu0 %v11241_v25  ;;  %3070 = vmatpush.msrb.mxu2 %v11242_v4  ;;  %v11269_v25 = vld [vmem:[#allocation124_spill] sm:$0xff]  ;;  %v11270_v4 = vld [vmem:[#allocation123_spill] sm:$0xff] }
 0x46c   :  { %3126 = vmatpush.msrb.mxu1 %v11239_v6  ;;  %3166 = vmatpush.msra.mxu3 %v11240_v11  ;;  %v11267_v6 = vld [vmem:[#allocation121_spill] sm:$0xff]  ;;  %v11268_v11 = vld [vmem:[#allocation122_spill] sm:$0xff] }
 0x46d   :  { %3031 = vmatpush.msra.mxu0 %v11245_v36  ;;  %3071 = vmatpush.msrb.mxu2 %v11246_v15  ;;  %v11273_v36 = vld [vmem:[#allocation127_spill] sm:$0xff]  ;;  %v11274_v15 = vld [vmem:[#allocation128_spill] sm:$0xff] }
 0x46e   :  { %3127 = vmatpush.msrb.mxu1 %v11243_v26  ;;  %3167 = vmatpush.msra.mxu3 %v11244_v19  ;;  %v11271_v26 = vld [vmem:[#allocation125_spill] sm:$0xff]  ;;  %v11272_v19 = vld [vmem:[#allocation126_spill] sm:$0xff] }
 0x46f   :  { %3032 = vmatpush.msra.mxu0 %v11249_v24  ;;  %3072 = vmatpush.msrb.mxu2 %v11250_v14  ;;  %v11277_v24 = vld [vmem:[#allocation131_spill] sm:$0xff]  ;;  %v11278_v14 = vld [vmem:[#allocation132_spill] sm:$0xff] }
 0x470   :  { %3128 = vmatpush.msrb.mxu1 %v11247_v20  ;;  %3168 = vmatpush.msra.mxu3 %v11248_v44  ;;  %v11275_v20 = vld [vmem:[#allocation129_spill] sm:$0xff]  ;;  %v11276_v44 = vld [vmem:[#allocation130_spill] sm:$0xff] }
 0x471   :  { %3033 = vmatpush.msra.mxu0 %v11253_v30  ;;  %3073 = vmatpush.msrb.mxu2 %v11254_v28  ;;  %v11281_v30 = vld [vmem:[#allocation135_spill] sm:$0xff]  ;;  %v11282_v28 = vld [vmem:[#allocation136_spill] sm:$0xff] }
 0x472   :  { %3129 = vmatpush.msrb.mxu1 %v11251_v50  ;;  %3169 = vmatpush.msra.mxu3 %v11252_v35  ;;  %v11279_v50 = vld [vmem:[#allocation133_spill] sm:$0xff]  ;;  %v11280_v35 = vld [vmem:[#allocation134_spill] sm:$0xff] }
 0x473   :  { %3034 = vmatpush.msra.mxu0 %v11257_v39  ;;  %3074 = vmatpush.msrb.mxu2 %v11258_v52  ;;  %v11285_v39 = vld [vmem:[#allocation139_spill] sm:$0xff]  ;;  %v11286_v52 = vld [vmem:[#allocation140_spill] sm:$0xff] }
 0x474   :  { %3130 = vmatpush.msrb.mxu1 %v11255_v42  ;;  %3170 = vmatpush.msra.mxu3 %v11256_v12  ;;  %v11283_v42 = vld [vmem:[#allocation137_spill] sm:$0xff]  ;;  %v11284_v12 = vld [vmem:[#allocation138_spill] sm:$0xff] }
 0x475   :  { %3035 = vmatpush.msra.mxu0 %v11261_v2  ;;  %3075 = vmatpush.msrb.mxu2 %v11262_v45  ;;  %v11289_v2 = vld [vmem:[#allocation143_spill] sm:$0xff]  ;;  %v11290_v45 = vld [vmem:[#allocation144_spill] sm:$0xff] }
 0x476   :  { %3131 = vmatpush.msrb.mxu1 %v11259_v37  ;;  %3171 = vmatpush.msra.mxu3 %v11260_v40  ;;  %v11287_v37 = vld [vmem:[#allocation141_spill] sm:$0xff]  ;;  %v11288_v40 = vld [vmem:[#allocation142_spill] sm:$0xff] }
 0x477   :  { %3036 = vmatpush.msra.mxu0 %v11265_v48  ;;  %3076 = vmatpush.msrb.mxu2 %v11266_v3  ;;  %v11293_v48 = vld [vmem:[#allocation147_spill] sm:$0xff]  ;;  %v11294_v3 = vld [vmem:[#allocation148_spill] sm:$0xff] }
 0x478   :  { %3132 = vmatpush.msrb.mxu1 %v11263_v16  ;;  %3172 = vmatpush.msra.mxu3 %v11264_v57  ;;  %v11291_v16 = vld [vmem:[#allocation145_spill] sm:$0xff]  ;;  %v11292_v57 = vld [vmem:[#allocation146_spill] sm:$0xff] }
 0x479   :  { %3101 = vmatpush.msrb.mxu0 %v11269_v25  ;;  %3141 = vmatpush.msra.mxu2 %v11270_v4  ;;  %v11297_v25 = vld [vmem:[#allocation151_spill] sm:$0xff]  ;;  %v11298_v4 = vld [vmem:[#allocation20_spill] sm:$0xff] }
 0x47a   :  { %3133 = vmatpush.msrb.mxu1 %v11267_v6  ;;  %3173 = vmatpush.msra.mxu3 %v11268_v11  ;;  %v11295_v6 = vld [vmem:[#allocation149_spill] sm:$0xff]  ;;  %v11296_v11 = vld [vmem:[#allocation150_spill] sm:$0xff] }
 0x47b   :  { %3102 = vmatpush.msrb.mxu0 %v11273_v36  ;;  %3142 = vmatpush.msra.mxu2 %v11274_v15  ;;  %v11301_v36 = vld [vmem:[#allocation152_spill] sm:$0xff]  ;;  %v11302_v15 = vld [vmem:[#allocation153_spill] sm:$0xff] }
 0x47c   :  { %3134 = vmatpush.msrb.mxu1 %v11271_v26  ;;  %3174 = vmatpush.msra.mxu3 %v11272_v19  ;;  %v11299_v26 = vld [vmem:[#allocation21_spill] sm:$0xff]  ;;  %v11300_v19 = vld [vmem:[#allocation22_spill] sm:$0xff] }
 0x47d   :  { %3103 = vmatpush.msrb.mxu0 %v11277_v24  ;;  %3143 = vmatpush.msra.mxu2 %v11278_v14  ;;  %v11305_v24 = vld [vmem:[#allocation156_spill] sm:$0xff]  ;;  %v11306_v14 = vld [vmem:[#allocation157_spill] sm:$0xff] }
 0x47e   :  { %3135 = vmatpush.msrb.mxu1 %v11275_v20  ;;  %3175 = vmatpush.msra.mxu3 %v11276_v44  ;;  %v11303_v20 = vld [vmem:[#allocation154_spill] sm:$0xff]  ;;  %v11304_v44 = vld [vmem:[#allocation155_spill] sm:$0xff] }
 0x47f   :  { %3104 = vmatpush.msrb.mxu0 %v11281_v30  ;;  %3144 = vmatpush.msra.mxu2 %v11282_v28 }
 0x480   :  { %3136 = vmatpush.msrb.mxu1 %v11279_v50  ;;  %3176 = vmatpush.msra.mxu3 %v11280_v35 }
 0x481   :  { %3105 = vmatpush.msrb.mxu0 %v11283_v42  ;;  %3145 = vmatpush.msra.mxu2 %v11284_v12  ;;  %v11307_v42 = vld [vmem:[#allocation16_spill] sm:$0xff] }
 0x483   :  { %3106 = vmatpush.msrb.mxu0 %v11285_v39  ;;  %3146 = vmatpush.msra.mxu2 %v11286_v52 }
 0x485   :  { %3107 = vmatpush.msrb.mxu0 %v11287_v37  ;;  %3147 = vmatpush.msra.mxu2 %v11288_v40  ;;  %v11308_v40 = vld [vmem:[#allocation17_spill] sm:$0xff] }
 0x487   :  { %3108 = vmatpush.msrb.mxu0 %v11289_v2  ;;  %3148 = vmatpush.msra.mxu2 %v11290_v45 }
 0x489   :  { %3109 = vmatpush.msrb.mxu0 %v11291_v16  ;;  %3149 = vmatpush.msra.mxu2 %v11292_v57 }
 0x48b   :  { %3110 = vmatpush.msrb.mxu0 %v11293_v48  ;;  %3150 = vmatpush.msra.mxu2 %v11294_v3 }
 0x48d   :  { %3111 = vmatpush.msrb.mxu0 %v11295_v6  ;;  %3151 = vmatpush.msra.mxu2 %v11296_v11 }
 0x48f   :  { %3112 = vmatpush.msrb.mxu0 %v11297_v25  ;;  %3152 = vmatpush.msra.mxu2 %v11298_v4  ;;  %v11309_v25 = vld [vmem:[#allocation102_spill] sm:$0xff] }
 0x491   :  { %3113 = vmatpush.msrb.mxu0 %v11299_v26  ;;  %3153 = vmatpush.msra.mxu2 %v11300_v19  ;;  %v11310_v19 = vld [vmem:[#allocation103_spill] sm:$0xff] }
 0x493   :  { %3114 = vmatpush.msrb.mxu0 %v11301_v36  ;;  %3154 = vmatpush.msra.mxu2 %v11302_v15 }
 0x495   :  { %3115 = vmatpush.msrb.mxu0 %v11303_v20  ;;  %3155 = vmatpush.msra.mxu2 %v11304_v44 }
 0x497   :  { %3116 = vmatpush.msrb.mxu0 %v11305_v24  ;;  %3156 = vmatpush.msra.mxu2 %v11306_v14  ;;  %v11311_v24 = vld [vmem:[#allocation18_spill] sm:$0xff] }
 0x498   :  { %v2580_v50 = vpop.f32.mrf.mxu1 }
 0x49e   :  { %v2620_v35 = vpop.f32.mrf.mxu3 }
 0x4a0   :  { %v2660_v30 = vpop.f32.mrf.mxu1 }
 0x4a6   :  { %v2700_v45 = vpop.f32.mrf.mxu3 }
 0x4b3   :  { %v2560_v28 = vpop.f32.mrf.mxu0 }
 0x4b4   :  { %v2561_v12 = vadd.f32 %v2560_v28, %v11307_v42 }
 0x4b6   :  { %v2581_v39 = vadd.f32 %v2580_v50, %v2561_v12 }
 0x4b8   :  { %v4316_v52 = vmul.f32 -1.442695, %v2581_v39 }
 0x4b9   :  { %v2600_v37 = vpop.f32.mrf.mxu2 }
 0x4ba   :  { %4578 = vpow2.f32 %v4316_v52  ;;  %v2601_v2 = vadd.f32 %v2600_v37, %v11308_v40  ;;  %v2807_v16 = vpop.f32.mrf.mxu1 }
 0x4bb   :  { %v2855_v57 = vrot.slane %v2807_v16, 3  ;;  %v2859_v6 = vrot.slane %v2807_v16, 4 }
 0x4bc   :  { %v2621_v48 = vadd.f32 %v2620_v35, %v2601_v2  ;;  %v2640_v28 = vpop.f32.mrf.mxu0 }
 0x4bd   :  { %v2871_v4 = vadd.f32 %v2855_v57, %v11309_v25  ;;  %v2875_v36 = vadd.f32 %v2859_v6, %v11310_v19  ;;  %v11312_v57 = vld [vmem:[#allocation19_spill] sm:$0xff]  ;;  %v11313_v6 = vld [vmem:[#allocation100_spill] sm:$0xff] }
 0x4be   :  { %v4317_v3 = vmul.f32 -1.442695, %v2621_v48  ;;  %v2641_v48 = vadd.f32 %v2640_v28, %v11312_v57 }
 0x4bf   :  { %v4321_v44 = vmul.f32 -1.442695, %v2871_v4  ;;  %v4322_v35 = vmul.f32 -1.442695, %v2875_v36  ;;  %v11314_v4 = vld [vmem:[#allocation101_spill] sm:$0xff] }
 0x4c0   :  { %v4579_v11 = vpop.eup %4578  ;;  %4580 = vpow2.f32 %v4317_v3  ;;  %v2847_v15 = vpop.f32.mrf.mxu3 }
 0x4c1   :  { %v2706_v26 = vadd.f32 1.0, %v4579_v11  ;;  %v2857_v12 = vrot.slane %v2847_v15, 3  ;;  %v2861_v37 = vrot.slane %v2847_v15, 4 }
 0x4c2   :  { %v2680_v20 = vpop.f32.mrf.mxu2 }
 0x4c3   :  { %4582 = vrcp.f32 %v2706_v26  ;;  %v2681_v14 = vadd.f32 %v2680_v20, %v11311_v24  ;;  %v2873_v11 = vadd.f32 %v2857_v12, %v11313_v6  ;;  %v2877_v19 = vadd.f32 %v2861_v37, %v11314_v4 }
 0x4c4   :  { %4584 = vpow2.f32 %v4321_v44  ;;  %v2661_v24 = vadd.f32 %v2660_v30, %v2641_v48  ;;  %v2718_v28 = vand.u32 2147483648, %v2706_v26  ;;  %vm2712_vm9 = vweird.f32 %v2706_v26 }
 0x4c5   :  { %v2701_v39 = vadd.f32 %v2700_v45, %v2681_v14  ;;  %v4323_v36 = vmul.f32 -1.442695, %v2873_v11  ;;  %v4324_v15 = vmul.f32 -1.442695, %v2877_v19  ;;  %v2716_v37 = vand.u32 2147483647, %v2706_v26 }
 0x4c6   :  { %v4581_v50 = vpop.eup %4580 }
 0x4c7   :  { %v2725_v52 = vadd.f32 1.0, %v4581_v50  ;;  %v4318_v2 = vmul.f32 -1.442695, %v2701_v39  ;;  %vm2717_vm14 = vcmp.eq.f32.partialorder %v2716_v37, 8.507059e+37 }
 0x4c9   :  { %v4583_v16 = vpop.eup %4582  ;;  %4586 = vrcp.f32 %v2725_v52  ;;  %v2735_v48 = vand.u32 2147483647, %v2725_v52  ;;  %vm2731_vm13 = vweird.f32 %v2725_v52 }
 0x4ca   :  { %v2708_v3 = vmul.f32 %v4583_v16, %v2706_v26  ;;  %4588 = vpow2.f32 %v4322_v35  ;;  %v4585_v25 = vpop.eup %4584  ;;  %vm2713_vm8 = vweird.f32 %v4583_v16 }
 0x4cb   :  { %4590 = vpow2.f32 %v4318_v2  ;;  %v8715_v40 = vadd.f32 1.0, %v4585_v25  ;;  %v2737_v2 = vand.u32 2147483648, %v2725_v52  ;;  %vm8717_vm11 = vmor %vm2712_vm9, %vm2713_vm8  ;;  %vm2736_vm0 = vcmp.eq.f32.partialorder %v2735_v48, 8.507059e+37 }
 0x4cc   :  { %v2709_v20 = vsub.f32 1.0, %v2708_v3  ;;  %4592 = vtanh.f32 %v2661_v24  ;;  %v2719_v24 = vor.u32 1.1754944e-38, %v2718_v28 }
 0x4cd   :  { %4594 = vpow2.f32 %v4323_v36  ;;  %vm2929_vm5 = vweird.f32 %v8715_v40 }
 0x4ce   :  { %v2710_v45 = vmul.f32 %v4583_v16, %v2709_v20  ;;  %4596 = vpow2.f32 %v4324_v15  ;;  %v2738_v15 = vor.u32 1.1754944e-38, %v2737_v2 }
 0x4cf   :  { %v4587_v14 = vpop.eup %4586  ;;  %4598 = vrcp.f32 %v8715_v40 }
 0x4d0   :  { %v2727_v44 = vmul.f32 %v4587_v14, %v2725_v52  ;;  %v2711_v50 = vadd.f32 %v4583_v16, %v2710_v45  ;;  %v4589_v39 = vpop.eup %4588  ;;  %vm2732_vm12 = vweird.f32 %v4587_v14  ;;  %v11318_v52 = vld [vmem:[#allocation80_spill] sm:$0xff] }
 0x4d1   :  { %v4591_v12 = vpop.eup %4590  ;;  %v8721_v19 = vadd.f32 1.0, %v4589_v39  ;;  %vm2733_vm15 = vmor %vm2731_vm13, %vm2732_vm12 }
 0x4d2   :  { %v2728_v35 = vsub.f32 1.0, %v2727_v44  ;;  %v2715_v25 = vsel %vm8717_vm11, %v4583_v16, %v2711_v50  ;;  %v8726_v11 = vadd.f32 1.0, %v4591_v12  ;;  %v4593_v36 = vpop.eup %4592  ;;  %v11317_v50 = vld [vmem:[#allocation77_spill] sm:$0xff] }
 0x4d3   :  { %v2720_v44 = vsel %vm2717_vm14, %v2719_v24, %v2715_v25  ;;  %vm2944_vm7 = vweird.f32 %v8721_v19 }
 0x4d4   :  { %v2729_v3 = vmul.f32 %v4587_v14, %v2728_v35  ;;  %v2787_v26 = vpop.f32.mrf.mxu0  ;;  %4600 = vrcp.f32 %v8726_v11  ;;  %v4595_v35 = vpop.eup %4594  ;;  %v2762_v6 = vmul.f32 %v4593_v36, %v2720_v44  ;;  %v2757_v44 = vand.u32 2147483648, %v8726_v11 }
 0x4d5   :  { %v2854_v45 = vrot.slane %v2787_v26, 3  ;;  %v2858_v39 = vrot.slane %v2787_v26, 4  ;;  %4602 = vrcp.f32 %v8721_v19  ;;  %v4597_v12 = vpop.eup %4596  ;;  %v8737_v42 = vadd.f32 1.0, %v4595_v35 }
 0x4d6   :  { %v2730_v20 = vadd.f32 %v4587_v14, %v2729_v3  ;;  %v11319_v3 = vld [vmem:[#allocation23_spill] sm:$0xff]  ;;  %v8733_v2 = vpop.eup %4598  ;;  %vm2751_vm2 = vweird.f32 %v8726_v11 }
 0x4d7   :  { %v2870_v28 = vadd.f32 %v2854_v45, %v11317_v50  ;;  %v2874_v37 = vadd.f32 %v2858_v39, %v11318_v52  ;;  %v2925_v48 = vmul.f32 %v8733_v2, %v8715_v40  ;;  %vm2930_vm6 = vweird.f32 %v8733_v2 }
 0x4d8   :  { %v2734_v16 = vsel %vm2733_vm15, %v4587_v14, %v2730_v20  ;;  %v8743_v20 = vadd.f32 1.0, %v4597_v12  ;;  %vm8794_vm9 = vmor %vm2929_vm5, %vm2930_vm6 }
 0x4d9   :  { %v2739_v30 = vsel %vm2736_vm0, %v2738_v15, %v2734_v16  ;;  %v4319_v57 = vmul.f32 -1.442695, %v2870_v28  ;;  %v4320_v25 = vmul.f32 -1.442695, %v2874_v37  ;;  %v2755_v28 = vand.u32 2147483647, %v8726_v11 }
 0x4da   :  { %v2761_v4 = vmul.f32 %v2739_v30, %v11319_v3  ;;  %v4601_v26 = vpop.eup %4600  ;;  %v2827_v16 = vpop.f32.mrf.mxu2  ;;  %v2935_v37 = vand.u32 2147483648, %v8715_v40 }
 0x4db   :  { %4604 = vpow2.f32 %v4319_v57  ;;  %v8739_v14 = vpop.eup %4602  ;;  %v2747_v45 = vmul.f32 %v4601_v26, %v8726_v11  ;;  %vm2752_vm1 = vweird.f32 %v4601_v26  ;;  %vm2756_vm4 = vcmp.eq.f32.partialorder %v2755_v28, 8.507059e+37 }
 0x4dc   :  { %v8735_v24 = vadd.f32 %v2762_v6, %v2761_v4  ;;  %4606 = vpow2.f32 %v4320_v25  ;;  %v2940_v6 = vmul.f32 %v8739_v14, %v8721_v19  ;;  %v2926_v4 = vsub.f32 1.0, %v2925_v48  ;;  %vm2753_vm3 = vmor %vm2751_vm2, %vm2752_vm1 }
 0x4dd   :  { %v2748_v36 = vsub.f32 1.0, %v2747_v45  ;;  %v2856_v45 = vrot.slane %v2827_v16, 3  ;;  %v2950_v11 = vand.u32 2147483648, %v8721_v19  ;;  %v2936_v1 = vor.u32 1.1754944e-38, %v2935_v37 }
 0x4de   :  { %11320 = vst [vmem:[#allocation28_spill] sm:$0xff] %v8735_v24  ;;  %4608 = vtanh.f32 %v8735_v24  ;;  %v2941_v3 = vsub.f32 1.0, %v2940_v6  ;;  %v2927_v48 = vmul.f32 %v8733_v2, %v2926_v4  ;;  %v2933_v4 = vand.u32 2147483647, %v8715_v40 }
 0x4df   :  { %4610 = vrcp.f32 %v8737_v42  ;;  %v2749_v15 = vmul.f32 %v4601_v26, %v2748_v36  ;;  %v2758_v36 = vor.u32 1.1754944e-38, %v2757_v44  ;;  %vm2945_vm11 = vweird.f32 %v8739_v14 }
 0x4e0   :  { %4612 = vrcp.f32 %v8743_v20  ;;  %v2942_v44 = vmul.f32 %v8739_v14, %v2941_v3  ;;  %v2928_v28 = vadd.f32 %v8733_v2, %v2927_v48  ;;  %vm8787_vm8 = vcmp.eq.f32.partialorder %v2933_v4, 8.507059e+37  ;;  %vm8808_vm12 = vmor %vm2944_vm7, %vm2945_vm11 }
 0x4e1   :  { %v4605_v57 = vpop.eup %4604  ;;  %v2750_v30 = vadd.f32 %v4601_v26, %v2749_v15  ;;  %v2860_v15 = vrot.slane %v2827_v16, 4  ;;  %v2872_v16 = vadd.f32 %v2856_v45, %v11157_v29  ;;  %v2948_v48 = vand.u32 2147483647, %v8721_v19 }
 0x4e2   :  { %v4607_v39 = vpop.eup %4606  ;;  %v8752_v35 = vadd.f32 1.0, %v4605_v57 }
 0x4e3   :  { %v8755_v12 = vadd.f32 1.0, %v4607_v39  ;;  %v2754_v24 = vsel %vm2753_vm3, %v4601_v26, %v2750_v30  ;;  %v2876_v37 = vadd.f32 %v2860_v15, %v11158_v54  ;;  %v2943_v15 = vadd.f32 %v8739_v14, %v2942_v44 }
 0x4e4   :  { %4614 = vrcp.f32 %v8752_v35  ;;  %v4609_v25 = vpop.eup %4608  ;;  %v2759_v50 = vsel %vm2756_vm4, %v2758_v36, %v2754_v24  ;;  %v2932_v54 = vsel %vm8794_vm9, %v8733_v2, %v2928_v28  ;;  %v2897_v60 = vand.u32 2147483648, %v8752_v35 }
 0x4e5   :  { %4616 = vrcp.f32 %v8755_v12  ;;  %v8762_v57 = vpop.eup %4610  ;;  %v2765_v27 = vmul.f32 %v4609_v25, %v2759_v50  ;;  %v2951_v25 = vor.u32 1.1754944e-38, %v2950_v11  ;;  %v2895_v52 = vand.u32 2147483647, %v8752_v35 }
 0x4e6   :  { %v8765_v6 = vpop.eup %4612  ;;  %v2965_v26 = vmul.f32 %v8762_v57, %v8737_v42  ;;  %4618 = vtanh.f32 %v2872_v16  ;;  %v2912_v2 = vand.u32 2147483648, %v8755_v12  ;;  %v8819_v16 = vld [vmem:[#allocation2 + $0x1f8] sm:$0xff]  ;;  %v2947_v28 = vsel %vm8808_vm12, %v8739_v14, %v2943_v15 }
 0x4e7   :  { %v2980_v24 = vmul.f32 %v8765_v6, %v8743_v20  ;;  %v3016_v3 = vrot.slane %v2765_v27, 3  ;;  %4620 = vtanh.f32 %v2876_v37  ;;  %vm2891_vm15 = vweird.f32 %v8752_v35 }
 0x4e8   :  { %v2966_v4 = vsub.f32 1.0, %v2965_v26  ;;  %v8816_v26 = vld [vmem:[#allocation2 + $0x1e8] sm:$0xff]  ;;  %vm2949_vm0 = vcmp.eq.f32.partialorder %v2948_v48, 8.507059e+37  ;;  %v2898_v14 = vor.u32 1.1754944e-38, %v2897_v60  ;;  %vm2906_vm2 = vweird.f32 %v8755_v12  ;;  %v8855_v60 = vld [vmem:[#allocation2 + $0x1b8] sm:$0xff] }
 0x4e9   :  { %v3018_v11 = vrot.slane %v3016_v3, 5  ;;  %v2981_v40 = vsub.f32 1.0, %v2980_v24  ;;  %v8831_v3 = vld [vmem:[#allocation2 + $0x1c8] sm:$0xff]  ;;  %vm2896_vm3 = vcmp.eq.f32.partialorder %v2895_v52, 8.507059e+37  ;;  %v2913_v15 = vor.u32 1.1754944e-38, %v2912_v2 }
 0x4ea   :  { %v8777_v30 = vpop.eup %4614  ;;  %v2967_v24 = vmul.f32 %v8762_v57, %v2966_v4  ;;  %v2952_v4 = vsel %vm2949_vm0, %v2951_v25, %v2947_v28  ;;  %v11329_v52 = vrot.slane %v8432_v49, 7  ;;  %v8865_v28 = vld [vmem:[#allocation2 + $0x198] sm:$0xff]  ;;  %vm2970_vm6 = vweird.f32 %v8762_v57 }
 0x4eb   :  { %v8783_v50 = vpop.eup %4616  ;;  %v2887_v36 = vmul.f32 %v8777_v30, %v8752_v35  ;;  %3057 = vmatmul.f32.vlgmr.msra.gmra.mxu1 %v3018_v11  ;;  %3097 = vmatmul.f32.vlgmr.msrb.gmra.mxu3 %v3018_v11  ;;  %vm2892_vm13 = vweird.f32 %v8777_v30  ;;  %v2937_v35 = vsel %vm8787_vm8, %v2936_v1, %v2932_v54  ;;  %v2982_v1 = vmul.f32 %v8765_v6, %v2981_v40  ;;  %v8875_v49 = vld [vmem:[#allocation2 + $0x178] sm:$0xff] }
 0x4ec   :  { %v2902_v27 = vmul.f32 %v8783_v50, %v8755_v12  ;;  %3268 = vmatpush.msra.mxu1 %v8816_v26  ;;  %3308 = vmatpush.msrb.mxu3 %v8819_v16  ;;  %vm2907_vm14 = vweird.f32 %v8783_v50  ;;  %vm8839_vm1 = vmor %vm2891_vm15, %vm2892_vm13  ;;  %v4619_v48 = vpop.eup %4618  ;;  %v3000_v2 = vmul.f32 %v11329_v52, %v2937_v35  ;;  %v2975_v35 = vand.u32 2147483648, %v8737_v42 }
 0x4ed   :  { %v2888_v39 = vsub.f32 1.0, %v2887_v36  ;;  %vm2908_vm4 = vmor %vm2906_vm2, %vm2907_vm14  ;;  %v4621_v54 = vpop.eup %4620  ;;  %vm2985_vm7 = vweird.f32 %v8765_v6  ;;  %vm2969_vm8 = vweird.f32 %v8737_v42  ;;  %vm2984_vm9 = vweird.f32 %v8743_v20 }
 0x4ee   :  { %v2903_v29 = vsub.f32 1.0, %v2902_v27  ;;  %3269 = vmatpush.msra.mxu1 %v8831_v3  ;;  %vm8905_vm11 = vmor %vm2969_vm8, %vm2970_vm6  ;;  %v2976_v52 = vor.u32 1.1754944e-38, %v2975_v35  ;;  %vm3013_vm15 = vcmask 1046534  }
 0x4ef   :  { %v2889_v44 = vmul.f32 %v8777_v30, %v2888_v39  ;;  %v2910_v39 = vand.u32 2147483647, %v8755_v12  ;;  %vm8913_vm12 = vmor %vm2984_vm9, %vm2985_vm7 }
 0x4f0   :  { %v2904_v19 = vmul.f32 %v8783_v50, %v2903_v29  ;;  %v8834_v29 = vld [vmem:[#allocation2 + $0x1d8] sm:$0xff] }
 0x4f1   :  { %v2890_v37 = vadd.f32 %v8777_v30, %v2889_v44  ;;  %3309 = vmatpush.msrb.mxu3 %v8834_v29  ;;  %v8852_v44 = vld [vmem:[#allocation2 + $0x1a8] sm:$0xff]  ;;  %vm2911_vm5 = vcmp.eq.f32.partialorder %v2910_v39, 8.507059e+37 }
 0x4f2   :  { %v2905_v36 = vadd.f32 %v8783_v50, %v2904_v19  ;;  %3270 = vmatpush.msra.mxu1 %v8852_v44  ;;  %v8862_v19 = vld [vmem:[#allocation2 + $0x188] sm:$0xff] }
 0x4f3   :  { %v2894_v27 = vsel %vm8839_vm1, %v8777_v30, %v2890_v37  ;;  %3310 = vmatpush.msrb.mxu3 %v8855_v60  ;;  %v11330_v37 = vrot.slane %v8436_v53, 7  ;;  %3137 = vmatmul.f32.vlgmr.msrb.gmra.mxu1 %v3018_v11  ;;  %v8872_v39 = vld [vmem:[#allocation2 + $0x168] sm:$0xff] }
 0x4f4   :  { %v2899_v12 = vsel %vm2896_vm3, %v2898_v14, %v2894_v27  ;;  %v2909_v30 = vsel %vm2908_vm4, %v8783_v50, %v2905_v36  ;;  %3271 = vmatpush.msra.mxu1 %v8862_v19  ;;  %3177 = vmatmul.f32.vlgmr.msra.gmra.mxu3 %v3018_v11  ;;  %v2968_v36 = vadd.f32 %v8762_v57, %v2967_v24  ;;  %v8883_v53 = vld [vmem:[#allocation2 + $0x148] sm:$0xff]  ;;  %v8886_v11 = vld [vmem:[#allocation2 + $0x158] sm:$0xff]  ;;  %v2990_v24 = vand.u32 2147483648, %v8743_v20 }
 0x4f5   :  { %v2914_v45 = vsel %vm2911_vm5, %v2913_v15, %v2909_v30  ;;  %v3002_v25 = vmul.f32 %v4619_v48, %v2899_v12  ;;  %3311 = vmatpush.msrb.mxu3 %v8865_v28  ;;  %v3001_v40 = vmul.f32 %v11330_v37, %v2952_v4  ;;  %v2983_v48 = vadd.f32 %v8765_v6, %v2982_v1  ;;  %v8897_v15 = vld [vmem:[#allocation2 + $0x128] sm:$0xff]  ;;  %v8900_v4 = vld [vmem:[#allocation2 + $0x138] sm:$0xff] }
 0x4f6   :  { %v3003_v17 = vmul.f32 %v4621_v54, %v2914_v45  ;;  %3272 = vmatpush.msra.mxu1 %v8872_v39  ;;  %v2973_v27 = vand.u32 2147483647, %v8737_v42  ;;  %v2988_v1 = vand.u32 2147483647, %v8743_v20  ;;  %v2972_v42 = vsel %vm8905_vm11, %v8762_v57, %v2968_v36  ;;  %v8917_v30 = vld [vmem:[#allocation2 + $0x108] sm:$0xff]  ;;  %v8920_v45 = vld [vmem:[#allocation2 + $0x118] sm:$0xff] }
 0x4f7   :  { %v8870_v50 = vadd.f32 %v3002_v25, %v3000_v2  ;;  %3312 = vmatpush.msrb.mxu3 %v8875_v49  ;;  %v2987_v20 = vsel %vm8913_vm12, %v8765_v6, %v2983_v48  ;;  %v2991_v2 = vor.u32 1.1754944e-38, %v2990_v24  ;;  %v8926_v25 = vld [vmem:[#allocation2 + $0xe8] sm:$0xff]  ;;  %v8929_v37 = vld [vmem:[#allocation2 + $0xf8] sm:$0xff] }
 0x4f8   :  { %v8878_v14 = vadd.f32 %v3003_v17, %v3001_v40  ;;  %3273 = vmatpush.msra.mxu1 %v8883_v53  ;;  %vm2974_vm13 = vcmp.eq.f32.partialorder %v2973_v27, 8.507059e+37  ;;  %vm2989_vm14 = vcmp.eq.f32.partialorder %v2988_v1, 8.507059e+37  ;;  %v8932_v54 = vld [vmem:[#allocation2 + $0xc8] sm:$0xff]  ;;  %v8935_v6 = vld [vmem:[#allocation2 + $0xd8] sm:$0xff] }
 0x4f9   :  { %4622 = vtanh.f32 %v8870_v50  ;;  %3313 = vmatpush.msrb.mxu3 %v8886_v11  ;;  %v2977_v40 = vsel %vm2974_vm13, %v2976_v52, %v2972_v42  ;;  %v2992_v36 = vsel %vm2989_vm14, %v2991_v2, %v2987_v20  ;;  %v8938_v27 = vld [vmem:[#allocation2 + $0xa8] sm:$0xff]  ;;  %v8941_v42 = vld [vmem:[#allocation2 + $0xb8] sm:$0xff] }
 0x4fa   :  { %4624 = vtanh.f32 %v8878_v14  ;;  %3274 = vmatpush.msra.mxu1 %v8897_v15  ;;  %v8944_v52 = vld [vmem:[#allocation2 + $0x88] sm:$0xff]  ;;  %v8947_v20 = vld [vmem:[#allocation2 + $0x98] sm:$0xff] }
 0x4fb   :  { %3314 = vmatpush.msrb.mxu3 %v8900_v4 }
 0x4fc   :  { %3275 = vmatpush.msra.mxu1 %v8917_v30 }
 0x4fd   :  { %3315 = vmatpush.msrb.mxu3 %v8920_v45 }
 0x4fe   :  { %3276 = vmatpush.msra.mxu1 %v8926_v25 }
 0x4ff   :  { %v4623_v57 = vpop.eup %4622  ;;  %3316 = vmatpush.msrb.mxu3 %v8929_v37 }
 0x500   :  { %v4625_v17 = vpop.eup %4624  ;;  %v3008_v35 = vmul.f32 %v4623_v57, %v2977_v40  ;;  %3277 = vmatpush.msra.mxu1 %v8932_v54 }
 0x501   :  { %3317 = vmatpush.msrb.mxu3 %v8935_v6  ;;  %v3009_v48 = vmul.f32 %v4625_v17, %v2992_v36  ;;  %v8953_v17 = vld [vmem:[#allocation2 + $0x68] sm:$0xff]  ;;  %v8956_v36 = vld [vmem:[#allocation2 + $0x78] sm:$0xff] }
 0x502   :  { %v3244_v24 = vrot.slane %v3008_v35, 5  ;;  %3278 = vmatpush.msra.mxu1 %v8938_v27 }
 0x503   :  { %3318 = vmatpush.msrb.mxu3 %v8941_v42  ;;  %v3012_v1 = vrot.slane %v3009_v48, 7  ;;  %v3245_v12 = vrot.slane %v3009_v48, 4  ;;  %v8960_v48 = vld [vmem:[#allocation2 + $0x48] sm:$0xff] }
 0x504   :  { %3279 = vmatpush.msra.mxu1 %v8944_v52  ;;  %11335 = vst [vmem:[#allocation31_spill] sm:$0xff] %v8960_v48 }
 0x505   :  { %3319 = vmatpush.msrb.mxu3 %v8947_v20  ;;  %v3014_v2 = vsel %vm3013_vm15, %v3012_v1, %v3008_v35  ;;  %v8951_v57 = vsel %vm637_vm10, %v3245_v12, %v3244_v24  ;;  %v8964_v35 = vld [vmem:[#allocation2 + $0x58] sm:$0xff]  ;;  %v8968_v24 = vld [vmem:[#allocation2 + $0x28] sm:$0xff]  ;;  %v9079_v12 = vld [vmem:[#allocation5 + $0x280] sm:$0xff] }
 0x506   :  { %v3017_v40 = vrot.slane %v3014_v2, 5  ;;  %3280 = vmatpush.msra.mxu1 %v8953_v17  ;;  %11336 = vst [vmem:[#allocation32_spill] sm:$0xff] %v8964_v35  ;;  %v8972_v1 = vld [vmem:[#allocation2 + $0x38] sm:$0xff]  ;;  %v9082_v2 = vld [vmem:[#allocation5 + $0x288] sm:$0xff] }
 0x507   :  { %3320 = vmatpush.msrb.mxu3 %v8956_v36  ;;  %11337 = vst [vmem:[#allocation35_spill] sm:$0xff] %v8968_v24 }
 0x508   :  { %3037 = vmatmul.f32.vlgmr.msra.gmra.mxu0 %v3017_v40  ;;  %3077 = vmatmul.f32.vlgmr.msrb.gmra.mxu2 %v3017_v40  ;;  %11338 = vst [vmem:[#allocation36_spill] sm:$0xff] %v8972_v1 }
 0x509   :  { %3248 = vmatpush.msra.mxu0 %v8473_v46  ;;  %3281 = vmatpush.msra.mxu1 %v8960_v48  ;;  %v8976_v46 = vld [vmem:[#allocation2 + $0x8] sm:$0xff]  ;;  %11367 = vst [vmem:[#allocation41_spill] sm:$0xff] %v9079_v12 }
 0x50a   :  { %3288 = vmatpush.msrb.mxu2 %v8476_v21  ;;  %3321 = vmatpush.msrb.mxu3 %v8964_v35  ;;  %11339 = vst [vmem:[#allocation39_spill] sm:$0xff] %v8976_v46  ;;  %v8980_v21 = vld [vmem:[#allocation2 + $0x18] sm:$0xff] }
 0x50b   :  { %3249 = vmatpush.msra.mxu0 %v8481_v34  ;;  %3282 = vmatpush.msra.mxu1 %v8968_v24  ;;  %11340 = vst [vmem:[#allocation40_spill] sm:$0xff] %v8980_v21  ;;  %v8989_v34 = vld [vmem:[#allocation5 + $0x3e0] sm:$0xff] }
 0x50c   :  { %3289 = vmatpush.msrb.mxu2 %v8484_v38  ;;  %3322 = vmatpush.msrb.mxu3 %v8972_v1  ;;  %11341 = vst [vmem:[#allocation43_spill] sm:$0xff] %v8989_v34  ;;  %v8992_v38 = vld [vmem:[#allocation5 + $0x3e8] sm:$0xff] }
 0x50d   :  { %3250 = vmatpush.msra.mxu0 %v8489_v62  ;;  %3283 = vmatpush.msra.mxu1 %v8976_v46  ;;  %11342 = vst [vmem:[#allocation44_spill] sm:$0xff] %v8992_v38  ;;  %v8997_v62 = vld [vmem:[#allocation5 + $0x3c0] sm:$0xff] }
 0x50e   :  { %3290 = vmatpush.msrb.mxu2 %v8492_v41  ;;  %3323 = vmatpush.msrb.mxu3 %v8980_v21  ;;  %11343 = vst [vmem:[#allocation47_spill] sm:$0xff] %v8997_v62  ;;  %v9000_v41 = vld [vmem:[#allocation5 + $0x3c8] sm:$0xff] }
 0x50f   :  { %3284 = vmatmul.f32.vlgmr.msra.gmra.mxu1 %v8951_v57  ;;  %3324 = vmatmul.f32.vlgmr.msrb.gmra.mxu3 %v8951_v57  ;;  %11344 = vst [vmem:[#allocation48_spill] sm:$0xff] %v9000_v41 }
 0x510   :  { %3251 = vmatpush.msra.mxu0 %v8499_v13  ;;  %3291 = vmatpush.msrb.mxu2 %v8502_v61  ;;  %v9005_v13 = vld [vmem:[#allocation5 + $0x3a0] sm:$0xff]  ;;  %v9008_v61 = vld [vmem:[#allocation5 + $0x3a8] sm:$0xff]  ;;  %11368 = vst [vmem:[#allocation42_spill] sm:$0xff] %v9082_v2 }
 0x511   :  { %3117 = vmatmul.f32.vlgmr.msrb.gmra.mxu0 %v3017_v40  ;;  %3157 = vmatmul.f32.vlgmr.msra.gmra.mxu2 %v3017_v40  ;;  %11345 = vst [vmem:[#allocation51_spill] sm:$0xff] %v9005_v13  ;;  %v9085_v40 = vld [vmem:[#allocation5 + $0x1e0] sm:$0xff] }
 0x512   :  { %3252 = vmatpush.msra.mxu0 %v8505_v63  ;;  %3292 = vmatpush.msrb.mxu2 %v8508_v47  ;;  %11346 = vst [vmem:[#allocation52_spill] sm:$0xff] %v9008_v61  ;;  %v9013_v63 = vld [vmem:[#allocation5 + $0x380] sm:$0xff]  ;;  %v9016_v47 = vld [vmem:[#allocation5 + $0x388] sm:$0xff] }
 0x513   :  { %3519 = vmatpush.msrb.mxu1 %v8989_v34  ;;  %3559 = vmatpush.msra.mxu3 %v8992_v38  ;;  %11347 = vst [vmem:[#allocation55_spill] sm:$0xff] %v9013_v63 }
 0x514   :  { %3253 = vmatpush.msra.mxu0 %v8513_v0  ;;  %3293 = vmatpush.msrb.mxu2 %v8516_v10  ;;  %11348 = vst [vmem:[#allocation56_spill] sm:$0xff] %v9016_v47  ;;  %v9021_v0 = vld [vmem:[#allocation5 + $0x360] sm:$0xff]  ;;  %v9024_v10 = vld [vmem:[#allocation5 + $0x368] sm:$0xff] }
 0x515   :  { %3520 = vmatpush.msrb.mxu1 %v8997_v62  ;;  %3560 = vmatpush.msra.mxu3 %v9000_v41  ;;  %11349 = vst [vmem:[#allocation59_spill] sm:$0xff] %v9021_v0 }
 0x516   :  { %3254 = vmatpush.msra.mxu0 %v8521_v58  ;;  %3294 = vmatpush.msrb.mxu2 %v8524_v51  ;;  %11350 = vst [vmem:[#allocation60_spill] sm:$0xff] %v9024_v10  ;;  %v9029_v58 = vld [vmem:[#allocation5 + $0x340] sm:$0xff]  ;;  %v9032_v51 = vld [vmem:[#allocation5 + $0x348] sm:$0xff] }
 0x517   :  { %3521 = vmatpush.msrb.mxu1 %v9005_v13  ;;  %3561 = vmatpush.msra.mxu3 %v9008_v61  ;;  %11351 = vst [vmem:[#allocation67_spill] sm:$0xff] %v9029_v58 }
 0x518   :  { %3255 = vmatpush.msra.mxu0 %v8529_v56  ;;  %3295 = vmatpush.msrb.mxu2 %v8532_v8  ;;  %11352 = vst [vmem:[#allocation29_spill] sm:$0xff] %v9032_v51  ;;  %v9037_v56 = vld [vmem:[#allocation5 + $0x320] sm:$0xff]  ;;  %v9040_v8 = vld [vmem:[#allocation5 + $0x328] sm:$0xff] }
 0x519   :  { %3522 = vmatpush.msrb.mxu1 %v9013_v63  ;;  %3562 = vmatpush.msra.mxu3 %v9016_v47  ;;  %11353 = vst [vmem:[#allocation63_spill] sm:$0xff] %v9037_v56 }
 0x51a   :  { %3256 = vmatpush.msra.mxu0 %v8537_v5  ;;  %3296 = vmatpush.msrb.mxu2 %v8540_v31  ;;  %11354 = vst [vmem:[#allocation64_spill] sm:$0xff] %v9040_v8  ;;  %v9045_v5 = vld [vmem:[#allocation5 + $0x300] sm:$0xff]  ;;  %v9048_v31 = vld [vmem:[#allocation5 + $0x308] sm:$0xff] }
 0x51b   :  { %3523 = vmatpush.msrb.mxu1 %v9021_v0  ;;  %3563 = vmatpush.msra.mxu3 %v9024_v10  ;;  %11355 = vst [vmem:[#allocation33_spill] sm:$0xff] %v9045_v5 }
 0x51c   :  { %3257 = vmatpush.msra.mxu0 %v8545_v32  ;;  %3297 = vmatpush.msrb.mxu2 %v8548_v55  ;;  %11356 = vst [vmem:[#allocation71_spill] sm:$0xff] %v9048_v31  ;;  %v9053_v32 = vld [vmem:[#allocation5 + $0x2e0] sm:$0xff]  ;;  %v9056_v55 = vld [vmem:[#allocation5 + $0x2e8] sm:$0xff] }
 0x51d   :  { %3524 = vmatpush.msrb.mxu1 %v9029_v58  ;;  %3564 = vmatpush.msra.mxu3 %v9032_v51  ;;  %11357 = vst [vmem:[#allocation30_spill] sm:$0xff] %v9053_v32  ;;  %v11476_v58 = vld [vmem:[#allocation103_spill] sm:$0xff] }
 0x51e   :  { %3258 = vmatpush.msra.mxu0 %v8553_v9  ;;  %3298 = vmatpush.msrb.mxu2 %v8556_v18  ;;  %11358 = vst [vmem:[#allocation68_spill] sm:$0xff] %v9056_v55  ;;  %v9061_v9 = vld [vmem:[#allocation5 + $0x2c0] sm:$0xff]  ;;  %v9064_v18 = vld [vmem:[#allocation5 + $0x2c8] sm:$0xff] }
 0x51f   :  { %3525 = vmatpush.msrb.mxu1 %v9037_v56  ;;  %3565 = vmatpush.msra.mxu3 %v9040_v8  ;;  %11359 = vst [vmem:[#allocation37_spill] sm:$0xff] %v9061_v9  ;;  %v11475_v56 = vld [vmem:[#allocation102_spill] sm:$0xff] }
 0x520   :  { %3259 = vmatpush.msra.mxu0 %v8561_v7  ;;  %3299 = vmatpush.msrb.mxu2 %v8564_v33  ;;  %11360 = vst [vmem:[#allocation75_spill] sm:$0xff] %v9064_v18  ;;  %v11361_v7 = vld [vmem:[#allocation24_spill] sm:$0xff]  ;;  %v11362_v33 = vld [vmem:[#allocation25_spill] sm:$0xff] }
 0x521   :  { %3526 = vmatpush.msrb.mxu1 %v9045_v5  ;;  %3566 = vmatpush.msra.mxu3 %v9048_v31  ;;  %11369 = vst [vmem:[#allocation45_spill] sm:$0xff] %v9085_v40 }
 0x522   :  { %3260 = vmatpush.msra.mxu0 %v8569_v22  ;;  %3300 = vmatpush.msrb.mxu2 %v8572_v43  ;;  %v9069_v22 = vld [vmem:[#allocation5 + $0x2a0] sm:$0xff]  ;;  %v9072_v43 = vld [vmem:[#allocation5 + $0x2a8] sm:$0xff] }
 0x523   :  { %3527 = vmatpush.msrb.mxu1 %v9053_v32  ;;  %3567 = vmatpush.msra.mxu3 %v9056_v55  ;;  %11363 = vst [vmem:[#allocation34_spill] sm:$0xff] %v9069_v22 }
 0x524   :  { %3261 = vmatpush.msra.mxu0 %v8577_v23  ;;  %3301 = vmatpush.msrb.mxu2 %v8580_v59  ;;  %11364 = vst [vmem:[#allocation72_spill] sm:$0xff] %v9072_v43  ;;  %v11365_v23 = vld [vmem:[#allocation26_spill] sm:$0xff]  ;;  %v11366_v59 = vld [vmem:[#allocation27_spill] sm:$0xff] }
 0x525   :  { %3528 = vmatpush.msrb.mxu1 %v9061_v9  ;;  %3568 = vmatpush.msra.mxu3 %v9064_v18 }
 0x526   :  { %3262 = vmatpush.msra.mxu0 %v11361_v7  ;;  %3302 = vmatpush.msrb.mxu2 %v11362_v33  ;;  %v9088_v7 = vld [vmem:[#allocation5 + $0x1e8] sm:$0xff]  ;;  %v9091_v33 = vld [vmem:[#allocation5 + $0x260] sm:$0xff] }
 0x527   :  { %3529 = vmatpush.msrb.mxu1 %v9069_v22  ;;  %3569 = vmatpush.msra.mxu3 %v9072_v43  ;;  %11370 = vst [vmem:[#allocation46_spill] sm:$0xff] %v9088_v7  ;;  %v11473_v43 = vld [vmem:[#allocation16_spill] sm:$0xff] }
 0x528   :  { %3263 = vmatpush.msra.mxu0 %v11365_v23  ;;  %3303 = vmatpush.msrb.mxu2 %v11366_v59  ;;  %11371 = vst [vmem:[#allocation38_spill] sm:$0xff] %v9091_v33  ;;  %v9097_v23 = vld [vmem:[#allocation5 + $0x1c0] sm:$0xff]  ;;  %v9100_v59 = vld [vmem:[#allocation5 + $0x1c8] sm:$0xff] }
 0x529   :  { %3264 = vmatmul.f32.vlgmr.msra.gmra.mxu0 %v8951_v57  ;;  %3304 = vmatmul.f32.vlgmr.msrb.gmra.mxu2 %v8951_v57  ;;  %v9094_v57 = vld [vmem:[#allocation5 + $0x268] sm:$0xff]  ;;  %11373 = vst [vmem:[#allocation86_spill] sm:$0xff] %v9097_v23 }
 0x52a   :  { %3530 = vmatpush.msrb.mxu1 %v9079_v12  ;;  %3570 = vmatpush.msra.mxu3 %v9082_v2  ;;  %11372 = vst [vmem:[#allocation76_spill] sm:$0xff] %v9094_v57 }
 0x52b   :  { %3499 = vmatpush.msrb.mxu0 %v9085_v40  ;;  %3539 = vmatpush.msra.mxu2 %v9088_v7  ;;  %11374 = vst [vmem:[#allocation50_spill] sm:$0xff] %v9100_v59  ;;  %v9103_v40 = vld [vmem:[#allocation5 + $0x240] sm:$0xff]  ;;  %v9106_v7 = vld [vmem:[#allocation5 + $0x248] sm:$0xff] }
 0x52c   :  { %3531 = vmatpush.msrb.mxu1 %v9091_v33  ;;  %3571 = vmatpush.msra.mxu3 %v9094_v57  ;;  %11375 = vst [vmem:[#allocation83_spill] sm:$0xff] %v9103_v40  ;;  %v9109_v33 = vld [vmem:[#allocation5 + $0x1a0] sm:$0xff]  ;;  %v9112_v57 = vld [vmem:[#allocation5 + $0x1a8] sm:$0xff] }
 0x52d   :  { %3500 = vmatpush.msrb.mxu0 %v9097_v23  ;;  %3540 = vmatpush.msra.mxu2 %v9100_v59  ;;  %11376 = vst [vmem:[#allocation49_spill] sm:$0xff] %v9106_v7  ;;  %v9115_v23 = vld [vmem:[#allocation5 + $0x220] sm:$0xff]  ;;  %v9118_v59 = vld [vmem:[#allocation5 + $0x228] sm:$0xff] }
 0x52e   :  { %3532 = vmatpush.msrb.mxu1 %v9103_v40  ;;  %3572 = vmatpush.msra.mxu3 %v9106_v7  ;;  %11377 = vst [vmem:[#allocation90_spill] sm:$0xff] %v9109_v33  ;;  %v9121_v40 = vld [vmem:[#allocation5 + $0x180] sm:$0xff]  ;;  %v9124_v7 = vld [vmem:[#allocation5 + $0x188] sm:$0xff] }
 0x52f   :  { %3501 = vmatpush.msrb.mxu0 %v9109_v33  ;;  %11378 = vst [vmem:[#allocation54_spill] sm:$0xff] %v9112_v57  ;;  %3541 = vmatpush.msra.mxu2 %v9112_v57  ;;  %v9127_v33 = vld [vmem:[#allocation5 + $0x200] sm:$0xff]  ;;  %v9130_v57 = vld [vmem:[#allocation5 + $0x208] sm:$0xff] }
 0x530   :  { %11379 = vst [vmem:[#allocation87_spill] sm:$0xff] %v9115_v23  ;;  %3533 = vmatpush.msrb.mxu1 %v9115_v23  ;;  %3573 = vmatpush.msra.mxu3 %v9118_v59  ;;  %v9133_v23 = vld [vmem:[#allocation5 + $0x3f0] sm:$0xff] }
 0x531   :  { %11380 = vst [vmem:[#allocation53_spill] sm:$0xff] %v9118_v59  ;;  %3502 = vmatpush.msrb.mxu0 %v9121_v40  ;;  %3542 = vmatpush.msra.mxu2 %v9124_v7  ;;  %v9136_v59 = vld [vmem:[#allocation5 + $0x3f8] sm:$0xff] }
 0x532   :  { %11381 = vst [vmem:[#allocation58_spill] sm:$0xff] %v9121_v40  ;;  %3534 = vmatpush.msrb.mxu1 %v9127_v33  ;;  %3574 = vmatpush.msra.mxu3 %v9130_v57  ;;  %v9139_v40 = vld [vmem:[#allocation5 + $0x160] sm:$0xff] }
 0x533   :  { %11382 = vst [vmem:[#allocation61_spill] sm:$0xff] %v9124_v7  ;;  %3503 = vmatpush.msrb.mxu0 %v9139_v40  ;;  %v9142_v7 = vld [vmem:[#allocation5 + $0x168] sm:$0xff] }
 0x534   :  { %11383 = vst [vmem:[#allocation91_spill] sm:$0xff] %v9127_v33  ;;  %3599 = vmatpush.msra.mxu1 %v9133_v23  ;;  %3639 = vmatpush.msrb.mxu3 %v9136_v59  ;;  %v9145_v33 = vld [vmem:[#allocation5 + $0x3d0] sm:$0xff] }
 0x535   :  { %11384 = vst [vmem:[#allocation57_spill] sm:$0xff] %v9130_v57  ;;  %3543 = vmatpush.msra.mxu2 %v9142_v7  ;;  %v9148_v57 = vld [vmem:[#allocation5 + $0x3d8] sm:$0xff] }
 0x536   :  { %11385 = vst [vmem:[#allocation66_spill] sm:$0xff] %v9133_v23  ;;  %3600 = vmatpush.msra.mxu1 %v9145_v33  ;;  %3640 = vmatpush.msrb.mxu3 %v9148_v57  ;;  %v9151_v23 = vld [vmem:[#allocation5 + $0x140] sm:$0xff] }
 0x537   :  { %11386 = vst [vmem:[#allocation69_spill] sm:$0xff] %v9136_v59  ;;  %3504 = vmatpush.msrb.mxu0 %v9151_v23  ;;  %v9154_v59 = vld [vmem:[#allocation5 + $0x148] sm:$0xff] }
 0x538   :  { %11387 = vst [vmem:[#allocation62_spill] sm:$0xff] %v9139_v40  ;;  %3544 = vmatpush.msra.mxu2 %v9154_v59  ;;  %v9157_v40 = vld [vmem:[#allocation5 + $0x3b0] sm:$0xff] }
 0x539   :  { %11388 = vst [vmem:[#allocation65_spill] sm:$0xff] %v9142_v7  ;;  %3601 = vmatpush.msra.mxu1 %v9157_v40  ;;  %v9160_v7 = vld [vmem:[#allocation5 + $0x3b8] sm:$0xff] }
 0x53a   :  { %11389 = vst [vmem:[#allocation74_spill] sm:$0xff] %v9145_v33  ;;  %3641 = vmatpush.msrb.mxu3 %v9160_v7  ;;  %v9163_v33 = vld [vmem:[#allocation5 + $0x120] sm:$0xff] }
 0x53b   :  { %11390 = vst [vmem:[#allocation78_spill] sm:$0xff] %v9148_v57  ;;  %3505 = vmatpush.msrb.mxu0 %v9163_v33  ;;  %v9166_v57 = vld [vmem:[#allocation5 + $0x128] sm:$0xff] }
 0x53c   :  { %11391 = vst [vmem:[#allocation70_spill] sm:$0xff] %v9151_v23  ;;  %3545 = vmatpush.msra.mxu2 %v9166_v57  ;;  %v9169_v23 = vld [vmem:[#allocation5 + $0x390] sm:$0xff] }
 0x53d   :  { %11392 = vst [vmem:[#allocation73_spill] sm:$0xff] %v9154_v59  ;;  %3602 = vmatpush.msra.mxu1 %v9169_v23  ;;  %v9172_v59 = vld [vmem:[#allocation5 + $0x398] sm:$0xff] }
 0x53e   :  { %11393 = vst [vmem:[#allocation82_spill] sm:$0xff] %v9157_v40  ;;  %3642 = vmatpush.msrb.mxu3 %v9172_v59  ;;  %v9175_v40 = vld [vmem:[#allocation5 + $0x100] sm:$0xff] }
 0x53f   :  { %11394 = vst [vmem:[#allocation84_spill] sm:$0xff] %v9160_v7  ;;  %3506 = vmatpush.msrb.mxu0 %v9175_v40  ;;  %v9178_v7 = vld [vmem:[#allocation5 + $0x108] sm:$0xff] }
 0x540   :  { %11395 = vst [vmem:[#allocation79_spill] sm:$0xff] %v9163_v33  ;;  %3546 = vmatpush.msra.mxu2 %v9178_v7  ;;  %v9181_v33 = vld [vmem:[#allocation5 + $0x370] sm:$0xff] }
 0x541   :  { %11396 = vst [vmem:[#allocation81_spill] sm:$0xff] %v9166_v57  ;;  %3603 = vmatpush.msra.mxu1 %v9181_v33  ;;  %v9184_v57 = vld [vmem:[#allocation5 + $0x378] sm:$0xff] }
 0x542   :  { %11397 = vst [vmem:[#allocation89_spill] sm:$0xff] %v9169_v23  ;;  %3643 = vmatpush.msrb.mxu3 %v9184_v57  ;;  %v9187_v23 = vld [vmem:[#allocation5 + $0xe0] sm:$0xff] }
 0x543   :  { %11398 = vst [vmem:[#allocation92_spill] sm:$0xff] %v9172_v59  ;;  %3507 = vmatpush.msrb.mxu0 %v9187_v23  ;;  %v9190_v59 = vld [vmem:[#allocation5 + $0xe8] sm:$0xff] }
 0x544   :  { %11399 = vst [vmem:[#allocation85_spill] sm:$0xff] %v9175_v40  ;;  %3547 = vmatpush.msra.mxu2 %v9190_v59  ;;  %v9193_v40 = vld [vmem:[#allocation5 + $0x350] sm:$0xff] }
 0x545   :  { %11400 = vst [vmem:[#allocation88_spill] sm:$0xff] %v9178_v7  ;;  %3604 = vmatpush.msra.mxu1 %v9193_v40  ;;  %v9196_v7 = vld [vmem:[#allocation5 + $0x358] sm:$0xff] }
 0x546   :  { %11401 = vst [vmem:[#allocation95_spill] sm:$0xff] %v9181_v33  ;;  %3644 = vmatpush.msrb.mxu3 %v9196_v7  ;;  %v9199_v33 = vld [vmem:[#allocation5 + $0xc0] sm:$0xff] }
 0x547   :  { %11402 = vst [vmem:[#allocation96_spill] sm:$0xff] %v9184_v57  ;;  %3508 = vmatpush.msrb.mxu0 %v9199_v33  ;;  %v9202_v57 = vld [vmem:[#allocation5 + $0xc8] sm:$0xff] }
 0x548   :  { %11403 = vst [vmem:[#allocation93_spill] sm:$0xff] %v9187_v23  ;;  %3548 = vmatpush.msra.mxu2 %v9202_v57  ;;  %v9205_v23 = vld [vmem:[#allocation5 + $0x330] sm:$0xff] }
 0x549   :  { %11404 = vst [vmem:[#allocation94_spill] sm:$0xff] %v9190_v59  ;;  %3605 = vmatpush.msra.mxu1 %v9205_v23  ;;  %v9208_v59 = vld [vmem:[#allocation5 + $0x338] sm:$0xff] }
 0x54a   :  { %11405 = vst [vmem:[#allocation99_spill] sm:$0xff] %v9193_v40  ;;  %3645 = vmatpush.msrb.mxu3 %v9208_v59  ;;  %v9211_v40 = vld [vmem:[#allocation5 + $0xa0] sm:$0xff] }
 0x54b   :  { %11406 = vst [vmem:[#allocation104_spill] sm:$0xff] %v9196_v7  ;;  %3509 = vmatpush.msrb.mxu0 %v9211_v40  ;;  %v9214_v7 = vld [vmem:[#allocation5 + $0xa8] sm:$0xff] }
 0x54c   :  { %11407 = vst [vmem:[#allocation97_spill] sm:$0xff] %v9199_v33  ;;  %3549 = vmatpush.msra.mxu2 %v9214_v7  ;;  %v9217_v33 = vld [vmem:[#allocation5 + $0x310] sm:$0xff] }
 0x54d   :  { %11408 = vst [vmem:[#allocation98_spill] sm:$0xff] %v9202_v57  ;;  %3606 = vmatpush.msra.mxu1 %v9217_v33  ;;  %v9220_v57 = vld [vmem:[#allocation5 + $0x318] sm:$0xff] }
 0x54e   :  { %11409 = vst [vmem:[#allocation109_spill] sm:$0xff] %v9205_v23  ;;  %3646 = vmatpush.msrb.mxu3 %v9220_v57  ;;  %v9223_v23 = vld [vmem:[#allocation5 + $0x80] sm:$0xff] }
 0x54f   :  { %11410 = vst [vmem:[#allocation110_spill] sm:$0xff] %v9208_v59  ;;  %3510 = vmatpush.msrb.mxu0 %v9223_v23  ;;  %v9226_v59 = vld [vmem:[#allocation5 + $0x88] sm:$0xff] }
 0x550   :  { %11411 = vst [vmem:[#allocation105_spill] sm:$0xff] %v9211_v40  ;;  %3550 = vmatpush.msra.mxu2 %v9226_v59  ;;  %v9229_v40 = vld [vmem:[#allocation5 + $0x2f0] sm:$0xff] }
 0x551   :  { %11412 = vst [vmem:[#allocation107_spill] sm:$0xff] %v9214_v7  ;;  %3607 = vmatpush.msra.mxu1 %v9229_v40  ;;  %v9232_v7 = vld [vmem:[#allocation5 + $0x2f8] sm:$0xff] }
 0x552   :  { %11413 = vst [vmem:[#allocation11_spill] sm:$0xff] %v9217_v33  ;;  %3647 = vmatpush.msrb.mxu3 %v9232_v7  ;;  %v9235_v33 = vld [vmem:[#allocation5 + $0x60] sm:$0xff] }
 0x553   :  { %11414 = vst [vmem:[#allocation12_spill] sm:$0xff] %v9220_v57  ;;  %3511 = vmatpush.msrb.mxu0 %v9235_v33  ;;  %v9238_v57 = vld [vmem:[#allocation5 + $0x68] sm:$0xff] }
 0x554   :  { %11415 = vst [vmem:[#allocation111_spill] sm:$0xff] %v9223_v23  ;;  %3551 = vmatpush.msra.mxu2 %v9238_v57  ;;  %v9241_v23 = vld [vmem:[#allocation5 + $0x2d0] sm:$0xff] }
 0x555   :  { %11416 = vst [vmem:[#allocation112_spill] sm:$0xff] %v9226_v59  ;;  %3608 = vmatpush.msra.mxu1 %v9241_v23  ;;  %v9244_v59 = vld [vmem:[#allocation5 + $0x2d8] sm:$0xff] }
 0x556   :  { %11417 = vst [vmem:[#allocation15_spill] sm:$0xff] %v9229_v40  ;;  %3648 = vmatpush.msrb.mxu3 %v9244_v59  ;;  %v9247_v40 = vld [vmem:[#allocation5 + $0x40] sm:$0xff] }
 0x557   :  { %11418 = vst [vmem:[#allocation113_spill] sm:$0xff] %v9232_v7  ;;  %3512 = vmatpush.msrb.mxu0 %v9247_v40  ;;  %v9250_v7 = vld [vmem:[#allocation5 + $0x48] sm:$0xff] }
 0x558   :  { %11419 = vst [vmem:[#allocation13_spill] sm:$0xff] %v9235_v33  ;;  %3552 = vmatpush.msra.mxu2 %v9250_v7  ;;  %v9253_v33 = vld [vmem:[#allocation5 + $0x2b0] sm:$0xff] }
 0x559   :  { %11420 = vst [vmem:[#allocation14_spill] sm:$0xff] %v9238_v57  ;;  %3609 = vmatpush.msra.mxu1 %v9253_v33  ;;  %v9256_v57 = vld [vmem:[#allocation5 + $0x2b8] sm:$0xff] }
 0x55a   :  { %11421 = vst [vmem:[#allocation114_spill] sm:$0xff] %v9241_v23  ;;  %3649 = vmatpush.msrb.mxu3 %v9256_v57  ;;  %v9259_v23 = vld [vmem:[#allocation5 + $0x20] sm:$0xff] }
 0x55b   :  { %11422 = vst [vmem:[#allocation116_spill] sm:$0xff] %v9244_v59  ;;  %3513 = vmatpush.msrb.mxu0 %v9259_v23  ;;  %v9262_v59 = vld [vmem:[#allocation5 + $0x28] sm:$0xff] }
 0x55c   :  { %11423 = vst [vmem:[#allocation115_spill] sm:$0xff] %v9247_v40  ;;  %3553 = vmatpush.msra.mxu2 %v9262_v59  ;;  %v9265_v40 = vld [vmem:[#allocation5 + $0x290] sm:$0xff] }
 0x55d   :  { %11424 = vst [vmem:[#allocation117_spill] sm:$0xff] %v9250_v7  ;;  %3610 = vmatpush.msra.mxu1 %v9265_v40  ;;  %v9268_v7 = vld [vmem:[#allocation5 + $0x298] sm:$0xff] }
 0x55e   :  { %11425 = vst [vmem:[#allocation118_spill] sm:$0xff] %v9253_v33  ;;  %3650 = vmatpush.msrb.mxu3 %v9268_v7  ;;  %v9271_v33 = vld [vmem:[#allocation5] sm:$0xff] }
 0x55f   :  { %11426 = vst [vmem:[#allocation120_spill] sm:$0xff] %v9256_v57  ;;  %3514 = vmatpush.msrb.mxu0 %v9271_v33  ;;  %v9274_v57 = vld [vmem:[#allocation5 + $0x8] sm:$0xff] }
 0x560   :  { %11427 = vst [vmem:[#allocation119_spill] sm:$0xff] %v9259_v23  ;;  %3554 = vmatpush.msra.mxu2 %v9274_v57  ;;  %v9277_v23 = vld [vmem:[#allocation5 + $0x270] sm:$0xff] }
 0x561   :  { %11428 = vst [vmem:[#allocation121_spill] sm:$0xff] %v9262_v59  ;;  %3611 = vmatpush.msra.mxu1 %v9277_v23  ;;  %v9280_v59 = vld [vmem:[#allocation5 + $0x278] sm:$0xff] }
 0x562   :  { %11429 = vst [vmem:[#allocation122_spill] sm:$0xff] %v9265_v40  ;;  %3651 = vmatpush.msrb.mxu3 %v9280_v59  ;;  %v9283_v40 = vld [vmem:[#allocation5 + $0x1f0] sm:$0xff] }
 0x563   :  { %11430 = vst [vmem:[#allocation124_spill] sm:$0xff] %v9268_v7  ;;  %3579 = vmatpush.msra.mxu0 %v9283_v40  ;;  %v9286_v7 = vld [vmem:[#allocation5 + $0x1f8] sm:$0xff] }
 0x564   :  { %11431 = vst [vmem:[#allocation123_spill] sm:$0xff] %v9271_v33  ;;  %3619 = vmatpush.msrb.mxu2 %v9286_v7  ;;  %v9289_v33 = vld [vmem:[#allocation5 + $0x250] sm:$0xff] }
 0x565   :  { %11432 = vst [vmem:[#allocation125_spill] sm:$0xff] %v9274_v57  ;;  %3612 = vmatpush.msra.mxu1 %v9289_v33  ;;  %v9292_v57 = vld [vmem:[#allocation5 + $0x258] sm:$0xff] }
 0x566   :  { %11433 = vst [vmem:[#allocation126_spill] sm:$0xff] %v9277_v23  ;;  %3652 = vmatpush.msrb.mxu3 %v9292_v57  ;;  %v9295_v23 = vld [vmem:[#allocation5 + $0x1d0] sm:$0xff] }
 0x567   :  { %11434 = vst [vmem:[#allocation127_spill] sm:$0xff] %v9280_v59  ;;  %3580 = vmatpush.msra.mxu0 %v9295_v23  ;;  %v9298_v59 = vld [vmem:[#allocation5 + $0x1d8] sm:$0xff] }
 0x568   :  { %11435 = vst [vmem:[#allocation128_spill] sm:$0xff] %v9283_v40  ;;  %3620 = vmatpush.msrb.mxu2 %v9298_v59  ;;  %v9301_v40 = vld [vmem:[#allocation5 + $0x230] sm:$0xff] }
 0x569   :  { %11436 = vst [vmem:[#allocation129_spill] sm:$0xff] %v9286_v7  ;;  %3613 = vmatpush.msra.mxu1 %v9301_v40  ;;  %v9304_v7 = vld [vmem:[#allocation5 + $0x238] sm:$0xff] }
 0x56a   :  { %11437 = vst [vmem:[#allocation130_spill] sm:$0xff] %v9289_v33  ;;  %3653 = vmatpush.msrb.mxu3 %v9304_v7  ;;  %v9307_v33 = vld [vmem:[#allocation5 + $0x1b0] sm:$0xff] }
 0x56b   :  { %11438 = vst [vmem:[#allocation131_spill] sm:$0xff] %v9292_v57  ;;  %3581 = vmatpush.msra.mxu0 %v9307_v33  ;;  %v9310_v57 = vld [vmem:[#allocation5 + $0x1b8] sm:$0xff] }
 0x56c   :  { %11439 = vst [vmem:[#allocation132_spill] sm:$0xff] %v9295_v23  ;;  %3621 = vmatpush.msrb.mxu2 %v9310_v57  ;;  %v9313_v23 = vld [vmem:[#allocation5 + $0x210] sm:$0xff] }
 0x56d   :  { %11440 = vst [vmem:[#allocation133_spill] sm:$0xff] %v9298_v59  ;;  %3614 = vmatpush.msra.mxu1 %v9313_v23  ;;  %v9316_v59 = vld [vmem:[#allocation5 + $0x218] sm:$0xff] }
 0x56e   :  { %11441 = vst [vmem:[#allocation134_spill] sm:$0xff] %v9301_v40  ;;  %3654 = vmatpush.msrb.mxu3 %v9316_v59  ;;  %v9319_v40 = vld [vmem:[#allocation5 + $0x190] sm:$0xff]  ;;  %v3098_v2 = vpop.f32.mrf.mxu3 }
 0x56f   :  { %11442 = vst [vmem:[#allocation135_spill] sm:$0xff] %v9304_v7  ;;  %3582 = vmatpush.msra.mxu0 %v9319_v40  ;;  %v9322_v7 = vld [vmem:[#allocation5 + $0x198] sm:$0xff] }
 0x570   :  { %11443 = vst [vmem:[#allocation136_spill] sm:$0xff] %v9307_v33  ;;  %3622 = vmatpush.msrb.mxu2 %v9322_v7  ;;  %v9325_v33 = vld [vmem:[#allocation5 + $0x170] sm:$0xff] }
 0x571   :  { %11444 = vst [vmem:[#allocation137_spill] sm:$0xff] %v9310_v57  ;;  %3583 = vmatpush.msra.mxu0 %v9325_v33  ;;  %v9328_v57 = vld [vmem:[#allocation5 + $0x178] sm:$0xff] }
 0x572   :  { %11445 = vst [vmem:[#allocation138_spill] sm:$0xff] %v9313_v23  ;;  %3623 = vmatpush.msrb.mxu2 %v9328_v57  ;;  %v9331_v23 = vld [vmem:[#allocation5 + $0x150] sm:$0xff] }
 0x573   :  { %11446 = vst [vmem:[#allocation139_spill] sm:$0xff] %v9316_v59  ;;  %3584 = vmatpush.msra.mxu0 %v9331_v23  ;;  %v9334_v59 = vld [vmem:[#allocation5 + $0x158] sm:$0xff] }
 0x574   :  { %11447 = vst [vmem:[#allocation140_spill] sm:$0xff] %v9319_v40  ;;  %3624 = vmatpush.msrb.mxu2 %v9334_v59  ;;  %v9337_v40 = vld [vmem:[#allocation5 + $0x130] sm:$0xff] }
 0x575   :  { %11448 = vst [vmem:[#allocation141_spill] sm:$0xff] %v9322_v7  ;;  %3585 = vmatpush.msra.mxu0 %v9337_v40  ;;  %v9340_v7 = vld [vmem:[#allocation5 + $0x138] sm:$0xff] }
 0x576   :  { %11449 = vst [vmem:[#allocation142_spill] sm:$0xff] %v9325_v33  ;;  %3625 = vmatpush.msrb.mxu2 %v9340_v7  ;;  %v9343_v33 = vld [vmem:[#allocation5 + $0x110] sm:$0xff] }
 0x577   :  { %11450 = vst [vmem:[#allocation143_spill] sm:$0xff] %v9328_v57  ;;  %3586 = vmatpush.msra.mxu0 %v9343_v33  ;;  %v9346_v57 = vld [vmem:[#allocation5 + $0x118] sm:$0xff]  ;;  %v3178_v31 = vpop.f32.mrf.mxu3 }
 0x578   :  { %11451 = vst [vmem:[#allocation144_spill] sm:$0xff] %v9331_v23  ;;  %3626 = vmatpush.msrb.mxu2 %v9346_v57  ;;  %v9349_v23 = vld [vmem:[#allocation5 + $0xf0] sm:$0xff] }
 0x579   :  { %11452 = vst [vmem:[#allocation145_spill] sm:$0xff] %v9334_v59  ;;  %3587 = vmatpush.msra.mxu0 %v9349_v23  ;;  %v9352_v59 = vld [vmem:[#allocation5 + $0xf8] sm:$0xff] }
 0x57a   :  { %11453 = vst [vmem:[#allocation146_spill] sm:$0xff] %v9337_v40  ;;  %3627 = vmatpush.msrb.mxu2 %v9352_v59  ;;  %v9355_v40 = vld [vmem:[#allocation5 + $0xd0] sm:$0xff] }
 0x57b   :  { %11454 = vst [vmem:[#allocation147_spill] sm:$0xff] %v9340_v7  ;;  %3588 = vmatpush.msra.mxu0 %v9355_v40  ;;  %v9358_v7 = vld [vmem:[#allocation5 + $0xd8] sm:$0xff] }
 0x57c   :  { %11455 = vst [vmem:[#allocation148_spill] sm:$0xff] %v9343_v33  ;;  %3628 = vmatpush.msrb.mxu2 %v9358_v7  ;;  %v9361_v33 = vld [vmem:[#allocation5 + $0xb0] sm:$0xff] }
 0x57d   :  { %11456 = vst [vmem:[#allocation149_spill] sm:$0xff] %v9346_v57  ;;  %3589 = vmatpush.msra.mxu0 %v9361_v33  ;;  %v9364_v57 = vld [vmem:[#allocation5 + $0xb8] sm:$0xff] }
 0x57e   :  { %11457 = vst [vmem:[#allocation150_spill] sm:$0xff] %v9349_v23  ;;  %3629 = vmatpush.msrb.mxu2 %v9364_v57  ;;  %v9367_v23 = vld [vmem:[#allocation5 + $0x90] sm:$0xff] }
 0x57f   :  { %11458 = vst [vmem:[#allocation151_spill] sm:$0xff] %v9352_v59  ;;  %3590 = vmatpush.msra.mxu0 %v9367_v23  ;;  %v9370_v59 = vld [vmem:[#allocation5 + $0x98] sm:$0xff] }
 0x580   :  { %11459 = vst [vmem:[#allocation20_spill] sm:$0xff] %v9355_v40  ;;  %3630 = vmatpush.msrb.mxu2 %v9370_v59  ;;  %v9373_v40 = vld [vmem:[#allocation5 + $0x70] sm:$0xff] }
 0x581   :  { %11460 = vst [vmem:[#allocation21_spill] sm:$0xff] %v9358_v7  ;;  %3591 = vmatpush.msra.mxu0 %v9373_v40  ;;  %v9376_v7 = vld [vmem:[#allocation5 + $0x78] sm:$0xff] }
 0x582   :  { %11461 = vst [vmem:[#allocation22_spill] sm:$0xff] %v9361_v33  ;;  %3631 = vmatpush.msrb.mxu2 %v9376_v7  ;;  %v9379_v33 = vld [vmem:[#allocation5 + $0x50] sm:$0xff] }
 0x583   :  { %11462 = vst [vmem:[#allocation152_spill] sm:$0xff] %v9364_v57  ;;  %3592 = vmatpush.msra.mxu0 %v9379_v33  ;;  %v9382_v57 = vld [vmem:[#allocation5 + $0x58] sm:$0xff] }
 0x584   :  { %11463 = vst [vmem:[#allocation153_spill] sm:$0xff] %v9367_v23  ;;  %3632 = vmatpush.msrb.mxu2 %v9382_v57  ;;  %v9385_v23 = vld [vmem:[#allocation5 + $0x30] sm:$0xff] }
 0x585   :  { %11464 = vst [vmem:[#allocation154_spill] sm:$0xff] %v9370_v59  ;;  %3593 = vmatpush.msra.mxu0 %v9385_v23  ;;  %v9388_v59 = vld [vmem:[#allocation5 + $0x38] sm:$0xff] }
 0x586   :  { %11465 = vst [vmem:[#allocation155_spill] sm:$0xff] %v9373_v40  ;;  %3633 = vmatpush.msrb.mxu2 %v9388_v59  ;;  %v9391_v40 = vld [vmem:[#allocation5 + $0x10] sm:$0xff] }
 0x587   :  { %11466 = vst [vmem:[#allocation156_spill] sm:$0xff] %v9376_v7  ;;  %3594 = vmatpush.msra.mxu0 %v9391_v40  ;;  %v9394_v7 = vld [vmem:[#allocation5 + $0x18] sm:$0xff] }
 0x588   :  { %11467 = vst [vmem:[#allocation157_spill] sm:$0xff] %v9379_v33  ;;  %3634 = vmatpush.msrb.mxu2 %v9394_v7  ;;  %v3058_v33 = vpop.f32.mrf.mxu1 }
 0x589   :  { %11468 = vst [vmem:[#allocation23_spill] sm:$0xff] %v9382_v57  ;;  %v3038_v57 = vpop.f32.mrf.mxu0 }
 0x58a   :  { %11469 = vst [vmem:[#allocation24_spill] sm:$0xff] %v9385_v23  ;;  %v3039_v22 = vadd.f32 %v3038_v57, %v11473_v43 }
 0x58b   :  { %11470 = vst [vmem:[#allocation25_spill] sm:$0xff] %v9388_v59  ;;  %v3078_v9 = vpop.f32.mrf.mxu2  ;;  %v11474_v59 = vld [vmem:[#allocation17_spill] sm:$0xff] }
 0x58c   :  { %11471 = vst [vmem:[#allocation26_spill] sm:$0xff] %v9391_v40  ;;  %v3059_v18 = vadd.f32 %v3058_v33, %v3039_v22  ;;  %v3079_v32 = vadd.f32 %v3078_v9, %v11474_v59 }
 0x58d   :  { %11472 = vst [vmem:[#allocation27_spill] sm:$0xff] %v9394_v7 }
 0x58e   :  { %v4325_v23 = vmul.f32 -1.442695, %v3059_v18  ;;  %v3099_v8 = vadd.f32 %v3098_v2, %v3079_v32  ;;  %v11478_v2 = vld [vmem:[#allocation19_spill] sm:$0xff] }
 0x590   :  { %v3138_v12 = vpop.f32.mrf.mxu1  ;;  %4626 = vpow2.f32 %v4325_v23  ;;  %v4326_v7 = vmul.f32 -1.442695, %v3099_v8  ;;  %v11477_v23 = vld [vmem:[#allocation18_spill] sm:$0xff] }
 0x591   :  { %v3118_v59 = vpop.f32.mrf.mxu0 }
 0x592   :  { %4628 = vpow2.f32 %v4326_v7  ;;  %v3325_v33 = vpop.f32.mrf.mxu3 }
 0x594   :  { %v3158_v22 = vpop.f32.mrf.mxu2 }
 0x595   :  { %v3159_v43 = vadd.f32 %v3158_v22, %v11477_v23 }
 0x596   :  { %v4627_v0 = vpop.eup %4626 }
 0x597   :  { %v3184_v47 = vadd.f32 1.0, %v4627_v0  ;;  %v3179_v32 = vadd.f32 %v3178_v31, %v3159_v43  ;;  %v3339_v0 = vrot.slane %v3325_v33, 3 }
 0x598   :  { %v3285_v55 = vpop.f32.mrf.mxu1  ;;  %v4629_v9 = vpop.eup %4628 }
 0x599   :  { %v3333_v5 = vrot.slane %v3285_v55, 2  ;;  %v3337_v40 = vrot.slane %v3285_v55, 3  ;;  %4630 = vrcp.f32 %v3184_v47  ;;  %v3335_v55 = vrot.slane %v3325_v33, 2 }
 0x59a   :  { %vm3190_vm1 = vweird.f32 %v3184_v47 }
 0x59b   :  { %v3349_v51 = vadd.f32 %v3333_v5, %v11475_v56  ;;  %v3353_v10 = vadd.f32 %v3337_v40, %v11476_v58  ;;  %v3203_v5 = vadd.f32 1.0, %v4629_v9  ;;  %v3119_v40 = vadd.f32 %v3118_v59, %v11478_v2 }
 0x59c   :  { %v4327_v56 = vmul.f32 -1.442695, %v3179_v32  ;;  %v3196_v32 = vand.u32 2147483648, %v3184_v47 }
 0x59d   :  { %v4330_v57 = vmul.f32 -1.442695, %v3349_v51  ;;  %v4331_v18 = vmul.f32 -1.442695, %v3353_v10  ;;  %v11479_v51 = vld [vmem:[#allocation100_spill] sm:$0xff]  ;;  %v3139_v22 = vadd.f32 %v3138_v12, %v3119_v40  ;;  %vm3209_vm5 = vweird.f32 %v3203_v5 }
 0x59e   :  { %v3351_v58 = vadd.f32 %v3335_v55, %v11479_v51  ;;  %v11486_v51 = vld [vmem:[#allocation80_spill] sm:$0xff] }
 0x59f   :  { %4632 = vpow2.f32 %v4330_v57  ;;  %v4631_v8 = vpop.eup %4630  ;;  %v11480_v57 = vld [vmem:[#allocation101_spill] sm:$0xff] }
 0x5a0   :  { %4634 = vpow2.f32 %v4331_v18  ;;  %v3186_v7 = vmul.f32 %v4631_v8, %v3184_v47  ;;  %v3355_v13 = vadd.f32 %v3339_v0, %v11480_v57  ;;  %v4332_v41 = vmul.f32 -1.442695, %v3351_v58 }
 0x5a1   :  { %4636 = vrcp.f32 %v3203_v5  ;;  %v3194_v18 = vand.u32 2147483647, %v3184_v47  ;;  %vm3191_vm0 = vweird.f32 %v4631_v8 }
 0x5a2   :  { %v3187_v63 = vsub.f32 1.0, %v3186_v7  ;;  %4638 = vpow2.f32 %v4327_v56  ;;  %v4333_v7 = vmul.f32 -1.442695, %v3355_v13  ;;  %vm9415_vm4 = vmor %vm3190_vm1, %vm3191_vm0 }
 0x5a3   :  { %4640 = vtanh.f32 %v3139_v22  ;;  %vm9410_vm2 = vcmp.eq.f32.partialorder %v3194_v18, 8.507059e+37 }
 0x5a4   :  { %v3188_v23 = vmul.f32 %v4631_v8, %v3187_v63  ;;  %4642 = vpow2.f32 %v4332_v41  ;;  %v3215_v63 = vand.u32 2147483648, %v3203_v5 }
 0x5a5   :  { %v4633_v10 = vpop.eup %4632 }
 0x5a6   :  { %v4635_v61 = vpop.eup %4634  ;;  %v9405_v43 = vadd.f32 1.0, %v4633_v10  ;;  %v3189_v33 = vadd.f32 %v4631_v8, %v3188_v23  ;;  %v3213_v23 = vand.u32 2147483647, %v3203_v5  ;;  %v3265_v41 = vpop.f32.mrf.mxu0  ;;  %v3197_v10 = vor.u32 1.1754944e-38, %v3196_v32 }
 0x5a7   :  { %v4637_v31 = vpop.eup %4636  ;;  %v9407_v9 = vadd.f32 1.0, %v4635_v61  ;;  %v3332_v47 = vrot.slane %v3265_v41, 2  ;;  %v3336_v0 = vrot.slane %v3265_v41, 3 }
 0x5a8   :  { %v3205_v59 = vmul.f32 %v4637_v31, %v3203_v5  ;;  %4644 = vrcp.f32 %v9405_v43  ;;  %v4639_v56 = vpop.eup %4638  ;;  %vm3210_vm3 = vweird.f32 %v4637_v31  ;;  %v3193_v13 = vsel %vm9415_vm4, %v4631_v8, %v3189_v33 }
 0x5a9   :  { %4646 = vrcp.f32 %v9407_v9  ;;  %v9421_v40 = vadd.f32 1.0, %v4639_v56  ;;  %v4641_v18 = vpop.eup %4640  ;;  %vm3211_vm6 = vmor %vm3209_vm5, %vm3210_vm3  ;;  %v3352_v2 = vadd.f32 %v3336_v0, %v11486_v51  ;;  %v3198_v8 = vsel %vm9410_vm2, %v3197_v10, %v3193_v13 }
 0x5aa   :  { %v3206_v55 = vsub.f32 1.0, %v3205_v59  ;;  %4648 = vpow2.f32 %v4333_v7  ;;  %v3216_v59 = vor.u32 1.1754944e-38, %v3215_v63  ;;  %v4643_v62 = vpop.eup %4642  ;;  %vm3214_vm7 = vcmp.eq.f32.partialorder %v3213_v23, 8.507059e+37  ;;  %v11487_v63 = vld [vmem:[#allocation28_spill] sm:$0xff] }
 0x5ab   :  { %4650 = vrcp.f32 %v9421_v40  ;;  %v4329_v7 = vmul.f32 -1.442695, %v3352_v2  ;;  %v3240_v41 = vmul.f32 %v4641_v18, %v3198_v8  ;;  %v9433_v38 = vadd.f32 1.0, %v4643_v62 }
 0x5ac   :  { %v3207_v61 = vmul.f32 %v4637_v31, %v3206_v55  ;;  %v11485_v55 = vld [vmem:[#allocation77_spill] sm:$0xff]  ;;  %vm3407_vm8 = vweird.f32 %v9405_v43  ;;  %vm3229_vm11 = vweird.f32 %v9421_v40  ;;  %vm3422_vm12 = vweird.f32 %v9407_v9 }
 0x5ad   :  { %v3348_v57 = vadd.f32 %v3332_v47, %v11485_v55  ;;  %v3426_v18 = vand.u32 2147483647, %v9407_v9 }
 0x5ae   :  { %v3208_v22 = vadd.f32 %v4637_v31, %v3207_v61  ;;  %v9428_v56 = vpop.eup %4644 }
 0x5af   :  { %v4328_v32 = vmul.f32 -1.442695, %v3348_v57  ;;  %v9430_v61 = vpop.eup %4646  ;;  %vm3408_vm15 = vweird.f32 %v9428_v56  ;;  %vm9483_vm2 = vcmp.eq.f32.partialorder %v3426_v18, 8.507059e+37 }
 0x5b0   :  { %v3212_v33 = vsel %vm3211_vm6, %v4637_v31, %v3208_v22  ;;  %v4649_v47 = vpop.eup %4648  ;;  %v3403_v31 = vmul.f32 %v9428_v56, %v9405_v43  ;;  %v3418_v2 = vmul.f32 %v9430_v61, %v9407_v9  ;;  %vm3423_vm0 = vweird.f32 %v9430_v61  ;;  %vm9489_vm3 = vmor %vm3407_vm8, %vm3408_vm15 }
 0x5b1   :  { %v3217_v5 = vsel %vm3214_vm7, %v3216_v59, %v3212_v33  ;;  %4652 = vpow2.f32 %v4328_v32  ;;  %v4651_v0 = vpop.eup %4650  ;;  %v9440_v57 = vadd.f32 1.0, %v4649_v47  ;;  %v3305_v33 = vpop.f32.mrf.mxu2  ;;  %v3411_v59 = vand.u32 2147483647, %v9405_v43  ;;  %vm9505_vm4 = vmor %vm3422_vm12, %vm3423_vm0 }
 0x5b2   :  { %v3239_v12 = vmul.f32 %v3217_v5, %v11487_v63  ;;  %4654 = vpow2.f32 %v4329_v7  ;;  %v3225_v23 = vmul.f32 %v4651_v0, %v9421_v40  ;;  %v3404_v10 = vsub.f32 1.0, %v3403_v31 }
 0x5b3   :  { %4656 = vrcp.f32 %v9433_v38  ;;  %v3235_v7 = vand.u32 2147483648, %v9421_v40  ;;  %v3419_v63 = vsub.f32 1.0, %v3418_v2  ;;  %vm3230_vm9 = vweird.f32 %v4651_v0 }
 0x5b4   :  { %v9437_v58 = vadd.f32 %v3240_v41, %v3239_v12  ;;  %v3226_v62 = vsub.f32 1.0, %v3225_v23  ;;  %v3233_v12 = vand.u32 2147483647, %v9421_v40  ;;  %v3405_v47 = vmul.f32 %v9428_v56, %v3404_v10  ;;  %vm3231_vm13 = vmor %vm3229_vm11, %vm3230_vm9  ;;  %v11489_v40 = vld [vmem:[#allocation106_spill] sm:$0xff] }
 0x5b5   :  { %v3413_v31 = vand.u32 2147483648, %v9405_v43  ;;  %v3334_v23 = vrot.slane %v3305_v33, 2  ;;  %v3236_v10 = vor.u32 1.1754944e-38, %v3235_v7  ;;  %v11490_v7 = vld [vmem:[#allocation108_spill] sm:$0xff]  ;;  %vm9479_vm1 = vcmp.eq.f32.partialorder %v3411_v59, 8.507059e+37 }
 0x5b6   :  { %11488 = vst [vmem:[#allocation28_spill] sm:$0xff] %v9437_v58  ;;  %4658 = vtanh.f32 %v9437_v58  ;;  %v3227_v5 = vmul.f32 %v4651_v0, %v3226_v62  ;;  %v3428_v62 = vand.u32 2147483648, %v9407_v9  ;;  %v3420_v58 = vmul.f32 %v9430_v61, %v3419_v63 }
 0x5b7   :  { %v4653_v13 = vpop.eup %4652  ;;  %4660 = vrcp.f32 %v9440_v57  ;;  %vm3234_vm14 = vcmp.eq.f32.partialorder %v3233_v12, 8.507059e+37  ;;  %v3406_v34 = vadd.f32 %v9428_v56, %v3405_v47  ;;  %v3414_v1 = vor.u32 1.1754944e-38, %v3413_v31 }
 0x5b8   :  { %v4655_v22 = vpop.eup %4654  ;;  %v9448_v8 = vadd.f32 1.0, %v4653_v13  ;;  %v3338_v13 = vrot.slane %v3305_v33, 3  ;;  %v3429_v24 = vor.u32 1.1754944e-38, %v3428_v62  ;;  %v3421_v31 = vadd.f32 %v9430_v61, %v3420_v58 }
 0x5b9   :  { %v9452_v32 = vadd.f32 1.0, %v4655_v22  ;;  %v9457_v41 = vpop.eup %4656  ;;  %v3228_v22 = vadd.f32 %v4651_v0, %v3227_v5  ;;  %v3350_v5 = vadd.f32 %v3334_v23, %v11489_v40  ;;  %v3410_v18 = vsel %vm9489_vm3, %v9428_v56, %v3406_v34 }
 0x5ba   :  { %4662 = vrcp.f32 %v9448_v8  ;;  %v3443_v51 = vmul.f32 %v9457_v41, %v9433_v38  ;;  %v3354_v35 = vadd.f32 %v3338_v13, %v11490_v7  ;;  %vm3369_vm7 = vweird.f32 %v9448_v8 }
 0x5bb   :  { %4664 = vrcp.f32 %v9452_v32  ;;  %v3232_v55 = vsel %vm3231_vm13, %v4651_v0, %v3228_v22  ;;  %v3375_v22 = vand.u32 2147483648, %v9448_v8  ;;  %v3390_v34 = vand.u32 2147483648, %v9452_v32 }
 0x5bc   :  { %v4659_v2 = vpop.eup %4658  ;;  %v3237_v21 = vsel %vm3234_vm14, %v3236_v10, %v3232_v55  ;;  %4666 = vtanh.f32 %v3350_v5  ;;  %v3373_v10 = vand.u32 2147483647, %v9448_v8  ;;  %v3388_v5 = vand.u32 2147483647, %v9452_v32 }
 0x5bd   :  { %v9471_v33 = vpop.eup %4660  ;;  %v3243_v63 = vmul.f32 %v4659_v2, %v3237_v21  ;;  %v3444_v21 = vsub.f32 1.0, %v3443_v51  ;;  %4668 = vtanh.f32 %v3354_v35  ;;  %v3425_v35 = vsel %vm9505_vm4, %v9430_v61, %v3421_v31  ;;  %v5318_v51 = vld [vmem:[#allocation2 + $0x1a0] sm:$0xff] }
 0x5be   :  { %v3458_v59 = vmul.f32 %v9471_v33, %v9440_v57  ;;  %vm3384_vm9 = vweird.f32 %v9452_v32  ;;  %vm3374_vm11 = vcmp.eq.f32.partialorder %v3373_v10, 8.507059e+37  ;;  %vm3389_vm13 = vcmp.eq.f32.partialorder %v3388_v5, 8.507059e+37  ;;  %v5320_v10 = vld [vmem:[#allocation2 + $0x180] sm:$0xff]  ;;  %v5323_v5 = vld [vmem:[#allocation2 + $0x170] sm:$0xff] }
 0x5bf   :  { %v3494_v62 = vrot.slane %v3243_v63, 2  ;;  %v3445_v55 = vmul.f32 %v9457_v41, %v3444_v21  ;;  %v11499_v21 = vrot.slane %v8870_v50, 7  ;;  %vm3448_vm14 = vweird.f32 %v9457_v41 }
 0x5c0   :  { %v4663_v46 = vpop.eup %4662  ;;  %v3459_v9 = vsub.f32 1.0, %v3458_v59  ;;  %vm3463_vm15 = vweird.f32 %v9471_v33  ;;  %vm3447_vm0 = vweird.f32 %v9433_v38 }
 0x5c1   :  { %v4665_v48 = vpop.eup %4664  ;;  %v3365_v0 = vmul.f32 %v4663_v46, %v9448_v8  ;;  %v3496_v2 = vrot.slane %v3494_v62, 6  ;;  %vm3370_vm5 = vweird.f32 %v4663_v46  ;;  %v3391_v8 = vor.u32 1.1754944e-38, %v3390_v34  ;;  %v5321_v34 = vld [vmem:[#allocation2 + $0x190] sm:$0xff] }
 0x5c2   :  { %v3380_v47 = vmul.f32 %v4665_v48, %v9452_v32  ;;  %vm3385_vm6 = vweird.f32 %v4665_v48  ;;  %vm3371_vm8 = vmor %vm3369_vm7, %vm3370_vm5  ;;  %v4667_v61 = vpop.eup %4666 }
 0x5c3   :  { %v3366_v13 = vsub.f32 1.0, %v3365_v0  ;;  %3535 = vmatmul.f32.vlgmr.msrb.gmra.mxu1 %v3496_v2  ;;  %3575 = vmatmul.f32.vlgmr.msra.gmra.mxu3 %v3496_v2  ;;  %v3415_v0 = vsel %vm9479_vm1, %v3414_v1, %v3410_v18  ;;  %vm3386_vm12 = vmor %vm3384_vm9, %vm3385_vm6  ;;  %v3430_v1 = vsel %vm9483_vm2, %v3429_v24, %v3425_v35  ;;  %v11500_v24 = vrot.slane %v8878_v14, 7  ;;  %v11507_v35 = vld [vmem:[#allocation43_spill] sm:$0xff] }
 0x5c4   :  { %v3381_v43 = vsub.f32 1.0, %v3380_v47  ;;  %3746 = vmatpush.msrb.mxu1 %v8816_v26  ;;  %3786 = vmatpush.msra.mxu3 %v8819_v16  ;;  %v3376_v47 = vor.u32 1.1754944e-38, %v3375_v22  ;;  %v4669_v26 = vpop.eup %4668  ;;  %v3478_v32 = vmul.f32 %v11499_v21, %v3415_v0  ;;  %vm3462_vm1 = vweird.f32 %v9440_v57  ;;  %vm3449_vm2 = vmor %vm3447_vm0, %vm3448_vm14  ;;  %v5325_v0 = vld [vmem:[#allocation2 + $0x150] sm:$0xff]  ;;  %v5330_v21 = vld [vmem:[#allocation2 + $0xe0] sm:$0xff] }
 0x5c5   :  { %v3367_v58 = vmul.f32 %v4663_v46, %v3366_v13  ;;  %vm3464_vm3 = vmor %vm3462_vm1, %vm3463_vm15  ;;  %vm3491_vm6 = vcmask 1047559  }
 0x5c6   :  { %v3382_v56 = vmul.f32 %v4665_v48, %v3381_v43  ;;  %3747 = vmatpush.msrb.mxu1 %v8831_v3  ;;  %3787 = vmatpush.msra.mxu3 %v8834_v29  ;;  %v3479_v3 = vmul.f32 %v11500_v24, %v3430_v1  ;;  %v5328_v1 = vld [vmem:[#allocation2 + $0x100] sm:$0xff]  ;;  %v5333_v24 = vld [vmem:[#allocation2 + $0xd0] sm:$0xff] }
 0x5c7   :  { %v3368_v63 = vadd.f32 %v4663_v46, %v3367_v58  ;;  %v11506_v58 = vld [vmem:[#allocation40_spill] sm:$0xff] }
 0x5c8   :  { %v3383_v62 = vadd.f32 %v4665_v48, %v3382_v56  ;;  %3748 = vmatpush.msrb.mxu1 %v8852_v44  ;;  %3788 = vmatpush.msra.mxu3 %v8855_v60  ;;  %v3453_v44 = vand.u32 2147483648, %v9433_v38  ;;  %v5322_v56 = vld [vmem:[#allocation2 + $0x160] sm:$0xff] }
 0x5c9   :  { %v3372_v31 = vsel %vm3371_vm8, %v4663_v46, %v3368_v63  ;;  %v3460_v46 = vmul.f32 %v9471_v33, %v3459_v9  ;;  %v11508_v9 = vld [vmem:[#allocation44_spill] sm:$0xff]  ;;  %v5324_v63 = vld [vmem:[#allocation2 + $0x140] sm:$0xff] }
 0x5ca   :  { %v3377_v16 = vsel %vm3374_vm11, %v3376_v47, %v3372_v31  ;;  %v3387_v12 = vsel %vm3386_vm12, %v4665_v48, %v3383_v62  ;;  %3749 = vmatpush.msrb.mxu1 %v8862_v19  ;;  %3789 = vmatpush.msra.mxu3 %v8865_v28  ;;  %v3446_v48 = vadd.f32 %v9457_v41, %v3445_v55  ;;  %v3468_v19 = vand.u32 2147483648, %v9440_v57  ;;  %v11509_v55 = vld [vmem:[#allocation47_spill] sm:$0xff]  ;;  %v11510_v47 = vld [vmem:[#allocation48_spill] sm:$0xff] }
 0x5cb   :  { %v3392_v59 = vsel %vm3389_vm13, %v3391_v8, %v3387_v12  ;;  %v3480_v13 = vmul.f32 %v4667_v61, %v3377_v16  ;;  %3615 = vmatmul.f32.vlgmr.msra.gmra.mxu1 %v3496_v2  ;;  %3655 = vmatmul.f32.vlgmr.msrb.gmra.mxu3 %v3496_v2  ;;  %v3461_v60 = vadd.f32 %v9471_v33, %v3460_v46  ;;  %v3451_v28 = vand.u32 2147483647, %v9433_v38  ;;  %v5317_v2 = vld [vmem:[#allocation2 + $0x1d0] sm:$0xff]  ;;  %v5326_v62 = vld [vmem:[#allocation2 + $0x120] sm:$0xff] }
 0x5cc   :  { %v3481_v23 = vmul.f32 %v4669_v26, %v3392_v59  ;;  %3750 = vmatpush.msrb.mxu1 %v8872_v39  ;;  %3790 = vmatpush.msra.mxu3 %v8875_v49  ;;  %v3466_v39 = vand.u32 2147483647, %v9440_v57  ;;  %v3450_v49 = vsel %vm3449_vm2, %v9457_v41, %v3446_v48  ;;  %v3454_v14 = vor.u32 1.1754944e-38, %v3453_v44  ;;  %v5327_v61 = vld [vmem:[#allocation2 + $0x130] sm:$0xff]  ;;  %v11511_v31 = vld [vmem:[#allocation51_spill] sm:$0xff] }
 0x5cd   :  { %v9535_v29 = vadd.f32 %v3480_v13, %v3478_v32  ;;  %v3465_v18 = vsel %vm3464_vm3, %v9471_v33, %v3461_v60  ;;  %v3469_v38 = vor.u32 1.1754944e-38, %v3468_v19  ;;  %vm3452_vm4 = vcmp.eq.f32.partialorder %v3451_v28, 8.507059e+37  ;;  %v11512_v8 = vld [vmem:[#allocation52_spill] sm:$0xff]  ;;  %v11513_v16 = vld [vmem:[#allocation55_spill] sm:$0xff] }
 0x5ce   :  { %v9539_v50 = vadd.f32 %v3481_v23, %v3479_v3  ;;  %3751 = vmatpush.msrb.mxu1 %v8883_v53  ;;  %3791 = vmatpush.msra.mxu3 %v8886_v11  ;;  %v3455_v53 = vsel %vm3452_vm4, %v3454_v14, %v3450_v49  ;;  %vm3467_vm5 = vcmp.eq.f32.partialorder %v3466_v39, 8.507059e+37  ;;  %v5329_v26 = vld [vmem:[#allocation2 + $0x110] sm:$0xff]  ;;  %v11515_v46 = vld [vmem:[#allocation59_spill] sm:$0xff] }
 0x5cf   :  { %4670 = vtanh.f32 %v9535_v29  ;;  %v3470_v57 = vsel %vm3467_vm5, %v3469_v38, %v3465_v18  ;;  %v11514_v12 = vld [vmem:[#allocation56_spill] sm:$0xff]  ;;  %v5332_v13 = vld [vmem:[#allocation2 + $0xc0] sm:$0xff]  ;;  %v11518_v23 = vld [vmem:[#allocation29_spill] sm:$0xff] }
 0x5d0   :  { %4672 = vtanh.f32 %v9539_v50  ;;  %3752 = vmatpush.msrb.mxu1 %v8897_v15  ;;  %3792 = vmatpush.msra.mxu3 %v8900_v4  ;;  %v5331_v32 = vld [vmem:[#allocation2 + $0xf0] sm:$0xff]  ;;  %v11517_v3 = vld [vmem:[#allocation67_spill] sm:$0xff] }
 0x5d1   :  { %v11516_v59 = vld [vmem:[#allocation60_spill] sm:$0xff]  ;;  %v5334_v48 = vld [vmem:[#allocation2 + $0xa0] sm:$0xff]  ;;  %v11521_v49 = vld [vmem:[#allocation33_spill] sm:$0xff] }
 0x5d2   :  { %3753 = vmatpush.msrb.mxu1 %v8917_v30  ;;  %3793 = vmatpush.msra.mxu3 %v8920_v45  ;;  %v5335_v44 = vld [vmem:[#allocation2 + $0xb0] sm:$0xff]  ;;  %v11519_v60 = vld [vmem:[#allocation63_spill] sm:$0xff] }
 0x5d3   :  { %v11520_v19 = vld [vmem:[#allocation64_spill] sm:$0xff]  ;;  %v5336_v28 = vld [vmem:[#allocation2 + $0x80] sm:$0xff] }
 0x5d4   :  { %3754 = vmatpush.msrb.mxu1 %v8926_v25  ;;  %3794 = vmatpush.msra.mxu3 %v8929_v37  ;;  %v5314_v37 = vld [vmem:[#allocation2 + $0x1e0] sm:$0xff]  ;;  %v5337_v39 = vld [vmem:[#allocation2 + $0x90] sm:$0xff] }
 0x5d5   :  { %v4671_v43 = vpop.eup %4670  ;;  %v11522_v14 = vld [vmem:[#allocation71_spill] sm:$0xff]  ;;  %v5339_v38 = vld [vmem:[#allocation2 + $0x70] sm:$0xff] }
 0x5d6   :  { %v4673_v11 = vpop.eup %4672  ;;  %v3486_v41 = vmul.f32 %v4671_v43, %v3455_v53  ;;  %3755 = vmatpush.msrb.mxu1 %v8932_v54  ;;  %3795 = vmatpush.msra.mxu3 %v8935_v6  ;;  %v5315_v54 = vld [vmem:[#allocation2 + $0x1f0] sm:$0xff]  ;;  %v11501_v6 = vld [vmem:[#allocation31_spill] sm:$0xff]  ;;  %v11523_v43 = vld [vmem:[#allocation30_spill] sm:$0xff] }
 0x5d7   :  { %v3487_v15 = vmul.f32 %v4673_v11, %v3470_v57  ;;  %v5338_v18 = vld [vmem:[#allocation2 + $0x60] sm:$0xff]  ;;  %v11524_v53 = vld [vmem:[#allocation68_spill] sm:$0xff] }
 0x5d8   :  { %v3722_v4 = vrot.slane %v3486_v41, 6  ;;  %3756 = vmatpush.msrb.mxu1 %v8938_v27  ;;  %3796 = vmatpush.msra.mxu3 %v8941_v42  ;;  %v11502_v27 = vld [vmem:[#allocation32_spill] sm:$0xff]  ;;  %v5316_v42 = vld [vmem:[#allocation2 + $0x1c0] sm:$0xff] }
 0x5d9   :  { %v3490_v33 = vrot.slane %v3487_v15, 7  ;;  %v3723_v30 = vrot.slane %v3487_v15, 5  ;;  %v5340_v11 = vld [vmem:[#allocation2 + $0x40] sm:$0xff]  ;;  %v5341_v57 = vld [vmem:[#allocation2 + $0x50] sm:$0xff] }
 0x5da   :  { %3757 = vmatpush.msrb.mxu1 %v8944_v52  ;;  %3797 = vmatpush.msra.mxu3 %v8947_v20  ;;  %v11503_v52 = vld [vmem:[#allocation35_spill] sm:$0xff]  ;;  %v11504_v20 = vld [vmem:[#allocation36_spill] sm:$0xff] }
 0x5db   :  { %v3492_v45 = vsel %vm3491_vm6, %v3490_v33, %v3486_v41  ;;  %v9570_v22 = vsel %vm637_vm10, %v3723_v30, %v3722_v4  ;;  %v11525_v41 = vld [vmem:[#allocation37_spill] sm:$0xff]  ;;  %v11526_v15 = vld [vmem:[#allocation75_spill] sm:$0xff]  ;;  %v11527_v30 = vld [vmem:[#allocation34_spill] sm:$0xff] }
 0x5dc   :  { %v3495_v25 = vrot.slane %v3492_v45, 6  ;;  %3758 = vmatpush.msrb.mxu1 %v8953_v17  ;;  %3798 = vmatpush.msra.mxu3 %v8956_v36  ;;  %v5319_v17 = vld [vmem:[#allocation2 + $0x1b0] sm:$0xff]  ;;  %v11505_v36 = vld [vmem:[#allocation39_spill] sm:$0xff] }
 0x5dd   :  { %v5342_v4 = vld [vmem:[#allocation2 + $0x20] sm:$0xff]  ;;  %v5343_v33 = vld [vmem:[#allocation2 + $0x30] sm:$0xff] }
 0x5de   :  { %3515 = vmatmul.f32.vlgmr.msrb.gmra.mxu0 %v3495_v25  ;;  %3555 = vmatmul.f32.vlgmr.msra.gmra.mxu2 %v3495_v25  ;;  %v11528_v45 = vld [vmem:[#allocation72_spill] sm:$0xff] }
 0x5df   :  { %3726 = vmatpush.msrb.mxu0 %v5314_v37  ;;  %3766 = vmatpush.msra.mxu2 %v5315_v54  ;;  %v5345_v37 = vld [vmem:[#allocation2 + $0x10] sm:$0xff] }
 0x5e0   :  { %3759 = vmatpush.msrb.mxu1 %v11501_v6  ;;  %3799 = vmatpush.msra.mxu3 %v11502_v27  ;;  %v11529_v54 = vld [vmem:[#allocation41_spill] sm:$0xff]  ;;  %v11530_v6 = vld [vmem:[#allocation42_spill] sm:$0xff] }
 0x5e1   :  { %3727 = vmatpush.msrb.mxu0 %v5316_v42  ;;  %3767 = vmatpush.msra.mxu2 %v5317_v2  ;;  %v11531_v27 = vld [vmem:[#allocation45_spill] sm:$0xff]  ;;  %v11532_v42 = vld [vmem:[#allocation46_spill] sm:$0xff] }
 0x5e2   :  { %3760 = vmatpush.msrb.mxu1 %v11503_v52  ;;  %3800 = vmatpush.msra.mxu3 %v11504_v20  ;;  %v11533_v2 = vld [vmem:[#allocation38_spill] sm:$0xff]  ;;  %v11534_v52 = vld [vmem:[#allocation76_spill] sm:$0xff] }
 0x5e3   :  { %3728 = vmatpush.msrb.mxu0 %v5318_v51  ;;  %3768 = vmatpush.msra.mxu2 %v5319_v17  ;;  %v11535_v20 = vld [vmem:[#allocation86_spill] sm:$0xff]  ;;  %v11537_v17 = vld [vmem:[#allocation83_spill] sm:$0xff] }
 0x5e4   :  { %3761 = vmatpush.msrb.mxu1 %v11505_v36  ;;  %3801 = vmatpush.msra.mxu3 %v11506_v58  ;;  %v11536_v51 = vld [vmem:[#allocation50_spill] sm:$0xff]  ;;  %v11538_v36 = vld [vmem:[#allocation49_spill] sm:$0xff] }
 0x5e5   :  { %3762 = vmatmul.f32.vlgmr.msrb.gmra.mxu1 %v9570_v22  ;;  %3802 = vmatmul.f32.vlgmr.msra.gmra.mxu3 %v9570_v22  ;;  %v11540_v58 = vld [vmem:[#allocation54_spill] sm:$0xff] }
 0x5e6   :  { %3729 = vmatpush.msrb.mxu0 %v5320_v10  ;;  %3769 = vmatpush.msra.mxu2 %v5321_v34  ;;  %v11541_v10 = vld [vmem:[#allocation87_spill] sm:$0xff]  ;;  %v11542_v34 = vld [vmem:[#allocation53_spill] sm:$0xff] }
 0x5e7   :  { %3595 = vmatmul.f32.vlgmr.msra.gmra.mxu0 %v3495_v25  ;;  %3635 = vmatmul.f32.vlgmr.msrb.gmra.mxu2 %v3495_v25  ;;  %v5344_v25 = vld [vmem:[#allocation2] sm:$0xff] }
 0x5e8   :  { %3730 = vmatpush.msrb.mxu0 %v5322_v56  ;;  %3770 = vmatpush.msra.mxu2 %v5323_v5  ;;  %v11543_v56 = vld [vmem:[#allocation58_spill] sm:$0xff]  ;;  %v11544_v5 = vld [vmem:[#allocation61_spill] sm:$0xff] }
 0x5e9   :  { %3999 = vmatpush.msra.mxu1 %v11507_v35  ;;  %4039 = vmatpush.msrb.mxu3 %v11508_v9  ;;  %v11545_v35 = vld [vmem:[#allocation91_spill] sm:$0xff]  ;;  %v11546_v9 = vld [vmem:[#allocation57_spill] sm:$0xff] }
 0x5ea   :  { %3731 = vmatpush.msrb.mxu0 %v5324_v63  ;;  %3771 = vmatpush.msra.mxu2 %v5325_v0  ;;  %v11547_v63 = vld [vmem:[#allocation66_spill] sm:$0xff]  ;;  %v11548_v0 = vld [vmem:[#allocation69_spill] sm:$0xff] }
 0x5eb   :  { %4000 = vmatpush.msra.mxu1 %v11509_v55  ;;  %4040 = vmatpush.msrb.mxu3 %v11510_v47  ;;  %v11549_v55 = vld [vmem:[#allocation62_spill] sm:$0xff]  ;;  %v11550_v47 = vld [vmem:[#allocation65_spill] sm:$0xff] }
 0x5ec   :  { %3732 = vmatpush.msrb.mxu0 %v5326_v62  ;;  %3772 = vmatpush.msra.mxu2 %v5327_v61  ;;  %v11551_v62 = vld [vmem:[#allocation74_spill] sm:$0xff] }
 0x5ed   :  { %4001 = vmatpush.msra.mxu1 %v11511_v31  ;;  %4041 = vmatpush.msrb.mxu3 %v11512_v8  ;;  %v11552_v61 = vld [vmem:[#allocation78_spill] sm:$0xff]  ;;  %v11554_v8 = vld [vmem:[#allocation73_spill] sm:$0xff] }
 0x5ee   :  { %3733 = vmatpush.msrb.mxu0 %v5328_v1  ;;  %3773 = vmatpush.msra.mxu2 %v5329_v26  ;;  %v11553_v31 = vld [vmem:[#allocation70_spill] sm:$0xff]  ;;  %v11556_v26 = vld [vmem:[#allocation84_spill] sm:$0xff] }
 0x5ef   :  { %4002 = vmatpush.msra.mxu1 %v11513_v16  ;;  %4042 = vmatpush.msrb.mxu3 %v11514_v12  ;;  %v11555_v1 = vld [vmem:[#allocation82_spill] sm:$0xff]  ;;  %v11557_v16 = vld [vmem:[#allocation79_spill] sm:$0xff]  ;;  %v11558_v12 = vld [vmem:[#allocation81_spill] sm:$0xff] }
 0x5f0   :  { %3734 = vmatpush.msrb.mxu0 %v5330_v21  ;;  %3774 = vmatpush.msra.mxu2 %v5331_v32  ;;  %v11559_v21 = vld [vmem:[#allocation89_spill] sm:$0xff]  ;;  %v11560_v32 = vld [vmem:[#allocation92_spill] sm:$0xff] }
 0x5f1   :  { %4003 = vmatpush.msra.mxu1 %v11515_v46  ;;  %4043 = vmatpush.msrb.mxu3 %v11516_v59  ;;  %v11561_v46 = vld [vmem:[#allocation85_spill] sm:$0xff]  ;;  %v11562_v59 = vld [vmem:[#allocation88_spill] sm:$0xff] }
 0x5f2   :  { %3735 = vmatpush.msrb.mxu0 %v5332_v13  ;;  %3775 = vmatpush.msra.mxu2 %v5333_v24  ;;  %v11563_v13 = vld [vmem:[#allocation95_spill] sm:$0xff]  ;;  %v11564_v24 = vld [vmem:[#allocation96_spill] sm:$0xff] }
 0x5f3   :  { %4004 = vmatpush.msra.mxu1 %v11517_v3  ;;  %4044 = vmatpush.msrb.mxu3 %v11518_v23  ;;  %v11565_v3 = vld [vmem:[#allocation93_spill] sm:$0xff]  ;;  %v11566_v23 = vld [vmem:[#allocation94_spill] sm:$0xff] }
 0x5f4   :  { %3736 = vmatpush.msrb.mxu0 %v5334_v48  ;;  %3776 = vmatpush.msra.mxu2 %v5335_v44  ;;  %v11567_v48 = vld [vmem:[#allocation99_spill] sm:$0xff]  ;;  %v11568_v44 = vld [vmem:[#allocation104_spill] sm:$0xff] }
 0x5f5   :  { %4005 = vmatpush.msra.mxu1 %v11519_v60  ;;  %4045 = vmatpush.msrb.mxu3 %v11520_v19  ;;  %v11569_v60 = vld [vmem:[#allocation97_spill] sm:$0xff]  ;;  %v11570_v19 = vld [vmem:[#allocation98_spill] sm:$0xff] }
 0x5f6   :  { %3737 = vmatpush.msrb.mxu0 %v5336_v28  ;;  %3777 = vmatpush.msra.mxu2 %v5337_v39  ;;  %v11571_v28 = vld [vmem:[#allocation109_spill] sm:$0xff]  ;;  %v11572_v39 = vld [vmem:[#allocation110_spill] sm:$0xff] }
 0x5f7   :  { %4006 = vmatpush.msra.mxu1 %v11521_v49  ;;  %4046 = vmatpush.msrb.mxu3 %v11522_v14  ;;  %v11573_v49 = vld [vmem:[#allocation105_spill] sm:$0xff]  ;;  %v11574_v14 = vld [vmem:[#allocation107_spill] sm:$0xff] }
 0x5f8   :  { %3738 = vmatpush.msrb.mxu0 %v5338_v18  ;;  %3778 = vmatpush.msra.mxu2 %v5339_v38  ;;  %v11575_v18 = vld [vmem:[#allocation11_spill] sm:$0xff]  ;;  %v11576_v38 = vld [vmem:[#allocation12_spill] sm:$0xff] }
 0x5f9   :  { %4007 = vmatpush.msra.mxu1 %v11523_v43  ;;  %4047 = vmatpush.msrb.mxu3 %v11524_v53  ;;  %v11577_v43 = vld [vmem:[#allocation111_spill] sm:$0xff]  ;;  %v11578_v53 = vld [vmem:[#allocation112_spill] sm:$0xff] }
 0x5fa   :  { %3739 = vmatpush.msrb.mxu0 %v5340_v11  ;;  %3779 = vmatpush.msra.mxu2 %v5341_v57  ;;  %v11579_v11 = vld [vmem:[#allocation15_spill] sm:$0xff]  ;;  %v11580_v57 = vld [vmem:[#allocation113_spill] sm:$0xff] }
 0x5fb   :  { %4008 = vmatpush.msra.mxu1 %v11525_v41  ;;  %4048 = vmatpush.msrb.mxu3 %v11526_v15  ;;  %v11581_v41 = vld [vmem:[#allocation13_spill] sm:$0xff]  ;;  %v11582_v15 = vld [vmem:[#allocation14_spill] sm:$0xff] }
 0x5fc   :  { %3740 = vmatpush.msrb.mxu0 %v5342_v4  ;;  %3780 = vmatpush.msra.mxu2 %v5343_v33  ;;  %v11583_v4 = vld [vmem:[#allocation114_spill] sm:$0xff]  ;;  %v11584_v33 = vld [vmem:[#allocation116_spill] sm:$0xff] }
 0x5fd   :  { %4009 = vmatpush.msra.mxu1 %v11527_v30  ;;  %4049 = vmatpush.msrb.mxu3 %v11528_v45  ;;  %v11585_v30 = vld [vmem:[#allocation115_spill] sm:$0xff]  ;;  %v11586_v45 = vld [vmem:[#allocation117_spill] sm:$0xff] }
 0x5fe   :  { %3741 = vmatpush.msrb.mxu0 %v5344_v25  ;;  %3781 = vmatpush.msra.mxu2 %v5345_v37  ;;  %v11587_v25 = vld [vmem:[#allocation118_spill] sm:$0xff]  ;;  %v11588_v37 = vld [vmem:[#allocation120_spill] sm:$0xff] }
 0x5ff   :  { %3742 = vmatmul.f32.vlgmr.msrb.gmra.mxu0 %v9570_v22  ;;  %3782 = vmatmul.f32.vlgmr.msra.gmra.mxu2 %v9570_v22  ;;  %v11539_v22 = vld [vmem:[#allocation90_spill] sm:$0xff] }
 0x600   :  { %4010 = vmatpush.msra.mxu1 %v11529_v54  ;;  %4050 = vmatpush.msrb.mxu3 %v11530_v6  ;;  %v11589_v54 = vld [vmem:[#allocation119_spill] sm:$0xff]  ;;  %v11590_v6 = vld [vmem:[#allocation121_spill] sm:$0xff] }
 0x601   :  { %3979 = vmatpush.msra.mxu0 %v11531_v27  ;;  %4019 = vmatpush.msrb.mxu2 %v11532_v42  ;;  %v11591_v27 = vld [vmem:[#allocation122_spill] sm:$0xff]  ;;  %v11592_v42 = vld [vmem:[#allocation124_spill] sm:$0xff] }
 0x602   :  { %4011 = vmatpush.msra.mxu1 %v11533_v2  ;;  %4051 = vmatpush.msrb.mxu3 %v11534_v52  ;;  %v11593_v2 = vld [vmem:[#allocation123_spill] sm:$0xff]  ;;  %v11594_v52 = vld [vmem:[#allocation125_spill] sm:$0xff] }
 0x603   :  { %3980 = vmatpush.msra.mxu0 %v11535_v20  ;;  %4020 = vmatpush.msrb.mxu2 %v11536_v51  ;;  %v11595_v20 = vld [vmem:[#allocation128_spill] sm:$0xff]  ;;  %v11596_v51 = vld [vmem:[#allocation126_spill] sm:$0xff] }
 0x604   :  { %4012 = vmatpush.msra.mxu1 %v11537_v17  ;;  %4052 = vmatpush.msrb.mxu3 %v11538_v36  ;;  %v11597_v17 = vld [vmem:[#allocation129_spill] sm:$0xff]  ;;  %v11598_v36 = vld [vmem:[#allocation127_spill] sm:$0xff] }
 0x605   :  { %3981 = vmatpush.msra.mxu0 %v11539_v22  ;;  %4021 = vmatpush.msrb.mxu2 %v11540_v58  ;;  %v11599_v22 = vld [vmem:[#allocation132_spill] sm:$0xff]  ;;  %v11600_v58 = vld [vmem:[#allocation130_spill] sm:$0xff] }
 0x606   :  { %4013 = vmatpush.msra.mxu1 %v11541_v10  ;;  %4053 = vmatpush.msrb.mxu3 %v11542_v34  ;;  %v11601_v10 = vld [vmem:[#allocation133_spill] sm:$0xff]  ;;  %v11602_v34 = vld [vmem:[#allocation131_spill] sm:$0xff] }
 0x607   :  { %3982 = vmatpush.msra.mxu0 %v11543_v56  ;;  %4022 = vmatpush.msrb.mxu2 %v11544_v5  ;;  %v11603_v56 = vld [vmem:[#allocation136_spill] sm:$0xff]  ;;  %v11604_v5 = vld [vmem:[#allocation134_spill] sm:$0xff] }
 0x608   :  { %4014 = vmatpush.msra.mxu1 %v11545_v35  ;;  %4054 = vmatpush.msrb.mxu3 %v11546_v9  ;;  %v11605_v35 = vld [vmem:[#allocation137_spill] sm:$0xff]  ;;  %v11606_v9 = vld [vmem:[#allocation135_spill] sm:$0xff] }
 0x609   :  { %3983 = vmatpush.msra.mxu0 %v11549_v55  ;;  %4023 = vmatpush.msrb.mxu2 %v11550_v47  ;;  %v11609_v55 = vld [vmem:[#allocation141_spill] sm:$0xff]  ;;  %v11610_v47 = vld [vmem:[#allocation139_spill] sm:$0xff] }
 0x60a   :  { %4079 = vmatpush.msrb.mxu1 %v11547_v63  ;;  %4119 = vmatpush.msra.mxu3 %v11548_v0  ;;  %v11607_v63 = vld [vmem:[#allocation140_spill] sm:$0xff]  ;;  %v11608_v0 = vld [vmem:[#allocation138_spill] sm:$0xff] }
 0x60b   :  { %3984 = vmatpush.msra.mxu0 %v11553_v31  ;;  %4024 = vmatpush.msrb.mxu2 %v11554_v8  ;;  %v11613_v31 = vld [vmem:[#allocation144_spill] sm:$0xff]  ;;  %v11614_v8 = vld [vmem:[#allocation145_spill] sm:$0xff] }
 0x60c   :  { %4080 = vmatpush.msrb.mxu1 %v11551_v62  ;;  %4120 = vmatpush.msra.mxu3 %v11552_v61  ;;  %v11611_v62 = vld [vmem:[#allocation142_spill] sm:$0xff]  ;;  %v11612_v61 = vld [vmem:[#allocation143_spill] sm:$0xff] }
 0x60d   :  { %3985 = vmatpush.msra.mxu0 %v11557_v16  ;;  %4025 = vmatpush.msrb.mxu2 %v11558_v12  ;;  %v11617_v16 = vld [vmem:[#allocation148_spill] sm:$0xff]  ;;  %v11618_v12 = vld [vmem:[#allocation149_spill] sm:$0xff] }
 0x60e   :  { %4081 = vmatpush.msrb.mxu1 %v11555_v1  ;;  %4121 = vmatpush.msra.mxu3 %v11556_v26  ;;  %v11615_v1 = vld [vmem:[#allocation146_spill] sm:$0xff]  ;;  %v11616_v26 = vld [vmem:[#allocation147_spill] sm:$0xff] }
 0x60f   :  { %3986 = vmatpush.msra.mxu0 %v11561_v46  ;;  %4026 = vmatpush.msrb.mxu2 %v11562_v59  ;;  %v11621_v46 = vld [vmem:[#allocation20_spill] sm:$0xff]  ;;  %v11622_v59 = vld [vmem:[#allocation21_spill] sm:$0xff] }
 0x610   :  { %4082 = vmatpush.msrb.mxu1 %v11559_v21  ;;  %4122 = vmatpush.msra.mxu3 %v11560_v32  ;;  %v11619_v21 = vld [vmem:[#allocation150_spill] sm:$0xff]  ;;  %v11620_v32 = vld [vmem:[#allocation151_spill] sm:$0xff] }
 0x611   :  { %3987 = vmatpush.msra.mxu0 %v11565_v3  ;;  %4027 = vmatpush.msrb.mxu2 %v11566_v23  ;;  %v11625_v3 = vld [vmem:[#allocation153_spill] sm:$0xff]  ;;  %v11626_v23 = vld [vmem:[#allocation154_spill] sm:$0xff] }
 0x612   :  { %4083 = vmatpush.msrb.mxu1 %v11563_v13  ;;  %4123 = vmatpush.msra.mxu3 %v11564_v24  ;;  %v11623_v13 = vld [vmem:[#allocation22_spill] sm:$0xff]  ;;  %v11624_v24 = vld [vmem:[#allocation152_spill] sm:$0xff] }
 0x613   :  { %3988 = vmatpush.msra.mxu0 %v11569_v60  ;;  %4028 = vmatpush.msrb.mxu2 %v11570_v19  ;;  %v11629_v60 = vld [vmem:[#allocation157_spill] sm:$0xff]  ;;  %v11630_v19 = vld [vmem:[#allocation23_spill] sm:$0xff] }
 0x614   :  { %4084 = vmatpush.msrb.mxu1 %v11567_v48  ;;  %4124 = vmatpush.msra.mxu3 %v11568_v44  ;;  %v11627_v48 = vld [vmem:[#allocation155_spill] sm:$0xff]  ;;  %v11628_v44 = vld [vmem:[#allocation156_spill] sm:$0xff] }
 0x615   :  { %3989 = vmatpush.msra.mxu0 %v11573_v49  ;;  %4029 = vmatpush.msrb.mxu2 %v11574_v14  ;;  %v11633_v49 = vld [vmem:[#allocation26_spill] sm:$0xff]  ;;  %v11634_v14 = vld [vmem:[#allocation27_spill] sm:$0xff] }
 0x616   :  { %4085 = vmatpush.msrb.mxu1 %v11571_v28  ;;  %4125 = vmatpush.msra.mxu3 %v11572_v39  ;;  %v11631_v28 = vld [vmem:[#allocation24_spill] sm:$0xff]  ;;  %v11632_v39 = vld [vmem:[#allocation25_spill] sm:$0xff] }
 0x617   :  { %3990 = vmatpush.msra.mxu0 %v11577_v43  ;;  %4030 = vmatpush.msrb.mxu2 %v11578_v53 }
 0x618   :  { %4086 = vmatpush.msrb.mxu1 %v11575_v18  ;;  %4126 = vmatpush.msra.mxu3 %v11576_v38 }
 0x619   :  { %3991 = vmatpush.msra.mxu0 %v11581_v41  ;;  %4031 = vmatpush.msrb.mxu2 %v11582_v15 }
 0x61a   :  { %4087 = vmatpush.msrb.mxu1 %v11579_v11  ;;  %4127 = vmatpush.msra.mxu3 %v11580_v57  ;;  %v11635_v11 = vld [vmem:[#allocation16_spill] sm:$0xff] }
 0x61b   :  { %3992 = vmatpush.msra.mxu0 %v11585_v30  ;;  %4032 = vmatpush.msrb.mxu2 %v11586_v45 }
 0x61c   :  { %4088 = vmatpush.msrb.mxu1 %v11583_v4  ;;  %4128 = vmatpush.msra.mxu3 %v11584_v33  ;;  %v11636_v33 = vld [vmem:[#allocation17_spill] sm:$0xff] }
 0x61d   :  { %3993 = vmatpush.msra.mxu0 %v11589_v54  ;;  %4033 = vmatpush.msrb.mxu2 %v11590_v6  ;;  %v11637_v6 = vld [vmem:[#allocation102_spill] sm:$0xff] }
 0x61e   :  { %4089 = vmatpush.msrb.mxu1 %v11587_v25  ;;  %4129 = vmatpush.msra.mxu3 %v11588_v37 }
 0x61f   :  { %3994 = vmatpush.msra.mxu0 %v11593_v2  ;;  %4034 = vmatpush.msrb.mxu2 %v11594_v52 }
 0x620   :  { %4090 = vmatpush.msrb.mxu1 %v11591_v27  ;;  %4130 = vmatpush.msra.mxu3 %v11592_v42 }
 0x621   :  { %4059 = vmatpush.msrb.mxu0 %v11595_v20  ;;  %4099 = vmatpush.msra.mxu2 %v11597_v17  ;;  %v11638_v17 = vld [vmem:[#allocation103_spill] sm:$0xff] }
 0x622   :  { %4091 = vmatpush.msrb.mxu1 %v11596_v51  ;;  %4131 = vmatpush.msra.mxu3 %v11598_v36 }
 0x623   :  { %4060 = vmatpush.msrb.mxu0 %v11599_v22  ;;  %4100 = vmatpush.msra.mxu2 %v11601_v10  ;;  %v11639_v10 = vld [vmem:[#allocation18_spill] sm:$0xff] }
 0x624   :  { %4092 = vmatpush.msrb.mxu1 %v11600_v58  ;;  %4132 = vmatpush.msra.mxu3 %v11602_v34 }
 0x625   :  { %4061 = vmatpush.msrb.mxu0 %v11603_v56  ;;  %4101 = vmatpush.msra.mxu2 %v11605_v35 }
 0x626   :  { %4093 = vmatpush.msrb.mxu1 %v11604_v5  ;;  %4133 = vmatpush.msra.mxu3 %v11606_v9 }
 0x627   :  { %4062 = vmatpush.msrb.mxu0 %v11607_v63  ;;  %4102 = vmatpush.msra.mxu2 %v11609_v55 }
 0x628   :  { %4094 = vmatpush.msrb.mxu1 %v11608_v0  ;;  %4134 = vmatpush.msra.mxu3 %v11610_v47 }
 0x629   :  { %4063 = vmatpush.msrb.mxu0 %v11611_v62  ;;  %4103 = vmatpush.msra.mxu2 %v11612_v61  ;;  %v11640_v62 = vld [vmem:[#allocation19_spill] sm:$0xff] }
 0x62b   :  { %4064 = vmatpush.msrb.mxu0 %v11613_v31  ;;  %4104 = vmatpush.msra.mxu2 %v11614_v8 }
 0x62d   :  { %4065 = vmatpush.msrb.mxu0 %v11615_v1  ;;  %4105 = vmatpush.msra.mxu2 %v11616_v26  ;;  %v11641_v1 = vld [vmem:[#allocation100_spill] sm:$0xff] }
 0x62f   :  { %4066 = vmatpush.msrb.mxu0 %v11617_v16  ;;  %4106 = vmatpush.msra.mxu2 %v11618_v12 }
 0x631   :  { %4067 = vmatpush.msrb.mxu0 %v11619_v21  ;;  %4107 = vmatpush.msra.mxu2 %v11620_v32 }
 0x633   :  { %4068 = vmatpush.msrb.mxu0 %v11621_v46  ;;  %4108 = vmatpush.msra.mxu2 %v11622_v59  ;;  %v11642_v46 = vld [vmem:[#allocation101_spill] sm:$0xff] }
 0x635   :  { %4069 = vmatpush.msrb.mxu0 %v11623_v13  ;;  %4109 = vmatpush.msra.mxu2 %v11624_v24 }
 0x637   :  { %4070 = vmatpush.msrb.mxu0 %v11625_v3  ;;  %4110 = vmatpush.msra.mxu2 %v11626_v23 }
 0x639   :  { %4071 = vmatpush.msrb.mxu0 %v11627_v48  ;;  %4111 = vmatpush.msra.mxu2 %v11628_v44 }
 0x63b   :  { %4072 = vmatpush.msrb.mxu0 %v11629_v60  ;;  %4112 = vmatpush.msra.mxu2 %v11630_v19 }
 0x63d   :  { %4073 = vmatpush.msrb.mxu0 %v11631_v28  ;;  %4113 = vmatpush.msra.mxu2 %v11632_v39 }
 0x63f   :  { %4074 = vmatpush.msrb.mxu0 %v11633_v49  ;;  %4114 = vmatpush.msra.mxu2 %v11634_v14 }
 0x640   :  { %v3536_v18 = vpop.f32.mrf.mxu1 }
 0x646   :  { %v3576_v38 = vpop.f32.mrf.mxu3 }
 0x648   :  { %v3616_v43 = vpop.f32.mrf.mxu1 }
 0x64e   :  { %v3656_v45 = vpop.f32.mrf.mxu3 }
 0x65b   :  { %v3516_v53 = vpop.f32.mrf.mxu0 }
 0x65c   :  { %v3517_v57 = vadd.f32 %v3516_v53, %v11635_v11 }
 0x65e   :  { %v3537_v41 = vadd.f32 %v3536_v18, %v3517_v57 }
 0x660   :  { %v4334_v15 = vmul.f32 -1.442695, %v3537_v41 }
 0x661   :  { %v3556_v4 = vpop.f32.mrf.mxu2 }
 0x662   :  { %4674 = vpow2.f32 %v4334_v15  ;;  %v3557_v30 = vadd.f32 %v3556_v4, %v11636_v33  ;;  %v3763_v25 = vpop.f32.mrf.mxu1 }
 0x663   :  { %v3811_v37 = vrot.slane %v3763_v25, 1  ;;  %v3815_v2 = vrot.slane %v3763_v25, 2 }
 0x664   :  { %v3577_v54 = vadd.f32 %v3576_v38, %v3557_v30  ;;  %v3596_v5 = vpop.f32.mrf.mxu0 }
 0x665   :  { %v3827_v27 = vadd.f32 %v3811_v37, %v11637_v6  ;;  %v3831_v36 = vadd.f32 %v3815_v2, %v11638_v17  ;;  %v3597_v61 = vadd.f32 %v3596_v5, %v11640_v62  ;;  %v11645_v2 = vld [vmem:[#allocation77_spill] sm:$0xff]  ;;  %v11646_v17 = vld [vmem:[#allocation80_spill] sm:$0xff] }
 0x666   :  { %v4335_v42 = vmul.f32 -1.442695, %v3577_v54 }
 0x667   :  { %v4339_v51 = vmul.f32 -1.442695, %v3827_v27  ;;  %v4340_v63 = vmul.f32 -1.442695, %v3831_v36  ;;  %v3617_v21 = vadd.f32 %v3616_v43, %v3597_v61 }
 0x668   :  { %v4675_v52 = vpop.eup %4674  ;;  %4676 = vpow2.f32 %v4335_v42  ;;  %v3803_v22 = vpop.f32.mrf.mxu3 }
 0x669   :  { %v3662_v20 = vadd.f32 1.0, %v4675_v52  ;;  %v3813_v35 = vrot.slane %v3803_v22, 1  ;;  %v3817_v8 = vrot.slane %v3803_v22, 2  ;;  %v11647_v22 = vld [vmem:[#allocation28_spill] sm:$0xff] }
 0x66a   :  { %v3636_v58 = vpop.f32.mrf.mxu2 }
 0x66b   :  { %4678 = vrcp.f32 %v3662_v20  ;;  %v3637_v34 = vadd.f32 %v3636_v58, %v11639_v10  ;;  %v3829_v26 = vadd.f32 %v3813_v35, %v11641_v1  ;;  %v3833_v59 = vadd.f32 %v3817_v8, %v11642_v46 }
 0x66c   :  { %4680 = vpow2.f32 %v4339_v51  ;;  %vm3668_vm7 = vweird.f32 %v3662_v20  ;;  %v3674_v60 = vand.u32 2147483648, %v3662_v20  ;;  %v3672_v39 = vand.u32 2147483647, %v3662_v20 }
 0x66d   :  { %v3657_v9 = vadd.f32 %v3656_v45, %v3637_v34  ;;  %v4341_v13 = vmul.f32 -1.442695, %v3829_v26  ;;  %v4342_v49 = vmul.f32 -1.442695, %v3833_v59 }
 0x66e   :  { %v4677_v56 = vpop.eup %4676  ;;  %v3675_v15 = vor.u32 1.1754944e-38, %v3674_v60  ;;  %vm3673_vm12 = vcmp.eq.f32.partialorder %v3672_v39, 8.507059e+37 }
 0x66f   :  { %v3681_v0 = vadd.f32 1.0, %v4677_v56  ;;  %v4336_v55 = vmul.f32 -1.442695, %v3657_v9 }
 0x671   :  { %v4679_v47 = vpop.eup %4678  ;;  %4682 = vrcp.f32 %v3681_v0  ;;  %v3693_v14 = vand.u32 2147483648, %v3681_v0  ;;  %v3691_v38 = vand.u32 2147483647, %v3681_v0  ;;  %vm3687_vm11 = vweird.f32 %v3681_v0 }
 0x672   :  { %v3664_v31 = vmul.f32 %v4679_v47, %v3662_v20  ;;  %4684 = vpow2.f32 %v4340_v63  ;;  %v4681_v16 = vpop.eup %4680  ;;  %vm3669_vm10 = vweird.f32 %v4679_v47 }
 0x673   :  { %4686 = vpow2.f32 %v4336_v55  ;;  %v9722_v3 = vadd.f32 1.0, %v4681_v16  ;;  %vm9725_vm8 = vmor %vm3668_vm7, %vm3669_vm10  ;;  %v3694_v37 = vor.u32 1.1754944e-38, %v3693_v14  ;;  %vm3692_vm14 = vcmp.eq.f32.partialorder %v3691_v38, 8.507059e+37 }
 0x674   :  { %v3665_v12 = vsub.f32 1.0, %v3664_v31  ;;  %4688 = vtanh.f32 %v3617_v21 }
 0x675   :  { %4690 = vpow2.f32 %v4341_v13  ;;  %v3891_v18 = vand.u32 2147483648, %v9722_v3  ;;  %vm3885_vm4 = vweird.f32 %v9722_v3 }
 0x676   :  { %v3666_v32 = vmul.f32 %v4679_v47, %v3665_v12  ;;  %4692 = vrcp.f32 %v9722_v3 }
 0x677   :  { %v4683_v24 = vpop.eup %4682 }
 0x678   :  { %v3683_v23 = vmul.f32 %v4683_v24, %v3681_v0  ;;  %v3667_v48 = vadd.f32 %v4679_v47, %v3666_v32  ;;  %v4685_v44 = vpop.eup %4684  ;;  %vm3688_vm9 = vweird.f32 %v4683_v24 }
 0x679   :  { %v4687_v19 = vpop.eup %4686  ;;  %v9731_v53 = vadd.f32 1.0, %v4685_v44  ;;  %vm3689_vm13 = vmor %vm3687_vm11, %vm3688_vm9 }
 0x67a   :  { %v3684_v28 = vsub.f32 1.0, %v3683_v23  ;;  %v9729_v43 = vadd.f32 1.0, %v4687_v19  ;;  %v3671_v41 = vsel %vm9725_vm8, %v4679_v47, %v3667_v48  ;;  %v4689_v25 = vpop.eup %4688 }
 0x67b   :  { %v3676_v54 = vsel %vm3673_vm12, %v3675_v15, %v3671_v41  ;;  %v4691_v27 = vpop.eup %4690  ;;  %vm3900_vm6 = vweird.f32 %v9731_v53 }
 0x67c   :  { %v3685_v57 = vmul.f32 %v4683_v24, %v3684_v28  ;;  %4694 = vrcp.f32 %v9729_v43  ;;  %v3743_v4 = vpop.f32.mrf.mxu0  ;;  %v9738_v20 = vpop.eup %4692  ;;  %v3718_v34 = vmul.f32 %v4689_v25, %v3676_v54  ;;  %v9747_v47 = vadd.f32 1.0, %v4691_v27 }
 0x67d   :  { %v3810_v45 = vrot.slane %v3743_v4, 1  ;;  %4696 = vpow2.f32 %v4342_v49  ;;  %v3814_v6 = vrot.slane %v3743_v4, 2  ;;  %v3881_v9 = vmul.f32 %v9738_v20, %v9722_v3 }
 0x67e   :  { %v3686_v30 = vadd.f32 %v4683_v24, %v3685_v57  ;;  %4698 = vrcp.f32 %v9731_v53  ;;  %v3713_v12 = vand.u32 2147483648, %v9729_v43  ;;  %vm3707_vm0 = vweird.f32 %v9729_v43 }
 0x67f   :  { %v3826_v52 = vadd.f32 %v3810_v45, %v11645_v2  ;;  %v3830_v36 = vadd.f32 %v3814_v6, %v11646_v17  ;;  %v3882_v8 = vsub.f32 1.0, %v3881_v9  ;;  %v3711_v46 = vand.u32 2147483647, %v9729_v43 }
 0x680   :  { %v3690_v42 = vsel %vm3689_vm13, %v4683_v24, %v3686_v30  ;;  %v3714_v39 = vor.u32 1.1754944e-38, %v3713_v12  ;;  %vm3886_vm3 = vweird.f32 %v9738_v20  ;;  %v3906_v57 = vand.u32 2147483648, %v9731_v53 }
 0x681   :  { %v3695_v51 = vsel %vm3692_vm14, %v3694_v37, %v3690_v42  ;;  %v4337_v56 = vmul.f32 -1.442695, %v3826_v52  ;;  %v4338_v35 = vmul.f32 -1.442695, %v3830_v36  ;;  %v3883_v48 = vmul.f32 %v9738_v20, %v3882_v8  ;;  %vm9790_vm5 = vmor %vm3885_vm4, %vm3886_vm3 }
 0x682   :  { %v3717_v58 = vmul.f32 %v3695_v51, %v11647_v22  ;;  %v4695_v5 = vpop.eup %4694  ;;  %v3783_v24 = vpop.f32.mrf.mxu2  ;;  %vm3712_vm2 = vcmp.eq.f32.partialorder %v3711_v46, 8.507059e+37  ;;  %v3952_v4 = vrot.slane %v9535_v29, 7  ;;  %v3953_v30 = vrot.slane %v9539_v50, 7 }
 0x683   :  { %v3703_v0 = vmul.f32 %v4695_v5, %v9729_v43  ;;  %4700 = vpow2.f32 %v4337_v56  ;;  %v4697_v55 = vpop.eup %4696  ;;  %vm3708_vm15 = vweird.f32 %v4695_v5  ;;  %v3812_v49 = vrot.slane %v3783_v24, 1 }
 0x684   :  { %v9744_v63 = vadd.f32 %v3718_v34, %v3717_v58  ;;  %4702 = vpow2.f32 %v4338_v35  ;;  %v9749_v61 = vpop.eup %4698  ;;  %v9752_v1 = vadd.f32 1.0, %v4697_v55  ;;  %vm9762_vm1 = vmor %vm3707_vm0, %vm3708_vm15  ;;  %v3816_v38 = vrot.slane %v3783_v24, 2 }
 0x685   :  { %v3704_v31 = vsub.f32 1.0, %v3703_v0  ;;  %v3896_v16 = vmul.f32 %v9749_v61, %v9731_v53  ;;  %v3884_v41 = vadd.f32 %v9738_v20, %v3883_v48  ;;  %v3889_v25 = vand.u32 2147483647, %v9722_v3 }
 0x686   :  { %4704 = vtanh.f32 %v9744_v63  ;;  %v3828_v6 = vadd.f32 %v3812_v49, %v11489_v40  ;;  %v3892_v29 = vor.u32 1.1754944e-38, %v3891_v18  ;;  %v3832_v52 = vadd.f32 %v3816_v38, %v11490_v7 }
 0x687   :  { %v3705_v26 = vmul.f32 %v4695_v5, %v3704_v31  ;;  %4706 = vrcp.f32 %v9747_v47  ;;  %v3897_v28 = vsub.f32 1.0, %v3896_v16  ;;  %v3904_v51 = vand.u32 2147483647, %v9731_v53 }
 0x688   :  { %4708 = vrcp.f32 %v9752_v1  ;;  %v3907_v3 = vor.u32 1.1754944e-38, %v3906_v57  ;;  %v3888_v40 = vsel %vm9790_vm5, %v9738_v20, %v3884_v41  ;;  %vm3901_vm10 = vweird.f32 %v9749_v61 }
 0x689   :  { %v4701_v21 = vpop.eup %4700  ;;  %v3706_v32 = vadd.f32 %v4695_v5, %v3705_v26  ;;  %v3898_v45 = vmul.f32 %v9749_v61, %v3897_v28  ;;  %vm3890_vm7 = vcmp.eq.f32.partialorder %v3889_v25, 8.507059e+37  ;;  %vm9809_vm8 = vmor %vm3900_vm6, %vm3901_vm10  ;;  %vm3905_vm13 = vcmp.eq.f32.partialorder %v3904_v51, 8.507059e+37 }
 0x68a   :  { %v4703_v59 = vpop.eup %4702  ;;  %v9760_v13 = vadd.f32 1.0, %v4701_v21  ;;  %v3893_v20 = vsel %vm3890_vm7, %v3892_v29, %v3888_v40  ;;  %vm3925_vm5 = vweird.f32 %v9747_v47  ;;  %v3929_v50 = vand.u32 2147483647, %v9747_v47 }
 0x68b   :  { %v9768_v44 = vadd.f32 1.0, %v4703_v59  ;;  %v3710_v60 = vsel %vm9762_vm1, %v4695_v5, %v3706_v32  ;;  %v3899_v34 = vadd.f32 %v9749_v61, %v3898_v45  ;;  %v3956_v59 = vmul.f32 %v3952_v4, %v3893_v20 }
 0x68c   :  { %v4705_v19 = vpop.eup %4704  ;;  %4710 = vrcp.f32 %v9760_v13  ;;  %v3715_v43 = vsel %vm3712_vm2, %v3714_v39, %v3710_v60  ;;  %v3853_v9 = vand.u32 2147483648, %v9760_v13  ;;  %v3851_v31 = vand.u32 2147483647, %v9760_v13 }
 0x68d   :  { %4712 = vrcp.f32 %v9768_v44  ;;  %v9774_v14 = vpop.eup %4706  ;;  %v3721_v15 = vmul.f32 %v4705_v19, %v3715_v43  ;;  %v3868_v8 = vand.u32 2147483648, %v9768_v44  ;;  %v3866_v16 = vand.u32 2147483647, %v9768_v44 }
 0x68e   :  { %v9784_v37 = vpop.eup %4708  ;;  %v3921_v54 = vmul.f32 %v9774_v14, %v9747_v47  ;;  %4714 = vtanh.f32 %v3828_v6  ;;  %v3903_v12 = vsel %vm9809_vm8, %v9749_v61, %v3899_v34  ;;  %vm3847_vm12 = vweird.f32 %v9760_v13 }
 0x68f   :  { %v3970_v27 = vrot.slane %v3721_v15, 1  ;;  %v3936_v7 = vmul.f32 %v9784_v37, %v9752_v1  ;;  %4716 = vtanh.f32 %v3832_v52  ;;  %v3854_v32 = vor.u32 1.1754944e-38, %v3853_v9  ;;  %v4216_v9 = vld [vmem:[%s9909_s6 + $0x70] sm:$0xff] }
 0x690   :  { %v3922_v56 = vsub.f32 1.0, %v3921_v54  ;;  %vm3862_vm15 = vweird.f32 %v9768_v44  ;;  %vm3852_vm0 = vcmp.eq.f32.partialorder %v3851_v31, 8.507059e+37  ;;  %v3869_v48 = vor.u32 1.1754944e-38, %v3868_v8  ;;  %v4213_v8 = vld [vmem:[%s9909_s6 + $0x58] sm:$0xff] }
 0x691   :  { %v3975_v22 = vrot.slane %v3970_v27, 7  ;;  %v3937_v21 = vsub.f32 1.0, %v3936_v7  ;;  %v3908_v60 = vsel %vm3905_vm13, %v3907_v3, %v3903_v12  ;;  %vm3867_vm2 = vcmp.eq.f32.partialorder %v3866_v16, 8.507059e+37  ;;  %v4212_v12 = vld [vmem:[%s9909_s6 + $0x50] sm:$0xff] }
 0x692   :  { %v4711_v42 = vpop.eup %4710  ;;  %v3957_v18 = vmul.f32 %v3953_v30, %v3908_v60  ;;  %vm3926_vm3 = vweird.f32 %v9774_v14  ;;  %v3931_v15 = vand.u32 2147483648, %v9747_v47  ;;  %vm3941_vm4 = vweird.f32 %v9784_v37 }
 0x693   :  { %v4713_v17 = vpop.eup %4712  ;;  %v3843_v36 = vmul.f32 %v4711_v42, %v9760_v13  ;;  %4015 = vmatmul.f32.vlgmr.msra.gmra.mxu1 %v3975_v22  ;;  %4055 = vmatmul.f32.vlgmr.msrb.gmra.mxu3 %v3975_v22  ;;  %vm3848_vm9 = vweird.f32 %v4711_v42  ;;  %v3923_v13 = vmul.f32 %v9774_v14, %v3922_v56  ;;  %v3946_v30 = vand.u32 2147483648, %v9752_v1  ;;  %vm3927_vm6 = vmor %vm3925_vm5, %vm3926_vm3 }
 0x694   :  { %v3858_v58 = vmul.f32 %v4713_v17, %v9768_v44  ;;  %vm3863_vm11 = vweird.f32 %v4713_v17  ;;  %vm3849_vm14 = vmor %vm3847_vm12, %vm3848_vm9  ;;  %v4715_v24 = vpop.eup %4714  ;;  %v3938_v44 = vmul.f32 %v9784_v37, %v3937_v21  ;;  %vm3940_vm10 = vweird.f32 %v9752_v1 }
 0x695   :  { %v3844_v5 = vsub.f32 1.0, %v3843_v36  ;;  %vm3864_vm1 = vmor %vm3862_vm15, %vm3863_vm11  ;;  %v4717_v19 = vpop.eup %4716  ;;  %v3924_v41 = vadd.f32 %v9774_v14, %v3923_v13  ;;  %v3944_v45 = vand.u32 2147483647, %v9752_v1  ;;  %v3932_v54 = vor.u32 1.1754944e-38, %v3931_v15 }
 0x696   :  { %v3859_v35 = vsub.f32 1.0, %v3858_v58  ;;  %v3939_v4 = vadd.f32 %v9784_v37, %v3938_v44  ;;  %vm3942_vm7 = vmor %vm3940_vm10, %vm3941_vm4  ;;  %vm3930_vm8 = vcmp.eq.f32.partialorder %v3929_v50, 8.507059e+37  ;;  %v3947_v27 = vor.u32 1.1754944e-38, %v3946_v30  ;;  %v4205_v50 = vld [vmem:[%s9909_s6 + $0x18] sm:$0xff] }
 0x697   :  { %v3845_v55 = vmul.f32 %v4711_v42, %v3844_v5  ;;  %v3928_v25 = vsel %vm3927_vm6, %v9774_v14, %v3924_v41  ;;  %vm3945_vm9 = vcmp.eq.f32.partialorder %v3944_v45, 8.507059e+37  ;;  %vm3971_vm11 = vcmask 1040384   ;;  %v4217_v5 = vld [vmem:[%s9909_s6 + $0x78] sm:$0xff] }
 0x698   :  { %v3860_v26 = vmul.f32 %v4713_v17, %v3859_v35  ;;  %v3943_v6 = vsel %vm3942_vm7, %v9784_v37, %v3939_v4  ;;  %v3933_v2 = vsel %vm3930_vm8, %v3932_v54, %v3928_v25  ;;  %vm4242_vm7 = vcmask 230400  }
 0x699   :  { %v3846_v53 = vadd.f32 %v4711_v42, %v3845_v55  ;;  %v3948_v47 = vsel %vm3945_vm9, %v3947_v27, %v3943_v6  ;;  %v4204_v27 = vld [vmem:[%s9909_s6 + $0x10] sm:$0xff] }
 0x69a   :  { %v3861_v46 = vadd.f32 %v4713_v17, %v3860_v26 }
 0x69b   :  { %v3850_v23 = vsel %vm3849_vm14, %v4711_v42, %v3846_v53  ;;  %4095 = vmatmul.f32.vlgmr.msrb.gmra.mxu1 %v3975_v22  ;;  %4135 = vmatmul.f32.vlgmr.msra.gmra.mxu3 %v3975_v22 }
 0x69c   :  { %v3855_v61 = vsel %vm3852_vm0, %v3854_v32, %v3850_v23  ;;  %v3865_v28 = vsel %vm3864_vm1, %v4713_v17, %v3861_v46  ;;  %v4211_v32 = vld [vmem:[%s9909_s6 + $0x48] sm:$0xff] }
 0x69d   :  { %v3870_v39 = vsel %vm3867_vm2, %v3869_v48, %v3865_v28  ;;  %v3958_v49 = vmul.f32 %v4715_v24, %v3855_v61  ;;  %v4209_v48 = vld [vmem:[%s9909_s6 + $0x38] sm:$0xff]  ;;  %v4208_v61 = vld [vmem:[%s9909_s6 + $0x30] sm:$0xff] }
 0x69e   :  { %v3959_v38 = vmul.f32 %v4717_v19, %v3870_v39 }
 0x69f   :  { %v3960_v43 = vadd.f32 %v3958_v49, %v3956_v59  ;;  %v4210_v59 = vld [vmem:[%s9909_s6 + $0x40] sm:$0xff]  ;;  %v4207_v49 = vld [vmem:[%s9909_s6 + $0x28] sm:$0xff] }
 0x6a0   :  { %v3961_v57 = vadd.f32 %v3959_v38, %v3957_v18 }
 0x6a1   :  { %4718 = vtanh.f32 %v3960_v43 }
 0x6a2   :  { %4720 = vtanh.f32 %v3961_v57  ;;  %v4206_v57 = vld [vmem:[%s9909_s6 + $0x20] sm:$0xff] }
 0x6a7   :  { %v4719_v42 = vpop.eup %4718 }
 0x6a8   :  { %v4721_v29 = vpop.eup %4720  ;;  %v3964_v52 = vmul.f32 %v4719_v42, %v3933_v2 }
 0x6a9   :  { %v3965_v51 = vmul.f32 %v4721_v29, %v3948_v47  ;;  %v4203_v29 = vld [vmem:[%s9909_s6 + $0x8] sm:$0xff] }
 0x6aa   :  { %v3972_v17 = vrot.slane %v3964_v52, 7 }
 0x6ab   :  { %v4343_v3 = vrot.slane %v3965_v51, 14 }
 0x6ad   :  { %v3974_v36 = vsel %vm3971_vm11, %v3972_v17, %v4343_v3 }
 0x6ae   :  { %3995 = vmatmul.f32.vlgmr.msra.gmra.mxu0 %v3974_v36  ;;  %4035 = vmatmul.f32.vlgmr.msrb.gmra.mxu2 %v3974_v36 }
 0x6af   :  { %4222 = vmatpush.msra.mxu0 %v4217_v5 }
 0x6b1   :  { %4223 = vmatpush.msra.mxu0 %v4216_v9 }
 0x6b6   :  { %4075 = vmatmul.f32.vlgmr.msrb.gmra.mxu0 %v3974_v36  ;;  %4115 = vmatmul.f32.vlgmr.msra.gmra.mxu2 %v3974_v36  ;;  %v4202_v36 = vld [vmem:[%s9909_s6] sm:$0xff] }
 0x710   :  { %v4016_v37 = vpop.f32.mrf.mxu1 }
 0x716   :  { %v4056_v58 = vpop.f32.mrf.mxu3 }
 0x718   :  { %v4096_v13 = vpop.f32.mrf.mxu1 }
 0x71e   :  { %v4136_v26 = vpop.f32.mrf.mxu3 }
 0x72b   :  { %v3996_v1 = vpop.f32.mrf.mxu0 }
 0x72c   :  { %v3997_v14 = vadd.f32 %v3996_v1, %v11635_v11  ;;  %v4215_v11 = vld [vmem:[%s9909_s6 + $0x68] sm:$0xff] }
 0x72d   :  { %4224 = vmatpush.msra.mxu0 %v4215_v11 }
 0x72e   :  { %v4017_v40 = vadd.f32 %v4016_v37, %v3997_v14 }
 0x730   :  { %v4344_v22 = vmul.f32 -1.442695, %v4017_v40 }
 0x731   :  { %v4036_v34 = vpop.f32.mrf.mxu2 }
 0x732   :  { %4722 = vpow2.f32 %v4344_v22  ;;  %v4037_v56 = vadd.f32 %v4036_v34, %v11636_v33  ;;  %v4214_v33 = vld [vmem:[%s9909_s6 + $0x60] sm:$0xff] }
 0x733   :  { %4225 = vmatpush.msra.mxu0 %v4214_v33  ;;  %v4076_v46 = vpop.f32.mrf.mxu0 }
 0x734   :  { %v4057_v7 = vadd.f32 %v4056_v58, %v4037_v56  ;;  %v4077_v60 = vadd.f32 %v4076_v46, %v11640_v62 }
 0x735   :  { %4226 = vmatpush.msra.mxu0 %v4213_v8 }
 0x736   :  { %v4345_v35 = vmul.f32 -1.442695, %v4057_v7  ;;  %v4097_v18 = vadd.f32 %v4096_v13, %v4077_v60 }
 0x737   :  { %4227 = vmatpush.msra.mxu0 %v4212_v12 }
 0x738   :  { %v4723_v20 = vpop.eup %4722  ;;  %4724 = vpow2.f32 %v4345_v35 }
 0x739   :  { %v4142_v0 = vadd.f32 1.0, %v4723_v20  ;;  %v4116_v55 = vpop.f32.mrf.mxu2  ;;  %4228 = vmatpush.msra.mxu0 %v4211_v32 }
 0x73a   :  { %v4117_v31 = vadd.f32 %v4116_v55, %v11639_v10 }
 0x73b   :  { %4726 = vrcp.f32 %v4142_v0  ;;  %4229 = vmatpush.msra.mxu0 %v4210_v59  ;;  %v4154_v41 = vand.u32 2147483648, %v4142_v0  ;;  %vm4148_vm13 = vweird.f32 %v4142_v0  ;;  %v4152_v4 = vand.u32 2147483647, %v4142_v0 }
 0x73c   :  { %v4137_v16 = vadd.f32 %v4136_v26, %v4117_v31 }
 0x73d   :  { %4230 = vmatpush.msra.mxu0 %v4209_v48  ;;  %v4155_v42 = vor.u32 1.1754944e-38, %v4154_v41  ;;  %vm4153_vm1 = vcmp.eq.f32.partialorder %v4152_v4, 8.507059e+37 }
 0x73e   :  { %v4725_v21 = vpop.eup %4724  ;;  %v4346_v53 = vmul.f32 -1.442695, %v4137_v16 }
 0x73f   :  { %v4161_v10 = vadd.f32 1.0, %v4725_v21  ;;  %4231 = vmatpush.msra.mxu0 %v4208_v61 }
 0x740   :  { %4728 = vpow2.f32 %v4346_v53 }
 0x741   :  { %v4727_v24 = vpop.eup %4726  ;;  %4730 = vrcp.f32 %v4161_v10  ;;  %4232 = vmatpush.msra.mxu0 %v4207_v49  ;;  %v4173_v30 = vand.u32 2147483648, %v4161_v10  ;;  %v4171_v6 = vand.u32 2147483647, %v4161_v10  ;;  %vm4167_vm0 = vweird.f32 %v4161_v10 }
 0x742   :  { %v4144_v23 = vmul.f32 %v4727_v24, %v4142_v0  ;;  %vm4149_vm12 = vweird.f32 %v4727_v24 }
 0x743   :  { %vm9881_vm14 = vmor %vm4148_vm13, %vm4149_vm12  ;;  %4233 = vmatpush.msra.mxu0 %v4206_v57  ;;  %v4174_v52 = vor.u32 1.1754944e-38, %v4173_v30  ;;  %vm4172_vm3 = vcmp.eq.f32.partialorder %v4171_v6, 8.507059e+37 }
 0x744   :  { %v4145_v19 = vsub.f32 1.0, %v4144_v23 }
 0x745   :  { %4234 = vmatpush.msra.mxu0 %v4205_v50 }
 0x746   :  { %v4729_v28 = vpop.eup %4728  ;;  %v4146_v39 = vmul.f32 %v4727_v24, %v4145_v19 }
 0x747   :  { %v4731_v44 = vpop.eup %4730  ;;  %v4181_v38 = vadd.f32 1.0, %v4729_v28  ;;  %4235 = vmatpush.msra.mxu0 %v4204_v27 }
 0x748   :  { %v4163_v43 = vmul.f32 %v4731_v44, %v4161_v10  ;;  %v4147_v62 = vadd.f32 %v4727_v24, %v4146_v39  ;;  %vm4168_vm15 = vweird.f32 %v4731_v44 }
 0x749   :  { %4732 = vrcp.f32 %v4181_v38  ;;  %vm4169_vm2 = vmor %vm4167_vm0, %vm4168_vm15  ;;  %4236 = vmatpush.msra.mxu0 %v4203_v29  ;;  %v4193_v56 = vand.u32 2147483648, %v4181_v38  ;;  %vm4187_vm5 = vweird.f32 %v4181_v38  ;;  %v4191_v5 = vand.u32 2147483647, %v4181_v38 }
 0x74a   :  { %v4164_v15 = vsub.f32 1.0, %v4163_v43  ;;  %4734 = vtanh.f32 %v4097_v18  ;;  %v4151_v54 = vsel %vm9881_vm14, %v4727_v24, %v4147_v62 }
 0x74b   :  { %v4156_v51 = vsel %vm4153_vm1, %v4155_v42, %v4151_v54  ;;  %4237 = vmatpush.msra.mxu0 %v4202_v36  ;;  %v4194_v9 = vor.u32 1.1754944e-38, %v4193_v56  ;;  %vm4192_vm10 = vcmp.eq.f32.partialorder %v4191_v5, 8.507059e+37 }
 0x74c   :  { %v4165_v25 = vmul.f32 %v4731_v44, %v4164_v15 }
 0x74e   :  { %v4166_v2 = vadd.f32 %v4731_v44, %v4165_v25 }
 0x74f   :  { %v4733_v47 = vpop.eup %4732 }
 0x750   :  { %v4170_v17 = vsel %vm4169_vm2, %v4731_v44, %v4166_v2  ;;  %v4183_v3 = vmul.f32 %v4733_v47, %v4181_v38  ;;  %v4735_v1 = vpop.eup %4734  ;;  %vm4188_vm4 = vweird.f32 %v4733_v47 }
 0x751   :  { %v4175_v14 = vsel %vm4172_vm3, %v4174_v52, %v4170_v17  ;;  %v4198_v40 = vmul.f32 %v4735_v1, %v4156_v51  ;;  %vm4189_vm6 = vmor %vm4187_vm5, %vm4188_vm4 }
 0x752   :  { %v4197_v37 = vmul.f32 %v4175_v14, %v9744_v63  ;;  %v4184_v22 = vsub.f32 1.0, %v4183_v3  ;;  %v4353_v63 = vld [vmem:[%s9910_s7] ss:$0 sm:$0xff] }
 0x754   :  { %v4199_v58 = vadd.f32 %v4198_v40, %v4197_v37  ;;  %v4185_v34 = vmul.f32 %v4733_v47, %v4184_v22 }
 0x756   :  { %4736 = vtanh.f32 %v4199_v58  ;;  %v4186_v7 = vadd.f32 %v4733_v47, %v4185_v34 }
 0x758   :  { %v4190_v35 = vsel %vm4189_vm6, %v4733_v47, %v4186_v7 }
 0x759   :  { %v4195_v20 = vsel %vm4192_vm10, %v4194_v9, %v4190_v35 }
 0x75c   :  { %v4737_v11 = vpop.eup %4736 }
 0x75d   :  { %v4201_v33 = vmul.f32 %v4737_v11, %v4195_v20 }
 0x75f   :  { %4238 = vmatmul.f32.vlgmr.msra.gmra.mxu0 %v4201_v33 }
 0x7dc   :  { %v4239_v0 = vpop.f32.mrf.mxu0 }
 0x7dd   :  { %v4240_v55 = vadd.f32 %v4353_v63, %v4239_v0 }
 0x7df   :  { %4243 = vst.msk [vmem:[#allocation7] sm:$0x3] %vm4242_vm7, %v4240_v55 }
 0x7e0   :  { %4254 = dma.vmem_to_hbm [thread:$0]  %s4250_s11, 32, %s4252_s14, [#allocation4]  }
 0x7e1   :  { %5422 = dma.done.wait [#allocation4], 32  }
 0x7e2   :  { %5423 = vsyncadd [#allocation4], 4294967264 }
 0x7e3   :  { %4259 = vsyncpa [#allocation3], 1 }
 0x7e4   :  { %4260 = vsyncpa [#allocation6], 1 }
 0x7e5   :  { %4261 = vsyncpa [#allocation4], 1 }

</bundles_post_ra>
